<compile_context>
chip_gen: v5e
topology: v5e:2x2
jax: 0.10.0
libtpu: 0.0.40
codegen_flags: <defaults>
</compile_context>

<pallas_src>
import functools

import jax
import jax.numpy as jnp
import numpy as np
from jax.experimental import pallas as pl
from jax.experimental.pallas import tpu as pltpu


# --------------------------------------------------------------------------
# Fused kernel: channel MLP + pre_conv(1x1,1x1) + scale + 4x conv5x5 + residual
# --------------------------------------------------------------------------
def fused_attention_roi_kernel(
        # inputs
        x_ref, g_ref, mlp_w12_ref, mlp_w3w_ref, pre_w_ref, band_w_ref, bias_ref,
        # outputs
        out_ref, cw_ref,
        # scratch
        pad_ref,
        *, B, H, W, C):
    f32, bf16 = jnp.float32, jnp.bfloat16
    WC = W * C
    BH = B * H

    # ---- channel MLP on global_feat (f32, tiny) ------------------------------
    g = g_ref[...]
    m = jnp.maximum(jnp.dot(g, mlp_w12_ref[0], preferred_element_type=f32)
                    + bias_ref[0:1, 0:C], 0.0)
    m = jnp.maximum(jnp.dot(m, mlp_w12_ref[1], preferred_element_type=f32)
                    + bias_ref[1:2, 0:C], 0.0)
    # w3 / b3 are pre-tiled W times along the lane dim, so sigmoid(z_wide) is
    # the channel weight already tiled for the lane-dense [.., W*C] layout.
    z_wide = jnp.dot(m, mlp_w3w_ref[...], preferred_element_type=f32) + bias_ref[2:3, :]
    cw_wide = 1.0 / (1.0 + jnp.exp(-z_wide))          # [B, W*C]; exp rides the EUP
    cw_ref[...] = cw_wide[:, 0:C]

    # ---- pre_conv: two 1x1 convs as block-diagonal bf16 GEMMs ----------------
    x = x_ref[...].astype(bf16)                        # [B*H, W*C]
    h = jnp.dot(x, pre_w_ref[0], preferred_element_type=f32) + bias_ref[3:4, :]
    h = jnp.maximum(h, 0.0)
    roi = jnp.dot(h.astype(bf16), pre_w_ref[1],
                  preferred_element_type=f32) + bias_ref[4:5, :]     # [B*H, W*C] f32

    # ---- channel-wise scaling (broadcast cw over the H rows of each batch) ---
    act = (roi.reshape(B, H, WC) * cw_wide.reshape(B, 1, WC)).reshape(BH, WC)

    # ---- zero ONLY the 2-row H halo of the padded scratch (once) -------------
    pad_ref[:, 0:2, :] = jnp.zeros((B, 2, WC), f32)
    pad_ref[:, H + 2:H + 4, :] = jnp.zeros((B, 2, WC), f32)

    def conv5x5(a, layer):
        """5x5 'same' conv = 5 banded GEMMs (one per ky).  The banded weight
        encodes the W-direction zero padding; the H padding comes from the
        zero halo rows of pad_ref."""
        pad_ref[:, 2:2 + H, :] = a.reshape(B, H, WC)            # lane-dense store
        acc = jnp.zeros((BH, WC), f32)
        for ky in range(5):
            slab = pad_ref[:, ky:ky + H, :].reshape(BH, WC).astype(bf16)
            acc = acc + jnp.dot(slab, band_w_ref[layer, ky],
                                preferred_element_type=f32)
        return acc + bias_ref[5 + layer:6 + layer, :]

    h = jnp.maximum(conv5x5(act, 0), 0.0)
    h = jnp.maximum(conv5x5(h, 1), 0.0)
    h = jnp.maximum(conv5x5(h, 2), 0.0)
    y = conv5x5(h, 3) + roi                                      # residual (f32)

    out_ref[...] = y.astype(out_ref.dtype)


# --------------------------------------------------------------------------
# Host/trace-time weight repacking (do ONCE for static weights)
# --------------------------------------------------------------------------
def pack_params(params, *, W, C, G):
    assert G == C, "packed MLP path assumes global_dim == img_feat_channel (module default)"
    f32, bf16 = jnp.float32, jnp.bfloat16
    WC = W * C

    # 1x1 pre_conv weights -> block-diagonal [W*C, W*C] for the lane-dense slab.
    eye_w = jnp.eye(W, dtype=f32)
    pre_bd = jnp.stack([jnp.kron(eye_w, params['pre_w1'].astype(f32)),
                        jnp.kron(eye_w, params['pre_w2'].astype(f32))]).astype(bf16)

    # 5x5 conv HWIO weights -> per-ky banded [W*C, W*C] matrices.
    # band[l, ky, w_in*C+ci, w*C+co] = Wconv[l][ky, w_in-w+2, ci, co] for |w_in-w|<=2,
    # 0<=w_in<W; out-of-range taps are simply omitted (== W-direction zero padding).
    sel = np.zeros((5, W, W), np.float32)              # sel[kx, w_in, w]
    for kx in range(5):
        for w in range(W):
            wi = w + kx - 2
            if 0 <= wi < W:
                sel[kx, wi, w] = 1.0
    post_w = jnp.stack([params[f'post_w{i}'] for i in (1, 2, 3, 4)]).astype(f32)
    band = jnp.einsum('xiw,lyxab->lyiawb', jnp.asarray(sel), post_w)
    band = band.reshape(4, 5, WC, WC).astype(bf16)

    # MLP weights: w1,w2 as-is; w3 tiled W times along the output (lane) dim.
    mlp_w12 = jnp.stack([params['mlp_w1'], params['mlp_w2']]).astype(f32)   # [2,C,C]
    mlp_w3w = jnp.tile(params['mlp_w3'].astype(f32), (1, W))                # [C,W*C]

    # All 9 biases W-tiled and stacked into one [9, W*C] slab.
    def tile_w(b):
        return jnp.tile(jnp.reshape(b, (1, C)).astype(f32), (1, W))
    biases = jnp.concatenate(
        [tile_w(params[k]) for k in
         ('mlp_b1', 'mlp_b2', 'mlp_b3', 'pre_b1', 'pre_b2',
          'post_b1', 'post_b2', 'post_b3', 'post_b4')], axis=0)             # [9,W*C]

    return dict(mlp_w12=mlp_w12, mlp_w3w=mlp_w3w, pre_bd=pre_bd,
                band=band, biases=biases)


# --------------------------------------------------------------------------
# Wrapper (layout plumbing + single gridless pallas_call)
# --------------------------------------------------------------------------
def attention_roi_forward(img_feat, global_feat, bdb_grid, params,
                          global_detach=True):
    del bdb_grid  # unused by the reference module's forward()
    B, C, H, W = img_feat.shape
    G = global_feat.shape[-1]
    WC = W * C

    # NOTE: for static weights hoist pack_params() out of the step function;
    # kept inline so this is a drop-in replacement for the torch forward().
    packed = pack_params(params, W=W, C=C, G=G)

    # NCHW -> NHWC -> lane-dense [B*H, W*C] slab (wrapper-side layout plumbing).
    x = jnp.transpose(img_feat, (0, 2, 3, 1)).reshape(B * H, WC).astype(jnp.float32)
    gf = global_feat.astype(jnp.float32)
    if global_detach:
        gf = jax.lax.stop_gradient(gf)

    kernel = functools.partial(fused_attention_roi_kernel, B=B, H=H, W=W, C=C)

    # Single gridless call: weights + activations total ~3 MiB of VMEM, well under
    # the scoped limit on every TPU generation (incl. v7x's 64 MiB physical), so no
    # grid / BlockSpec pipelining is needed at these shapes.
    # NOTE(v7x): to use the second TensorCore, add grid=(B,) with
    # dimension_semantics=("parallel",) and per-batch BlockSpecs; keep gridless on
    # v5e/v6e (single TC) where a grid only adds per-step overhead.
    out, cw = pl.pallas_call(
        kernel,
        out_shape=(jax.ShapeDtypeStruct((B * H, WC), jnp.float32),
                   jax.ShapeDtypeStruct((B, C), jnp.float32)),
        scratch_shapes=[pltpu.VMEM((B, H + 4, WC), jnp.float32)],   # H-padded buffer
    )(x, gf, packed['mlp_w12'], packed['mlp_w3w'], packed['pre_bd'],
      packed['band'], packed['biases'])

    roi_feat = jnp.transpose(out.reshape(B, H, W, C), (0, 3, 1, 2))
    return {'roi_feat': roi_feat, 'channel_atten_weight': cw}


# --------------------------------------------------------------------------
# Pure-JAX reference (for correctness check)
# --------------------------------------------------------------------------
def reference_forward(img_feat, global_feat, params):
    P = jax.lax.Precision.HIGHEST
    x = jnp.transpose(img_feat, (0, 2, 3, 1)).astype(jnp.float32)

    def lin(a, w, b):
        return jnp.dot(a, w, precision=P) + b

    def conv1x1(a, w, b):
        return jnp.einsum('bhwc,cd->bhwd', a, w, precision=P) + b.reshape(1, 1, 1, -1)

    def conv5x5(a, w, b):
        y = jax.lax.conv_general_dilated(
            a, w, window_strides=(1, 1), padding=((2, 2), (2, 2)),
            dimension_numbers=('NHWC', 'HWIO', 'NHWC'), precision=P)
        return y + b.reshape(1, 1, 1, -1)

    roi = conv1x1(jnp.maximum(conv1x1(x, params['pre_w1'], params['pre_b1']), 0.0),
                  params['pre_w2'], params['pre_b2'])

    g = global_feat.astype(jnp.float32)
    m = jnp.maximum(lin(g, params['mlp_w1'], params['mlp_b1']), 0.0)
    m = jnp.maximum(lin(m, params['mlp_w2'], params['mlp_b2']), 0.0)
    cw = jax.nn.sigmoid(lin(m, params['mlp_w3'], params['mlp_b3']))

    h = cw[:, None, None, :] * roi
    h = jnp.maximum(conv5x5(h, params['post_w1'], params['post_b1']), 0.0)
    h = jnp.maximum(conv5x5(h, params['post_w2'], params['post_b2']), 0.0)
    h = jnp.maximum(conv5x5(h, params['post_w3'], params['post_b3']), 0.0)
    out = conv5x5(h, params['post_w4'], params['post_b4']) + roi
    return {'roi_feat': jnp.transpose(out, (0, 3, 1, 2)),
            'channel_atten_weight': cw}


# --------------------------------------------------------------------------
# Deterministic parameter init
# --------------------------------------------------------------------------
def init_params(key, channels=32, global_dim=32):
    keys = jax.random.split(key, 18)
    s = 0.05

    def w(k, shape):
        return (s * jax.random.normal(k, shape)).astype(jnp.float32)

    p = {
        'mlp_w1': w(keys[0], (global_dim, channels)), 'mlp_b1': w(keys[1], (1, channels)),
        'mlp_w2': w(keys[2], (channels, channels)),   'mlp_b2': w(keys[3], (1, channels)),
        'mlp_w3': w(keys[4], (channels, channels)),   'mlp_b3': w(keys[5], (1, channels)),
        'pre_w1': w(keys[6], (channels, channels)),   'pre_b1': w(keys[7], (1, channels)),
        'pre_w2': w(keys[8], (channels, channels)),   'pre_b2': w(keys[9], (1, channels)),
    }
    for i in range(4):
        p[f'post_w{i + 1}'] = w(keys[10 + 2 * i], (5, 5, channels, channels))
        p[f'post_b{i + 1}'] = w(keys[11 + 2 * i], (1, channels))
    return p


# --------------------------------------------------------------------------
if __name__ == "__main__":
    B, C, G, H, W = 2, 32, 32, 8, 8
    key = jax.random.PRNGKey(0)
    k_img, k_glob, k_grid, k_param = jax.random.split(key, 4)

    img_feat = jax.random.normal(k_img, (B, C, H, W), dtype=jnp.float32)      # NCHW
    global_feat = jax.random.normal(k_glob, (B, G), dtype=jnp.float32)
    bdb_grid = jax.random.uniform(k_grid, (B, H, W, 2), dtype=jnp.float32)    # unused
    params = init_params(k_param, channels=C, global_dim=G)

    fwd = jax.jit(attention_roi_forward)
    out = fwd(img_feat, global_feat, bdb_grid, params)
    jax.block_until_ready(out)

    ref = reference_forward(img_feat, global_feat, params)
    # channel MLP runs fully in f32 -> tight check.
    np.testing.assert_allclose(np.asarray(out['channel_atten_weight']),
                               np.asarray(ref['channel_atten_weight']),
                               rtol=5e-3, atol=1e-4)
    # roi_feat uses bf16 MXU operands with f32 accumulation across 6 chained
    # GEMM layers (per perf review), so allow bf16-input rounding here.
    np.testing.assert_allclose(np.asarray(out['roi_feat']),
                               np.asarray(ref['roi_feat']),
                               rtol=1e-2, atol=3e-3)

    print("KERNEL_OK")
</pallas_src>

<mosaic_0001>
module attributes {stable_mosaic.version = 11 : i64} {
  func.func @fused_attention_roi_kernel(%arg0: memref<16x256xf32, #tpu.memory_space<vmem>>, %arg1: memref<2x32xf32, #tpu.memory_space<vmem>>, %arg2: memref<2x32x32xf32, #tpu.memory_space<vmem>>, %arg3: memref<32x256xf32, #tpu.memory_space<vmem>>, %arg4: memref<2x256x256xbf16, #tpu.memory_space<vmem>>, %arg5: memref<4x5x256x256xbf16, #tpu.memory_space<vmem>>, %arg6: memref<9x256xf32, #tpu.memory_space<vmem>>, %arg7: memref<16x256xf32, #tpu.memory_space<vmem>>, %arg8: memref<2x32xf32, #tpu.memory_space<vmem>>, %arg9: memref<2x12x256xf32, #tpu.memory_space<vmem>>) attributes {dimension_semantics = [], scalar_prefetch = 0 : i64, scratch_operands = 1 : i64, tpu.core_type = #tpu.core_type<tc>} {
    %c0 = arith.constant 0 : index
    %c0_0 = arith.constant 0 : index
    %0 = vector.load %arg1[%c0, %c0_0] : memref<2x32xf32, #tpu.memory_space<vmem>>, vector<2x32xf32>
    %c0_1 = arith.constant 0 : index
    %c0_2 = arith.constant 0 : index
    %c0_3 = arith.constant 0 : index
    %1 = vector.load %arg2[%c0_1, %c0_2, %c0_3] : memref<2x32x32xf32, #tpu.memory_space<vmem>>, vector<1x32x32xf32>
    %2 = vector.shape_cast %1 : vector<1x32x32xf32> to vector<32x32xf32>
    %cst = arith.constant dense<0.000000e+00> : vector<2x32xf32>
    %3 = tpu.matmul %0, %2, %cst {dimension_numbers = #tpu.dot_dimension_numbers<[1], [0], [0], [1], [0, 0, 1, 1], [], []>} : vector<2x32xf32>, vector<32x32xf32>, vector<2x32xf32> -> vector<2x32xf32>
    %c0_4 = arith.constant 0 : index
    %c0_5 = arith.constant 0 : index
    %4 = vector.load %arg6[%c0_4, %c0_5] : memref<9x256xf32, #tpu.memory_space<vmem>>, vector<1x32xf32>
    %5 = vector.broadcast %4 : vector<1x32xf32> to vector<2x32xf32>
    %6 = arith.addf %3, %5 : vector<2x32xf32>
    %cst_6 = arith.constant 0.000000e+00 : f32
    %7 = vector.broadcast %cst_6 : f32 to vector<2x32xf32>
    %8 = arith.maximumf %6, %7 : vector<2x32xf32>
    %c1 = arith.constant 1 : index
    %c0_7 = arith.constant 0 : index
    %c0_8 = arith.constant 0 : index
    %9 = vector.load %arg2[%c1, %c0_7, %c0_8] : memref<2x32x32xf32, #tpu.memory_space<vmem>>, vector<1x32x32xf32>
    %10 = vector.shape_cast %9 : vector<1x32x32xf32> to vector<32x32xf32>
    %cst_9 = arith.constant dense<0.000000e+00> : vector<2x32xf32>
    %11 = tpu.matmul %8, %10, %cst_9 {dimension_numbers = #tpu.dot_dimension_numbers<[1], [0], [0], [1], [0, 0, 1, 1], [], []>} : vector<2x32xf32>, vector<32x32xf32>, vector<2x32xf32> -> vector<2x32xf32>
    %c1_10 = arith.constant 1 : index
    %c0_11 = arith.constant 0 : index
    %12 = vector.load %arg6[%c1_10, %c0_11] : memref<9x256xf32, #tpu.memory_space<vmem>>, vector<1x32xf32>
    %13 = vector.broadcast %12 : vector<1x32xf32> to vector<2x32xf32>
    %14 = arith.addf %11, %13 : vector<2x32xf32>
    %cst_12 = arith.constant 0.000000e+00 : f32
    %15 = vector.broadcast %cst_12 : f32 to vector<2x32xf32>
    %16 = arith.maximumf %14, %15 : vector<2x32xf32>
    %c0_13 = arith.constant 0 : index
    %c0_14 = arith.constant 0 : index
    %17 = vector.load %arg3[%c0_13, %c0_14] : memref<32x256xf32, #tpu.memory_space<vmem>>, vector<32x256xf32>
    %cst_15 = arith.constant dense<0.000000e+00> : vector<2x256xf32>
    %18 = tpu.matmul %16, %17, %cst_15 {dimension_numbers = #tpu.dot_dimension_numbers<[1], [0], [0], [1], [0, 0, 1, 1], [], []>} : vector<2x32xf32>, vector<32x256xf32>, vector<2x256xf32> -> vector<2x256xf32>
    %c2 = arith.constant 2 : index
    %c0_16 = arith.constant 0 : index
    %19 = vector.load %arg6[%c2, %c0_16] : memref<9x256xf32, #tpu.memory_space<vmem>>, vector<1x256xf32>
    %20 = vector.broadcast %19 : vector<1x256xf32> to vector<2x256xf32>
    %21 = arith.addf %18, %20 : vector<2x256xf32>
    %cst_17 = arith.constant 0.000000e+00 : f32
    %22 = vector.broadcast %cst_17 : f32 to vector<2x256xf32>
    %23 = arith.subf %22, %21 : vector<2x256xf32>
    %24 = math.exp %23 : vector<2x256xf32>
    %cst_18 = arith.constant 1.000000e+00 : f32
    %25 = vector.broadcast %cst_18 : f32 to vector<2x256xf32>
    %26 = arith.addf %25, %24 : vector<2x256xf32>
    %cst_19 = arith.constant 1.000000e+00 : f32
    %27 = vector.broadcast %cst_19 : f32 to vector<2x256xf32>
    %28 = arith.divf %27, %26 : vector<2x256xf32>
    %29 = vector.extract_strided_slice %28 {offsets = [0, 0], sizes = [2, 32], strides = [1, 1]} : vector<2x256xf32> to vector<2x32xf32>
    %c0_20 = arith.constant 0 : index
    %c0_21 = arith.constant 0 : index
    %30 = vector.load %arg8[%c0_20, %c0_21] : memref<2x32xf32, #tpu.memory_space<vmem>>, vector<2x32xf32>
    tpu.vector_store %arg8[%c0_20, %c0_21], %29 {strides = array<i32>} : memref<2x32xf32, #tpu.memory_space<vmem>>, vector<2x32xf32>,
    %c0_22 = arith.constant 0 : index
    %c0_23 = arith.constant 0 : index
    %31 = vector.load %arg0[%c0_22, %c0_23] : memref<16x256xf32, #tpu.memory_space<vmem>>, vector<16x256xf32>
    %32 = arith.truncf %31 : vector<16x256xf32> to vector<16x256xbf16>
    %c0_24 = arith.constant 0 : index
    %c0_25 = arith.constant 0 : index
    %c0_26 = arith.constant 0 : index
    %33 = vector.load %arg4[%c0_24, %c0_25, %c0_26] : memref<2x256x256xbf16, #tpu.memory_space<vmem>>, vector<1x256x256xbf16>
    %34 = vector.shape_cast %33 : vector<1x256x256xbf16> to vector<256x256xbf16>
    %cst_27 = arith.constant dense<0.000000e+00> : vector<16x256xf32>
    %35 = tpu.matmul %32, %34, %cst_27 {dimension_numbers = #tpu.dot_dimension_numbers<[1], [0], [0], [1], [0, 0, 1, 1], [], []>} : vector<16x256xbf16>, vector<256x256xbf16>, vector<16x256xf32> -> vector<16x256xf32>
    %c3 = arith.constant 3 : index
    %c0_28 = arith.constant 0 : index
    %36 = vector.load %arg6[%c3, %c0_28] : memref<9x256xf32, #tpu.memory_space<vmem>>, vector<1x256xf32>
    %37 = vector.broadcast %36 : vector<1x256xf32> to vector<16x256xf32>
    %38 = arith.addf %35, %37 : vector<16x256xf32>
    %cst_29 = arith.constant 0.000000e+00 : f32
    %39 = vector.broadcast %cst_29 : f32 to vector<16x256xf32>
    %40 = arith.maximumf %38, %39 : vector<16x256xf32>
    %41 = arith.truncf %40 : vector<16x256xf32> to vector<16x256xbf16>
    %c1_30 = arith.constant 1 : index
    %c0_31 = arith.constant 0 : index
    %c0_32 = arith.constant 0 : index
    %42 = vector.load %arg4[%c1_30, %c0_31, %c0_32] : memref<2x256x256xbf16, #tpu.memory_space<vmem>>, vector<1x256x256xbf16>
    %43 = vector.shape_cast %42 : vector<1x256x256xbf16> to vector<256x256xbf16>
    %cst_33 = arith.constant dense<0.000000e+00> : vector<16x256xf32>
    %44 = tpu.matmul %41, %43, %cst_33 {dimension_numbers = #tpu.dot_dimension_numbers<[1], [0], [0], [1], [0, 0, 1, 1], [], []>} : vector<16x256xbf16>, vector<256x256xbf16>, vector<16x256xf32> -> vector<16x256xf32>
    %c4 = arith.constant 4 : index
    %c0_34 = arith.constant 0 : index
    %45 = vector.load %arg6[%c4, %c0_34] : memref<9x256xf32, #tpu.memory_space<vmem>>, vector<1x256xf32>
    %46 = vector.broadcast %45 : vector<1x256xf32> to vector<16x256xf32>
    %47 = arith.addf %44, %46 : vector<16x256xf32>
    %48 = vector.shape_cast %47 : vector<16x256xf32> to vector<2x8x256xf32>
    %49 = vector.shape_cast %28 : vector<2x256xf32> to vector<2x1x256xf32>
    %50 = vector.broadcast %49 : vector<2x1x256xf32> to vector<2x8x256xf32>
    %51 = arith.mulf %48, %50 : vector<2x8x256xf32>
    %52 = vector.shape_cast %51 : vector<2x8x256xf32> to vector<16x256xf32>
    %cst_35 = arith.constant 0.000000e+00 : f32
    %53 = vector.broadcast %cst_35 : f32 to vector<2x2x256xf32>
    %c0_36 = arith.constant 0 : index
    %c0_37 = arith.constant 0 : index
    %c0_38 = arith.constant 0 : index
    %54 = vector.load %arg9[%c0_36, %c0_37, %c0_38] : memref<2x12x256xf32, #tpu.memory_space<vmem>>, vector<2x2x256xf32>
    tpu.vector_store %arg9[%c0_36, %c0_37, %c0_38], %53 {strides = array<i32>} : memref<2x12x256xf32, #tpu.memory_space<vmem>>, vector<2x2x256xf32>,
    %cst_39 = arith.constant 0.000000e+00 : f32
    %55 = vector.broadcast %cst_39 : f32 to vector<2x2x256xf32>
    %c0_40 = arith.constant 0 : index
    %c10 = arith.constant 10 : index
    %c0_41 = arith.constant 0 : index
    %56 = vector.load %arg9[%c0_40, %c10, %c0_41] : memref<2x12x256xf32, #tpu.memory_space<vmem>>, vector<2x2x256xf32>
    tpu.vector_store %arg9[%c0_40, %c10, %c0_41], %55 {strides = array<i32>} : memref<2x12x256xf32, #tpu.memory_space<vmem>>, vector<2x2x256xf32>,
    %57 = vector.shape_cast %52 : vector<16x256xf32> to vector<2x8x256xf32>
    %c0_42 = arith.constant 0 : index
    %c2_43 = arith.constant 2 : index
    %c0_44 = arith.constant 0 : index
    %58 = vector.load %arg9[%c0_42, %c2_43, %c0_44] : memref<2x12x256xf32, #tpu.memory_space<vmem>>, vector<2x8x256xf32>
    tpu.vector_store %arg9[%c0_42, %c2_43, %c0_44], %57 {strides = array<i32>} : memref<2x12x256xf32, #tpu.memory_space<vmem>>, vector<2x8x256xf32>,
    %cst_45 = arith.constant 0.000000e+00 : f32
    %59 = vector.broadcast %cst_45 : f32 to vector<16x256xf32>
    %c0_46 = arith.constant 0 : index
    %c0_47 = arith.constant 0 : index
    %c0_48 = arith.constant 0 : index
    %60 = vector.load %arg9[%c0_46, %c0_47, %c0_48] : memref<2x12x256xf32, #tpu.memory_space<vmem>>, vector<2x8x256xf32>
    %61 = vector.shape_cast %60 : vector<2x8x256xf32> to vector<16x256xf32>
    %62 = arith.truncf %61 : vector<16x256xf32> to vector<16x256xbf16>
    %c0_49 = arith.constant 0 : index
    %c0_50 = arith.constant 0 : index
    %c0_51 = arith.constant 0 : index
    %c0_52 = arith.constant 0 : index
    %63 = vector.load %arg5[%c0_49, %c0_50, %c0_51, %c0_52] : memref<4x5x256x256xbf16, #tpu.memory_space<vmem>>, vector<1x1x256x256xbf16>
    %64 = vector.shape_cast %63 : vector<1x1x256x256xbf16> to vector<256x256xbf16>
    %cst_53 = arith.constant dense<0.000000e+00> : vector<16x256xf32>
    %65 = tpu.matmul %62, %64, %cst_53 {dimension_numbers = #tpu.dot_dimension_numbers<[1], [0], [0], [1], [0, 0, 1, 1], [], []>} : vector<16x256xbf16>, vector<256x256xbf16>, vector<16x256xf32> -> vector<16x256xf32>
    %66 = arith.addf %59, %65 : vector<16x256xf32>
    %c0_54 = arith.constant 0 : index
    %c1_55 = arith.constant 1 : index
    %c0_56 = arith.constant 0 : index
    %67 = vector.load %arg9[%c0_54, %c1_55, %c0_56] : memref<2x12x256xf32, #tpu.memory_space<vmem>>, vector<2x8x256xf32>
    %68 = vector.shape_cast %67 : vector<2x8x256xf32> to vector<16x256xf32>
    %69 = arith.truncf %68 : vector<16x256xf32> to vector<16x256xbf16>
    %c0_57 = arith.constant 0 : index
    %c1_58 = arith.constant 1 : index
    %c0_59 = arith.constant 0 : index
    %c0_60 = arith.constant 0 : index
    %70 = vector.load %arg5[%c0_57, %c1_58, %c0_59, %c0_60] : memref<4x5x256x256xbf16, #tpu.memory_space<vmem>>, vector<1x1x256x256xbf16>
    %71 = vector.shape_cast %70 : vector<1x1x256x256xbf16> to vector<256x256xbf16>
    %cst_61 = arith.constant dense<0.000000e+00> : vector<16x256xf32>
    %72 = tpu.matmul %69, %71, %cst_61 {dimension_numbers = #tpu.dot_dimension_numbers<[1], [0], [0], [1], [0, 0, 1, 1], [], []>} : vector<16x256xbf16>, vector<256x256xbf16>, vector<16x256xf32> -> vector<16x256xf32>
    %73 = arith.addf %66, %72 : vector<16x256xf32>
    %c0_62 = arith.constant 0 : index
    %c2_63 = arith.constant 2 : index
    %c0_64 = arith.constant 0 : index
    %74 = vector.load %arg9[%c0_62, %c2_63, %c0_64] : memref<2x12x256xf32, #tpu.memory_space<vmem>>, vector<2x8x256xf32>
    %75 = vector.shape_cast %74 : vector<2x8x256xf32> to vector<16x256xf32>
    %76 = arith.truncf %75 : vector<16x256xf32> to vector<16x256xbf16>
    %c0_65 = arith.constant 0 : index
    %c2_66 = arith.constant 2 : index
    %c0_67 = arith.constant 0 : index
    %c0_68 = arith.constant 0 : index
    %77 = vector.load %arg5[%c0_65, %c2_66, %c0_67, %c0_68] : memref<4x5x256x256xbf16, #tpu.memory_space<vmem>>, vector<1x1x256x256xbf16>
    %78 = vector.shape_cast %77 : vector<1x1x256x256xbf16> to vector<256x256xbf16>
    %cst_69 = arith.constant dense<0.000000e+00> : vector<16x256xf32>
    %79 = tpu.matmul %76, %78, %cst_69 {dimension_numbers = #tpu.dot_dimension_numbers<[1], [0], [0], [1], [0, 0, 1, 1], [], []>} : vector<16x256xbf16>, vector<256x256xbf16>, vector<16x256xf32> -> vector<16x256xf32>
    %80 = arith.addf %73, %79 : vector<16x256xf32>
    %c0_70 = arith.constant 0 : index
    %c3_71 = arith.constant 3 : index
    %c0_72 = arith.constant 0 : index
    %81 = vector.load %arg9[%c0_70, %c3_71, %c0_72] : memref<2x12x256xf32, #tpu.memory_space<vmem>>, vector<2x8x256xf32>
    %82 = vector.shape_cast %81 : vector<2x8x256xf32> to vector<16x256xf32>
    %83 = arith.truncf %82 : vector<16x256xf32> to vector<16x256xbf16>
    %c0_73 = arith.constant 0 : index
    %c3_74 = arith.constant 3 : index
    %c0_75 = arith.constant 0 : index
    %c0_76 = arith.constant 0 : index
    %84 = vector.load %arg5[%c0_73, %c3_74, %c0_75, %c0_76] : memref<4x5x256x256xbf16, #tpu.memory_space<vmem>>, vector<1x1x256x256xbf16>
    %85 = vector.shape_cast %84 : vector<1x1x256x256xbf16> to vector<256x256xbf16>
    %cst_77 = arith.constant dense<0.000000e+00> : vector<16x256xf32>
    %86 = tpu.matmul %83, %85, %cst_77 {dimension_numbers = #tpu.dot_dimension_numbers<[1], [0], [0], [1], [0, 0, 1, 1], [], []>} : vector<16x256xbf16>, vector<256x256xbf16>, vector<16x256xf32> -> vector<16x256xf32>
    %87 = arith.addf %80, %86 : vector<16x256xf32>
    %c0_78 = arith.constant 0 : index
    %c4_79 = arith.constant 4 : index
    %c0_80 = arith.constant 0 : index
    %88 = vector.load %arg9[%c0_78, %c4_79, %c0_80] : memref<2x12x256xf32, #tpu.memory_space<vmem>>, vector<2x8x256xf32>
    %89 = vector.shape_cast %88 : vector<2x8x256xf32> to vector<16x256xf32>
    %90 = arith.truncf %89 : vector<16x256xf32> to vector<16x256xbf16>
    %c0_81 = arith.constant 0 : index
    %c4_82 = arith.constant 4 : index
    %c0_83 = arith.constant 0 : index
    %c0_84 = arith.constant 0 : index
    %91 = vector.load %arg5[%c0_81, %c4_82, %c0_83, %c0_84] : memref<4x5x256x256xbf16, #tpu.memory_space<vmem>>, vector<1x1x256x256xbf16>
    %92 = vector.shape_cast %91 : vector<1x1x256x256xbf16> to vector<256x256xbf16>
    %cst_85 = arith.constant dense<0.000000e+00> : vector<16x256xf32>
    %93 = tpu.matmul %90, %92, %cst_85 {dimension_numbers = #tpu.dot_dimension_numbers<[1], [0], [0], [1], [0, 0, 1, 1], [], []>} : vector<16x256xbf16>, vector<256x256xbf16>, vector<16x256xf32> -> vector<16x256xf32>
    %94 = arith.addf %87, %93 : vector<16x256xf32>
    %c5 = arith.constant 5 : index
    %c0_86 = arith.constant 0 : index
    %95 = vector.load %arg6[%c5, %c0_86] : memref<9x256xf32, #tpu.memory_space<vmem>>, vector<1x256xf32>
    %96 = vector.broadcast %95 : vector<1x256xf32> to vector<16x256xf32>
    %97 = arith.addf %94, %96 : vector<16x256xf32>
    %cst_87 = arith.constant 0.000000e+00 : f32
    %98 = vector.broadcast %cst_87 : f32 to vector<16x256xf32>
    %99 = arith.maximumf %97, %98 : vector<16x256xf32>
    %100 = vector.shape_cast %99 : vector<16x256xf32> to vector<2x8x256xf32>
    %c0_88 = arith.constant 0 : index
    %c2_89 = arith.constant 2 : index
    %c0_90 = arith.constant 0 : index
    %101 = vector.load %arg9[%c0_88, %c2_89, %c0_90] : memref<2x12x256xf32, #tpu.memory_space<vmem>>, vector<2x8x256xf32>
    tpu.vector_store %arg9[%c0_88, %c2_89, %c0_90], %100 {strides = array<i32>} : memref<2x12x256xf32, #tpu.memory_space<vmem>>, vector<2x8x256xf32>,
    %cst_91 = arith.constant 0.000000e+00 : f32
    %102 = vector.broadcast %cst_91 : f32 to vector<16x256xf32>
    %c0_92 = arith.constant 0 : index
    %c0_93 = arith.constant 0 : index
    %c0_94 = arith.constant 0 : index
    %103 = vector.load %arg9[%c0_92, %c0_93, %c0_94] : memref<2x12x256xf32, #tpu.memory_space<vmem>>, vector<2x8x256xf32>
    %104 = vector.shape_cast %103 : vector<2x8x256xf32> to vector<16x256xf32>
    %105 = arith.truncf %104 : vector<16x256xf32> to vector<16x256xbf16>
    %c1_95 = arith.constant 1 : index
    %c0_96 = arith.constant 0 : index
    %c0_97 = arith.constant 0 : index
    %c0_98 = arith.constant 0 : index
    %106 = vector.load %arg5[%c1_95, %c0_96, %c0_97, %c0_98] : memref<4x5x256x256xbf16, #tpu.memory_space<vmem>>, vector<1x1x256x256xbf16>
    %107 = vector.shape_cast %106 : vector<1x1x256x256xbf16> to vector<256x256xbf16>
    %cst_99 = arith.constant dense<0.000000e+00> : vector<16x256xf32>
    %108 = tpu.matmul %105, %107, %cst_99 {dimension_numbers = #tpu.dot_dimension_numbers<[1], [0], [0], [1], [0, 0, 1, 1], [], []>} : vector<16x256xbf16>, vector<256x256xbf16>, vector<16x256xf32> -> vector<16x256xf32>
    %109 = arith.addf %102, %108 : vector<16x256xf32>
    %c0_100 = arith.constant 0 : index
    %c1_101 = arith.constant 1 : index
    %c0_102 = arith.constant 0 : index
    %110 = vector.load %arg9[%c0_100, %c1_101, %c0_102] : memref<2x12x256xf32, #tpu.memory_space<vmem>>, vector<2x8x256xf32>
    %111 = vector.shape_cast %110 : vector<2x8x256xf32> to vector<16x256xf32>
    %112 = arith.truncf %111 : vector<16x256xf32> to vector<16x256xbf16>
    %c1_103 = arith.constant 1 : index
    %c1_104 = arith.constant 1 : index
    %c0_105 = arith.constant 0 : index
    %c0_106 = arith.constant 0 : index
    %113 = vector.load %arg5[%c1_103, %c1_104, %c0_105, %c0_106] : memref<4x5x256x256xbf16, #tpu.memory_space<vmem>>, vector<1x1x256x256xbf16>
    %114 = vector.shape_cast %113 : vector<1x1x256x256xbf16> to vector<256x256xbf16>
    %cst_107 = arith.constant dense<0.000000e+00> : vector<16x256xf32>
    %115 = tpu.matmul %112, %114, %cst_107 {dimension_numbers = #tpu.dot_dimension_numbers<[1], [0], [0], [1], [0, 0, 1, 1], [], []>} : vector<16x256xbf16>, vector<256x256xbf16>, vector<16x256xf32> -> vector<16x256xf32>
    %116 = arith.addf %109, %115 : vector<16x256xf32>
    %c0_108 = arith.constant 0 : index
    %c2_109 = arith.constant 2 : index
    %c0_110 = arith.constant 0 : index
    %117 = vector.load %arg9[%c0_108, %c2_109, %c0_110] : memref<2x12x256xf32, #tpu.memory_space<vmem>>, vector<2x8x256xf32>
    %118 = vector.shape_cast %117 : vector<2x8x256xf32> to vector<16x256xf32>
    %119 = arith.truncf %118 : vector<16x256xf32> to vector<16x256xbf16>
    %c1_111 = arith.constant 1 : index
    %c2_112 = arith.constant 2 : index
    %c0_113 = arith.constant 0 : index
    %c0_114 = arith.constant 0 : index
    %120 = vector.load %arg5[%c1_111, %c2_112, %c0_113, %c0_114] : memref<4x5x256x256xbf16, #tpu.memory_space<vmem>>, vector<1x1x256x256xbf16>
    %121 = vector.shape_cast %120 : vector<1x1x256x256xbf16> to vector<256x256xbf16>
    %cst_115 = arith.constant dense<0.000000e+00> : vector<16x256xf32>
    %122 = tpu.matmul %119, %121, %cst_115 {dimension_numbers = #tpu.dot_dimension_numbers<[1], [0], [0], [1], [0, 0, 1, 1], [], []>} : vector<16x256xbf16>, vector<256x256xbf16>, vector<16x256xf32> -> vector<16x256xf32>
    %123 = arith.addf %116, %122 : vector<16x256xf32>
    %c0_116 = arith.constant 0 : index
    %c3_117 = arith.constant 3 : index
    %c0_118 = arith.constant 0 : index
    %124 = vector.load %arg9[%c0_116, %c3_117, %c0_118] : memref<2x12x256xf32, #tpu.memory_space<vmem>>, vector<2x8x256xf32>
    %125 = vector.shape_cast %124 : vector<2x8x256xf32> to vector<16x256xf32>
    %126 = arith.truncf %125 : vector<16x256xf32> to vector<16x256xbf16>
    %c1_119 = arith.constant 1 : index
    %c3_120 = arith.constant 3 : index
    %c0_121 = arith.constant 0 : index
    %c0_122 = arith.constant 0 : index
    %127 = vector.load %arg5[%c1_119, %c3_120, %c0_121, %c0_122] : memref<4x5x256x256xbf16, #tpu.memory_space<vmem>>, vector<1x1x256x256xbf16>
    %128 = vector.shape_cast %127 : vector<1x1x256x256xbf16> to vector<256x256xbf16>
    %cst_123 = arith.constant dense<0.000000e+00> : vector<16x256xf32>
    %129 = tpu.matmul %126, %128, %cst_123 {dimension_numbers = #tpu.dot_dimension_numbers<[1], [0], [0], [1], [0, 0, 1, 1], [], []>} : vector<16x256xbf16>, vector<256x256xbf16>, vector<16x256xf32> -> vector<16x256xf32>
    %130 = arith.addf %123, %129 : vector<16x256xf32>
    %c0_124 = arith.constant 0 : index
    %c4_125 = arith.constant 4 : index
    %c0_126 = arith.constant 0 : index
    %131 = vector.load %arg9[%c0_124, %c4_125, %c0_126] : memref<2x12x256xf32, #tpu.memory_space<vmem>>, vector<2x8x256xf32>
    %132 = vector.shape_cast %131 : vector<2x8x256xf32> to vector<16x256xf32>
    %133 = arith.truncf %132 : vector<16x256xf32> to vector<16x256xbf16>
    %c1_127 = arith.constant 1 : index
    %c4_128 = arith.constant 4 : index
    %c0_129 = arith.constant 0 : index
    %c0_130 = arith.constant 0 : index
    %134 = vector.load %arg5[%c1_127, %c4_128, %c0_129, %c0_130] : memref<4x5x256x256xbf16, #tpu.memory_space<vmem>>, vector<1x1x256x256xbf16>
    %135 = vector.shape_cast %134 : vector<1x1x256x256xbf16> to vector<256x256xbf16>
    %cst_131 = arith.constant dense<0.000000e+00> : vector<16x256xf32>
    %136 = tpu.matmul %133, %135, %cst_131 {dimension_numbers = #tpu.dot_dimension_numbers<[1], [0], [0], [1], [0, 0, 1, 1], [], []>} : vector<16x256xbf16>, vector<256x256xbf16>, vector<16x256xf32> -> vector<16x256xf32>
    %137 = arith.addf %130, %136 : vector<16x256xf32>
    %c6 = arith.constant 6 : index
    %c0_132 = arith.constant 0 : index
    %138 = vector.load %arg6[%c6, %c0_132] : memref<9x256xf32, #tpu.memory_space<vmem>>, vector<1x256xf32>
    %139 = vector.broadcast %138 : vector<1x256xf32> to vector<16x256xf32>
    %140 = arith.addf %137, %139 : vector<16x256xf32>
    %cst_133 = arith.constant 0.000000e+00 : f32
    %141 = vector.broadcast %cst_133 : f32 to vector<16x256xf32>
    %142 = arith.maximumf %140, %141 : vector<16x256xf32>
    %143 = vector.shape_cast %142 : vector<16x256xf32> to vector<2x8x256xf32>
    %c0_134 = arith.constant 0 : index
    %c2_135 = arith.constant 2 : index
    %c0_136 = arith.constant 0 : index
    %144 = vector.load %arg9[%c0_134, %c2_135, %c0_136] : memref<2x12x256xf32, #tpu.memory_space<vmem>>, vector<2x8x256xf32>
    tpu.vector_store %arg9[%c0_134, %c2_135, %c0_136], %143 {strides = array<i32>} : memref<2x12x256xf32, #tpu.memory_space<vmem>>, vector<2x8x256xf32>,
    %cst_137 = arith.constant 0.000000e+00 : f32
    %145 = vector.broadcast %cst_137 : f32 to vector<16x256xf32>
    %c0_138 = arith.constant 0 : index
    %c0_139 = arith.constant 0 : index
    %c0_140 = arith.constant 0 : index
    %146 = vector.load %arg9[%c0_138, %c0_139, %c0_140] : memref<2x12x256xf32, #tpu.memory_space<vmem>>, vector<2x8x256xf32>
    %147 = vector.shape_cast %146 : vector<2x8x256xf32> to vector<16x256xf32>
    %148 = arith.truncf %147 : vector<16x256xf32> to vector<16x256xbf16>
    %c2_141 = arith.constant 2 : index
    %c0_142 = arith.constant 0 : index
    %c0_143 = arith.constant 0 : index
    %c0_144 = arith.constant 0 : index
    %149 = vector.load %arg5[%c2_141, %c0_142, %c0_143, %c0_144] : memref<4x5x256x256xbf16, #tpu.memory_space<vmem>>, vector<1x1x256x256xbf16>
    %150 = vector.shape_cast %149 : vector<1x1x256x256xbf16> to vector<256x256xbf16>
    %cst_145 = arith.constant dense<0.000000e+00> : vector<16x256xf32>
    %151 = tpu.matmul %148, %150, %cst_145 {dimension_numbers = #tpu.dot_dimension_numbers<[1], [0], [0], [1], [0, 0, 1, 1], [], []>} : vector<16x256xbf16>, vector<256x256xbf16>, vector<16x256xf32> -> vector<16x256xf32>
    %152 = arith.addf %145, %151 : vector<16x256xf32>
    %c0_146 = arith.constant 0 : index
    %c1_147 = arith.constant 1 : index
    %c0_148 = arith.constant 0 : index
    %153 = vector.load %arg9[%c0_146, %c1_147, %c0_148] : memref<2x12x256xf32, #tpu.memory_space<vmem>>, vector<2x8x256xf32>
    %154 = vector.shape_cast %153 : vector<2x8x256xf32> to vector<16x256xf32>
    %155 = arith.truncf %154 : vector<16x256xf32> to vector<16x256xbf16>
    %c2_149 = arith.constant 2 : index
    %c1_150 = arith.constant 1 : index
    %c0_151 = arith.constant 0 : index
    %c0_152 = arith.constant 0 : index
    %156 = vector.load %arg5[%c2_149, %c1_150, %c0_151, %c0_152] : memref<4x5x256x256xbf16, #tpu.memory_space<vmem>>, vector<1x1x256x256xbf16>
    %157 = vector.shape_cast %156 : vector<1x1x256x256xbf16> to vector<256x256xbf16>
    %cst_153 = arith.constant dense<0.000000e+00> : vector<16x256xf32>
    %158 = tpu.matmul %155, %157, %cst_153 {dimension_numbers = #tpu.dot_dimension_numbers<[1], [0], [0], [1], [0, 0, 1, 1], [], []>} : vector<16x256xbf16>, vector<256x256xbf16>, vector<16x256xf32> -> vector<16x256xf32>
    %159 = arith.addf %152, %158 : vector<16x256xf32>
    %c0_154 = arith.constant 0 : index
    %c2_155 = arith.constant 2 : index
    %c0_156 = arith.constant 0 : index
    %160 = vector.load %arg9[%c0_154, %c2_155, %c0_156] : memref<2x12x256xf32, #tpu.memory_space<vmem>>, vector<2x8x256xf32>
    %161 = vector.shape_cast %160 : vector<2x8x256xf32> to vector<16x256xf32>
    %162 = arith.truncf %161 : vector<16x256xf32> to vector<16x256xbf16>
    %c2_157 = arith.constant 2 : index
    %c2_158 = arith.constant 2 : index
    %c0_159 = arith.constant 0 : index
    %c0_160 = arith.constant 0 : index
    %163 = vector.load %arg5[%c2_157, %c2_158, %c0_159, %c0_160] : memref<4x5x256x256xbf16, #tpu.memory_space<vmem>>, vector<1x1x256x256xbf16>
    %164 = vector.shape_cast %163 : vector<1x1x256x256xbf16> to vector<256x256xbf16>
    %cst_161 = arith.constant dense<0.000000e+00> : vector<16x256xf32>
    %165 = tpu.matmul %162, %164, %cst_161 {dimension_numbers = #tpu.dot_dimension_numbers<[1], [0], [0], [1], [0, 0, 1, 1], [], []>} : vector<16x256xbf16>, vector<256x256xbf16>, vector<16x256xf32> -> vector<16x256xf32>
    %166 = arith.addf %159, %165 : vector<16x256xf32>
    %c0_162 = arith.constant 0 : index
    %c3_163 = arith.constant 3 : index
    %c0_164 = arith.constant 0 : index
    %167 = vector.load %arg9[%c0_162, %c3_163, %c0_164] : memref<2x12x256xf32, #tpu.memory_space<vmem>>, vector<2x8x256xf32>
    %168 = vector.shape_cast %167 : vector<2x8x256xf32> to vector<16x256xf32>
    %169 = arith.truncf %168 : vector<16x256xf32> to vector<16x256xbf16>
    %c2_165 = arith.constant 2 : index
    %c3_166 = arith.constant 3 : index
    %c0_167 = arith.constant 0 : index
    %c0_168 = arith.constant 0 : index
    %170 = vector.load %arg5[%c2_165, %c3_166, %c0_167, %c0_168] : memref<4x5x256x256xbf16, #tpu.memory_space<vmem>>, vector<1x1x256x256xbf16>
    %171 = vector.shape_cast %170 : vector<1x1x256x256xbf16> to vector<256x256xbf16>
    %cst_169 = arith.constant dense<0.000000e+00> : vector<16x256xf32>
    %172 = tpu.matmul %169, %171, %cst_169 {dimension_numbers = #tpu.dot_dimension_numbers<[1], [0], [0], [1], [0, 0, 1, 1], [], []>} : vector<16x256xbf16>, vector<256x256xbf16>, vector<16x256xf32> -> vector<16x256xf32>
    %173 = arith.addf %166, %172 : vector<16x256xf32>
    %c0_170 = arith.constant 0 : index
    %c4_171 = arith.constant 4 : index
    %c0_172 = arith.constant 0 : index
    %174 = vector.load %arg9[%c0_170, %c4_171, %c0_172] : memref<2x12x256xf32, #tpu.memory_space<vmem>>, vector<2x8x256xf32>
    %175 = vector.shape_cast %174 : vector<2x8x256xf32> to vector<16x256xf32>
    %176 = arith.truncf %175 : vector<16x256xf32> to vector<16x256xbf16>
    %c2_173 = arith.constant 2 : index
    %c4_174 = arith.constant 4 : index
    %c0_175 = arith.constant 0 : index
    %c0_176 = arith.constant 0 : index
    %177 = vector.load %arg5[%c2_173, %c4_174, %c0_175, %c0_176] : memref<4x5x256x256xbf16, #tpu.memory_space<vmem>>, vector<1x1x256x256xbf16>
    %178 = vector.shape_cast %177 : vector<1x1x256x256xbf16> to vector<256x256xbf16>
    %cst_177 = arith.constant dense<0.000000e+00> : vector<16x256xf32>
    %179 = tpu.matmul %176, %178, %cst_177 {dimension_numbers = #tpu.dot_dimension_numbers<[1], [0], [0], [1], [0, 0, 1, 1], [], []>} : vector<16x256xbf16>, vector<256x256xbf16>, vector<16x256xf32> -> vector<16x256xf32>
    %180 = arith.addf %173, %179 : vector<16x256xf32>
    %c7 = arith.constant 7 : index
    %c0_178 = arith.constant 0 : index
    %181 = vector.load %arg6[%c7, %c0_178] : memref<9x256xf32, #tpu.memory_space<vmem>>, vector<1x256xf32>
    %182 = vector.broadcast %181 : vector<1x256xf32> to vector<16x256xf32>
    %183 = arith.addf %180, %182 : vector<16x256xf32>
    %cst_179 = arith.constant 0.000000e+00 : f32
    %184 = vector.broadcast %cst_179 : f32 to vector<16x256xf32>
    %185 = arith.maximumf %183, %184 : vector<16x256xf32>
    %186 = vector.shape_cast %185 : vector<16x256xf32> to vector<2x8x256xf32>
    %c0_180 = arith.constant 0 : index
    %c2_181 = arith.constant 2 : index
    %c0_182 = arith.constant 0 : index
    %187 = vector.load %arg9[%c0_180, %c2_181, %c0_182] : memref<2x12x256xf32, #tpu.memory_space<vmem>>, vector<2x8x256xf32>
    tpu.vector_store %arg9[%c0_180, %c2_181, %c0_182], %186 {strides = array<i32>} : memref<2x12x256xf32, #tpu.memory_space<vmem>>, vector<2x8x256xf32>,
    %cst_183 = arith.constant 0.000000e+00 : f32
    %188 = vector.broadcast %cst_183 : f32 to vector<16x256xf32>
    %c0_184 = arith.constant 0 : index
    %c0_185 = arith.constant 0 : index
    %c0_186 = arith.constant 0 : index
    %189 = vector.load %arg9[%c0_184, %c0_185, %c0_186] : memref<2x12x256xf32, #tpu.memory_space<vmem>>, vector<2x8x256xf32>
    %190 = vector.shape_cast %189 : vector<2x8x256xf32> to vector<16x256xf32>
    %191 = arith.truncf %190 : vector<16x256xf32> to vector<16x256xbf16>
    %c3_187 = arith.constant 3 : index
    %c0_188 = arith.constant 0 : index
    %c0_189 = arith.constant 0 : index
    %c0_190 = arith.constant 0 : index
    %192 = vector.load %arg5[%c3_187, %c0_188, %c0_189, %c0_190] : memref<4x5x256x256xbf16, #tpu.memory_space<vmem>>, vector<1x1x256x256xbf16>
    %193 = vector.shape_cast %192 : vector<1x1x256x256xbf16> to vector<256x256xbf16>
    %cst_191 = arith.constant dense<0.000000e+00> : vector<16x256xf32>
    %194 = tpu.matmul %191, %193, %cst_191 {dimension_numbers = #tpu.dot_dimension_numbers<[1], [0], [0], [1], [0, 0, 1, 1], [], []>} : vector<16x256xbf16>, vector<256x256xbf16>, vector<16x256xf32> -> vector<16x256xf32>
    %195 = arith.addf %188, %194 : vector<16x256xf32>
    %c0_192 = arith.constant 0 : index
    %c1_193 = arith.constant 1 : index
    %c0_194 = arith.constant 0 : index
    %196 = vector.load %arg9[%c0_192, %c1_193, %c0_194] : memref<2x12x256xf32, #tpu.memory_space<vmem>>, vector<2x8x256xf32>
    %197 = vector.shape_cast %196 : vector<2x8x256xf32> to vector<16x256xf32>
    %198 = arith.truncf %197 : vector<16x256xf32> to vector<16x256xbf16>
    %c3_195 = arith.constant 3 : index
    %c1_196 = arith.constant 1 : index
    %c0_197 = arith.constant 0 : index
    %c0_198 = arith.constant 0 : index
    %199 = vector.load %arg5[%c3_195, %c1_196, %c0_197, %c0_198] : memref<4x5x256x256xbf16, #tpu.memory_space<vmem>>, vector<1x1x256x256xbf16>
    %200 = vector.shape_cast %199 : vector<1x1x256x256xbf16> to vector<256x256xbf16>
    %cst_199 = arith.constant dense<0.000000e+00> : vector<16x256xf32>
    %201 = tpu.matmul %198, %200, %cst_199 {dimension_numbers = #tpu.dot_dimension_numbers<[1], [0], [0], [1], [0, 0, 1, 1], [], []>} : vector<16x256xbf16>, vector<256x256xbf16>, vector<16x256xf32> -> vector<16x256xf32>
    %202 = arith.addf %195, %201 : vector<16x256xf32>
    %c0_200 = arith.constant 0 : index
    %c2_201 = arith.constant 2 : index
    %c0_202 = arith.constant 0 : index
    %203 = vector.load %arg9[%c0_200, %c2_201, %c0_202] : memref<2x12x256xf32, #tpu.memory_space<vmem>>, vector<2x8x256xf32>
    %204 = vector.shape_cast %203 : vector<2x8x256xf32> to vector<16x256xf32>
    %205 = arith.truncf %204 : vector<16x256xf32> to vector<16x256xbf16>
    %c3_203 = arith.constant 3 : index
    %c2_204 = arith.constant 2 : index
    %c0_205 = arith.constant 0 : index
    %c0_206 = arith.constant 0 : index
    %206 = vector.load %arg5[%c3_203, %c2_204, %c0_205, %c0_206] : memref<4x5x256x256xbf16, #tpu.memory_space<vmem>>, vector<1x1x256x256xbf16>
    %207 = vector.shape_cast %206 : vector<1x1x256x256xbf16> to vector<256x256xbf16>
    %cst_207 = arith.constant dense<0.000000e+00> : vector<16x256xf32>
    %208 = tpu.matmul %205, %207, %cst_207 {dimension_numbers = #tpu.dot_dimension_numbers<[1], [0], [0], [1], [0, 0, 1, 1], [], []>} : vector<16x256xbf16>, vector<256x256xbf16>, vector<16x256xf32> -> vector<16x256xf32>
    %209 = arith.addf %202, %208 : vector<16x256xf32>
    %c0_208 = arith.constant 0 : index
    %c3_209 = arith.constant 3 : index
    %c0_210 = arith.constant 0 : index
    %210 = vector.load %arg9[%c0_208, %c3_209, %c0_210] : memref<2x12x256xf32, #tpu.memory_space<vmem>>, vector<2x8x256xf32>
    %211 = vector.shape_cast %210 : vector<2x8x256xf32> to vector<16x256xf32>
    %212 = arith.truncf %211 : vector<16x256xf32> to vector<16x256xbf16>
    %c3_211 = arith.constant 3 : index
    %c3_212 = arith.constant 3 : index
    %c0_213 = arith.constant 0 : index
    %c0_214 = arith.constant 0 : index
    %213 = vector.load %arg5[%c3_211, %c3_212, %c0_213, %c0_214] : memref<4x5x256x256xbf16, #tpu.memory_space<vmem>>, vector<1x1x256x256xbf16>
    %214 = vector.shape_cast %213 : vector<1x1x256x256xbf16> to vector<256x256xbf16>
    %cst_215 = arith.constant dense<0.000000e+00> : vector<16x256xf32>
    %215 = tpu.matmul %212, %214, %cst_215 {dimension_numbers = #tpu.dot_dimension_numbers<[1], [0], [0], [1], [0, 0, 1, 1], [], []>} : vector<16x256xbf16>, vector<256x256xbf16>, vector<16x256xf32> -> vector<16x256xf32>
    %216 = arith.addf %209, %215 : vector<16x256xf32>
    %c0_216 = arith.constant 0 : index
    %c4_217 = arith.constant 4 : index
    %c0_218 = arith.constant 0 : index
    %217 = vector.load %arg9[%c0_216, %c4_217, %c0_218] : memref<2x12x256xf32, #tpu.memory_space<vmem>>, vector<2x8x256xf32>
    %218 = vector.shape_cast %217 : vector<2x8x256xf32> to vector<16x256xf32>
    %219 = arith.truncf %218 : vector<16x256xf32> to vector<16x256xbf16>
    %c3_219 = arith.constant 3 : index
    %c4_220 = arith.constant 4 : index
    %c0_221 = arith.constant 0 : index
    %c0_222 = arith.constant 0 : index
    %220 = vector.load %arg5[%c3_219, %c4_220, %c0_221, %c0_222] : memref<4x5x256x256xbf16, #tpu.memory_space<vmem>>, vector<1x1x256x256xbf16>
    %221 = vector.shape_cast %220 : vector<1x1x256x256xbf16> to vector<256x256xbf16>
    %cst_223 = arith.constant dense<0.000000e+00> : vector<16x256xf32>
    %222 = tpu.matmul %219, %221, %cst_223 {dimension_numbers = #tpu.dot_dimension_numbers<[1], [0], [0], [1], [0, 0, 1, 1], [], []>} : vector<16x256xbf16>, vector<256x256xbf16>, vector<16x256xf32> -> vector<16x256xf32>
    %223 = arith.addf %216, %222 : vector<16x256xf32>
    %c8 = arith.constant 8 : index
    %c0_224 = arith.constant 0 : index
    %224 = vector.load %arg6[%c8, %c0_224] : memref<9x256xf32, #tpu.memory_space<vmem>>, vector<1x256xf32>
    %225 = vector.broadcast %224 : vector<1x256xf32> to vector<16x256xf32>
    %226 = arith.addf %223, %225 : vector<16x256xf32>
    %227 = arith.addf %226, %47 : vector<16x256xf32>
    %c0_225 = arith.constant 0 : index
    %c0_226 = arith.constant 0 : index
    %228 = vector.load %arg7[%c0_225, %c0_226] : memref<16x256xf32, #tpu.memory_space<vmem>>, vector<16x256xf32>
    tpu.vector_store %arg7[%c0_225, %c0_226], %227 {strides = array<i32>} : memref<16x256xf32, #tpu.memory_space<vmem>>, vector<16x256xf32>,
    return
  }
}

</mosaic_0001>

<bundles_post_ra>
// kernel: tile.54
= control target key start
LH: loop header
LB: loop body
LE: loop exit
PB: predicated region body
PF: predicated region fallthrough
CT: control target
= control target key end

     0   :  { %vm92_vm0 = vcmask 1047556   ;;  %s459_s14 = smov 96   ;;  %s460_s22 = smov 64   ;;  %vm3_vm1 = vcmask 261120   ;;  %vm96_vm2 = vcmask 1048320   ;;  %vm183_vm3 = vcmask 785920   ;;  %s896_s0 = inlined_call_operand.vmem [shape: f32[32,8,32], index: 0, kind: input, shape index: {}]   ;;  %s897_s1 = inlined_call_operand.vmem [shape: f32[32,256], index: 1, kind: output, shape index: {}]  }
   0x1   :  { %v392_v0 = vld [vmem:[%s896_s0 + $0x7] ss:$8 sm:$0xf]   ;;  %v387_v3 = vld [vmem:[%s896_s0 + $0x3] ss:$8 sm:$0xf]  }
   0x2   :  { %v393_v1 = vld [vmem:[%s896_s0 + $0x7] ss:$8 sm:$0xf0]   ;;  %v388_v4 = vld [vmem:[%s896_s0 + $0x3] ss:$8 sm:$0xf0]  }
   0x3   :  { %v114_v2 = vsel %vm92_vm0, %v393_v1, %v392_v0  ;;  %v93_v5 = vsel %vm92_vm0, %v388_v4, %v387_v3  ;;  %v395_v6 = vld [vmem:[%s896_s0 + $0x87] ss:$8 sm:$0xf]   ;;  %v389_v8 = vld [vmem:[%s896_s0 + $0x83] ss:$8 sm:$0xf]  }
   0x4   :  { %115 = vrot.lane.b32.xlu1 %v114_v2, %s459_s14  ;;  %94 = vrot.lane.b32.xlu0 %v93_v5, %s459_s14  ;;  %v396_v7 = vld [vmem:[%s896_s0 + $0x87] ss:$8 sm:$0xf0]   ;;  %v390_v9 = vld [vmem:[%s896_s0 + $0x83] ss:$8 sm:$0xf0]  }
   0x5   :  { %v398_v10 = vld [vmem:[%s896_s0 + $0x43] ss:$8 sm:$0xf]   ;;  %v125_v12 = vsel %vm92_vm0, %v396_v7, %v395_v6  ;;  %v103_v14 = vsel %vm92_vm0, %v390_v9, %v389_v8  ;;  %v407_v17 = vld [vmem:[%s896_s0 + $0xc7] ss:$8 sm:$0xf]  }
   0x6   :  { %v399_v11 = vld [vmem:[%s896_s0 + $0x43] ss:$8 sm:$0xf0]   ;;  %v408_v18 = vld [vmem:[%s896_s0 + $0xc7] ss:$8 sm:$0xf0]  }
   0x7   :  { %v136_v13 = vsel %vm92_vm0, %v399_v11, %v398_v10  ;;  %v401_v15 = vld [vmem:[%s896_s0 + $0xc3] ss:$8 sm:$0xf]   ;;  %v404_v19 = vld [vmem:[%s896_s0 + $0x47] ss:$8 sm:$0xf]   ;;  %v169_v22 = vsel %vm92_vm0, %v408_v18, %v407_v17 }
   0x8   :  { %137 = vrot.lane.b32.xlu2 %v136_v13, %s459_s14  ;;  %v402_v16 = vld [vmem:[%s896_s0 + $0xc3] ss:$8 sm:$0xf0]   ;;  %v405_v20 = vld [vmem:[%s896_s0 + $0x47] ss:$8 sm:$0xf0]  }
   0x9   :  { %v147_v21 = vsel %vm92_vm0, %v402_v16, %v401_v15  ;;  %v158_v23 = vsel %vm92_vm0, %v405_v20, %v404_v19  ;;  %v410_v24 = vld [vmem:[%s896_s0 + $0x2] ss:$8 sm:$0xf]   ;;  %v415_v26 = vld [vmem:[%s896_s0 + $0x6] ss:$8 sm:$0xf]  }
   0xa   :  { %v411_v25 = vld [vmem:[%s896_s0 + $0x2] ss:$8 sm:$0xf0]   ;;  %v416_v27 = vld [vmem:[%s896_s0 + $0x6] ss:$8 sm:$0xf0]  }
   0xb   :  { %v412_v28 = vld [vmem:[%s896_s0 + $0x82] ss:$8 sm:$0xf]   ;;  %v180_v30 = vsel %vm92_vm0, %v411_v25, %v410_v24  ;;  %v201_v31 = vsel %vm92_vm0, %v416_v27, %v415_v26  ;;  %v418_v33 = vld [vmem:[%s896_s0 + $0x86] ss:$8 sm:$0xf]  }
   0xc   :  { %126 = vrot.lane.b32.xlu1 %v125_v12, %s459_s14  ;;  %104 = vrot.lane.b32.xlu0 %v103_v14, %s459_s14  ;;  %v413_v29 = vld [vmem:[%s896_s0 + $0x82] ss:$8 sm:$0xf0]   ;;  %v419_v34 = vld [vmem:[%s896_s0 + $0x86] ss:$8 sm:$0xf0]  }
   0xd   :  { %v190_v32 = vsel %vm92_vm0, %v413_v29, %v412_v28  ;;  %v424_v35 = vld [vmem:[%s896_s0 + $0xc2] ss:$8 sm:$0xf]   ;;  %v212_v39 = vsel %vm92_vm0, %v419_v34, %v418_v33  ;;  %v427_v42 = vld [vmem:[%s896_s0 + $0x46] ss:$8 sm:$0xf]  }
   0xe   :  { %v425_v36 = vld [vmem:[%s896_s0 + $0xc2] ss:$8 sm:$0xf0]   ;;  %v428_v43 = vld [vmem:[%s896_s0 + $0x46] ss:$8 sm:$0xf0]  }
   0xf   :  { %v421_v37 = vld [vmem:[%s896_s0 + $0x42] ss:$8 sm:$0xf]   ;;  %v234_v40 = vsel %vm92_vm0, %v425_v36, %v424_v35  ;;  %v433_v44 = vld [vmem:[%s896_s0 + $0x1] ss:$8 sm:$0xf]   ;;  %v245_v48 = vsel %vm92_vm0, %v428_v43, %v427_v42 }
  0x10   :  { %148 = vrot.lane.b32.xlu2 %v147_v21, %s459_s14  ;;  %v422_v38 = vld [vmem:[%s896_s0 + $0x42] ss:$8 sm:$0xf0]   ;;  %v434_v45 = vld [vmem:[%s896_s0 + $0x1] ss:$8 sm:$0xf0]  }
  0x11   :  { %v223_v41 = vsel %vm92_vm0, %v422_v38, %v421_v37  ;;  %v430_v46 = vld [vmem:[%s896_s0 + $0xc6] ss:$8 sm:$0xf]   ;;  %v267_v49 = vsel %vm92_vm0, %v434_v45, %v433_v44  ;;  %s461_s18 = smov 32   ;;  %v2_v8 = vld [vmem:[%s896_s0] ss:$4 sm:$0xff]  }
  0x12   :  { %v431_v47 = vld [vmem:[%s896_s0 + $0xc6] ss:$8 sm:$0xf0]   ;;  %v435_v51 = vld [vmem:[%s896_s0 + $0x81] ss:$8 sm:$0xf]  }
  0x13   :  { %v256_v50 = vsel %vm92_vm0, %v431_v47, %v430_v46  ;;  %v436_v52 = vld [vmem:[%s896_s0 + $0x81] ss:$8 sm:$0xf0]   ;;  %v441_v53 = vld [vmem:[%s896_s0 + $0x85] ss:$8 sm:$0xf]  }
  0x14   :  { %170 = vrot.lane.b32.xlu1 %v169_v22, %s459_s14  ;;  %159 = vrot.lane.b32.xlu0 %v158_v23, %s459_s14  ;;  %v442_v54 = vld [vmem:[%s896_s0 + $0x85] ss:$8 sm:$0xf0]   ;;  %v277_v57 = vsel %vm92_vm0, %v436_v52, %v435_v51  ;;  %v444_v60 = vld [vmem:[%s896_s0 + $0x41] ss:$8 sm:$0xf]  }
  0x15   :  { %v438_v55 = vld [vmem:[%s896_s0 + $0x5] ss:$8 sm:$0xf]   ;;  %v299_v58 = vsel %vm92_vm0, %v442_v54, %v441_v53  ;;  %v445_v61 = vld [vmem:[%s896_s0 + $0x41] ss:$8 sm:$0xf0]  }
  0x16   :  { %v439_v56 = vld [vmem:[%s896_s0 + $0x5] ss:$8 sm:$0xf0]   ;;  %v447_v0 = vld [vmem:[%s896_s0 + $0xc1] ss:$8 sm:$0xf]   ;;  %v310_v2 = vsel %vm92_vm0, %v445_v61, %v444_v60 }
  0x17   :  { %v288_v59 = vsel %vm92_vm0, %v439_v56, %v438_v55  ;;  %v450_v62 = vld [vmem:[%s896_s0 + $0x45] ss:$8 sm:$0xf]   ;;  %v448_v1 = vld [vmem:[%s896_s0 + $0xc1] ss:$8 sm:$0xf0]  }
  0x18   :  { %181 = vrot.lane.b32.xlu2 %v180_v30, %s460_s22  ;;  %v451_v63 = vld [vmem:[%s896_s0 + $0x45] ss:$8 sm:$0xf0]   ;;  %v321_v4 = vsel %vm92_vm0, %v448_v1, %v447_v0  ;;  %4 = vst.msk [vmem:[%s897_s1] ss:$8 sm:$0x3] %vm3_vm1, %v2_v8  }
  0x19   :  { %v332_v3 = vsel %vm92_vm0, %v451_v63, %v450_v62  ;;  %v453_v5 = vld [vmem:[%s896_s0 + $0xc5] ss:$8 sm:$0xf]   ;;  %349 = vst.msk [vmem:[%s897_s1 - $0xf] ss:$8 sm:$0xc] %vm3_vm1, %v2_v8  }
  0x1a   :  { %v454_v6 = vld [vmem:[%s896_s0 + $0xc5] ss:$8 sm:$0xf0]   ;;  %v352_v9 = vld [vmem:[%s896_s0 + $0x20] ss:$4 sm:$0xff]   ;;  %vm270_vm4 = vcmask 523520  }
  0x1b   :  { %v343_v7 = vsel %vm92_vm0, %v454_v6, %v453_v5  ;;  %350 = vst.msk [vmem:[%s897_s1 - $0x1e] ss:$8 sm:$0x30] %vm3_vm1, %v2_v8   ;;  %v367_v10 = vld [vmem:[%s896_s0 + $0x80] ss:$4 sm:$0xff]  }
  0x1c   :  { %202 = vrot.lane.b32.xlu1 %v201_v31, %s460_s22  ;;  %191 = vrot.lane.b32.xlu0 %v190_v32, %s460_s22  ;;  %351 = vst.msk [vmem:[%s897_s1 - $0x2d] ss:$8 sm:$0xc0] %vm3_vm1, %v2_v8   ;;  %v372_v11 = vld [vmem:[%s896_s0 + $0xa0] ss:$4 sm:$0xff]  }
  0x1d   :  { %353 = vst.msk [vmem:[%s897_s1 + $0x4] ss:$8 sm:$0x3] %vm3_vm1, %v352_v9   ;;  %v357_v13 = vld [vmem:[%s896_s0 + $0x40] ss:$4 sm:$0xff]  }
  0x1e   :  { %354 = vst.msk [vmem:[%s897_s1 - $0xb] ss:$8 sm:$0xc] %vm3_vm1, %v352_v9   ;;  %v362_v14 = vld [vmem:[%s896_s0 + $0x60] ss:$4 sm:$0xff]  }
  0x1f   :  { %355 = vst.msk [vmem:[%s897_s1 - $0x1a] ss:$8 sm:$0x30] %vm3_vm1, %v352_v9   ;;  %v377_v16 = vld [vmem:[%s896_s0 + $0xc0] ss:$4 sm:$0xff]  }
  0x20   :  { %213 = vrot.lane.b32.xlu2 %v212_v39, %s460_s22  ;;  %356 = vst.msk [vmem:[%s897_s1 - $0x29] ss:$8 sm:$0xc0] %vm3_vm1, %v352_v9   ;;  %v382_v17 = vld [vmem:[%s896_s0 + $0xe0] ss:$4 sm:$0xff]  }
  0x21   :  { %368 = vst.msk [vmem:[%s897_s1 + $0x20] ss:$8 sm:$0x3] %vm3_vm1, %v367_v10  }
  0x22   :  { %369 = vst.msk [vmem:[%s897_s1 + $0x11] ss:$8 sm:$0xc] %vm3_vm1, %v367_v10  }
  0x23   :  { %370 = vst.msk [vmem:[%s897_s1 + $0x2] ss:$8 sm:$0x30] %vm3_vm1, %v367_v10  }
  0x24   :  { %235 = vrot.lane.b32.xlu1 %v234_v40, %s460_s22  ;;  %224 = vrot.lane.b32.xlu0 %v223_v41, %s460_s22  ;;  %371 = vst.msk [vmem:[%s897_s1 - $0xd] ss:$8 sm:$0xc0] %vm3_vm1, %v367_v10  }
  0x25   :  { %373 = vst.msk [vmem:[%s897_s1 + $0x24] ss:$8 sm:$0x3] %vm3_vm1, %v372_v11  }
  0x26   :  { %374 = vst.msk [vmem:[%s897_s1 + $0x15] ss:$8 sm:$0xc] %vm3_vm1, %v372_v11  }
  0x27   :  { %375 = vst.msk [vmem:[%s897_s1 + $0x6] ss:$8 sm:$0x30] %vm3_vm1, %v372_v11  }
  0x28   :  { %246 = vrot.lane.b32.xlu2 %v245_v48, %s460_s22  ;;  %376 = vst.msk [vmem:[%s897_s1 - $0x9] ss:$8 sm:$0xc0] %vm3_vm1, %v372_v11  }
  0x29   :  { %358 = vst.msk [vmem:[%s897_s1 + $0x10] ss:$8 sm:$0x3] %vm3_vm1, %v357_v13  }
  0x2a   :  { %359 = vst.msk [vmem:[%s897_s1 + $0x1] ss:$8 sm:$0xc] %vm3_vm1, %v357_v13  }
  0x2b   :  { %360 = vst.msk [vmem:[%s897_s1 - $0xe] ss:$8 sm:$0x30] %vm3_vm1, %v357_v13  }
  0x2c   :  { %268 = vrot.lane.b32.xlu1 %v267_v49, %s461_s18  ;;  %257 = vrot.lane.b32.xlu0 %v256_v50, %s460_s22  ;;  %361 = vst.msk [vmem:[%s897_s1 - $0x1d] ss:$8 sm:$0xc0] %vm3_vm1, %v357_v13  }
  0x2d   :  { %363 = vst.msk [vmem:[%s897_s1 + $0x14] ss:$8 sm:$0x3] %vm3_vm1, %v362_v14  }
  0x2e   :  { %364 = vst.msk [vmem:[%s897_s1 + $0x5] ss:$8 sm:$0xc] %vm3_vm1, %v362_v14  }
  0x2f   :  { %365 = vst.msk [vmem:[%s897_s1 - $0xa] ss:$8 sm:$0x30] %vm3_vm1, %v362_v14  }
  0x30   :  { %278 = vrot.lane.b32.xlu2 %v277_v57, %s461_s18  ;;  %366 = vst.msk [vmem:[%s897_s1 - $0x19] ss:$8 sm:$0xc0] %vm3_vm1, %v362_v14  }
  0x31   :  { %378 = vst.msk [vmem:[%s897_s1 + $0x30] ss:$8 sm:$0x3] %vm3_vm1, %v377_v16  }
  0x32   :  { %379 = vst.msk [vmem:[%s897_s1 + $0x21] ss:$8 sm:$0xc] %vm3_vm1, %v377_v16  }
  0x33   :  { %380 = vst.msk [vmem:[%s897_s1 + $0x12] ss:$8 sm:$0x30] %vm3_vm1, %v377_v16  }
  0x34   :  { %300 = vrot.lane.b32.xlu1 %v299_v58, %s461_s18  ;;  %289 = vrot.lane.b32.xlu0 %v288_v59, %s461_s18  ;;  %381 = vst.msk [vmem:[%s897_s1 + $0x3] ss:$8 sm:$0xc0] %vm3_vm1, %v377_v16  }
  0x35   :  { %383 = vst.msk [vmem:[%s897_s1 + $0x34] ss:$8 sm:$0x3] %vm3_vm1, %v382_v17  }
  0x36   :  { %384 = vst.msk [vmem:[%s897_s1 + $0x25] ss:$8 sm:$0xc] %vm3_vm1, %v382_v17  }
  0x37   :  { %385 = vst.msk [vmem:[%s897_s1 + $0x16] ss:$8 sm:$0x30] %vm3_vm1, %v382_v17  }
  0x38   :  { %311 = vrot.lane.b32.xlu2 %v310_v2, %s461_s18  ;;  %386 = vst.msk [vmem:[%s897_s1 + $0x7] ss:$8 sm:$0xc0] %vm3_vm1, %v382_v17  }
  0x3c   :  { %333 = vrot.lane.b32.xlu1 %v332_v3, %s461_s18  ;;  %322 = vrot.lane.b32.xlu0 %v321_v4, %s461_s18 }
  0x40   :  { %344 = vrot.lane.b32.xlu2 %v343_v7, %s461_s18 }
  0x62   :  { %v138_v12 = vpop.permute.xlu2 %137  }
  0x63   :  { %400 = vst.msk [vmem:[%s897_s1 + $0x10] sm:$0xff] %vm96_vm2, %v138_v12  }
  0x6a   :  { %v149_v15 = vpop.permute.xlu2 %148  }
  0x6b   :  { %403 = vst.msk [vmem:[%s897_s1 + $0x30] sm:$0xff] %vm96_vm2, %v149_v15  }
  0x72   :  { %v182_v18 = vpop.permute.xlu2 %181  }
  0x76   :  { %v116_v19 = vpop.permute.xlu1 %115   ;;  %v95_v20 = vpop.permute.xlu0 %94  }
  0x77   :  { %394 = vst.msk [vmem:[%s897_s1 + $0x8] sm:$0xff] %vm96_vm2, %v116_v19  }
  0x78   :  { %97 = vst.msk [vmem:[%s897_s1] sm:$0xff] %vm96_vm2, %v95_v20  }
  0x79   :  { %184 = vst.msk [vmem:[%s897_s1] sm:$0xff] %vm183_vm3, %v182_v18  }
  0x7a   :  { %v214_v21 = vpop.permute.xlu2 %213  }
  0x7e   :  { %v127_v22 = vpop.permute.xlu1 %126   ;;  %v105_v23 = vpop.permute.xlu0 %104  }
  0x7f   :  { %397 = vst.msk [vmem:[%s897_s1 + $0x28] sm:$0xff] %vm96_vm2, %v127_v22  }
  0x80   :  { %420 = vst.msk [vmem:[%s897_s1 + $0x28] sm:$0xff] %vm183_vm3, %v214_v21  }
  0x81   :  { %391 = vst.msk [vmem:[%s897_s1 + $0x20] sm:$0xff] %vm96_vm2, %v105_v23  }
  0x82   :  { %v247_v24 = vpop.permute.xlu2 %246  }
  0x86   :  { %v171_v25 = vpop.permute.xlu1 %170   ;;  %v160_v26 = vpop.permute.xlu0 %159  }
  0x87   :  { %409 = vst.msk [vmem:[%s897_s1 + $0x38] sm:$0xff] %vm96_vm2, %v171_v25  }
  0x88   :  { %406 = vst.msk [vmem:[%s897_s1 + $0x18] sm:$0xff] %vm96_vm2, %v160_v26  }
  0x89   :  { %429 = vst.msk [vmem:[%s897_s1 + $0x18] sm:$0xff] %vm183_vm3, %v247_v24  }
  0x8a   :  { %v279_v27 = vpop.permute.xlu2 %278  }
  0x8e   :  { %v203_v28 = vpop.permute.xlu1 %202   ;;  %v192_v29 = vpop.permute.xlu0 %191  }
  0x8f   :  { %417 = vst.msk [vmem:[%s897_s1 + $0x8] sm:$0xff] %vm183_vm3, %v203_v28  }
  0x90   :  { %414 = vst.msk [vmem:[%s897_s1 + $0x20] sm:$0xff] %vm183_vm3, %v192_v29  }
  0x91   :  { %437 = vst.msk [vmem:[%s897_s1 + $0x20] sm:$0xff] %vm270_vm4, %v279_v27  }
  0x92   :  { %v312_v30 = vpop.permute.xlu2 %311  }
  0x96   :  { %v236_v31 = vpop.permute.xlu1 %235   ;;  %v225_v32 = vpop.permute.xlu0 %224  }
  0x97   :  { %426 = vst.msk [vmem:[%s897_s1 + $0x30] sm:$0xff] %vm183_vm3, %v236_v31  }
  0x98   :  { %423 = vst.msk [vmem:[%s897_s1 + $0x10] sm:$0xff] %vm183_vm3, %v225_v32  }
  0x99   :  { %446 = vst.msk [vmem:[%s897_s1 + $0x10] sm:$0xff] %vm270_vm4, %v312_v30  }
  0x9a   :  { %v345_v33 = vpop.permute.xlu2 %344  }
  0x9e   :  { %v269_v34 = vpop.permute.xlu1 %268   ;;  %v258_v35 = vpop.permute.xlu0 %257  }
  0x9f   :  { %271 = vst.msk [vmem:[%s897_s1] sm:$0xff] %vm270_vm4, %v269_v34  }
  0xa0   :  { %432 = vst.msk [vmem:[%s897_s1 + $0x38] sm:$0xff] %vm183_vm3, %v258_v35  }
  0xa1   :  { %455 = vst.msk [vmem:[%s897_s1 + $0x38] sm:$0xff] %vm270_vm4, %v345_v33  }
  0xa6   :  { %v301_v36 = vpop.permute.xlu1 %300   ;;  %v290_v37 = vpop.permute.xlu0 %289  }
  0xa7   :  { %443 = vst.msk [vmem:[%s897_s1 + $0x28] sm:$0xff] %vm270_vm4, %v301_v36  }
  0xa8   :  { %440 = vst.msk [vmem:[%s897_s1 + $0x8] sm:$0xff] %vm270_vm4, %v290_v37  }
  0xae   :  { %v334_v38 = vpop.permute.xlu1 %333   ;;  %v323_v39 = vpop.permute.xlu0 %322  }
  0xaf   :  { %452 = vst.msk [vmem:[%s897_s1 + $0x18] sm:$0xff] %vm270_vm4, %v334_v38  }
  0xb0   :  { %449 = vst.msk [vmem:[%s897_s1 + $0x30] sm:$0xff] %vm270_vm4, %v323_v39  }

// kernel: attention_roi_forward.1
= control target key start
LH: loop header
LB: loop body
LE: loop exit
PB: predicated region body
PF: predicated region fallthrough
CT: control target
= control target key end

     0   :  { %s15518_s0 = inlined_call_operand.vmem [shape: f32[16,256], index: 0, kind: input, shape index: {}]   ;;  %s15519_s1 = inlined_call_operand.vmem [shape: f32[2,32], index: 1, kind: input, shape index: {}]   ;;  %s15520_s2 = inlined_call_operand.vmem [shape: f32[2,32,32], index: 2, kind: input, shape index: {}]   ;;  %s15521_s3 = inlined_call_operand.vmem [shape: f32[32,256], index: 3, kind: input, shape index: {}]   ;;  %s15522_s4 = inlined_call_operand.vmem [shape: bf16[2,256,256], index: 4, kind: input, shape index: {}]   ;;  %s15523_s5 = inlined_call_operand.vmem [shape: bf16[4,5,256,256], index: 5, kind: input, shape index: {}]   ;;  %s15524_s6 = inlined_call_operand.vmem [shape: f32[9,256], index: 6, kind: input, shape index: {}]   ;;  %s15525_s7 = inlined_call_operand.vmem [shape: f32[16,256], index: 7, kind: output, shape index: {0}]   ;;  %s15526_s8 = inlined_call_operand.hbm [shape: f32[2,32], index: 8, kind: output, shape index: {1}]  }
   0x1   :  { %v33_v0 = vld [vmem:[%s15520_s2 + $0x18] sm:$0xff]  ;;  %v32_v1 = vld [vmem:[%s15520_s2 + $0x10] sm:$0xff]  ;;  %v31_v3 = vld [vmem:[%s15520_s2 + $0x8] sm:$0xff] }
   0x2   :  { %51 = vmatpush.msra.mxu0 %v33_v0  ;;  %v6506_v2 = vld [vmem:[%s15520_s2 + $0x38] sm:$0xff] }
   0x3   :  { %81 = vmatpush.msra.mxu1 %v6506_v2 }
   0x4   :  { %14 = vsyncpa [#allocation4], 0  ;;  %52 = vmatpush.msra.mxu0 %v32_v1  ;;  %v30_v4 = vld [vmem:[%s15520_s2] sm:$0xff]  ;;  %vm35_vm0 = vcmask 261120   ;;  %v6505_v6 = vld [vmem:[%s15520_s2 + $0x30] sm:$0xff]  ;;  %vm714_vm8 = vcmask 1040384  }
   0x5   :  { %v29_v5 = vld [vmem:[%s15519_s1] sm:$0x3]  ;;  %82 = vmatpush.msra.mxu1 %v6505_v6  ;;  %v6504_v7 = vld [vmem:[%s15520_s2 + $0x28] sm:$0xff]  ;;  %v6570_v9 = vld [vmem:[%s15522_s4 + $0x70] sm:$0xf]  ;;  %vm716_vm9 = vcmask 1041409  }
   0x6   :  { %53 = vmatpush.msra.mxu0 %v31_v3  ;;  %v6503_v8 = vld [vmem:[%s15520_s2 + $0x20] sm:$0xff]  ;;  %v9988_v10 = vld [vmem:[%s15522_s4 + $0x74] sm:$0xf0]  ;;  %v6634_v11 = vld [vmem:[%s15522_s4 + $0xf0] sm:$0xf]  ;;  %vm186_vm11 = vcmask 254976  }
   0x7   :  { %83 = vmatpush.msra.mxu1 %v6504_v7  ;;  %v6571_v12 = vor.u32 %v9988_v10, %v6570_v9  ;;  %v10004_v13 = vld [vmem:[%s15522_s4 + $0xf4] sm:$0xf0]  ;;  %v6562_v14 = vld [vmem:[%s15522_s4 + $0x60] sm:$0xf]  ;;  %v9986_v15 = vld [vmem:[%s15522_s4 + $0x64] sm:$0xf0] }
   0x8   :  { %54 = vmatpush.msra.mxu0 %v30_v4  ;;  %v6635_v16 = vor.u32 %v10004_v13, %v6634_v11  ;;  %v96_v17 = vld [vmem:[%s15521_s3 + $0x30] sm:$0xff]  ;;  %v97_v18 = vld [vmem:[%s15521_s3 + $0x38] sm:$0xff]  ;;  %v6626_v19 = vld [vmem:[%s15522_s4 + $0xe0] sm:$0xf]  ;;  %v6563_v20 = vor.u32 %v9986_v15, %v6562_v14  ;;  %vm813_vm12 = vcmask 1046528   ;;  %vm1313_vm13 = vcmask 1045504  }
   0x9   :  { %6502 = vmatmul.msk.f32.vlgmr.msra.gmra.mxu0 %vm35_vm0, %v29_v5  ;;  %84 = vmatpush.msra.mxu1 %v6503_v8  ;;  %v10002_v21 = vld [vmem:[%s15522_s4 + $0xe4] sm:$0xf0]  ;;  %v94_v22 = vld [vmem:[%s15521_s3 + $0x20] sm:$0xff]  ;;  %v6554_v25 = vld [vmem:[%s15522_s4 + $0x50] sm:$0xf]  ;;  %vm1601_vm14 = vcmask 1044480  }
   0xa   :  { %393 = vmatpush.bf16.msrb.mxu0 %v6571_v12  ;;  %120 = vmatpush.msra.mxu2 %v96_v17  ;;  %v95_v23 = vld [vmem:[%s15521_s3 + $0x28] sm:$0xff]  ;;  %v6627_v24 = vor.u32 %v10002_v21, %v6626_v19  ;;  %v9984_v26 = vld [vmem:[%s15522_s4 + $0x54] sm:$0xf0]  ;;  %v92_v27 = vld [vmem:[%s15521_s3 + $0x10] sm:$0xff]  ;;  %vm1889_vm15 = vcmask 1043456   ;;  %s6491_s11 = sshll.u32 %s15526_s8, 4  ;;  %s6492_s11 = int_to_ptr.hbm [resolvable:$true] %s6491_s11 }
   0xb   :  { %407 = vmatpush.bf16.msrb.mxu1 %v6635_v16  ;;  %140 = vmatpush.msra.mxu3 %v97_v18  ;;  %v93_v28 = vld [vmem:[%s15521_s3 + $0x18] sm:$0xff]  ;;  %v6618_v29 = vld [vmem:[%s15522_s4 + $0xd0] sm:$0xf]  ;;  %v90_v31 = vld [vmem:[%s15521_s3] sm:$0xff]  ;;  %v6555_v33 = vor.u32 %v9984_v26, %v6554_v25  ;;  %s10714_s12 = smov [#allocation3]  }
   0xc   :  { %121 = vmatpush.msra.mxu2 %v94_v22  ;;  %v10000_v30 = vld [vmem:[%s15522_s4 + $0xd4] sm:$0xf0]  ;;  %v91_v32 = vld [vmem:[%s15521_s3 + $0x8] sm:$0xff]  ;;  %v6546_v34 = vld [vmem:[%s15522_s4 + $0x40] sm:$0xf] }
   0xd   :  { %141 = vmatpush.msra.mxu3 %v95_v23  ;;  %v9987_v35 = vld [vmem:[%s15522_s4 + $0x74] sm:$0xf]  ;;  %v6572_v36 = vld [vmem:[%s15522_s4 + $0x78] sm:$0xf0]  ;;  %v6619_v37 = vor.u32 %v10000_v30, %v6618_v29  ;;  %v9982_v38 = vld [vmem:[%s15522_s4 + $0x44] sm:$0xf0] }
   0xe   :  { %394 = vmatpush.bf16.msrb.mxu0 %v6563_v20  ;;  %122 = vmatpush.msra.mxu2 %v92_v27  ;;  %v6575_v39 = vor.u32 %v9987_v35, %v6572_v36  ;;  %v10003_v40 = vld [vmem:[%s15522_s4 + $0xf4] sm:$0xf]  ;;  %v6636_v41 = vld [vmem:[%s15522_s4 + $0xf8] sm:$0xf0]  ;;  %v6610_v43 = vld [vmem:[%s15522_s4 + $0xc0] sm:$0xf]  ;;  %v6547_v48 = vor.u32 %v9982_v38, %v6546_v34 }
   0xf   :  { %408 = vmatpush.bf16.msrb.mxu1 %v6627_v24  ;;  %142 = vmatpush.msra.mxu3 %v93_v28  ;;  %v6639_v42 = vor.u32 %v10003_v40, %v6636_v41  ;;  %v9998_v44 = vld [vmem:[%s15522_s4 + $0xc4] sm:$0xf0]  ;;  %v9985_v45 = vld [vmem:[%s15522_s4 + $0x64] sm:$0xf]  ;;  %v6564_v46 = vld [vmem:[%s15522_s4 + $0x68] sm:$0xf0] }
  0x10   :  { %123 = vmatpush.msra.mxu2 %v90_v31  ;;  %v10001_v47 = vld [vmem:[%s15522_s4 + $0xe4] sm:$0xf]  ;;  %v6538_v49 = vld [vmem:[%s15522_s4 + $0x30] sm:$0xf]  ;;  %v9980_v50 = vld [vmem:[%s15522_s4 + $0x34] sm:$0xf0]  ;;  %v6567_v51 = vor.u32 %v9985_v45, %v6564_v46  ;;  %v6611_v53 = vor.u32 %v9998_v44, %v6610_v43 }
  0x11   :  { %143 = vmatpush.msra.mxu3 %v91_v32  ;;  %v6628_v52 = vld [vmem:[%s15522_s4 + $0xe8] sm:$0xf0]  ;;  %v6602_v55 = vld [vmem:[%s15522_s4 + $0xb0] sm:$0xf]  ;;  %v9996_v56 = vld [vmem:[%s15522_s4 + $0xb4] sm:$0xf0]  ;;  %v6539_v62 = vor.u32 %v9980_v50, %v6538_v49 }
  0x12   :  { %421 = vmatpush.bf16.msrb.mxu2 %v6575_v39  ;;  %395 = vmatpush.bf16.msrb.mxu0 %v6555_v33  ;;  %v6631_v54 = vor.u32 %v10001_v47, %v6628_v52  ;;  %v9983_v57 = vld [vmem:[%s15522_s4 + $0x54] sm:$0xf]  ;;  %v6556_v58 = vld [vmem:[%s15522_s4 + $0x58] sm:$0xf0]  ;;  %v6530_v63 = vld [vmem:[%s15522_s4 + $0x20] sm:$0xf]  ;;  %v6603_v3 = vor.u32 %v9996_v56, %v6602_v55 }
  0x13   :  { %435 = vmatpush.bf16.msrb.mxu3 %v6639_v42  ;;  %409 = vmatpush.bf16.msrb.mxu1 %v6619_v37  ;;  %v9999_v59 = vld [vmem:[%s15522_s4 + $0xd4] sm:$0xf]  ;;  %v6620_v60 = vld [vmem:[%s15522_s4 + $0xd8] sm:$0xf0]  ;;  %v6559_v61 = vor.u32 %v9983_v57, %v6556_v58  ;;  %v9981_v1 = vld [vmem:[%s15522_s4 + $0x44] sm:$0xf] }
  0x14   :  { %v6623_v0 = vor.u32 %v9999_v59, %v6620_v60  ;;  %v6548_v2 = vld [vmem:[%s15522_s4 + $0x48] sm:$0xf0]  ;;  %v9978_v4 = vld [vmem:[%s15522_s4 + $0x24] sm:$0xf0]  ;;  %v9997_v5 = vld [vmem:[%s15522_s4 + $0xc4] sm:$0xf] }
  0x15   :  { %v6612_v6 = vld [vmem:[%s15522_s4 + $0xc8] sm:$0xf0]  ;;  %v6594_v7 = vld [vmem:[%s15522_s4 + $0xa0] sm:$0xf]  ;;  %v9994_v8 = vld [vmem:[%s15522_s4 + $0xa4] sm:$0xf0]  ;;  %v6551_v9 = vor.u32 %v9981_v1, %v6548_v2  ;;  %v6531_v10 = vor.u32 %v9978_v4, %v6530_v63 }
  0x16   :  { %422 = vmatpush.bf16.msrb.mxu2 %v6567_v51  ;;  %396 = vmatpush.bf16.msrb.mxu0 %v6547_v48  ;;  %v6522_v11 = vld [vmem:[%s15522_s4 + $0x10] sm:$0xf]  ;;  %v6615_v12 = vor.u32 %v9997_v5, %v6612_v6  ;;  %v9979_v13 = vld [vmem:[%s15522_s4 + $0x34] sm:$0xf]  ;;  %v6540_v14 = vld [vmem:[%s15522_s4 + $0x38] sm:$0xf0]  ;;  %v6595_v15 = vor.u32 %v9994_v8, %v6594_v7 }
  0x17   :  { %436 = vmatpush.bf16.msrb.mxu3 %v6631_v54  ;;  %410 = vmatpush.bf16.msrb.mxu1 %v6611_v53  ;;  %v9976_v16 = vld [vmem:[%s15522_s4 + $0x14] sm:$0xf0]  ;;  %v9995_v17 = vld [vmem:[%s15522_s4 + $0xb4] sm:$0xf]  ;;  %v6604_v18 = vld [vmem:[%s15522_s4 + $0xb8] sm:$0xf0]  ;;  %v6543_v21 = vor.u32 %v9979_v13, %v6540_v14 }
  0x18   :  { %v6586_v19 = vld [vmem:[%s15522_s4 + $0x90] sm:$0xf]  ;;  %v9992_v20 = vld [vmem:[%s15522_s4 + $0x94] sm:$0xf0]  ;;  %v6523_v22 = vor.u32 %v9976_v16, %v6522_v11  ;;  %v6607_v23 = vor.u32 %v9995_v17, %v6604_v18  ;;  %v6514_v25 = vld [vmem:[%s15522_s4] sm:$0xf] }
  0x19   :  { %v6587_v24 = vor.u32 %v9992_v20, %v6586_v19  ;;  %v9974_v26 = vld [vmem:[%s15522_s4 + $0x4] sm:$0xf0]  ;;  %v34_v27 = vld [vmem:[%s15524_s6] ss:$0 sm:$0xff]  ;;  %v190_v36 = vld [vmem:[%s15518_s0 + $0x10] sm:$0xff] }
  0x1a   :  { %423 = vmatpush.bf16.msrb.mxu2 %v6559_v61  ;;  %397 = vmatpush.bf16.msrb.mxu0 %v6539_v62  ;;  %v6515_v29 = vor.u32 %v9974_v26, %v6514_v25  ;;  %v6578_v32 = vld [vmem:[%s15522_s4 + $0x80] sm:$0xf]  ;;  %v9990_v33 = vld [vmem:[%s15522_s4 + $0x84] sm:$0xf0]  ;;  %v9977_v38 = vld [vmem:[%s15522_s4 + $0x24] sm:$0xf] }
  0x1b   :  { %437 = vmatpush.bf16.msrb.mxu3 %v6623_v0  ;;  %411 = vmatpush.bf16.msrb.mxu1 %v6603_v3  ;;  %v6579_v34 = vor.u32 %v9990_v33, %v6578_v32  ;;  %v188_v35 = vld [vmem:[%s15518_s0] sm:$0xff]  ;;  %v6532_v39 = vld [vmem:[%s15522_s4 + $0x28] sm:$0xf0]  ;;  %v191_v44 = vld [vmem:[%s15518_s0 + $0x18] sm:$0xff] }
  0x1c   :  { %v10978_v37 = vpack.c.bf16 %v190_v36, %v188_v35  ;;  %v9993_v40 = vld [vmem:[%s15522_s4 + $0xa4] sm:$0xf]  ;;  %v6535_v41 = vor.u32 %v9977_v38, %v6532_v39  ;;  %v6596_v42 = vld [vmem:[%s15522_s4 + $0xa8] sm:$0xf0]  ;;  %v9975_v47 = vld [vmem:[%s15522_s4 + $0x14] sm:$0xf] }
  0x1d   :  { %v189_v43 = vld [vmem:[%s15518_s0 + $0x8] sm:$0xff]  ;;  %v6599_v45 = vor.u32 %v9993_v40, %v6596_v42  ;;  %v6524_v48 = vld [vmem:[%s15522_s4 + $0x18] sm:$0xf0]  ;;  %v9991_v49 = vld [vmem:[%s15522_s4 + $0x94] sm:$0xf] }
  0x1e   :  { %424 = vmatpush.bf16.msrb.mxu2 %v6551_v9  ;;  %398 = vmatpush.bf16.msrb.mxu0 %v6531_v10  ;;  %v193_v46 = vpack.c.bf16 %v191_v44, %v189_v43  ;;  %v6527_v50 = vor.u32 %v9975_v47, %v6524_v48  ;;  %v6588_v51 = vld [vmem:[%s15522_s4 + $0x98] sm:$0xf0]  ;;  %v9973_v53 = vld [vmem:[%s15522_s4 + $0x4] sm:$0xf]  ;;  %v6516_v54 = vld [vmem:[%s15522_s4 + $0x8] sm:$0xf0] }
  0x1f   :  { %438 = vmatpush.bf16.msrb.mxu3 %v6615_v12  ;;  %412 = vmatpush.bf16.msrb.mxu1 %v6595_v15  ;;  %v6591_v52 = vor.u32 %v9991_v49, %v6588_v51  ;;  %v9989_v55 = vld [vmem:[%s15522_s4 + $0x84] sm:$0xf]  ;;  %v6519_v56 = vor.u32 %v9973_v53, %v6516_v54  ;;  %v6580_v57 = vld [vmem:[%s15522_s4 + $0x88] sm:$0xf0]  ;;  %v6731_v59 = vld [vmem:[%s15522_s4 + $0x170] sm:$0xf] }
  0x20   :  { %v6583_v58 = vor.u32 %v9989_v55, %v6580_v57  ;;  %v10020_v60 = vld [vmem:[%s15522_s4 + $0x174] sm:$0xf0]  ;;  %v6723_v62 = vld [vmem:[%s15522_s4 + $0x160] sm:$0xf]  ;;  %v10018_v63 = vld [vmem:[%s15522_s4 + $0x164] sm:$0xf0] }
  0x21   :  { %v6732_v61 = vor.u32 %v10020_v60, %v6731_v59  ;;  %v6724_v0 = vor.u32 %v10018_v63, %v6723_v62  ;;  %v6715_v1 = vld [vmem:[%s15522_s4 + $0x150] sm:$0xf]  ;;  %v10016_v2 = vld [vmem:[%s15522_s4 + $0x154] sm:$0xf0]  ;;  %v6707_v4 = vld [vmem:[%s15522_s4 + $0x140] sm:$0xf] }
  0x22   :  { %425 = vmatpush.bf16.msrb.mxu2 %v6543_v21  ;;  %399 = vmatpush.bf16.msrb.mxu0 %v6523_v22  ;;  %v6716_v3 = vor.u32 %v10016_v2, %v6715_v1  ;;  %v10014_v5 = vld [vmem:[%s15522_s4 + $0x144] sm:$0xf0]  ;;  %v65_v7 = vld [vmem:[%s15524_s6 + $0x1] ss:$0 sm:$0xff]  ;;  %v10019_v8 = vld [vmem:[%s15522_s4 + $0x174] sm:$0xf] }
  0x23   :  { %439 = vmatpush.bf16.msrb.mxu3 %v6607_v23  ;;  %413 = vmatpush.bf16.msrb.mxu1 %v6587_v24  ;;  %v6708_v6 = vor.u32 %v10014_v5, %v6707_v4  ;;  %v6733_v9 = vld [vmem:[%s15522_s4 + $0x178] sm:$0xf0]  ;;  %v10017_v14 = vld [vmem:[%s15522_s4 + $0x164] sm:$0xf]  ;;  %v6725_v15 = vld [vmem:[%s15522_s4 + $0x168] sm:$0xf0] }
  0x24   :  { %v6736_v12 = vor.u32 %v10019_v8, %v6733_v9  ;;  %v6728_v16 = vor.u32 %v10017_v14, %v6725_v15  ;;  %v10015_v17 = vld [vmem:[%s15522_s4 + $0x154] sm:$0xf]  ;;  %v6717_v18 = vld [vmem:[%s15522_s4 + $0x158] sm:$0xf0]  ;;  %v10013_v20 = vld [vmem:[%s15522_s4 + $0x144] sm:$0xf] }
  0x25   :  { %v6720_v19 = vor.u32 %v10015_v17, %v6717_v18  ;;  %v6709_v21 = vld [vmem:[%s15522_s4 + $0x148] sm:$0xf0]  ;;  %v6699_v23 = vld [vmem:[%s15522_s4 + $0x130] sm:$0xf]  ;;  %v10012_v24 = vld [vmem:[%s15522_s4 + $0x134] sm:$0xf0] }
  0x26   :  { %400 = vmatpush.bf16.msrb.mxu0 %v6515_v29  ;;  %426 = vmatpush.bf16.msrb.mxu2 %v6535_v41  ;;  %v6712_v22 = vor.u32 %v10013_v20, %v6709_v21  ;;  %v10011_v25 = vld [vmem:[%s15522_s4 + $0x134] sm:$0xf]  ;;  %v6700_v26 = vor.u32 %v10012_v24, %v6699_v23  ;;  %v10036_v29 = vld [vmem:[%s15522_s4 + $0x1f4] sm:$0xf0]  ;;  %v6797_v33 = vld [vmem:[%s15522_s4 + $0x1f8] sm:$0xf0] }
  0x27   :  { %414 = vmatpush.bf16.msrb.mxu1 %v6579_v34  ;;  %440 = vmatpush.bf16.msrb.mxu3 %v6599_v45  ;;  %v10035_v32 = vld [vmem:[%s15522_s4 + $0x1f4] sm:$0xf]  ;;  %v6691_v34 = vld [vmem:[%s15522_s4 + $0x120] sm:$0xf]  ;;  %v10010_v36 = vld [vmem:[%s15522_s4 + $0x124] sm:$0xf0] }
  0x28   :  { %v6800_v35 = vor.u32 %v10035_v32, %v6797_v33  ;;  %v6693_v38 = vld [vmem:[%s15522_s4 + $0x128] sm:$0xf0]  ;;  %v6692_v39 = vor.u32 %v10010_v36, %v6691_v34  ;;  %v6787_v41 = vld [vmem:[%s15522_s4 + $0x1e0] sm:$0xf]  ;;  %v10034_v42 = vld [vmem:[%s15522_s4 + $0x1e4] sm:$0xf0] }
  0x29   :  { %401 = vmatmul.bf16.vlgmr.msrb.gmra.mxu0 %v10978_v37  ;;  %v10033_v43 = vld [vmem:[%s15522_s4 + $0x1e4] sm:$0xf]  ;;  %v6788_v44 = vor.u32 %v10034_v42, %v6787_v41  ;;  %v6789_v45 = vld [vmem:[%s15522_s4 + $0x1e8] sm:$0xf0]  ;;  %v6683_v54 = vld [vmem:[%s15522_s4 + $0x110] sm:$0xf] }
  0x2a   :  { %427 = vmatpush.bf16.msrb.mxu2 %v6527_v50  ;;  %655 = vmatpush.bf16.msra.mxu0 %v6732_v61  ;;  %v11128_v47 = vld [vmem:[%s15524_s6 + $0x3] ss:$8 sm:$0x3]  ;;  %v10008_v55 = vld [vmem:[%s15522_s4 + $0x114] sm:$0xf0] }
  0x2b   :  { %441 = vmatpush.bf16.msrb.mxu3 %v6591_v52  ;;  %v229_v48 = vperm.slane %v11128_v47, 0  ;;  %v6685_v59 = vld [vmem:[%s15522_s4 + $0x118] sm:$0xf0]  ;;  %v6779_v61 = vld [vmem:[%s15522_s4 + $0x1d0] sm:$0xf] }
  0x2c   :  { %v10032_v62 = vld [vmem:[%s15522_s4 + $0x1d4] sm:$0xf0]  ;;  %v10031_v63 = vld [vmem:[%s15522_s4 + $0x1d4] sm:$0xf]  ;;  %v10005_v8 = vld [vmem:[%s15522_s4 + $0x104] sm:$0xf] }
  0x2d   :  { %v6780_v2 = vor.u32 %v10032_v62, %v6779_v61  ;;  %v10030_v14 = vld [vmem:[%s15522_s4 + $0x1c4] sm:$0xf0]  ;;  %v6773_v17 = vld [vmem:[%s15522_s4 + $0x1c8] sm:$0xf0]  ;;  %v6763_v20 = vld [vmem:[%s15522_s4 + $0x1b0] sm:$0xf] }
  0x2e   :  { %428 = vmatpush.bf16.msrb.mxu2 %v6519_v56  ;;  %656 = vmatpush.bf16.msra.mxu0 %v6724_v0  ;;  %v10007_v56 = vld [vmem:[%s15522_s4 + $0x114] sm:$0xf]  ;;  %v10028_v21 = vld [vmem:[%s15522_s4 + $0x1b4] sm:$0xf0]  ;;  %v6765_v24 = vld [vmem:[%s15522_s4 + $0x1b8] sm:$0xf0] }
  0x2f   :  { %442 = vmatpush.bf16.msrb.mxu3 %v6583_v58  ;;  %v6684_v58 = vor.u32 %v10008_v55, %v6683_v54  ;;  %v6688_v60 = vor.u32 %v10007_v56, %v6685_v59  ;;  %v10027_v23 = vld [vmem:[%s15522_s4 + $0x1b4] sm:$0xf]  ;;  %v6747_v32 = vld [vmem:[%s15522_s4 + $0x190] sm:$0xf]  ;;  %v10024_v33 = vld [vmem:[%s15522_s4 + $0x194] sm:$0xf0] }
  0x30   :  { %v10023_v34 = vld [vmem:[%s15522_s4 + $0x194] sm:$0xf]  ;;  %v6749_v36 = vld [vmem:[%s15522_s4 + $0x198] sm:$0xf0]  ;;  %v6741_v42 = vld [vmem:[%s15522_s4 + $0x188] sm:$0xf0] }
  0x31   :  { %v10082_v54 = vld [vmem:[%s15523_s5 + $0x164] sm:$0xf0]  ;;  %v10081_v56 = vld [vmem:[%s15523_s5 + $0x164] sm:$0xf]  ;;  %v10099_v61 = vld [vmem:[%s15523_s5 + $0x1f4] sm:$0xf] }
  0x32   :  { %657 = vmatpush.bf16.msra.mxu0 %v6716_v3  ;;  %v6781_v3 = vld [vmem:[%s15522_s4 + $0x1d8] sm:$0xf0] }
  0x33   :  { %v6784_v5 = vor.u32 %v10031_v63, %v6781_v3  ;;  %v6957_v62 = vld [vmem:[%s15523_s5 + $0x1f8] sm:$0xf0]  ;;  %v10080_v3 = vld [vmem:[%s15523_s5 + $0x154] sm:$0xf0] }
  0x36   :  { %658 = vmatpush.bf16.msra.mxu0 %v6708_v6  ;;  %v6675_v6 = vld [vmem:[%s15522_s4 + $0x100] sm:$0xf] }
  0x3a   :  { %659 = vmatpush.bf16.msra.mxu0 %v6700_v26  ;;  %v6755_v26 = vld [vmem:[%s15522_s4 + $0x1a0] sm:$0xf] }
  0x3e   :  { %660 = vmatpush.bf16.msra.mxu0 %v6692_v39  ;;  %v10022_v39 = vld [vmem:[%s15522_s4 + $0x184] sm:$0xf0] }
  0x42   :  { %661 = vmatpush.bf16.msra.mxu0 %v6684_v58  ;;  %v6955_v58 = vld [vmem:[%s15523_s5 + $0x1f0] sm:$0xf] }
  0x86   :  { %v56_v28 = vpop.f32.mrf.mxu0 }
  0x87   :  { %v57_v30 = vadd.f32 %v56_v28, %v34_v27  ;;  %v6701_v27 = vld [vmem:[%s15522_s4 + $0x138] sm:$0xf0]  ;;  %v6795_v28 = vld [vmem:[%s15522_s4 + $0x1f0] sm:$0xf] }
  0x89   :  { %v59_v31 = vmax.f32 %v57_v30, 0.0  ;;  %v6704_v30 = vor.u32 %v10011_v25, %v6701_v27  ;;  %v6768_v25 = vor.u32 %v10027_v23, %v6765_v24  ;;  %v10026_v27 = vld [vmem:[%s15522_s4 + $0x1a4] sm:$0xf0]  ;;  %v230_v24 = vperm.slane %v11128_v47, 1 }
  0x8b   :  { %6507 = vmatmul.msk.f32.vlgmr.msra.gmra.mxu1 %vm35_vm0, %v59_v31  ;;  %v6796_v31 = vor.u32 %v10036_v29, %v6795_v28  ;;  %v10025_v28 = vld [vmem:[%s15522_s4 + $0x1a4] sm:$0xf]  ;;  %v6756_v29 = vor.u32 %v10026_v27, %v6755_v26 }
  0x8d   :  { %669 = vmatpush.bf16.msra.mxu1 %v6796_v31 }
  0x91   :  { %670 = vmatpush.bf16.msra.mxu1 %v6788_v44 }
  0x93   :  { %415 = vmatmul.bf16.vlgmr.msrb.gmra.mxu1 %v193_v46 }
  0x95   :  { %671 = vmatpush.bf16.msra.mxu1 %v6780_v2  ;;  %v6875_v2 = vld [vmem:[%s15523_s5 + $0x150] sm:$0xf] }
  0xa6   :  { %v402_v49 = vpop.f32.mrf.mxu0 }
  0xa7   :  { %v403_v51 = vadd.f32 %v402_v49, %v229_v48  ;;  %v10084_v49 = vld [vmem:[%s15523_s5 + $0x174] sm:$0xf0] }
  0xae   :  { %v404_v53 = vpop.f32.mrf.mxu0 }
  0xaf   :  { %v405_v57 = vadd.f32 %v404_v53, %v229_v48  ;;  %v6891_v48 = vld [vmem:[%s15523_s5 + $0x170] sm:$0xf]  ;;  %v6883_v53 = vld [vmem:[%s15523_s5 + $0x160] sm:$0xf] }
  0xb0   :  { %v6884_v59 = vor.u32 %v10082_v54, %v6883_v53 }
 0x108   :  { %v86_v10 = vpop.f32.mrf.mxu1 }
 0x109   :  { %v87_v11 = vadd.f32 %v86_v10, %v65_v7  ;;  %v10006_v7 = vld [vmem:[%s15522_s4 + $0x104] sm:$0xf0]  ;;  %v6677_v10 = vld [vmem:[%s15522_s4 + $0x108] sm:$0xf0] }
 0x10a   :  { %v6676_v9 = vor.u32 %v10006_v7, %v6675_v6  ;;  %v6947_v6 = vld [vmem:[%s15523_s5 + $0x1e0] sm:$0xf]  ;;  %v10098_v7 = vld [vmem:[%s15523_s5 + $0x1e4] sm:$0xf0] }
 0x10b   :  { %v89_v13 = vmax.f32 %v87_v11, 0.0 }
 0x10c   :  { %662 = vmatpush.bf16.msra.mxu0 %v6676_v9 }
 0x10d   :  { %6509 = vmatmul.msk.f32.vlgmr.msra.gmra.mxu2 %vm35_vm0, %v89_v13  ;;  %6510 = vmatmul.msk.f32.vlgmr.msra.gmra.mxu3 %vm35_vm0, %v89_v13  ;;  %v6771_v13 = vld [vmem:[%s15522_s4 + $0x1c0] sm:$0xf] }
 0x10e   :  { %683 = vmatpush.bf16.msra.mxu2 %v6736_v12  ;;  %697 = vmatpush.bf16.msra.mxu3 %v6800_v35  ;;  %v6680_v12 = vor.u32 %v10005_v8, %v6677_v10  ;;  %v6772_v15 = vor.u32 %v10030_v14, %v6771_v13  ;;  %v6748_v35 = vor.u32 %v10024_v33, %v6747_v32 }
 0x10f   :  { %v6948_v10 = vor.u32 %v10098_v7, %v6947_v6  ;;  %v10095_v7 = vld [vmem:[%s15523_s5 + $0x1d4] sm:$0xf] }
 0x110   :  { %v416_v50 = vpop.f32.mrf.mxu1  ;;  %672 = vmatpush.bf16.msra.mxu1 %v6772_v15  ;;  %v6876_v15 = vor.u32 %v10080_v3, %v6875_v2  ;;  %v6869_v2 = vld [vmem:[%s15523_s5 + $0x148] sm:$0xf0]  ;;  %v6939_v3 = vld [vmem:[%s15523_s5 + $0x1d0] sm:$0xf] }
 0x111   :  { %v417_v52 = vadd.f32 %v416_v50, %v403_v51  ;;  %v10083_v50 = vld [vmem:[%s15523_s5 + $0x174] sm:$0xf]  ;;  %v6892_v51 = vor.u32 %v10084_v49, %v6891_v48 }
 0x112   :  { %684 = vmatpush.bf16.msra.mxu2 %v6728_v16  ;;  %v10029_v16 = vld [vmem:[%s15522_s4 + $0x1c4] sm:$0xf] }
 0x113   :  { %v449_v0 = vmax.f32 %v417_v52, 0.0  ;;  %v6893_v52 = vld [vmem:[%s15523_s5 + $0x178] sm:$0xf0]  ;;  %1025 = vmatpush.bf16.msrb.mxu0 %v6892_v51 }
 0x114   :  { %v6896_v55 = vor.u32 %v10083_v50, %v6893_v52  ;;  %v6837_v50 = vld [vmem:[%s15523_s5 + $0x108] sm:$0xf0] }
 0x115   :  { %429 = vmatmul.bf16.vlgmr.msrb.gmra.mxu2 %v10978_v37  ;;  %443 = vmatmul.bf16.vlgmr.msrb.gmra.mxu3 %v193_v46  ;;  %v10009_v37 = vld [vmem:[%s15522_s4 + $0x124] sm:$0xf]  ;;  %v6792_v46 = vor.u32 %v10033_v43, %v6789_v45  ;;  %v6508_v43 = vld [vmem:[%s15524_s6 + $0x2] ss:$8 sm:$0x3] }
 0x116   :  { %685 = vmatpush.bf16.msra.mxu2 %v6720_v19  ;;  %v6696_v40 = vor.u32 %v10009_v37, %v6693_v38  ;;  %v6776_v19 = vor.u32 %v10029_v16, %v6773_v17  ;;  %v6752_v37 = vor.u32 %v10023_v34, %v6749_v36  ;;  %v6739_v38 = vld [vmem:[%s15522_s4 + $0x180] sm:$0xf]  ;;  %v101_v45 = vperm.slane %v6508_v43, 0 }
 0x117   :  { %698 = vmatpush.bf16.msra.mxu3 %v6792_v46  ;;  %v6740_v41 = vor.u32 %v10022_v39, %v6739_v38  ;;  %v102_v46 = vperm.slane %v6508_v43, 1  ;;  %1026 = vmatpush.bf16.msrb.mxu0 %v6884_v59 }
 0x118   :  { %v418_v1 = vpop.f32.mrf.mxu1 }
 0x119   :  { %v419_v4 = vadd.f32 %v418_v1, %v405_v57  ;;  %v6885_v57 = vld [vmem:[%s15523_s5 + $0x168] sm:$0xf0]  ;;  %v6960_v1 = vor.u32 %v10099_v61, %v6957_v62  ;;  %v6867_v62 = vld [vmem:[%s15523_s5 + $0x140] sm:$0xf] }
 0x11a   :  { %686 = vmatpush.bf16.msra.mxu2 %v6712_v22  ;;  %v6764_v22 = vor.u32 %v10028_v21, %v6763_v20  ;;  %v6888_v63 = vor.u32 %v10081_v56, %v6885_v57 }
 0x11b   :  { %v451_v11 = vmax.f32 %v419_v4, 0.0  ;;  %699 = vmatpush.bf16.msra.mxu3 %v6784_v5  ;;  %v10079_v4 = vld [vmem:[%s15523_s5 + $0x154] sm:$0xf]  ;;  %v6877_v5 = vld [vmem:[%s15523_s5 + $0x158] sm:$0xf0]  ;;  %1027 = vmatpush.bf16.msrb.mxu0 %v6876_v15 }
 0x11c   :  { %673 = vmatpush.bf16.msra.mxu1 %v6764_v22  ;;  %v6880_v17 = vor.u32 %v10079_v4, %v6877_v5  ;;  %v10096_v4 = vld [vmem:[%s15523_s5 + $0x1d4] sm:$0xf0] }
 0x11d   :  { %v453_v18 = vpack.c.bf16 %v451_v11, %v449_v0  ;;  %v10097_v11 = vld [vmem:[%s15523_s5 + $0x1e4] sm:$0xf]  ;;  %v6940_v6 = vor.u32 %v10096_v4, %v6939_v3  ;;  %v10050_v3 = vld [vmem:[%s15523_s5 + $0x64] sm:$0xf0] }
 0x11e   :  { %687 = vmatpush.bf16.msra.mxu2 %v6704_v30  ;;  %v6757_v30 = vld [vmem:[%s15522_s4 + $0x1a8] sm:$0xf0]  ;;  %v10049_v4 = vld [vmem:[%s15523_s5 + $0x64] sm:$0xf] }
 0x11f   :  { %700 = vmatpush.bf16.msra.mxu3 %v6776_v19  ;;  %663 = vmatmul.bf16.vlgmr.msra.gmra.mxu0 %v453_v18  ;;  %v6760_v31 = vor.u32 %v10025_v28, %v6757_v30 }
 0x120   :  { %674 = vmatpush.bf16.msra.mxu1 %v6756_v29 }
 0x122   :  { %688 = vmatpush.bf16.msra.mxu2 %v6696_v40  ;;  %v10021_v40 = vld [vmem:[%s15522_s4 + $0x184] sm:$0xf]  ;;  %s6489_s4 = sshll.u32 %s10714_s12, 4  ;;  %s6490_s4 = int_to_ptr.vmem [resolvable:$true] %s6489_s4 }
 0x123   :  { %701 = vmatpush.bf16.msra.mxu3 %v6768_v25  ;;  %v6744_v44 = vor.u32 %v10021_v40, %v6741_v42 }
 0x124   :  { %675 = vmatpush.bf16.msra.mxu1 %v6748_v35 }
 0x126   :  { %689 = vmatpush.bf16.msra.mxu2 %v6688_v60  ;;  %v10100_v60 = vld [vmem:[%s15523_s5 + $0x1f4] sm:$0xf0] }
 0x127   :  { %702 = vmatpush.bf16.msra.mxu3 %v6760_v31  ;;  %v6956_v0 = vor.u32 %v10100_v60, %v6955_v58 }
 0x128   :  { %676 = vmatpush.bf16.msra.mxu1 %v6740_v41 }
 0x12a   :  { %690 = vmatpush.bf16.msra.mxu2 %v6680_v12  ;;  %v6949_v12 = vld [vmem:[%s15523_s5 + $0x1e8] sm:$0xf0] }
 0x12b   :  { %703 = vmatpush.bf16.msra.mxu3 %v6752_v37  ;;  %v6952_v16 = vor.u32 %v10097_v11, %v6949_v12  ;;  %v10076_v11 = vld [vmem:[%s15523_s5 + $0x134] sm:$0xf0]  ;;  %v10075_v12 = vld [vmem:[%s15523_s5 + $0x134] sm:$0xf] }
 0x12c   :  { %1039 = vmatpush.bf16.msrb.mxu1 %v6956_v0  ;;  %v10077_v0 = vld [vmem:[%s15523_s5 + $0x144] sm:$0xf] }
 0x12d   :  { %691 = vmatmul.bf16.vlgmr.msra.gmra.mxu2 %v453_v18  ;;  %v6872_v5 = vor.u32 %v10077_v0, %v6869_v2  ;;  %v6909_v0 = vld [vmem:[%s15523_s5 + $0x198] sm:$0xf0]  ;;  %v7011_v2 = vld [vmem:[%s15523_s5 + $0x60] sm:$0xf] }
 0x12e   :  { %1053 = vmatpush.bf16.msrb.mxu2 %v6896_v55 }
 0x12f   :  { %704 = vmatpush.bf16.msra.mxu3 %v6744_v44 }
 0x130   :  { %1040 = vmatpush.bf16.msrb.mxu1 %v6948_v10 }
 0x132   :  { %1054 = vmatpush.bf16.msrb.mxu2 %v6888_v63  ;;  %v10078_v63 = vld [vmem:[%s15523_s5 + $0x144] sm:$0xf0] }
 0x133   :  { %1067 = vmatpush.bf16.msrb.mxu3 %v6960_v1  ;;  %v6868_v1 = vor.u32 %v10078_v63, %v6867_v62  ;;  %v10087_v62 = vld [vmem:[%s15523_s5 + $0x194] sm:$0xf] }
 0x134   :  { %1041 = vmatpush.bf16.msrb.mxu1 %v6940_v6  ;;  %v7013_v6 = vld [vmem:[%s15523_s5 + $0x68] sm:$0xf0] }
 0x135   :  { %1028 = vmatpush.bf16.msrb.mxu0 %v6868_v1  ;;  %v6912_v1 = vor.u32 %v10087_v62, %v6909_v0 }
 0x136   :  { %1055 = vmatpush.bf16.msrb.mxu2 %v6880_v17  ;;  %v10094_v17 = vld [vmem:[%s15523_s5 + $0x1c4] sm:$0xf0] }
 0x137   :  { %1068 = vmatpush.bf16.msrb.mxu3 %v6952_v16  ;;  %v6931_v16 = vld [vmem:[%s15523_s5 + $0x1c0] sm:$0xf] }
 0x13a   :  { %1056 = vmatpush.bf16.msrb.mxu2 %v6872_v5  ;;  %v7012_v5 = vor.u32 %v10050_v3, %v7011_v2  ;;  %v10060_v2 = vld [vmem:[%s15523_s5 + $0xb4] sm:$0xf0]  ;;  %v10059_v3 = vld [vmem:[%s15523_s5 + $0xb4] sm:$0xf] }
 0x190   :  { %v125_v8 = vpop.f32.mrf.mxu2  ;;  %v145_v9 = vpop.f32.mrf.mxu3 }
 0x191   :  { %v126_v13 = vadd.f32 %v125_v8, %v101_v45  ;;  %v146_v14 = vadd.f32 %v145_v9, %v102_v46  ;;  %v6941_v8 = vld [vmem:[%s15523_s5 + $0x1d8] sm:$0xf0]  ;;  %v6859_v9 = vld [vmem:[%s15523_s5 + $0x130] sm:$0xf] }
 0x192   :  { %v6944_v10 = vor.u32 %v10095_v7, %v6941_v8  ;;  %v6899_v7 = vld [vmem:[%s15523_s5 + $0x180] sm:$0xf]  ;;  %v10086_v8 = vld [vmem:[%s15523_s5 + $0x184] sm:$0xf0] }
 0x193   :  { %v148_v18 = vsub.f32 0.0, %v126_v13  ;;  %v149_v19 = vsub.f32 0.0, %v146_v14  ;;  %v6861_v13 = vld [vmem:[%s15523_s5 + $0x138] sm:$0xf0]  ;;  %v6860_v14 = vor.u32 %v10076_v11, %v6859_v9  ;;  %v7016_v9 = vor.u32 %v10049_v4, %v7013_v6  ;;  %v10085_v11 = vld [vmem:[%s15523_s5 + $0x184] sm:$0xf] }
 0x194   :  { %v6864_v15 = vor.u32 %v10075_v12, %v6861_v13  ;;  %1069 = vmatpush.bf16.msrb.mxu3 %v6944_v10  ;;  %v6900_v10 = vor.u32 %v10086_v8, %v6899_v7  ;;  %v6901_v12 = vld [vmem:[%s15523_s5 + $0x188] sm:$0xf0]  ;;  %v7083_v13 = vld [vmem:[%s15523_s5 + $0xf0] sm:$0xf] }
 0x195   :  { %v150_v20 = vmul.f32 1.442695, %v148_v18  ;;  %v152_v21 = vmul.f32 1.442695, %v149_v19  ;;  %1029 = vmatpush.bf16.msrb.mxu0 %v6860_v14  ;;  %v10093_v18 = vld [vmem:[%s15523_s5 + $0x1c4] sm:$0xf]  ;;  %v6932_v19 = vor.u32 %v10094_v17, %v6931_v16  ;;  %v6904_v14 = vor.u32 %v10085_v11, %v6901_v12 }
 0x196   :  { %1057 = vmatpush.bf16.msrb.mxu2 %v6864_v15  ;;  %v10068_v15 = vld [vmem:[%s15523_s5 + $0xf4] sm:$0xf0]  ;;  %v10067_v16 = vld [vmem:[%s15523_s5 + $0xf4] sm:$0xf]  ;;  %v7085_v17 = vld [vmem:[%s15523_s5 + $0xf8] sm:$0xf0] }
 0x197   :  { %10679 = vpow2.f32 %v150_v20  ;;  %v6933_v20 = vld [vmem:[%s15523_s5 + $0x1c8] sm:$0xf0]  ;;  %1042 = vmatpush.bf16.msrb.mxu1 %v6932_v19  ;;  %v7088_v19 = vor.u32 %v10067_v16, %v7085_v17  ;;  %v6971_v8 = vld [vmem:[%s15523_s5 + $0x10] sm:$0xf]  ;;  %v6973_v12 = vld [vmem:[%s15523_s5 + $0x18] sm:$0xf0] }
 0x198   :  { %10681 = vpow2.f32 %v152_v21  ;;  %v430_v22 = vpop.f32.mrf.mxu2  ;;  %v444_v23 = vpop.f32.mrf.mxu3  ;;  %v6851_v21 = vld [vmem:[%s15523_s5 + $0x120] sm:$0xf]  ;;  %v11574_v6 = vld [vmem:[%s15524_s6 + $0x4] ss:$8 sm:$0x3] }
 0x199   :  { %v431_v26 = vadd.f32 %v430_v22, %v230_v24  ;;  %v10074_v22 = vld [vmem:[%s15523_s5 + $0x124] sm:$0xf0]  ;;  %v10057_v17 = vld [vmem:[%s15523_s5 + $0xa4] sm:$0xf] }
 0x19b   :  { %v445_v31 = vadd.f32 %v444_v23, %v431_v26  ;;  %v6936_v23 = vor.u32 %v10093_v18, %v6933_v20  ;;  %v6853_v26 = vld [vmem:[%s15523_s5 + $0x128] sm:$0xf0]  ;;  %v7084_v18 = vor.u32 %v10068_v15, %v7083_v13  ;;  %v7003_v20 = vld [vmem:[%s15523_s5 + $0x50] sm:$0xf]  ;;  %v7043_v13 = vld [vmem:[%s15523_s5 + $0xa0] sm:$0xf] }
 0x19d   :  { %v10680_v25 = vpop.eup %10679  ;;  %v450_v35 = vmax.f32 %v445_v31, 0.0  ;;  %v6925_v31 = vld [vmem:[%s15523_s5 + $0x1b8] sm:$0xf0]  ;;  %1070 = vmatpush.bf16.msrb.mxu3 %v6936_v23 }
 0x19e   :  { %v10682_v27 = vpop.eup %10681  ;;  %v154_v28 = vadd.f32 1.0, %v10680_v25  ;;  %v10073_v25 = vld [vmem:[%s15523_s5 + $0x124] sm:$0xf] }
 0x19f   :  { %v155_v29 = vadd.f32 1.0, %v10682_v27  ;;  %v6923_v27 = vld [vmem:[%s15523_s5 + $0x1b0] sm:$0xf] }
 0x1a0   :  { %10683 = vrcp.f32 %v154_v28  ;;  %v432_v30 = vpop.f32.mrf.mxu2  ;;  %v446_v33 = vpop.f32.mrf.mxu3  ;;  %vm161_vm3 = vweird.f32 %v154_v28  ;;  %v167_v49 = vand.u32 2147483648, %v154_v28  ;;  %v165_v51 = vand.u32 2147483647, %v154_v28 }
 0x1a1   :  { %10685 = vrcp.f32 %v155_v29  ;;  %v433_v32 = vadd.f32 %v432_v30, %v230_v24  ;;  %v182_v44 = vand.u32 2147483648, %v155_v29  ;;  %v180_v46 = vand.u32 2147483647, %v155_v29  ;;  %v10091_v30 = vld [vmem:[%s15523_s5 + $0x1b4] sm:$0xf] }
 0x1a2   :  { %vm176_vm5 = vweird.f32 %v155_v29  ;;  %v168_v56 = vor.u32 1.1754944e-38, %v167_v49  ;;  %vm166_vm10 = vcmp.eq.f32.partialorder %v165_v51, 8.507059e+37  ;;  %v6852_v24 = vor.u32 %v10074_v22, %v6851_v21  ;;  %v10069_v49 = vld [vmem:[%s15523_s5 + $0x104] sm:$0xf]  ;;  %v7019_v51 = vld [vmem:[%s15523_s5 + $0x70] sm:$0xf] }
 0x1a3   :  { %v447_v34 = vadd.f32 %v446_v33, %v433_v32  ;;  %v183_v53 = vor.u32 1.1754944e-38, %v182_v44  ;;  %vm181_vm7 = vcmp.eq.f32.partialorder %v180_v46, 8.507059e+37  ;;  %v6928_v33 = vor.u32 %v10091_v30, %v6925_v31  ;;  %v6835_v44 = vld [vmem:[%s15523_s5 + $0x100] sm:$0xf]  ;;  %v10048_v21 = vld [vmem:[%s15523_s5 + $0x54] sm:$0xf0] }
 0x1a4   :  { %1030 = vmatpush.bf16.msrb.mxu0 %v6852_v24  ;;  %v10047_v22 = vld [vmem:[%s15523_s5 + $0x54] sm:$0xf]  ;;  %v7004_v23 = vor.u32 %v10048_v21, %v7003_v20  ;;  %v7005_v24 = vld [vmem:[%s15523_s5 + $0x58] sm:$0xf0]  ;;  %v7077_v30 = vld [vmem:[%s15523_s5 + $0xe8] sm:$0xf0] }
 0x1a5   :  { %v452_v36 = vmax.f32 %v447_v34, 0.0  ;;  %v6843_v34 = vld [vmem:[%s15523_s5 + $0x110] sm:$0xf]  ;;  %1071 = vmatpush.bf16.msrb.mxu3 %v6928_v33  ;;  %v10046_v33 = vld [vmem:[%s15523_s5 + $0x44] sm:$0xf0] }
 0x1a6   :  { %v10684_v37 = vpop.eup %10683  ;;  %v10038_v21 = vld [vmem:[%s15523_s5 + $0x4] sm:$0xf0] }
 0x1a7   :  { %v10686_v38 = vpop.eup %10685  ;;  %v157_v39 = vmul.f32 %v10684_v37, %v154_v28  ;;  %v454_v40 = vpack.c.bf16 %v452_v36, %v450_v35  ;;  %vm162_vm1 = vweird.f32 %v10684_v37  ;;  %v6856_v28 = vor.u32 %v10073_v25, %v6853_v26  ;;  %v10072_v35 = vld [vmem:[%s15523_s5 + $0x114] sm:$0xf0]  ;;  %v10071_v36 = vld [vmem:[%s15523_s5 + $0x114] sm:$0xf]  ;;  %v7075_v26 = vld [vmem:[%s15523_s5 + $0xe0] sm:$0xf] }
 0x1a8   :  { %v172_v41 = vmul.f32 %v10686_v38, %v155_v29  ;;  %vm177_vm2 = vweird.f32 %v10686_v38  ;;  %vm11291_vm4 = vmor %vm161_vm3, %vm162_vm1  ;;  %v10092_v29 = vld [vmem:[%s15523_s5 + $0x1b4] sm:$0xf0]  ;;  %v7008_v25 = vor.u32 %v10047_v22, %v7005_v24  ;;  %v10037_v22 = vld [vmem:[%s15523_s5 + $0x4] sm:$0xf]  ;;  %v664_v24 = vpop.f32.mrf.mxu0 }
 0x1a9   :  { %v158_v47 = vsub.f32 1.0, %v157_v39  ;;  %677 = vmatmul.bf16.vlgmr.msra.gmra.mxu1 %v454_v40  ;;  %705 = vmatmul.bf16.vlgmr.msra.gmra.mxu3 %v454_v40  ;;  %vm178_vm6 = vmor %vm176_vm5, %vm177_vm2  ;;  %v6924_v32 = vor.u32 %v10092_v29, %v6923_v27  ;;  %v6915_v40 = vld [vmem:[%s15523_s5 + $0x1a0] sm:$0xf]  ;;  %v10066_v27 = vld [vmem:[%s15523_s5 + $0xe4] sm:$0xf0] }
 0x1aa   :  { %v173_v42 = vsub.f32 1.0, %v172_v41  ;;  %1058 = vmatpush.bf16.msrb.mxu2 %v6856_v28  ;;  %v10090_v41 = vld [vmem:[%s15523_s5 + $0x1a4] sm:$0xf0]  ;;  %v10065_v28 = vld [vmem:[%s15523_s5 + $0xe4] sm:$0xf]  ;;  %v7076_v29 = vor.u32 %v10066_v27, %v7075_v26  ;;  %v491_v27 = vperm.slane %v11574_v6, 0 }
 0x1ab   :  { %v159_v43 = vmul.f32 %v10684_v37, %v158_v47  ;;  %1043 = vmatpush.bf16.msrb.mxu1 %v6924_v32  ;;  %v10089_v47 = vld [vmem:[%s15523_s5 + $0x1a4] sm:$0xf]  ;;  %v7080_v31 = vor.u32 %v10065_v28, %v7077_v30  ;;  %v6995_v32 = vld [vmem:[%s15523_s5 + $0x40] sm:$0xf]  ;;  %v7035_v28 = vld [vmem:[%s15523_s5 + $0x90] sm:$0xf] }
 0x1ac   :  { %v174_v45 = vmul.f32 %v10686_v38, %v173_v42  ;;  %v6916_v42 = vor.u32 %v10090_v41, %v6915_v40  ;;  %v10064_v40 = vld [vmem:[%s15523_s5 + $0xd4] sm:$0xf0]  ;;  %v10063_v41 = vld [vmem:[%s15523_s5 + $0xd4] sm:$0xf] }
 0x1ad   :  { %v160_v48 = vadd.f32 %v10684_v37, %v159_v43  ;;  %v6917_v43 = vld [vmem:[%s15523_s5 + $0x1a8] sm:$0xf0]  ;;  %v10055_v30 = vld [vmem:[%s15523_s5 + $0x94] sm:$0xf] }
 0x1ae   :  { %v175_v52 = vadd.f32 %v10686_v38, %v174_v45  ;;  %v10070_v45 = vld [vmem:[%s15523_s5 + $0x104] sm:$0xf0]  ;;  %v6920_v46 = vor.u32 %v10089_v47, %v6917_v43 }
 0x1af   :  { %v164_v54 = vsel %vm11291_vm4, %v10684_v37, %v160_v48  ;;  %v6844_v37 = vor.u32 %v10072_v35, %v6843_v34  ;;  %v6836_v48 = vor.u32 %v10070_v45, %v6835_v44  ;;  %1044 = vmatpush.bf16.msrb.mxu1 %v6916_v42  ;;  %v10045_v34 = vld [vmem:[%s15523_s5 + $0x44] sm:$0xf]  ;;  %v6996_v35 = vor.u32 %v10046_v33, %v6995_v32  ;;  %v7069_v42 = vld [vmem:[%s15523_s5 + $0xd8] sm:$0xf0]  ;;  %v6987_v44 = vld [vmem:[%s15523_s5 + $0x30] sm:$0xf] }
 0x1b0   :  { %v179_v55 = vsel %vm178_vm6, %v10686_v38, %v175_v52  ;;  %v169_v59 = vsel %vm166_vm10, %v168_v56, %v164_v54  ;;  %v6845_v38 = vld [vmem:[%s15523_s5 + $0x118] sm:$0xf0]  ;;  %v6840_v52 = vor.u32 %v10069_v49, %v6837_v50  ;;  %v10051_v54 = vld [vmem:[%s15523_s5 + $0x74] sm:$0xf]  ;;  %1072 = vmatpush.bf16.msrb.mxu3 %v6920_v46  ;;  %v7072_v43 = vor.u32 %v10063_v41, %v7069_v42  ;;  %v10044_v45 = vld [vmem:[%s15523_s5 + $0x34] sm:$0xf0] }
 0x1b1   :  { %v184_v57 = vsel %vm181_vm7, %v183_v53, %v179_v55  ;;  %v6848_v39 = vor.u32 %v10071_v36, %v6845_v38  ;;  %187 = vst.msk [vmem:[#allocation3] sm:$0x3] %vm186_vm11, %v169_v59  ;;  %1031 = vmatpush.bf16.msrb.mxu0 %v6844_v37  ;;  %v10052_v53 = vld [vmem:[%s15523_s5 + $0x74] sm:$0xf0]  ;;  %v7021_v55 = vld [vmem:[%s15523_s5 + $0x78] sm:$0xf0] }
 0x1b2   :  { %v713_v58 = vrot.slane %v184_v57, 7  ;;  %v7020_v56 = vor.u32 %v10052_v53, %v7019_v51  ;;  %v7024_v57 = vor.u32 %v10051_v54, %v7021_v55  ;;  %v6997_v36 = vld [vmem:[%s15523_s5 + $0x48] sm:$0xf0]  ;;  %v10713_v37 = vmov 0.0   ;;  %v10043_v46 = vld [vmem:[%s15523_s5 + $0x34] sm:$0xf] }
 0x1b3   :  { %1059 = vmatpush.bf16.msrb.mxu2 %v6848_v39  ;;  %731 = vst [vmem:[#allocation2 + $0x30] sm:$0x3] %v10713_v37  ;;  %v7000_v38 = vor.u32 %v10045_v34, %v6997_v36  ;;  %v7067_v39 = vld [vmem:[%s15523_s5 + $0xd0] sm:$0xf]  ;;  %v6989_v49 = vld [vmem:[%s15523_s5 + $0x38] sm:$0xf0]  ;;  %v665_v34 = vadd.f32 %v664_v24, %v491_v27 }
 0x1b4   :  { %v11297_v60 = vsel %vm714_vm8, %v169_v59, %v713_v58  ;;  %v11299_v61 = vsel %vm716_vm9, %v169_v59, %v713_v58  ;;  %v6907_v58 = vld [vmem:[%s15523_s5 + $0x190] sm:$0xf]  ;;  %v10088_v59 = vld [vmem:[%s15523_s5 + $0x194] sm:$0xf0]  ;;  %1073 = vmatpush.bf16.msrb.mxu3 %v6912_v1  ;;  %v7068_v47 = vor.u32 %v10064_v40, %v7067_v39  ;;  %733 = vst [vmem:[#allocation2 + $0x28] sm:$0x3] %v10713_v37 }
 0x1b5   :  { %1032 = vmatpush.bf16.msrb.mxu0 %v6836_v48  ;;  %v6908_v63 = vor.u32 %v10088_v59, %v6907_v58  ;;  %v6988_v48 = vor.u32 %v10044_v45, %v6987_v44  ;;  %732 = vst [vmem:[#allocation2] sm:$0x3] %v10713_v37  ;;  %v6992_v50 = vor.u32 %v10043_v46, %v6989_v49  ;;  %v7059_v51 = vld [vmem:[%s15523_s5 + $0xc0] sm:$0xf]  ;;  %v10061_v53 = vld [vmem:[%s15523_s5 + $0xc4] sm:$0xf]  ;;  %v666_v46 = vpop.f32.mrf.mxu0 }
 0x1b6   :  { %v7061_v55 = vld [vmem:[%s15523_s5 + $0xc8] sm:$0xf0]  ;;  %734 = vst [vmem:[#allocation2 + $0x20] sm:$0x3] %v10713_v37  ;;  %v10042_v58 = vld [vmem:[%s15523_s5 + $0x24] sm:$0xf0] }
 0x1b7   :  { %1060 = vmatpush.bf16.msrb.mxu2 %v6840_v52  ;;  %1045 = vmatpush.bf16.msrb.mxu1 %v6908_v63  ;;  %v10062_v52 = vld [vmem:[%s15523_s5 + $0xc4] sm:$0xf0]  ;;  %v10041_v59 = vld [vmem:[%s15523_s5 + $0x24] sm:$0xf]  ;;  %v6981_v63 = vld [vmem:[%s15523_s5 + $0x28] sm:$0xf0] }
 0x1b8   :  { %1074 = vmatpush.bf16.msrb.mxu3 %v6904_v14  ;;  %v7060_v54 = vor.u32 %v10062_v52, %v7059_v51  ;;  %735 = vst [vmem:[#allocation2 + $0x8] sm:$0xc] %v10713_v37  ;;  %v6984_v0 = vor.u32 %v10041_v59, %v6981_v63  ;;  %v7051_v1 = vld [vmem:[%s15523_s5 + $0xb0] sm:$0xf]  ;;  %v10058_v14 = vld [vmem:[%s15523_s5 + $0xa4] sm:$0xf0]  ;;  %v667_v52 = vadd.f32 %v666_v46, %v491_v27 }
 0x1b9   :  { %1241 = vmatpush.bf16.msra.mxu0 %v7020_v56  ;;  %v7064_v56 = vor.u32 %v10061_v53, %v7061_v55  ;;  %v7052_v4 = vor.u32 %v10060_v2, %v7051_v1  ;;  %736 = vst [vmem:[#allocation2 + $0x10] sm:$0xc] %v10713_v37  ;;  %v7044_v16 = vor.u32 %v10058_v14, %v7043_v13  ;;  %v10053_v39 = vld [vmem:[%s15523_s5 + $0x84] sm:$0xf]  ;;  %v492_v40 = vperm.slane %v11574_v6, 1 }
 0x1ba   :  { %737 = vst [vmem:[#allocation2 + $0x18] sm:$0xc] %v10713_v37  ;;  %v10114_v24 = vld [vmem:[%s15523_s5 + $0x264] sm:$0xf0]  ;;  %v7173_v27 = vld [vmem:[%s15523_s5 + $0x268] sm:$0xf0] }
 0x1bb   :  { %1269 = vmatpush.bf16.msra.mxu2 %v7024_v57  ;;  %1046 = vmatpush.bf16.msrb.mxu1 %v6900_v10  ;;  %v6979_v57 = vld [vmem:[%s15523_s5 + $0x20] sm:$0xf]  ;;  %v10039_v10 = vld [vmem:[%s15523_s5 + $0x14] sm:$0xf]  ;;  %738 = vst [vmem:[#allocation2 + $0x38] sm:$0xc] %v10713_v37 }
 0x1bc   :  { %1283 = vmatpush.bf16.msra.mxu3 %v7088_v19  ;;  %v6980_v62 = vor.u32 %v10042_v58, %v6979_v57  ;;  %v6976_v15 = vor.u32 %v10039_v10, %v6973_v12  ;;  %v6963_v19 = vld [vmem:[%s15523_s5] sm:$0xf]  ;;  %6494 = dma.vmem_to_hbm [thread:$0]  %s6490_s4, 32, %s6492_s11, [#allocation4]  }
 0x1bd   :  { %1242 = vmatpush.bf16.msra.mxu0 %v7012_v5  ;;  %v7053_v5 = vld [vmem:[%s15523_s5 + $0xb8] sm:$0xf0]  ;;  %v7027_v37 = vld [vmem:[%s15523_s5 + $0x80] sm:$0xf] }
 0x1be   :  { %v7056_v7 = vor.u32 %v10059_v3, %v7053_v5 }
 0x1bf   :  { %1270 = vmatpush.bf16.msra.mxu2 %v7016_v9  ;;  %1255 = vmatpush.bf16.msra.mxu1 %v7084_v18  ;;  %v10040_v9 = vld [vmem:[%s15523_s5 + $0x14] sm:$0xf0]  ;;  %v7045_v18 = vld [vmem:[%s15523_s5 + $0xa8] sm:$0xf0] }
 0x1c0   :  { %1284 = vmatpush.bf16.msra.mxu3 %v7080_v31  ;;  %v6972_v11 = vor.u32 %v10040_v9, %v6971_v8  ;;  %v7048_v20 = vor.u32 %v10057_v17, %v7045_v18  ;;  %v7037_v31 = vld [vmem:[%s15523_s5 + $0x98] sm:$0xf0]  ;;  %v10116_v8 = vld [vmem:[%s15523_s5 + $0x274] sm:$0xf0]  ;;  %v10115_v9 = vld [vmem:[%s15523_s5 + $0x274] sm:$0xf] }
 0x1c1   :  { %1243 = vmatpush.bf16.msra.mxu0 %v7004_v23  ;;  %v6965_v23 = vld [vmem:[%s15523_s5 + $0x8] sm:$0xf0]  ;;  %v7040_v33 = vor.u32 %v10055_v30, %v7037_v31 }
 0x1c2   :  { %v6968_v26 = vor.u32 %v10037_v22, %v6965_v23  ;;  %v7171_v23 = vld [vmem:[%s15523_s5 + $0x260] sm:$0xf] }
 0x1c3   :  { %1271 = vmatpush.bf16.msra.mxu2 %v7008_v25  ;;  %1256 = vmatpush.bf16.msra.mxu1 %v7076_v29  ;;  %v6964_v25 = vor.u32 %v10038_v21, %v6963_v19  ;;  %v10056_v29 = vld [vmem:[%s15523_s5 + $0x94] sm:$0xf0] }
 0x1c4   :  { %1285 = vmatpush.bf16.msra.mxu3 %v7072_v43  ;;  %v7036_v32 = vor.u32 %v10056_v29, %v7035_v28  ;;  %v7029_v43 = vld [vmem:[%s15523_s5 + $0x88] sm:$0xf0]  ;;  %v7243_v28 = vld [vmem:[%s15523_s5 + $0x2f0] sm:$0xf]  ;;  %v10132_v29 = vld [vmem:[%s15523_s5 + $0x2f4] sm:$0xf0] }
 0x1c5   :  { %1244 = vmatpush.bf16.msra.mxu0 %v6996_v35  ;;  %v692_v35 = vpop.f32.mrf.mxu2  ;;  %v7032_v44 = vor.u32 %v10053_v39, %v7029_v43  ;;  %v7165_v43 = vld [vmem:[%s15523_s5 + $0x258] sm:$0xf0]  ;;  %v7244_v46 = vor.u32 %v10132_v29, %v7243_v28  ;;  %v7211_v28 = vld [vmem:[%s15523_s5 + $0x2b0] sm:$0xf]  ;;  %v10124_v29 = vld [vmem:[%s15523_s5 + $0x2b4] sm:$0xf0] }
 0x1c7   :  { %1272 = vmatpush.bf16.msra.mxu2 %v7000_v38  ;;  %1257 = vmatpush.bf16.msra.mxu1 %v7068_v47  ;;  %v10054_v38 = vld [vmem:[%s15523_s5 + $0x84] sm:$0xf0]  ;;  %v719_v47 = vperm.slane %v11297_v60, 0 }
 0x1c8   :  { %1286 = vmatpush.bf16.msra.mxu3 %v7064_v56  ;;  %v7028_v42 = vor.u32 %v10054_v38, %v7027_v37  ;;  %v7172_v37 = vor.u32 %v10114_v24, %v7171_v23  ;;  %v10106_v23 = vld [vmem:[%s15523_s5 + $0x224] sm:$0xf0]  ;;  %v10105_v24 = vld [vmem:[%s15523_s5 + $0x224] sm:$0xf] }
 0x1c9   :  { %1245 = vmatpush.bf16.msra.mxu0 %v6988_v48  ;;  %v693_v48 = vadd.f32 %v692_v35, %v492_v40 }
 0x1cb   :  { %1273 = vmatpush.bf16.msra.mxu2 %v6992_v50  ;;  %1258 = vmatpush.bf16.msra.mxu1 %v7060_v54  ;;  %v718_v50 = vrot.slane %v11299_v61, 1  ;;  %v720_v54 = vperm.slane %v11297_v60, 1 }
 0x1cc   :  { %1287 = vmatpush.bf16.msra.mxu3 %v7056_v7  ;;  %v7179_v7 = vld [vmem:[%s15523_s5 + $0x270] sm:$0xf] }
 0x1cd   :  { %1246 = vmatpush.bf16.msra.mxu0 %v6980_v62  ;;  %v721_v58 = vperm.slane %v718_v50, 0  ;;  %v694_v59 = vpop.f32.mrf.mxu2  ;;  %v722_v60 = vperm.slane %v718_v50, 1  ;;  %v7180_v21 = vor.u32 %v10116_v8, %v7179_v7  ;;  %v7147_v7 = vld [vmem:[%s15523_s5 + $0x230] sm:$0xf]  ;;  %v10108_v8 = vld [vmem:[%s15523_s5 + $0x234] sm:$0xf0] }
 0x1cf   :  { %1274 = vmatpush.bf16.msra.mxu2 %v6984_v0  ;;  %1259 = vmatpush.bf16.msra.mxu1 %v7052_v4  ;;  %v695_v0 = vadd.f32 %v694_v59, %v492_v40  ;;  %v7163_v40 = vld [vmem:[%s15523_s5 + $0x250] sm:$0xf]  ;;  %v10110_v59 = vld [vmem:[%s15523_s5 + $0x244] sm:$0xf0] }
 0x1d0   :  { %1288 = vmatpush.bf16.msra.mxu3 %v7048_v20 }
 0x1d1   :  { %1247 = vmatpush.bf16.msra.mxu0 %v6972_v11 }
 0x1d3   :  { %1275 = vmatpush.bf16.msra.mxu2 %v6976_v15  ;;  %1260 = vmatpush.bf16.msra.mxu1 %v7044_v16  ;;  %v7181_v15 = vld [vmem:[%s15523_s5 + $0x278] sm:$0xf0] }
 0x1d4   :  { %1289 = vmatpush.bf16.msra.mxu3 %v7040_v33  ;;  %v7184_v22 = vor.u32 %v10115_v9, %v7181_v15  ;;  %v10131_v33 = vld [vmem:[%s15523_s5 + $0x2f4] sm:$0xf]  ;;  %v10126_v15 = vld [vmem:[%s15523_s5 + $0x2c4] sm:$0xf0] }
 0x1d5   :  { %1248 = vmatpush.bf16.msra.mxu0 %v6964_v25  ;;  %v10113_v25 = vld [vmem:[%s15523_s5 + $0x264] sm:$0xf]  ;;  %v10107_v9 = vld [vmem:[%s15523_s5 + $0x234] sm:$0xf] }
 0x1d6   :  { %v7176_v38 = vor.u32 %v10113_v25, %v7173_v27  ;;  %v7141_v25 = vld [vmem:[%s15523_s5 + $0x228] sm:$0xf0] }
 0x1d7   :  { %1276 = vmatpush.bf16.msra.mxu2 %v6968_v26  ;;  %1261 = vmatpush.bf16.msra.mxu1 %v7036_v32 }
 0x1d8   :  { %1290 = vmatpush.bf16.msra.mxu3 %v7032_v44 }
 0x1db   :  { %1262 = vmatpush.bf16.msra.mxu1 %v7028_v42  ;;  %v10111_v42 = vld [vmem:[%s15523_s5 + $0x254] sm:$0xf] }
 0x226   :  { %v678_v36 = vpop.f32.mrf.mxu1 }
 0x227   :  { %v11637_v41 = vadd.f32 %v678_v36, %v665_v34  ;;  %v7245_v36 = vld [vmem:[%s15523_s5 + $0x2f8] sm:$0xf0] }
 0x229   :  { %v727_v45 = vmul.f32 %v719_v47, %v11637_v41  ;;  %v10112_v47 = vld [vmem:[%s15523_s5 + $0x254] sm:$0xf0] }
 0x22b   :  { %v743_v49 = vrot.slane %v727_v45, 6 }
 0x22c   :  { %v706_v51 = vpop.f32.mrf.mxu3 }
 0x22d   :  { %751 = vst [vmem:[#allocation2 + $0x30] sm:$0xfc] %v743_v49  ;;  %v11645_v53 = vadd.f32 %v706_v51, %v693_v48  ;;  %v7248_v48 = vor.u32 %v10131_v33, %v7245_v36  ;;  %v10130_v51 = vld [vmem:[%s15523_s5 + $0x2e4] sm:$0xf0]  ;;  %v7144_v33 = vor.u32 %v10105_v24, %v7141_v25  ;;  %v7131_v36 = vld [vmem:[%s15523_s5 + $0x210] sm:$0xf] }
 0x22e   :  { %753 = vst [vmem:[#allocation2 + $0x8] sm:$0x3] %v743_v49  ;;  %v680_v55 = vpop.f32.mrf.mxu1  ;;  %v7235_v49 = vld [vmem:[%s15523_s5 + $0x2e0] sm:$0xf]  ;;  %v7189_v25 = vld [vmem:[%s15523_s5 + $0x288] sm:$0xf0] }
 0x22f   :  { %v728_v56 = vmul.f32 %v720_v54, %v11645_v53  ;;  %v11649_v57 = vadd.f32 %v680_v55, %v667_v52  ;;  %v10129_v52 = vld [vmem:[%s15523_s5 + $0x2e4] sm:$0xf]  ;;  %v7237_v54 = vld [vmem:[%s15523_s5 + $0x2e8] sm:$0xf0]  ;;  %v7164_v55 = vor.u32 %v10112_v47, %v7163_v40  ;;  %v7203_v40 = vld [vmem:[%s15523_s5 + $0x2a0] sm:$0xf]  ;;  %v7212_v47 = vor.u32 %v10124_v29, %v7211_v28 }
 0x230   :  { %v7403_v28 = vld [vmem:[%s15523_s5 + $0x3f0] sm:$0xf]  ;;  %v10164_v29 = vld [vmem:[%s15523_s5 + $0x3f4] sm:$0xf0] }
 0x231   :  { %v744_v62 = vrot.slane %v728_v56, 6  ;;  %v729_v63 = vmul.f32 %v721_v58, %v11649_v57  ;;  %v7168_v56 = vor.u32 %v10111_v42, %v7165_v43  ;;  %v7155_v58 = vld [vmem:[%s15523_s5 + $0x240] sm:$0xf]  ;;  %v10122_v43 = vld [vmem:[%s15523_s5 + $0x2a4] sm:$0xf0] }
 0x233   :  { %752 = vst [vmem:[#allocation2] sm:$0xfc] %v744_v62  ;;  %v745_v61 = vrot.slane %v729_v63, 6  ;;  %v7157_v63 = vld [vmem:[%s15523_s5 + $0x248] sm:$0xf0] }
 0x234   :  { %754 = vst [vmem:[#allocation2 + $0x10] sm:$0x3] %v744_v62  ;;  %v708_v1 = vpop.f32.mrf.mxu3  ;;  %v797_v5 = vld [vmem:[#allocation2 + $0x30] sm:$0xfe]  ;;  %v10109_v62 = vld [vmem:[%s15523_s5 + $0x244] sm:$0xf] }
 0x235   :  { %755 = vst [vmem:[#allocation2 + $0x28] sm:$0xfc] %v745_v61  ;;  %v11652_v2 = vadd.f32 %v708_v1, %v695_v0  ;;  %v799_v6 = vld [vmem:[#allocation2 + $0x8] sm:$0x1]  ;;  %v814_v11 = vrot.slane %v797_v5, 1  ;;  %v7236_v0 = vor.u32 %v10130_v51, %v7235_v49  ;;  %v7156_v5 = vor.u32 %v10110_v59, %v7155_v58 }
 0x236   :  { %757 = vst [vmem:[#allocation2 + $0x18] sm:$0x3] %v745_v61  ;;  %v815_v12 = vrot.slane %v799_v6, 1  ;;  %v7240_v61 = vor.u32 %v10129_v52, %v7237_v54  ;;  %v7227_v1 = vld [vmem:[%s15523_s5 + $0x2d0] sm:$0xf]  ;;  %v7160_v6 = vor.u32 %v10109_v62, %v7157_v63 }
 0x237   :  { %v730_v3 = vmul.f32 %v722_v60, %v11652_v2  ;;  %v10128_v60 = vld [vmem:[%s15523_s5 + $0x2d4] sm:$0xf0]  ;;  %v10102_v49 = vld [vmem:[%s15523_s5 + $0x204] sm:$0xf0]  ;;  %v7125_v51 = vld [vmem:[%s15523_s5 + $0x208] sm:$0xf0] }
 0x238   :  { %v816_v19 = vsel %vm813_vm12, %v814_v11, %v815_v12  ;;  %v7228_v11 = vor.u32 %v10128_v60, %v7227_v1  ;;  %v7339_v58 = vld [vmem:[%s15523_s5 + $0x370] sm:$0xf]  ;;  %v10148_v59 = vld [vmem:[%s15523_s5 + $0x374] sm:$0xf0]  ;;  %v1299_v63 = vld [vmem:[#allocation2 + $0x8] sm:$0x3]  ;;  %v7204_v60 = vor.u32 %v10122_v43, %v7203_v40 }
 0x239   :  { %v746_v4 = vrot.slane %v730_v3, 6  ;;  %v10127_v3 = vld [vmem:[%s15523_s5 + $0x2d4] sm:$0xf]  ;;  %v7195_v1 = vld [vmem:[%s15523_s5 + $0x290] sm:$0xf] }
 0x23a   :  { %v798_v17 = vld [vmem:[#allocation2] sm:$0xfe]  ;;  %v1297_v62 = vld [vmem:[#allocation2 + $0x30] sm:$0xfc]  ;;  %v10144_v43 = vld [vmem:[%s15523_s5 + $0x354] sm:$0xf0] }
 0x23b   :  { %756 = vst [vmem:[#allocation2 + $0x20] sm:$0xfc] %v746_v4  ;;  %v800_v18 = vld [vmem:[#allocation2 + $0x10] sm:$0x1]  ;;  %v817_v31 = vrot.slane %v798_v17, 1 }
 0x23c   :  { %758 = vst [vmem:[#allocation2 + $0x38] sm:$0x3] %v746_v4  ;;  %v801_v10 = vld [vmem:[#allocation2 + $0x28] sm:$0xfe]  ;;  %v818_v32 = vrot.slane %v800_v18, 1  ;;  %v759_v18 = vld [vmem:[#allocation2 + $0x30] sm:$0xff] }
 0x23d   :  { %v803_v13 = vld [vmem:[#allocation2 + $0x18] sm:$0x1]  ;;  %v820_v14 = vrot.slane %v801_v10, 1  ;;  %v7229_v4 = vld [vmem:[%s15523_s5 + $0x2d8] sm:$0xf0] }
 0x23e   :  { %v821_v16 = vrot.slane %v803_v13, 1  ;;  %v819_v44 = vsel %vm813_vm12, %v817_v31, %v818_v32  ;;  %v7149_v10 = vld [vmem:[%s15523_s5 + $0x238] sm:$0xf0]  ;;  %v7232_v12 = vor.u32 %v10127_v3, %v7229_v4  ;;  %v761_v13 = vld [vmem:[#allocation2 + $0x28] sm:$0xff]  ;;  %v1303_v54 = vld [vmem:[#allocation2 + $0x18] sm:$0x3] }
 0x23f   :  { %v7221_v17 = vld [vmem:[%s15523_s5 + $0x2c8] sm:$0xf0]  ;;  %v7213_v31 = vld [vmem:[%s15523_s5 + $0x2b8] sm:$0xf0]  ;;  %v10120_v4 = vld [vmem:[%s15523_s5 + $0x294] sm:$0xf0] }
 0x240   :  { %v822_v20 = vsel %vm813_vm12, %v820_v14, %v821_v16  ;;  %v7219_v14 = vld [vmem:[%s15523_s5 + $0x2c0] sm:$0xf]  ;;  %v10125_v16 = vld [vmem:[%s15523_s5 + $0x2c4] sm:$0xf]  ;;  %v1301_v52 = vld [vmem:[#allocation2 + $0x28] sm:$0xfc] }
 0x241   :  { %v830_v26 = vpack.c.bf16 %v822_v20, %v816_v19  ;;  %v7148_v19 = vor.u32 %v10108_v8, %v7147_v7  ;;  %v7152_v20 = vor.u32 %v10107_v9, %v7149_v10  ;;  %v7224_v27 = vor.u32 %v10125_v16, %v7221_v17  ;;  %v7197_v8 = vld [vmem:[%s15523_s5 + $0x298] sm:$0xf0]  ;;  %v7333_v16 = vld [vmem:[%s15523_s5 + $0x368] sm:$0xf0] }
 0x242   :  { %v802_v30 = vld [vmem:[#allocation2 + $0x20] sm:$0xfe]  ;;  %v1321_v7 = vrot.slane %v1303_v54, 2  ;;  %v1314_v9 = vrot.slane %v1297_v62, 2  ;;  %v1315_v10 = vrot.slane %v1299_v63, 2  ;;  %v7340_v17 = vor.u32 %v10148_v59, %v7339_v58 }
 0x243   :  { %1033 = vmatmul.bf16.vlgmr.msrb.gmra.mxu0 %v830_v26  ;;  %1061 = vmatmul.bf16.vlgmr.msrb.gmra.mxu2 %v830_v26  ;;  %v804_v34 = vld [vmem:[#allocation2 + $0x38] sm:$0x1]  ;;  %v823_v35 = vrot.slane %v802_v30, 1  ;;  %v7220_v26 = vor.u32 %v10126_v15, %v7219_v14  ;;  %v10123_v30 = vld [vmem:[%s15523_s5 + $0x2b4] sm:$0xf] }
 0x244   :  { %1525 = vmatpush.bf16.msrb.mxu0 %v7180_v21  ;;  %1553 = vmatpush.bf16.msrb.mxu2 %v7184_v22  ;;  %v824_v39 = vrot.slane %v804_v34, 1  ;;  %v7139_v21 = vld [vmem:[%s15523_s5 + $0x220] sm:$0xf]  ;;  %v763_v22 = vpack.c.bf16 %v761_v13, %v759_v18  ;;  %v7216_v42 = vor.u32 %v10123_v30, %v7213_v31  ;;  %v10146_v14 = vld [vmem:[%s15523_s5 + $0x364] sm:$0xf0]  ;;  %v1316_v31 = vsel %vm1313_vm13, %v1314_v9, %v1315_v10 }
 0x245   :  { %v7140_v32 = vor.u32 %v10106_v23, %v7139_v21  ;;  %v760_v34 = vld [vmem:[#allocation2] sm:$0xff]  ;;  %v10163_v30 = vld [vmem:[%s15523_s5 + $0x3f4] sm:$0xf]  ;;  %v10142_v63 = vld [vmem:[%s15523_s5 + $0x344] sm:$0xf0] }
 0x246   :  { %v825_v45 = vsel %vm813_vm12, %v823_v35, %v824_v39  ;;  %v762_v35 = vld [vmem:[#allocation2 + $0x20] sm:$0xff]  ;;  %v7133_v39 = vld [vmem:[%s15523_s5 + $0x218] sm:$0xf0] }
 0x247   :  { %v831_v50 = vpack.c.bf16 %v825_v45, %v819_v44  ;;  %v10121_v44 = vld [vmem:[%s15523_s5 + $0x2a4] sm:$0xf]  ;;  %v7205_v45 = vld [vmem:[%s15523_s5 + $0x2a8] sm:$0xf0]  ;;  %v7315_v62 = vld [vmem:[%s15523_s5 + $0x340] sm:$0xf] }
 0x248   :  { %1526 = vmatpush.bf16.msrb.mxu0 %v7172_v37  ;;  %1554 = vmatpush.bf16.msrb.mxu2 %v7176_v38  ;;  %v10104_v37 = vld [vmem:[%s15523_s5 + $0x214] sm:$0xf0]  ;;  %v10103_v38 = vld [vmem:[%s15523_s5 + $0x214] sm:$0xf]  ;;  %v7208_v3 = vor.u32 %v10121_v44, %v7205_v45  ;;  %v10145_v15 = vld [vmem:[%s15523_s5 + $0x364] sm:$0xf]  ;;  %v7316_v9 = vor.u32 %v10142_v63, %v7315_v62 }
 0x249   :  { %1047 = vmatmul.bf16.vlgmr.msrb.gmra.mxu1 %v831_v50  ;;  %1075 = vmatmul.bf16.vlgmr.msrb.gmra.mxu3 %v831_v50  ;;  %v10101_v50 = vld [vmem:[%s15523_s5 + $0x204] sm:$0xf]  ;;  %v10143_v44 = vld [vmem:[%s15523_s5 + $0x354] sm:$0xf]  ;;  %v7325_v45 = vld [vmem:[%s15523_s5 + $0x358] sm:$0xf0] }
 0x24a   :  { %1539 = vmatpush.bf16.msrb.mxu1 %v7244_v46  ;;  %1567 = vmatpush.bf16.msrb.mxu3 %v7248_v48  ;;  %v764_v46 = vpack.c.bf16 %v762_v35, %v760_v34  ;;  %v7123_v48 = vld [vmem:[%s15523_s5 + $0x200] sm:$0xf]  ;;  %v7128_v13 = vor.u32 %v10101_v50, %v7125_v51  ;;  %v10117_v21 = vld [vmem:[%s15523_s5 + $0x284] sm:$0xf]  ;;  %v1300_v35 = vld [vmem:[#allocation2 + $0x10] sm:$0x3]  ;;  %v7328_v58 = vor.u32 %v10143_v44, %v7325_v45 }
 0x24b   :  { %v1298_v34 = vld [vmem:[#allocation2] sm:$0xfc]  ;;  %v1318_v50 = vrot.slane %v1300_v35, 2  ;;  %v7291_v35 = vld [vmem:[%s15523_s5 + $0x310] sm:$0xf] }
 0x24c   :  { %1527 = vmatpush.bf16.msrb.mxu0 %v7164_v55  ;;  %1555 = vmatpush.bf16.msrb.mxu2 %v7168_v56  ;;  %v7132_v55 = vor.u32 %v10104_v37, %v7131_v36  ;;  %v7136_v56 = vor.u32 %v10103_v38, %v7133_v39  ;;  %v7336_v37 = vor.u32 %v10145_v15, %v7333_v16  ;;  %v7323_v38 = vld [vmem:[%s15523_s5 + $0x350] sm:$0xf]  ;;  %v7395_v51 = vld [vmem:[%s15523_s5 + $0x3e0] sm:$0xf]  ;;  %v10161_v54 = vld [vmem:[%s15523_s5 + $0x3e4] sm:$0xf] }
 0x24d   :  { %v7365_v44 = vld [vmem:[%s15523_s5 + $0x3a8] sm:$0xf0]  ;;  %v7283_v45 = vld [vmem:[%s15523_s5 + $0x300] sm:$0xf]  ;;  %v10179_v62 = vld [vmem:[%s15523_s5 + $0x474] sm:$0xf] }
 0x24e   :  { %1540 = vmatpush.bf16.msrb.mxu1 %v7236_v0  ;;  %1568 = vmatpush.bf16.msrb.mxu3 %v7240_v61  ;;  %v10147_v0 = vld [vmem:[%s15523_s5 + $0x374] sm:$0xf]  ;;  %v7341_v61 = vld [vmem:[%s15523_s5 + $0x378] sm:$0xf0] }
 0x24f   :  { %v7344_v18 = vor.u32 %v10147_v0, %v7341_v61  ;;  %v10141_v0 = vld [vmem:[%s15523_s5 + $0x344] sm:$0xf]  ;;  %v7317_v61 = vld [vmem:[%s15523_s5 + $0x348] sm:$0xf0]  ;;  %v7501_v63 = vld [vmem:[%s15523_s5 + $0x478] sm:$0xf0] }
 0x250   :  { %1528 = vmatpush.bf16.msrb.mxu0 %v7156_v5  ;;  %1556 = vmatpush.bf16.msrb.mxu2 %v7160_v6  ;;  %v10119_v5 = vld [vmem:[%s15523_s5 + $0x294] sm:$0xf]  ;;  %v1320_v6 = vrot.slane %v1301_v52, 2  ;;  %v10162_v52 = vld [vmem:[%s15523_s5 + $0x3e4] sm:$0xf0]  ;;  %v7320_v10 = vor.u32 %v10141_v0, %v7317_v61 }
 0x251   :  { %v7200_v23 = vor.u32 %v10119_v5, %v7197_v8  ;;  %v7389_v8 = vld [vmem:[%s15523_s5 + $0x3d8] sm:$0xf0] }
 0x252   :  { %1541 = vmatpush.bf16.msrb.mxu1 %v7228_v11  ;;  %1569 = vmatpush.bf16.msrb.mxu3 %v7232_v12  ;;  %v7331_v11 = vld [vmem:[%s15523_s5 + $0x360] sm:$0xf]  ;;  %v7124_v12 = vor.u32 %v10102_v49, %v7123_v48  ;;  %v1322_v24 = vsel %vm1313_vm13, %v1320_v6, %v1321_v7  ;;  %v1317_v49 = vrot.slane %v1298_v34, 2  ;;  %v10160_v6 = vld [vmem:[%s15523_s5 + $0x3d4] sm:$0xf0] }
 0x253   :  { %1249 = vmatmul.bf16.vlgmr.msra.gmra.mxu0 %v763_v22  ;;  %1277 = vmatmul.bf16.vlgmr.msra.gmra.mxu2 %v763_v22  ;;  %v7196_v22 = vor.u32 %v10120_v4, %v7195_v1  ;;  %v1330_v36 = vpack.c.bf16 %v1322_v24, %v1316_v31  ;;  %v7387_v4 = vld [vmem:[%s15523_s5 + $0x3d0] sm:$0xf]  ;;  %v10159_v7 = vld [vmem:[%s15523_s5 + $0x3d4] sm:$0xf]  ;;  %v10138_v24 = vld [vmem:[%s15523_s5 + $0x324] sm:$0xf0] }
 0x254   :  { %1529 = vmatpush.bf16.msrb.mxu0 %v7148_v19  ;;  %1557 = vmatpush.bf16.msrb.mxu2 %v7152_v20  ;;  %v7187_v19 = vld [vmem:[%s15523_s5 + $0x280] sm:$0xf]  ;;  %v10118_v20 = vld [vmem:[%s15523_s5 + $0x284] sm:$0xf0]  ;;  %v1319_v1 = vsel %vm1313_vm13, %v1317_v49, %v1318_v50  ;;  %v7388_v15 = vor.u32 %v10160_v6, %v7387_v4  ;;  %v7392_v16 = vor.u32 %v10159_v7, %v7389_v8  ;;  %v10155_v31 = vld [vmem:[%s15523_s5 + $0x3b4] sm:$0xf] }
 0x255   :  { %v7285_v49 = vld [vmem:[%s15523_s5 + $0x308] sm:$0xf0]  ;;  %v7357_v6 = vld [vmem:[%s15523_s5 + $0x398] sm:$0xf0] }
 0x256   :  { %1542 = vmatpush.bf16.msrb.mxu1 %v7220_v26  ;;  %1570 = vmatpush.bf16.msrb.mxu3 %v7224_v27  ;;  %v1302_v26 = vld [vmem:[#allocation2 + $0x20] sm:$0xfc]  ;;  %v1304_v27 = vld [vmem:[#allocation2 + $0x38] sm:$0x3]  ;;  %v1589_v50 = vld [vmem:[#allocation2 + $0x28] sm:$0xf8] }
 0x257   :  { %v1323_v39 = vrot.slane %v1302_v26, 2  ;;  %v1324_v40 = vrot.slane %v1304_v27, 2  ;;  %v7301_v26 = vld [vmem:[%s15523_s5 + $0x328] sm:$0xf0] }
 0x258   :  { %1530 = vmatpush.bf16.msrb.mxu0 %v7140_v32  ;;  %1558 = vmatpush.bf16.msrb.mxu2 %v7144_v33  ;;  %v7332_v32 = vor.u32 %v10146_v14, %v7331_v11  ;;  %v7405_v33 = vld [vmem:[%s15523_s5 + $0x3f8] sm:$0xf0]  ;;  %v7307_v11 = vld [vmem:[%s15523_s5 + $0x330] sm:$0xf] }
 0x259   :  { %1263 = vmatmul.bf16.vlgmr.msra.gmra.mxu1 %v764_v46  ;;  %1291 = vmatmul.bf16.vlgmr.msra.gmra.mxu3 %v764_v46  ;;  %v7404_v46 = vor.u32 %v10164_v29, %v7403_v28  ;;  %v7408_v48 = vor.u32 %v10163_v30, %v7405_v33  ;;  %v1325_v59 = vsel %vm1313_vm13, %v1323_v39, %v1324_v40  ;;  %v7309_v14 = vld [vmem:[%s15523_s5 + $0x338] sm:$0xf0]  ;;  %v7371_v29 = vld [vmem:[%s15523_s5 + $0x3b0] sm:$0xf]  ;;  %v10156_v30 = vld [vmem:[%s15523_s5 + $0x3b4] sm:$0xf0] }
 0x25a   :  { %1543 = vmatpush.bf16.msrb.mxu1 %v7212_v47  ;;  %1571 = vmatpush.bf16.msrb.mxu3 %v7216_v42  ;;  %v7188_v47 = vor.u32 %v10118_v20, %v7187_v19  ;;  %v7192_v42 = vor.u32 %v10117_v21, %v7189_v25  ;;  %v1331_v5 = vpack.c.bf16 %v1325_v59, %v1319_v1  ;;  %v10157_v19 = vld [vmem:[%s15523_s5 + $0x3c4] sm:$0xf]  ;;  %v7381_v20 = vld [vmem:[%s15523_s5 + $0x3c8] sm:$0xf0]  ;;  %v7363_v39 = vld [vmem:[%s15523_s5 + $0x3a0] sm:$0xf] }
 0x25b   :  { %v10137_v25 = vld [vmem:[%s15523_s5 + $0x324] sm:$0xf]  ;;  %v7384_v28 = vor.u32 %v10157_v19, %v7381_v20  ;;  %v7372_v40 = vor.u32 %v10156_v30, %v7371_v29  ;;  %v10180_v59 = vld [vmem:[%s15523_s5 + $0x474] sm:$0xf0]  ;;  %v7355_v1 = vld [vmem:[%s15523_s5 + $0x390] sm:$0xf] }
 0x25c   :  { %1531 = vmatpush.bf16.msrb.mxu0 %v7132_v55  ;;  %1559 = vmatpush.bf16.msrb.mxu2 %v7136_v56  ;;  %v7397_v55 = vld [vmem:[%s15523_s5 + $0x3e8] sm:$0xf0]  ;;  %v7324_v56 = vor.u32 %v10144_v43, %v7323_v38  ;;  %v7304_v34 = vor.u32 %v10137_v25, %v7301_v26  ;;  %v7293_v38 = vld [vmem:[%s15523_s5 + $0x318] sm:$0xf0]  ;;  %v10153_v43 = vld [vmem:[%s15523_s5 + $0x3a4] sm:$0xf] }
 0x25d   :  { %v7368_v61 = vor.u32 %v10153_v43, %v7365_v44  ;;  %v1590_v19 = vld [vmem:[#allocation2 + $0x20] sm:$0xf8]  ;;  %v1592_v20 = vld [vmem:[#allocation2 + $0x38] sm:$0x7]  ;;  %v7349_v25 = vld [vmem:[%s15523_s5 + $0x388] sm:$0xf0] }
 0x25e   :  { %1544 = vmatpush.bf16.msrb.mxu1 %v7204_v60  ;;  %1572 = vmatpush.bf16.msrb.mxu3 %v7208_v3  ;;  %v7396_v60 = vor.u32 %v10162_v52, %v7395_v51  ;;  %v7400_v3 = vor.u32 %v10161_v54, %v7397_v55  ;;  %v1591_v51 = vld [vmem:[#allocation2 + $0x18] sm:$0x7]  ;;  %v7499_v55 = vld [vmem:[%s15523_s5 + $0x470] sm:$0xf] }
 0x25f   :  { %v1609_v4 = vrot.slane %v1591_v51, 3  ;;  %v7563_v26 = vld [vmem:[%s15523_s5 + $0x4f0] sm:$0xf]  ;;  %v10176_v43 = vld [vmem:[%s15523_s5 + $0x454] sm:$0xf0] }
 0x260   :  { %1532 = vmatpush.bf16.msrb.mxu0 %v7124_v12  ;;  %1560 = vmatpush.bf16.msrb.mxu2 %v7128_v13  ;;  %v10140_v12 = vld [vmem:[%s15523_s5 + $0x334] sm:$0xf0]  ;;  %v10139_v13 = vld [vmem:[%s15523_s5 + $0x334] sm:$0xf]  ;;  %v1588_v29 = vld [vmem:[#allocation2 + $0x10] sm:$0x7] }
 0x261   :  { %v7308_v21 = vor.u32 %v10140_v12, %v7307_v11  ;;  %v7491_v11 = vld [vmem:[%s15523_s5 + $0x460] sm:$0xf]  ;;  %v10178_v12 = vld [vmem:[%s15523_s5 + $0x464] sm:$0xf0] }
 0x262   :  { %1545 = vmatpush.bf16.msrb.mxu1 %v7196_v22  ;;  %1573 = vmatpush.bf16.msrb.mxu3 %v7200_v23  ;;  %v7312_v22 = vor.u32 %v10139_v13, %v7309_v14  ;;  %v7299_v23 = vld [vmem:[%s15523_s5 + $0x320] sm:$0xf]  ;;  %v10177_v13 = vld [vmem:[%s15523_s5 + $0x464] sm:$0xf]  ;;  %v7493_v14 = vld [vmem:[%s15523_s5 + $0x468] sm:$0xf0] }
 0x263   :  { %1533 = vmatmul.bf16.vlgmr.msrb.gmra.mxu0 %v1330_v36  ;;  %1561 = vmatmul.bf16.vlgmr.msrb.gmra.mxu2 %v1330_v36  ;;  %v7300_v33 = vor.u32 %v10138_v24, %v7299_v23  ;;  %v10136_v36 = vld [vmem:[%s15523_s5 + $0x314] sm:$0xf0]  ;;  %v10149_v24 = vld [vmem:[%s15523_s5 + $0x384] sm:$0xf]  ;;  %v10194_v51 = vld [vmem:[%s15523_s5 + $0x4e4] sm:$0xf0] }
 0x264   :  { %1813 = vmatpush.bf16.msra.mxu0 %v7340_v17  ;;  %1841 = vmatpush.bf16.msra.mxu2 %v7344_v18  ;;  %v7379_v17 = vld [vmem:[%s15523_s5 + $0x3c0] sm:$0xf]  ;;  %v10158_v18 = vld [vmem:[%s15523_s5 + $0x3c4] sm:$0xf0]  ;;  %v7292_v52 = vor.u32 %v10136_v36, %v7291_v35  ;;  %v7492_v36 = vor.u32 %v10178_v12, %v7491_v11 }
 0x265   :  { %v7380_v27 = vor.u32 %v10158_v18, %v7379_v17  ;;  %v7347_v17 = vld [vmem:[%s15523_s5 + $0x380] sm:$0xf]  ;;  %v10150_v18 = vld [vmem:[%s15523_s5 + $0x384] sm:$0xf0] }
 0x266   :  { %1546 = vmatpush.bf16.msrb.mxu1 %v7188_v47  ;;  %1574 = vmatpush.bf16.msrb.mxu3 %v7192_v42  ;;  %v10154_v42 = vld [vmem:[%s15523_s5 + $0x3a4] sm:$0xf0] }
 0x267   :  { %v7364_v0 = vor.u32 %v10154_v42, %v7363_v39  ;;  %v7352_v39 = vor.u32 %v10149_v24, %v7349_v25  ;;  %v7483_v42 = vld [vmem:[%s15523_s5 + $0x450] sm:$0xf]  ;;  %v10169_v25 = vld [vmem:[%s15523_s5 + $0x424] sm:$0xf] }
 0x268   :  { %1814 = vmatpush.bf16.msra.mxu0 %v7332_v32  ;;  %1842 = vmatpush.bf16.msra.mxu2 %v7336_v37  ;;  %v7373_v32 = vld [vmem:[%s15523_s5 + $0x3b8] sm:$0xf0]  ;;  %v10135_v37 = vld [vmem:[%s15523_s5 + $0x314] sm:$0xf] }
 0x269   :  { %1547 = vmatmul.bf16.vlgmr.msrb.gmra.mxu1 %v1331_v5  ;;  %1575 = vmatmul.bf16.vlgmr.msrb.gmra.mxu3 %v1331_v5  ;;  %v7376_v47 = vor.u32 %v10155_v31, %v7373_v32  ;;  %v7296_v54 = vor.u32 %v10135_v37, %v7293_v38  ;;  %v10151_v5 = vld [vmem:[%s15523_s5 + $0x394] sm:$0xf]  ;;  %v7565_v32 = vld [vmem:[%s15523_s5 + $0x4f8] sm:$0xf0]  ;;  %v7496_v37 = vor.u32 %v10177_v13, %v7493_v14 }
 0x26a   :  { %1827 = vmatpush.bf16.msra.mxu1 %v7404_v46  ;;  %1855 = vmatpush.bf16.msra.mxu3 %v7408_v48  ;;  %v10134_v46 = vld [vmem:[%s15523_s5 + $0x304] sm:$0xf0]  ;;  %v10133_v48 = vld [vmem:[%s15523_s5 + $0x304] sm:$0xf]  ;;  %v10195_v31 = vld [vmem:[%s15523_s5 + $0x4f4] sm:$0xf]  ;;  %v7348_v38 = vor.u32 %v10150_v18, %v7347_v17 }
 0x26b   :  { %v10171_v13 = vld [vmem:[%s15523_s5 + $0x434] sm:$0xf]  ;;  %v7469_v14 = vld [vmem:[%s15523_s5 + $0x438] sm:$0xf0]  ;;  %v10189_v17 = vld [vmem:[%s15523_s5 + $0x4c4] sm:$0xf] }
 0x26c   :  { %1815 = vmatpush.bf16.msra.mxu0 %v7324_v56  ;;  %1843 = vmatpush.bf16.msra.mxu2 %v7328_v58  ;;  %v1585_v56 = vld [vmem:[#allocation2 + $0x30] sm:$0xf8]  ;;  %v1587_v58 = vld [vmem:[#allocation2 + $0x8] sm:$0x7]  ;;  %v7541_v18 = vld [vmem:[%s15523_s5 + $0x4c8] sm:$0xf0] }
 0x26d   :  { %v1602_v7 = vrot.slane %v1585_v56, 3  ;;  %v1603_v8 = vrot.slane %v1587_v58, 3  ;;  %v7484_v56 = vor.u32 %v10176_v43, %v7483_v42  ;;  %v7544_v24 = vor.u32 %v10189_v17, %v7541_v18  ;;  %v10186_v42 = vld [vmem:[%s15523_s5 + $0x4a4] sm:$0xf0]  ;;  %v10185_v43 = vld [vmem:[%s15523_s5 + $0x4a4] sm:$0xf] }
 0x26e   :  { %1828 = vmatpush.bf16.msra.mxu1 %v7396_v60  ;;  %1856 = vmatpush.bf16.msra.mxu3 %v7400_v3  ;;  %v10152_v60 = vld [vmem:[%s15523_s5 + $0x394] sm:$0xf0]  ;;  %v1608_v3 = vrot.slane %v1589_v50, 3 }
 0x26f   :  { %v1604_v30 = vsel %vm1601_vm14, %v1602_v7, %v1603_v8 }
 0x270   :  { %1816 = vmatpush.bf16.msra.mxu0 %v7316_v9  ;;  %1844 = vmatpush.bf16.msra.mxu2 %v7320_v10  ;;  %v7284_v9 = vor.u32 %v10134_v46, %v7283_v45  ;;  %v7288_v10 = vor.u32 %v10133_v48, %v7285_v49  ;;  %v1610_v23 = vsel %vm1601_vm14, %v1608_v3, %v1609_v4  ;;  %v10175_v46 = vld [vmem:[%s15523_s5 + $0x454] sm:$0xf]  ;;  %v7485_v48 = vld [vmem:[%s15523_s5 + $0x458] sm:$0xf0]  ;;  %v7555_v49 = vld [vmem:[%s15523_s5 + $0x4e0] sm:$0xf] }
 0x271   :  { %v1618_v35 = vpack.c.bf16 %v1610_v23, %v1604_v30  ;;  %v7568_v45 = vor.u32 %v10195_v31, %v7565_v32  ;;  %v7488_v58 = vor.u32 %v10175_v46, %v7485_v48  ;;  %v7547_v3 = vld [vmem:[%s15523_s5 + $0x4d0] sm:$0xf]  ;;  %v10192_v4 = vld [vmem:[%s15523_s5 + $0x4d4] sm:$0xf0]  ;;  %v7533_v30 = vld [vmem:[%s15523_s5 + $0x4b8] sm:$0xf0] }
 0x272   :  { %1829 = vmatpush.bf16.msra.mxu1 %v7388_v15  ;;  %1857 = vmatpush.bf16.msra.mxu3 %v7392_v16  ;;  %v7500_v15 = vor.u32 %v10180_v59, %v7499_v55  ;;  %v7504_v16 = vor.u32 %v10179_v62, %v7501_v63  ;;  %v7475_v59 = vld [vmem:[%s15523_s5 + $0x440] sm:$0xf]  ;;  %v10174_v62 = vld [vmem:[%s15523_s5 + $0x444] sm:$0xf0]  ;;  %v7548_v11 = vor.u32 %v10192_v4, %v7547_v3  ;;  %v1877_v31 = vld [vmem:[#allocation2 + $0x28] sm:$0xf0] }
 0x273   :  { %v7476_v7 = vor.u32 %v10174_v62, %v7475_v59  ;;  %v1875_v46 = vld [vmem:[#allocation2 + $0x8] sm:$0xf]  ;;  %v7445_v59 = vld [vmem:[%s15523_s5 + $0x408] sm:$0xf0]  ;;  %v7515_v62 = vld [vmem:[%s15523_s5 + $0x490] sm:$0xf] }
 0x274   :  { %1817 = vmatpush.bf16.msra.mxu0 %v7308_v21  ;;  %1845 = vmatpush.bf16.msra.mxu2 %v7312_v22  ;;  %v7356_v21 = vor.u32 %v10152_v60, %v7355_v1  ;;  %v7360_v22 = vor.u32 %v10151_v5, %v7357_v6  ;;  %v10173_v1 = vld [vmem:[%s15523_s5 + $0x444] sm:$0xf]  ;;  %v7477_v60 = vld [vmem:[%s15523_s5 + $0x448] sm:$0xf0]  ;;  %v10191_v5 = vld [vmem:[%s15523_s5 + $0x4d4] sm:$0xf] }
 0x275   :  { %v7549_v6 = vld [vmem:[%s15523_s5 + $0x4d8] sm:$0xf0]  ;;  %v7480_v8 = vor.u32 %v10173_v1, %v7477_v60  ;;  %v1891_v60 = vrot.slane %v1875_v46, 4  ;;  %v10241_v46 = vld [vmem:[%s15523_s5 + $0x664] sm:$0xf] }
 0x276   :  { %1830 = vmatpush.bf16.msra.mxu1 %v7380_v27  ;;  %1858 = vmatpush.bf16.msra.mxu3 %v7384_v28  ;;  %v10196_v27 = vld [vmem:[%s15523_s5 + $0x4f4] sm:$0xf0]  ;;  %v1586_v28 = vld [vmem:[#allocation2] sm:$0xf8]  ;;  %v7552_v12 = vor.u32 %v10191_v5, %v7549_v6 }
 0x277   :  { %v7564_v44 = vor.u32 %v10196_v27, %v7563_v26  ;;  %v7461_v26 = vld [vmem:[%s15523_s5 + $0x428] sm:$0xf0]  ;;  %v7531_v27 = vld [vmem:[%s15523_s5 + $0x4b0] sm:$0xf]  ;;  %v1878_v5 = vld [vmem:[#allocation2 + $0x20] sm:$0xf0] }
 0x278   :  { %1818 = vmatpush.bf16.msra.mxu0 %v7300_v33  ;;  %1846 = vmatpush.bf16.msra.mxu2 %v7304_v34  ;;  %v1611_v33 = vrot.slane %v1590_v19, 3  ;;  %v1612_v34 = vrot.slane %v1592_v20, 3  ;;  %v7472_v20 = vor.u32 %v10171_v13, %v7469_v14  ;;  %v1880_v6 = vld [vmem:[#allocation2 + $0x38] sm:$0xf]  ;;  %v10182_v13 = vld [vmem:[%s15523_s5 + $0x484] sm:$0xf0] }
 0x279   :  { %v10181_v14 = vld [vmem:[%s15523_s5 + $0x484] sm:$0xf]  ;;  %v1899_v17 = vrot.slane %v1878_v5, 4  ;;  %v1900_v18 = vrot.slane %v1880_v6, 4  ;;  %v10258_v5 = vld [vmem:[%s15523_s5 + $0x6e4] sm:$0xf0] }
 0x27a   :  { %1831 = vmatpush.bf16.msra.mxu1 %v7372_v40  ;;  %1859 = vmatpush.bf16.msra.mxu3 %v7376_v47  ;;  %v1605_v40 = vrot.slane %v1586_v28, 3  ;;  %v1606_v47 = vrot.slane %v1588_v29, 3  ;;  %v1613_v50 = vsel %vm1601_vm14, %v1611_v33, %v1612_v34  ;;  %v10188_v28 = vld [vmem:[%s15523_s5 + $0x4b4] sm:$0xf0]  ;;  %v10187_v29 = vld [vmem:[%s15523_s5 + $0x4b4] sm:$0xf]  ;;  %v7464_v33 = vor.u32 %v10169_v25, %v7461_v26 }
 0x27b   :  { %v7451_v34 = vld [vmem:[%s15523_s5 + $0x410] sm:$0xf]  ;;  %v10257_v6 = vld [vmem:[%s15523_s5 + $0x6e4] sm:$0xf] }
 0x27c   :  { %1819 = vmatpush.bf16.msra.mxu0 %v7292_v52  ;;  %1847 = vmatpush.bf16.msra.mxu2 %v7296_v54  ;;  %v10193_v52 = vld [vmem:[%s15523_s5 + $0x4e4] sm:$0xf]  ;;  %v7557_v54 = vld [vmem:[%s15523_s5 + $0x4e8] sm:$0xf0]  ;;  %v1607_v55 = vsel %vm1601_vm14, %v1605_v40, %v1606_v47  ;;  %v7453_v40 = vld [vmem:[%s15523_s5 + $0x418] sm:$0xf0] }
 0x27d   :  { %v1619_v63 = vpack.c.bf16 %v1613_v50, %v1607_v55  ;;  %v7523_v47 = vld [vmem:[%s15523_s5 + $0x4a0] sm:$0xf] }
 0x27e   :  { %1832 = vmatpush.bf16.msra.mxu1 %v7364_v0  ;;  %1860 = vmatpush.bf16.msra.mxu3 %v7368_v61  ;;  %v7556_v0 = vor.u32 %v10194_v51, %v7555_v49  ;;  %v7560_v61 = vor.u32 %v10193_v52, %v7557_v54  ;;  %v7443_v50 = vld [vmem:[%s15523_s5 + $0x400] sm:$0xf]  ;;  %v10166_v51 = vld [vmem:[%s15523_s5 + $0x404] sm:$0xf0]  ;;  %v1896_v52 = vrot.slane %v1877_v31, 4  ;;  %v7524_v55 = vor.u32 %v10186_v42, %v7523_v47 }
 0x27f   :  { %v7444_v3 = vor.u32 %v10166_v51, %v7443_v50 }
 0x280   :  { %1820 = vmatpush.bf16.msra.mxu0 %v7284_v9  ;;  %1848 = vmatpush.bf16.msra.mxu2 %v7288_v10  ;;  %v7467_v9 = vld [vmem:[%s15523_s5 + $0x430] sm:$0xf]  ;;  %v10172_v10 = vld [vmem:[%s15523_s5 + $0x434] sm:$0xf0] }
 0x281   :  { %v7468_v19 = vor.u32 %v10172_v10, %v7467_v9  ;;  %v7507_v10 = vld [vmem:[%s15523_s5 + $0x480] sm:$0xf] }
 0x282   :  { %1833 = vmatpush.bf16.msra.mxu1 %v7356_v21  ;;  %1861 = vmatpush.bf16.msra.mxu3 %v7360_v22  ;;  %v7459_v21 = vld [vmem:[%s15523_s5 + $0x420] sm:$0xf]  ;;  %v10170_v22 = vld [vmem:[%s15523_s5 + $0x424] sm:$0xf0] }
 0x283   :  { %1821 = vmatmul.bf16.vlgmr.msra.gmra.mxu0 %v1618_v35  ;;  %1849 = vmatmul.bf16.vlgmr.msra.gmra.mxu2 %v1618_v35  ;;  %v7460_v32 = vor.u32 %v10170_v22, %v7459_v21  ;;  %v10168_v35 = vld [vmem:[%s15523_s5 + $0x414] sm:$0xf0] }
 0x284   :  { %2101 = vmatpush.bf16.msrb.mxu0 %v7500_v15  ;;  %2129 = vmatpush.bf16.msrb.mxu2 %v7504_v16  ;;  %v7539_v15 = vld [vmem:[%s15523_s5 + $0x4c0] sm:$0xf]  ;;  %v10190_v16 = vld [vmem:[%s15523_s5 + $0x4c4] sm:$0xf0]  ;;  %v7452_v48 = vor.u32 %v10168_v35, %v7451_v34 }
 0x285   :  { %v7540_v23 = vor.u32 %v10190_v16, %v7539_v15  ;;  %v7509_v15 = vld [vmem:[%s15523_s5 + $0x488] sm:$0xf0] }
 0x286   :  { %1834 = vmatpush.bf16.msra.mxu1 %v7348_v38  ;;  %1862 = vmatpush.bf16.msra.mxu3 %v7352_v39  ;;  %v7536_v38 = vor.u32 %v10187_v29, %v7533_v30  ;;  %v10167_v39 = vld [vmem:[%s15523_s5 + $0x414] sm:$0xf]  ;;  %v7512_v21 = vor.u32 %v10181_v14, %v7509_v15  ;;  %v7670_v15 = vld [vmem:[%s15523_s5 + $0x648] sm:$0xf0] }
 0x287   :  { %v7456_v49 = vor.u32 %v10167_v39, %v7453_v40  ;;  %v7694_v40 = vld [vmem:[%s15523_s5 + $0x678] sm:$0xf0] }
 0x288   :  { %2102 = vmatpush.bf16.msrb.mxu0 %v7492_v36  ;;  %2130 = vmatpush.bf16.msrb.mxu2 %v7496_v37  ;;  %v1879_v36 = vld [vmem:[#allocation2 + $0x18] sm:$0xf]  ;;  %v7532_v37 = vor.u32 %v10188_v28, %v7531_v27 }
 0x289   :  { %1835 = vmatmul.bf16.vlgmr.msra.gmra.mxu1 %v1619_v63  ;;  %1863 = vmatmul.bf16.vlgmr.msra.gmra.mxu3 %v1619_v63  ;;  %v1897_v54 = vrot.slane %v1879_v36, 4  ;;  %v10184_v63 = vld [vmem:[%s15523_s5 + $0x494] sm:$0xf0]  ;;  %v7692_v36 = vld [vmem:[%s15523_s5 + $0x670] sm:$0xf] }
 0x28a   :  { %2115 = vmatpush.bf16.msrb.mxu1 %v7564_v44  ;;  %2143 = vmatpush.bf16.msrb.mxu3 %v7568_v45  ;;  %v7525_v44 = vld [vmem:[%s15523_s5 + $0x4a8] sm:$0xf0]  ;;  %v1873_v45 = vld [vmem:[#allocation2 + $0x30] sm:$0xf0] }
 0x28b   :  { %v1890_v1 = vrot.slane %v1873_v45, 4  ;;  %v1898_v9 = vsel %vm1889_vm15, %v1896_v52, %v1897_v54  ;;  %v10242_v45 = vld [vmem:[%s15523_s5 + $0x664] sm:$0xf0]  ;;  %v7756_v52 = vld [vmem:[%s15523_s5 + $0x6f0] sm:$0xf] }
 0x28c   :  { %2103 = vmatpush.bf16.msrb.mxu0 %v7484_v56  ;;  %2131 = vmatpush.bf16.msrb.mxu2 %v7488_v58  ;;  %v7528_v56 = vor.u32 %v10185_v43, %v7525_v44  ;;  %v10165_v58 = vld [vmem:[%s15523_s5 + $0x404] sm:$0xf]  ;;  %v7684_v44 = vld [vmem:[%s15523_s5 + $0x660] sm:$0xf]  ;;  %v10260_v54 = vld [vmem:[%s15523_s5 + $0x6f4] sm:$0xf0] }
 0x28d   :  { %v7448_v4 = vor.u32 %v10165_v58, %v7445_v59  ;;  %v1892_v16 = vsel %vm1889_vm15, %v1890_v1, %v1891_v60  ;;  %v7758_v58 = vld [vmem:[%s15523_s5 + $0x6f8] sm:$0xf0]  ;;  %v7676_v59 = vld [vmem:[%s15523_s5 + $0x650] sm:$0xf]  ;;  %v10239_v1 = vld [vmem:[%s15523_s5 + $0x654] sm:$0xf] }
 0x28e   :  { %2116 = vmatpush.bf16.msrb.mxu1 %v7556_v0  ;;  %2144 = vmatpush.bf16.msrb.mxu3 %v7560_v61  ;;  %v10183_v0 = vld [vmem:[%s15523_s5 + $0x494] sm:$0xf]  ;;  %v7517_v61 = vld [vmem:[%s15523_s5 + $0x498] sm:$0xf0] }
 0x28f   :  { %v7678_v60 = vld [vmem:[%s15523_s5 + $0x658] sm:$0xf0] }
 0x290   :  { %2104 = vmatpush.bf16.msrb.mxu0 %v7476_v7  ;;  %2132 = vmatpush.bf16.msrb.mxu2 %v7480_v8  ;;  %v7516_v7 = vor.u32 %v10184_v63, %v7515_v62  ;;  %v7520_v8 = vor.u32 %v10183_v0, %v7517_v61  ;;  %v10240_v62 = vld [vmem:[%s15523_s5 + $0x654] sm:$0xf0] }
 0x291   :  { %v7677_v61 = vor.u32 %v10240_v62, %v7676_v59  ;;  %v7724_v59 = vld [vmem:[%s15523_s5 + $0x6b0] sm:$0xf]  ;;  %v10252_v62 = vld [vmem:[%s15523_s5 + $0x6b4] sm:$0xf0] }
 0x292   :  { %2117 = vmatpush.bf16.msrb.mxu1 %v7548_v11  ;;  %2145 = vmatpush.bf16.msrb.mxu3 %v7552_v12  ;;  %v1874_v11 = vld [vmem:[#allocation2] sm:$0xf0]  ;;  %v1876_v12 = vld [vmem:[#allocation2 + $0x10] sm:$0xf] }
 0x293   :  { %v1893_v22 = vrot.slane %v1874_v11, 4  ;;  %v7668_v11 = vld [vmem:[%s15523_s5 + $0x640] sm:$0xf] }
 0x294   :  { %2105 = vmatpush.bf16.msrb.mxu0 %v7468_v19  ;;  %2133 = vmatpush.bf16.msrb.mxu2 %v7472_v20  ;;  %v1906_v19 = vpack.c.bf16 %v1898_v9, %v1892_v16  ;;  %v7508_v20 = vor.u32 %v10182_v13, %v7507_v10  ;;  %v10237_v13 = vld [vmem:[%s15523_s5 + $0x644] sm:$0xf]  ;;  %v7740_v16 = vld [vmem:[%s15523_s5 + $0x6d0] sm:$0xf] }
 0x296   :  { %2118 = vmatpush.bf16.msrb.mxu1 %v7540_v23  ;;  %2146 = vmatpush.bf16.msrb.mxu3 %v7544_v24  ;;  %v1894_v23 = vrot.slane %v1876_v12, 4  ;;  %v1901_v24 = vsel %vm1889_vm15, %v1899_v17, %v1900_v18  ;;  %v10238_v12 = vld [vmem:[%s15523_s5 + $0x644] sm:$0xf0]  ;;  %v10256_v17 = vld [vmem:[%s15523_s5 + $0x6d4] sm:$0xf0] }
 0x297   :  { %v7669_v14 = vor.u32 %v10238_v12, %v7668_v11 }
 0x298   :  { %2106 = vmatpush.bf16.msrb.mxu0 %v7460_v32  ;;  %2134 = vmatpush.bf16.msrb.mxu2 %v7464_v33  ;;  %v1895_v25 = vsel %vm1889_vm15, %v1893_v22, %v1894_v23  ;;  %v7742_v22 = vld [vmem:[%s15523_s5 + $0x6d8] sm:$0xf0]  ;;  %v7660_v23 = vld [vmem:[%s15523_s5 + $0x630] sm:$0xf] }
 0x299   :  { %v1907_v26 = vpack.c.bf16 %v1901_v24, %v1895_v25  ;;  %v10236_v25 = vld [vmem:[%s15523_s5 + $0x634] sm:$0xf0] }
 0x29a   :  { %2119 = vmatpush.bf16.msrb.mxu1 %v7532_v37  ;;  %2147 = vmatpush.bf16.msrb.mxu3 %v7536_v38  ;;  %v10244_v37 = vld [vmem:[%s15523_s5 + $0x674] sm:$0xf0]  ;;  %v10243_v38 = vld [vmem:[%s15523_s5 + $0x674] sm:$0xf] }
 0x29b   :  { %v7693_v39 = vor.u32 %v10244_v37, %v7692_v36  ;;  %v7697_v42 = vor.u32 %v10243_v38, %v7694_v40  ;;  %v7662_v36 = vld [vmem:[%s15523_s5 + $0x638] sm:$0xf0]  ;;  %v7661_v38 = vor.u32 %v10236_v25, %v7660_v23  ;;  %v7732_v40 = vld [vmem:[%s15523_s5 + $0x6c0] sm:$0xf]  ;;  %v7718_v23 = vld [vmem:[%s15523_s5 + $0x6a8] sm:$0xf0] }
 0x29c   :  { %2107 = vmatpush.bf16.msrb.mxu0 %v7452_v48  ;;  %2135 = vmatpush.bf16.msrb.mxu2 %v7456_v49  ;;  %v7685_v48 = vor.u32 %v10242_v45, %v7684_v44  ;;  %v7686_v49 = vld [vmem:[%s15523_s5 + $0x668] sm:$0xf0]  ;;  %v10253_v44 = vld [vmem:[%s15523_s5 + $0x6c4] sm:$0xf]  ;;  %v10230_v25 = vld [vmem:[%s15523_s5 + $0x604] sm:$0xf0] }
 0x29d   :  { %v7689_v51 = vor.u32 %v10241_v46, %v7686_v49  ;;  %v7734_v46 = vld [vmem:[%s15523_s5 + $0x6c8] sm:$0xf0] }
 0x29e   :  { %2120 = vmatpush.bf16.msrb.mxu1 %v7524_v55  ;;  %2148 = vmatpush.bf16.msrb.mxu3 %v7528_v56  ;;  %v10259_v55 = vld [vmem:[%s15523_s5 + $0x6f4] sm:$0xf]  ;;  %v7757_v56 = vor.u32 %v10260_v54, %v7756_v52  ;;  %v7737_v49 = vor.u32 %v10253_v44, %v7734_v46  ;;  %v10234_v52 = vld [vmem:[%s15523_s5 + $0x624] sm:$0xf0]  ;;  %v10233_v54 = vld [vmem:[%s15523_s5 + $0x624] sm:$0xf] }
 0x29f   :  { %v7761_v0 = vor.u32 %v10259_v55, %v7758_v58  ;;  %v7654_v58 = vld [vmem:[%s15523_s5 + $0x628] sm:$0xf0]  ;;  %v10211_v46 = vld [vmem:[%s15523_s5 + $0x574] sm:$0xf] }
 0x2a0   :  { %2108 = vmatpush.bf16.msrb.mxu0 %v7444_v3  ;;  %2136 = vmatpush.bf16.msrb.mxu2 %v7448_v4  ;;  %v7748_v3 = vld [vmem:[%s15523_s5 + $0x6e0] sm:$0xf]  ;;  %v7681_v4 = vor.u32 %v10239_v1, %v7678_v60  ;;  %v10251_v1 = vld [vmem:[%s15523_s5 + $0x6b4] sm:$0xf]  ;;  %v7726_v60 = vld [vmem:[%s15523_s5 + $0x6b8] sm:$0xf0] }
 0x2a1   :  { %v7749_v9 = vor.u32 %v10258_v5, %v7748_v3  ;;  %v7644_v3 = vld [vmem:[%s15523_s5 + $0x610] sm:$0xf]  ;;  %v10232_v5 = vld [vmem:[%s15523_s5 + $0x614] sm:$0xf0] }
 0x2a2   :  { %2121 = vmatpush.bf16.msrb.mxu1 %v7516_v7  ;;  %2149 = vmatpush.bf16.msrb.mxu3 %v7520_v8  ;;  %v7750_v7 = vld [vmem:[%s15523_s5 + $0x6e8] sm:$0xf0] }
 0x2a3   :  { %2109 = vmatmul.bf16.vlgmr.msrb.gmra.mxu0 %v1906_v19  ;;  %2137 = vmatmul.bf16.vlgmr.msrb.gmra.mxu2 %v1906_v19  ;;  %v7753_v10 = vor.u32 %v10257_v6, %v7750_v7  ;;  %v7673_v19 = vor.u32 %v10237_v13, %v7670_v15  ;;  %v10231_v6 = vld [vmem:[%s15523_s5 + $0x614] sm:$0xf]  ;;  %v7646_v7 = vld [vmem:[%s15523_s5 + $0x618] sm:$0xf0] }
 0x2a4   :  { %2462 = vmatpush.bf16.msra.mxu0 %v7693_v39  ;;  %2490 = vmatpush.bf16.msra.mxu2 %v7697_v42  ;;  %v10254_v42 = vld [vmem:[%s15523_s5 + $0x6c4] sm:$0xf0]  ;;  %v7649_v11 = vor.u32 %v10231_v6, %v7646_v7 }
 0x2a5   :  { %v7733_v45 = vor.u32 %v10254_v42, %v7732_v40  ;;  %v7638_v40 = vld [vmem:[%s15523_s5 + $0x608] sm:$0xf0]  ;;  %v7820_v42 = vld [vmem:[%s15523_s5 + $0x570] sm:$0xf] }
 0x2a6   :  { %2122 = vmatpush.bf16.msrb.mxu1 %v7508_v20  ;;  %2150 = vmatpush.bf16.msrb.mxu3 %v7512_v21  ;;  %v7741_v20 = vor.u32 %v10256_v17, %v7740_v16  ;;  %v10255_v21 = vld [vmem:[%s15523_s5 + $0x6d4] sm:$0xf] }
 0x2a7   :  { %v7745_v24 = vor.u32 %v10255_v21, %v7742_v22  ;;  %v10249_v21 = vld [vmem:[%s15523_s5 + $0x6a4] sm:$0xf] }
 0x2a8   :  { %2463 = vmatpush.bf16.msra.mxu0 %v7685_v48  ;;  %2491 = vmatpush.bf16.msra.mxu2 %v7689_v51  ;;  %v7652_v51 = vld [vmem:[%s15523_s5 + $0x620] sm:$0xf] }
 0x2a9   :  { %2123 = vmatmul.bf16.vlgmr.msrb.gmra.mxu1 %v1907_v26  ;;  %2151 = vmatmul.bf16.vlgmr.msrb.gmra.mxu3 %v1907_v26  ;;  %v10235_v26 = vld [vmem:[%s15523_s5 + $0x634] sm:$0xf] }
 0x2aa   :  { %2476 = vmatpush.bf16.msra.mxu1 %v7757_v56  ;;  %2504 = vmatpush.bf16.msra.mxu3 %v7761_v0  ;;  %v7665_v39 = vor.u32 %v10235_v26, %v7662_v36  ;;  %v7653_v56 = vor.u32 %v10234_v52, %v7652_v51  ;;  %v7657_v0 = vor.u32 %v10233_v54, %v7654_v58  ;;  %v7708_v54 = vld [vmem:[%s15523_s5 + $0x690] sm:$0xf]  ;;  %v10247_v58 = vld [vmem:[%s15523_s5 + $0x694] sm:$0xf] }
 0x2ab   :  { %v7721_v36 = vor.u32 %v10249_v21, %v7718_v23  ;;  %v7702_v21 = vld [vmem:[%s15523_s5 + $0x688] sm:$0xf0]  ;;  %v10228_v23 = vld [vmem:[%s15523_s5 + $0x5f4] sm:$0xf0] }
 0x2ac   :  { %2464 = vmatpush.bf16.msra.mxu0 %v7677_v61  ;;  %2492 = vmatpush.bf16.msra.mxu2 %v7681_v4  ;;  %v7725_v61 = vor.u32 %v10252_v62, %v7724_v59  ;;  %v7729_v4 = vor.u32 %v10251_v1, %v7726_v60  ;;  %v7710_v62 = vld [vmem:[%s15523_s5 + $0x698] sm:$0xf0]  ;;  %v7812_v1 = vld [vmem:[%s15523_s5 + $0x560] sm:$0xf]  ;;  %v10210_v60 = vld [vmem:[%s15523_s5 + $0x564] sm:$0xf0] }
 0x2ae   :  { %2477 = vmatpush.bf16.msra.mxu1 %v7749_v9  ;;  %2505 = vmatpush.bf16.msra.mxu3 %v7753_v10  ;;  %v7645_v9 = vor.u32 %v10232_v5, %v7644_v3  ;;  %v10209_v3 = vld [vmem:[%s15523_s5 + $0x564] sm:$0xf]  ;;  %v7814_v5 = vld [vmem:[%s15523_s5 + $0x568] sm:$0xf0] }
 0x2af   :  { %v7817_v7 = vor.u32 %v10209_v3, %v7814_v5  ;;  %v10206_v3 = vld [vmem:[%s15523_s5 + $0x544] sm:$0xf0] }
 0x2b0   :  { %2465 = vmatpush.bf16.msra.mxu0 %v7669_v14  ;;  %2493 = vmatpush.bf16.msra.mxu2 %v7673_v19  ;;  %v7716_v19 = vld [vmem:[%s15523_s5 + $0x6a0] sm:$0xf] }
 0x2b2   :  { %2478 = vmatpush.bf16.msra.mxu1 %v7741_v20  ;;  %2506 = vmatpush.bf16.msra.mxu3 %v7745_v24  ;;  %v10250_v20 = vld [vmem:[%s15523_s5 + $0x6a4] sm:$0xf0]  ;;  %v7636_v24 = vld [vmem:[%s15523_s5 + $0x600] sm:$0xf] }
 0x2b3   :  { %v7717_v22 = vor.u32 %v10250_v20, %v7716_v19  ;;  %v10245_v19 = vld [vmem:[%s15523_s5 + $0x684] sm:$0xf] }
 0x2b4   :  { %2466 = vmatpush.bf16.msra.mxu0 %v7661_v38  ;;  %2494 = vmatpush.bf16.msra.mxu2 %v7665_v39  ;;  %v7637_v38 = vor.u32 %v10230_v25, %v7636_v24  ;;  %v10229_v39 = vld [vmem:[%s15523_s5 + $0x604] sm:$0xf]  ;;  %v7705_v25 = vor.u32 %v10245_v19, %v7702_v21  ;;  %v7870_v21 = vld [vmem:[%s15523_s5 + $0x5d8] sm:$0xf0] }
 0x2b5   :  { %v7641_v44 = vor.u32 %v10229_v39, %v7638_v40  ;;  %v7886_v39 = vld [vmem:[%s15523_s5 + $0x5f8] sm:$0xf0]  ;;  %v7804_v40 = vld [vmem:[%s15523_s5 + $0x550] sm:$0xf] }
 0x2b6   :  { %2479 = vmatpush.bf16.msra.mxu1 %v7733_v45  ;;  %2507 = vmatpush.bf16.msra.mxu3 %v7737_v49  ;;  %v10212_v45 = vld [vmem:[%s15523_s5 + $0x574] sm:$0xf0]  ;;  %v7822_v49 = vld [vmem:[%s15523_s5 + $0x578] sm:$0xf0] }
 0x2b7   :  { %v7821_v51 = vor.u32 %v10212_v45, %v7820_v42  ;;  %v7825_v52 = vor.u32 %v10211_v46, %v7822_v49  ;;  %v10207_v45 = vld [vmem:[%s15523_s5 + $0x554] sm:$0xf]  ;;  %v7806_v46 = vld [vmem:[%s15523_s5 + $0x558] sm:$0xf0] }
 0x2b8   :  { %2467 = vmatpush.bf16.msra.mxu0 %v7653_v56  ;;  %2495 = vmatpush.bf16.msra.mxu2 %v7657_v0  ;;  %v10248_v56 = vld [vmem:[%s15523_s5 + $0x694] sm:$0xf0] }
 0x2b9   :  { %v7709_v59 = vor.u32 %v10248_v56, %v7708_v54  ;;  %v7876_v54 = vld [vmem:[%s15523_s5 + $0x5e0] sm:$0xf]  ;;  %v10226_v56 = vld [vmem:[%s15523_s5 + $0x5e4] sm:$0xf0] }
 0x2ba   :  { %2480 = vmatpush.bf16.msra.mxu1 %v7725_v61  ;;  %2508 = vmatpush.bf16.msra.mxu3 %v7729_v4  ;;  %v7713_v61 = vor.u32 %v10247_v58, %v7710_v62  ;;  %v7813_v4 = vor.u32 %v10210_v60, %v7812_v1  ;;  %v10225_v58 = vld [vmem:[%s15523_s5 + $0x5e4] sm:$0xf]  ;;  %v7877_v62 = vor.u32 %v10226_v56, %v7876_v54  ;;  %v7796_v60 = vld [vmem:[%s15523_s5 + $0x540] sm:$0xf] }
 0x2bb   :  { %v7797_v5 = vor.u32 %v10206_v3, %v7796_v60 }
 0x2bc   :  { %2468 = vmatpush.bf16.msra.mxu0 %v7645_v9  ;;  %2496 = vmatpush.bf16.msra.mxu2 %v7649_v11  ;;  %v7700_v9 = vld [vmem:[%s15523_s5 + $0x680] sm:$0xf]  ;;  %v10246_v11 = vld [vmem:[%s15523_s5 + $0x684] sm:$0xf0] }
 0x2bd   :  { %v7701_v20 = vor.u32 %v10246_v11, %v7700_v9  ;;  %v7868_v9 = vld [vmem:[%s15523_s5 + $0x5d0] sm:$0xf]  ;;  %v10224_v11 = vld [vmem:[%s15523_s5 + $0x5d4] sm:$0xf0] }
 0x2be   :  { %2481 = vmatpush.bf16.msra.mxu1 %v7717_v22  ;;  %2509 = vmatpush.bf16.msra.mxu3 %v7721_v36  ;;  %v7884_v22 = vld [vmem:[%s15523_s5 + $0x5f0] sm:$0xf] }
 0x2bf   :  { %v7885_v36 = vor.u32 %v10228_v23, %v7884_v22  ;;  %v7788_v22 = vld [vmem:[%s15523_s5 + $0x530] sm:$0xf] }
 0x2c0   :  { %v12247_v27 = vpop.f32.mrf.mxu0  ;;  %2469 = vmatpush.bf16.msra.mxu0 %v7637_v38  ;;  %2497 = vmatpush.bf16.msra.mxu2 %v7641_v44  ;;  %v10227_v38 = vld [vmem:[%s15523_s5 + $0x5f4] sm:$0xf]  ;;  %v10208_v44 = vld [vmem:[%s15523_s5 + $0x554] sm:$0xf0] }
 0x2c1   :  { %v7889_v42 = vor.u32 %v10227_v38, %v7886_v39  ;;  %v10204_v39 = vld [vmem:[%s15523_s5 + $0x534] sm:$0xf0] }
 0x2c2   :  { %2482 = vmatpush.bf16.msra.mxu1 %v7709_v59  ;;  %2510 = vmatpush.bf16.msra.mxu3 %v7713_v61  ;;  %v7878_v61 = vld [vmem:[%s15523_s5 + $0x5e8] sm:$0xf0] }
 0x2c3   :  { %v7881_v1 = vor.u32 %v10225_v58, %v7878_v61  ;;  %v10201_v61 = vld [vmem:[%s15523_s5 + $0x524] sm:$0xf] }
 0x2c4   :  { %2678 = vmatpush.bf16.msrb.mxu0 %v7821_v51  ;;  %2706 = vmatpush.bf16.msrb.mxu2 %v7825_v52  ;;  %v7805_v51 = vor.u32 %v10208_v44, %v7804_v40  ;;  %v7809_v52 = vor.u32 %v10207_v45, %v7806_v46  ;;  %v10203_v40 = vld [vmem:[%s15523_s5 + $0x534] sm:$0xf]  ;;  %v7860_v44 = vld [vmem:[%s15523_s5 + $0x5c0] sm:$0xf]  ;;  %v10222_v45 = vld [vmem:[%s15523_s5 + $0x5c4] sm:$0xf0] }
 0x2c5   :  { %v10221_v46 = vld [vmem:[%s15523_s5 + $0x5c4] sm:$0xf] }
 0x2c6   :  { %v12249_v28 = vpop.f32.mrf.mxu1  ;;  %v12251_v29 = vpop.f32.mrf.mxu2  ;;  %2483 = vmatpush.bf16.msra.mxu1 %v7701_v20  ;;  %2511 = vmatpush.bf16.msra.mxu3 %v7705_v25  ;;  %v10223_v20 = vld [vmem:[%s15523_s5 + $0x5d4] sm:$0xf] }
 0x2c7   :  { %v1049_v59 = vadd.f32 %v12249_v28, %v12247_v27  ;;  %v10205_v27 = vld [vmem:[%s15523_s5 + $0x544] sm:$0xf]  ;;  %v7873_v38 = vor.u32 %v10223_v20, %v7870_v21  ;;  %v7774_v20 = vld [vmem:[%s15523_s5 + $0x518] sm:$0xf0] }
 0x2c8   :  { %v12255_v31 = vpop.f32.mrf.mxu0  ;;  %2679 = vmatpush.bf16.msrb.mxu0 %v7813_v4  ;;  %2707 = vmatpush.bf16.msrb.mxu2 %v7817_v7  ;;  %v7798_v7 = vld [vmem:[%s15523_s5 + $0x548] sm:$0xf0] }
 0x2ca   :  { %2692 = vmatpush.bf16.msrb.mxu1 %v7885_v36  ;;  %2720 = vmatpush.bf16.msrb.mxu3 %v7889_v42  ;;  %v7790_v42 = vld [vmem:[%s15523_s5 + $0x538] sm:$0xf0] }
 0x2cc   :  { %v12253_v30 = vpop.f32.mrf.mxu3  ;;  %2680 = vmatpush.bf16.msrb.mxu0 %v7805_v51  ;;  %2708 = vmatpush.bf16.msrb.mxu2 %v7809_v52  ;;  %v7780_v51 = vld [vmem:[%s15523_s5 + $0x520] sm:$0xf]  ;;  %v10202_v52 = vld [vmem:[%s15523_s5 + $0x524] sm:$0xf0] }
 0x2cd   :  { %v1077_v23 = vadd.f32 %v12253_v30, %v12251_v29 }
 0x2ce   :  { %v12257_v32 = vpop.f32.mrf.mxu1  ;;  %v12259_v33 = vpop.f32.mrf.mxu2  ;;  %2693 = vmatpush.bf16.msrb.mxu1 %v7877_v62  ;;  %2721 = vmatpush.bf16.msrb.mxu3 %v7881_v1  ;;  %v7861_v62 = vor.u32 %v10222_v45, %v7860_v44  ;;  %v7782_v1 = vld [vmem:[%s15523_s5 + $0x528] sm:$0xf0]  ;;  %v10197_v45 = vld [vmem:[%s15523_s5 + $0x504] sm:$0xf] }
 0x2cf   :  { %v1051_v29 = vadd.f32 %v12257_v32, %v12255_v31  ;;  %v7862_v32 = vld [vmem:[%s15523_s5 + $0x5c8] sm:$0xf0] }
 0x2d0   :  { %v12263_v35 = vpop.f32.mrf.mxu0  ;;  %2681 = vmatpush.bf16.msrb.mxu0 %v7797_v5  ;;  %v10219_v5 = vld [vmem:[%s15523_s5 + $0x5b4] sm:$0xf] }
 0x2d1   :  { %v1251_v28 = vadd.f32 %v12263_v35, %v1049_v59  ;;  %v12587_v35 = vld [vmem:[%s15524_s6 + $0x5] ss:$8 sm:$0x3] }
 0x2d2   :  { %2722 = vmatpush.bf16.msrb.mxu3 %v7873_v38  ;;  %v7844_v38 = vld [vmem:[%s15523_s5 + $0x5a0] sm:$0xf]  ;;  %v2165_v44 = vperm.slane %v12587_v35, 1 }
 0x2d4   :  { %v12261_v34 = vpop.f32.mrf.mxu3 }
 0x2d6   :  { %v12277_v47 = vpop.f32.mrf.mxu1  ;;  %v12279_v43 = vpop.f32.mrf.mxu2 }
 0x2d7   :  { %v1265_v25 = vadd.f32 %v12277_v47, %v1251_v28  ;;  %v1279_v54 = vadd.f32 %v12279_v43, %v1077_v23  ;;  %v2164_v43 = vperm.slane %v12587_v35, 0  ;;  %v7781_v28 = vor.u32 %v10202_v52, %v7780_v51  ;;  %v7830_v35 = vld [vmem:[%s15523_s5 + $0x588] sm:$0xf0] }
 0x2d8   :  { %v12313_v63 = vpop.f32.mrf.mxu0 }
 0x2d9   :  { %v1253_v56 = vadd.f32 %v12313_v63, %v1051_v29  ;;  %v7865_v63 = vor.u32 %v10221_v46, %v7862_v32  ;;  %v10198_v29 = vld [vmem:[%s15523_s5 + $0x504] sm:$0xf0]  ;;  %v7766_v46 = vld [vmem:[%s15523_s5 + $0x508] sm:$0xf0] }
 0x2db   :  { %2723 = vmatpush.bf16.msrb.mxu3 %v7865_v63 }
 0x2dc   :  { %v12293_v50 = vpop.f32.mrf.mxu3 }
 0x2de   :  { %v12333_v8 = vpop.f32.mrf.mxu1  ;;  %v12353_v18 = vpop.f32.mrf.mxu2 }
 0x2df   :  { %v1267_v21 = vadd.f32 %v12333_v8, %v1253_v56  ;;  %v10218_v8 = vld [vmem:[%s15523_s5 + $0x5a4] sm:$0xf0] }
 0x2e0   :  { %v12387_v48 = vpop.f32.mrf.mxu0  ;;  %v7845_v56 = vor.u32 %v10218_v8, %v7844_v38  ;;  %v7980_v38 = vld [vmem:[%s15523_s5 + $0x770] sm:$0xf]  ;;  %v10276_v8 = vld [vmem:[%s15523_s5 + $0x774] sm:$0xf0] }
 0x2e4   :  { %v12373_v37 = vpop.f32.mrf.mxu3 }
 0x2e6   :  { %v12398_v55 = vpop.f32.mrf.mxu1  ;;  %v12427_v10 = vpop.f32.mrf.mxu2 }
 0x2e7   :  { %v1549_v4 = vadd.f32 %v12398_v55, %v12387_v48  ;;  %v7801_v48 = vor.u32 %v10205_v27, %v7798_v7  ;;  %v7869_v55 = vor.u32 %v10224_v11, %v7868_v9  ;;  %v7854_v7 = vld [vmem:[%s15523_s5 + $0x5b8] sm:$0xf0]  ;;  %v7772_v9 = vld [vmem:[%s15523_s5 + $0x510] sm:$0xf]  ;;  %v1293_v11 = vadd.f32 %v12293_v50, %v1279_v54 }
 0x2e8   :  { %v12431_v13 = vpop.f32.mrf.mxu0 }
 0x2e9   :  { %2709 = vmatpush.bf16.msrb.mxu2 %v7801_v48  ;;  %v1581_v31 = vadd.f32 %v1549_v4, %v1265_v25  ;;  %2694 = vmatpush.bf16.msrb.mxu1 %v7869_v55  ;;  %v7785_v4 = vor.u32 %v10201_v61, %v7782_v1  ;;  %v10200_v48 = vld [vmem:[%s15523_s5 + $0x514] sm:$0xf0]  ;;  %v10199_v55 = vld [vmem:[%s15523_s5 + $0x514] sm:$0xf]  ;;  %v7836_v1 = vld [vmem:[%s15523_s5 + $0x590] sm:$0xf] }
 0x2ec   :  { %v12429_v12 = vpop.f32.mrf.mxu3 }
 0x2ed   :  { %v1577_v58 = vadd.f32 %v12429_v12, %v12427_v10  ;;  %v7852_v10 = vld [vmem:[%s15523_s5 + $0x5b0] sm:$0xf]  ;;  %v10220_v12 = vld [vmem:[%s15523_s5 + $0x5b4] sm:$0xf0]  ;;  %2695 = vmatpush.bf16.msrb.mxu1 %v7861_v62 }
 0x2ee   :  { %v12433_v14 = vpop.f32.mrf.mxu1  ;;  %v12435_v15 = vpop.f32.mrf.mxu2 }
 0x2ef   :  { %v1551_v27 = vadd.f32 %v12433_v14, %v12431_v13  ;;  %v1582_v23 = vadd.f32 %v1577_v58, %v1293_v11 }
 0x2f4   :  { %v12437_v16 = vpop.f32.mrf.mxu3 }
 0x2f5   :  { %v1579_v32 = vadd.f32 %v12437_v16, %v12435_v15  ;;  %v7769_v16 = vor.u32 %v10197_v45, %v7766_v46  ;;  %v7981_v45 = vor.u32 %v10276_v8, %v7980_v38  ;;  %v7948_v38 = vld [vmem:[%s15523_s5 + $0x730] sm:$0xf]  ;;  %v10268_v8 = vld [vmem:[%s15523_s5 + $0x734] sm:$0xf0] }
 0x300   :  { %v12439_v17 = vpop.f32.mrf.mxu0 }
 0x306   :  { %v12459_v26 = vpop.f32.mrf.mxu1  ;;  %v12491_v0 = vpop.f32.mrf.mxu2 }
 0x307   :  { %v1837_v36 = vadd.f32 %v12459_v26, %v12439_v17  ;;  %v7789_v17 = vor.u32 %v10204_v39, %v7788_v22  ;;  %v7793_v26 = vor.u32 %v10203_v40, %v7790_v42  ;;  %v7777_v39 = vor.u32 %v10199_v55, %v7774_v20  ;;  %v7846_v40 = vld [vmem:[%s15523_s5 + $0x5a8] sm:$0xf0]  ;;  %v7764_v42 = vld [vmem:[%s15523_s5 + $0x500] sm:$0xf] }
 0x308   :  { %v12525_v24 = vpop.f32.mrf.mxu0  ;;  %v7765_v15 = vor.u32 %v10198_v29, %v7764_v42  ;;  %v7982_v42 = vld [vmem:[%s15523_s5 + $0x778] sm:$0xf0] }
 0x309   :  { %v1869_v60 = vadd.f32 %v1837_v36, %v1581_v31  ;;  %2682 = vmatpush.bf16.msrb.mxu0 %v7789_v17  ;;  %2710 = vmatpush.bf16.msrb.mxu2 %v7793_v26  ;;  %v7857_v36 = vor.u32 %v10219_v5, %v7854_v7 }
 0x30b   :  { %2724 = vmatpush.bf16.msrb.mxu3 %v7857_v36 }
 0x30c   :  { %v12505_v6 = vpop.f32.mrf.mxu3 }
 0x30d   :  { %v1865_v13 = vadd.f32 %v12505_v6, %v12491_v0  ;;  %v7853_v0 = vor.u32 %v10220_v12, %v7852_v10  ;;  %v1079_v6 = vadd.f32 %v12261_v34, %v12259_v33  ;;  %2683 = vmatpush.bf16.msrb.mxu0 %v7781_v28  ;;  %2711 = vmatpush.bf16.msrb.mxu2 %v7785_v4 }
 0x30e   :  { %v12545_v49 = vpop.f32.mrf.mxu1  ;;  %v12582_v19 = vpop.f32.mrf.mxu2  ;;  %v7773_v34 = vor.u32 %v10200_v48, %v7772_v9 }
 0x30f   :  { %v1839_v50 = vadd.f32 %v12545_v49, %v12525_v24  ;;  %v10217_v24 = vld [vmem:[%s15523_s5 + $0x5a4] sm:$0xf]  ;;  %v1583_v49 = vadd.f32 %v1551_v27, %v1267_v21  ;;  %v1281_v31 = vadd.f32 %v12353_v18, %v1079_v6  ;;  %2696 = vmatpush.bf16.msrb.mxu1 %v7853_v0  ;;  %v10216_v18 = vld [vmem:[%s15523_s5 + $0x594] sm:$0xf0] }
 0x310   :  { %v7849_v61 = vor.u32 %v10217_v24, %v7846_v40  ;;  %v7837_v28 = vor.u32 %v10216_v18, %v7836_v1  ;;  %v10275_v24 = vld [vmem:[%s15523_s5 + $0x774] sm:$0xf] }
 0x311   :  { %v1871_v51 = vadd.f32 %v1839_v50, %v1583_v49  ;;  %2684 = vmatpush.bf16.msrb.mxu0 %v7773_v34  ;;  %2712 = vmatpush.bf16.msrb.mxu2 %v7777_v39  ;;  %v1295_v63 = vadd.f32 %v12373_v37, %v1281_v31  ;;  %v7828_v37 = vld [vmem:[%s15523_s5 + $0x580] sm:$0xf]  ;;  %v7985_v46 = vor.u32 %v10275_v24, %v7982_v42  ;;  %v10291_v1 = vld [vmem:[%s15523_s5 + $0x7f4] sm:$0xf]  ;;  %v10286_v42 = vld [vmem:[%s15523_s5 + $0x7c4] sm:$0xf0] }
 0x312   :  { %2725 = vmatpush.bf16.msrb.mxu3 %v7849_v61  ;;  %v7972_v31 = vld [vmem:[%s15523_s5 + $0x760] sm:$0xf]  ;;  %v10267_v24 = vld [vmem:[%s15523_s5 + $0x734] sm:$0xf] }
 0x313   :  { %2697 = vmatpush.bf16.msrb.mxu1 %v7845_v56  ;;  %v1584_v4 = vadd.f32 %v1579_v32, %v1295_v63  ;;  %v10274_v32 = vld [vmem:[%s15523_s5 + $0x764] sm:$0xf0]  ;;  %v8044_v56 = vld [vmem:[%s15523_s5 + $0x7f0] sm:$0xf] }
 0x314   :  { %v12614_v30 = vpop.f32.mrf.mxu3 }
 0x315   :  { %v1867_v10 = vadd.f32 %v12614_v30, %v12582_v19  ;;  %v10214_v19 = vld [vmem:[%s15523_s5 + $0x584] sm:$0xf0]  ;;  %2685 = vmatpush.bf16.msrb.mxu0 %v7765_v15  ;;  %2713 = vmatpush.bf16.msrb.mxu2 %v7769_v16  ;;  %v8046_v16 = vld [vmem:[%s15523_s5 + $0x7f8] sm:$0xf0] }
 0x316   :  { %v7829_v20 = vor.u32 %v10214_v19, %v7828_v37  ;;  %v8036_v37 = vld [vmem:[%s15523_s5 + $0x7e0] sm:$0xf] }
 0x317   :  { %2698 = vmatpush.bf16.msrb.mxu1 %v7837_v28  ;;  %v7966_v28 = vld [vmem:[%s15523_s5 + $0x758] sm:$0xf0] }
 0x31b   :  { %2699 = vmatpush.bf16.msrb.mxu1 %v7829_v20  ;;  %v7958_v20 = vld [vmem:[%s15523_s5 + $0x748] sm:$0xf0] }
 0x320   :  { %v2110_v47 = vpop.f32.mrf.mxu0 }
 0x326   :  { %v2124_v59 = vpop.f32.mrf.mxu1  ;;  %v2138_v22 = vpop.f32.mrf.mxu2 }
 0x327   :  { %v2125_v3 = vadd.f32 %v2124_v59, %v2110_v47  ;;  %v1870_v47 = vadd.f32 %v1865_v13, %v1582_v23  ;;  %v10213_v13 = vld [vmem:[%s15523_s5 + $0x584] sm:$0xf] }
 0x328   :  { %v2112_v52 = vpop.f32.mrf.mxu0 }
 0x329   :  { %v2157_v14 = vadd.f32 %v2125_v3, %v1869_v60  ;;  %v10215_v60 = vld [vmem:[%s15523_s5 + $0x594] sm:$0xf]  ;;  %v7838_v3 = vld [vmem:[%s15523_s5 + $0x598] sm:$0xf0] }
 0x32a   :  { %v7841_v9 = vor.u32 %v10215_v60, %v7838_v3  ;;  %v7973_v60 = vor.u32 %v10274_v32, %v7972_v31  ;;  %v10266_v31 = vld [vmem:[%s15523_s5 + $0x724] sm:$0xf0]  ;;  %v10265_v32 = vld [vmem:[%s15523_s5 + $0x724] sm:$0xf] }
 0x32b   :  { %v2168_v25 = vadd.f32 %v2164_v43, %v2157_v14 }
 0x32c   :  { %v2152_v33 = vpop.f32.mrf.mxu3  ;;  %2726 = vmatpush.bf16.msrb.mxu3 %v7841_v9  ;;  %v8049_v9 = vor.u32 %v10291_v1, %v8046_v16  ;;  %v7932_v16 = vld [vmem:[%s15523_s5 + $0x710] sm:$0xf] }
 0x32d   :  { %v2172_v17 = vmax.f32 %v2168_v25, 0.0  ;;  %v2153_v26 = vadd.f32 %v2152_v33, %v2138_v22  ;;  %v7833_v22 = vor.u32 %v10213_v13, %v7830_v35  ;;  %v8038_v13 = vld [vmem:[%s15523_s5 + $0x7e8] sm:$0xf0] }
 0x32e   :  { %v2126_v54 = vpop.f32.mrf.mxu1  ;;  %v2140_v30 = vpop.f32.mrf.mxu2 }
 0x32f   :  { %v2180_v58 = vrot.slane %v2172_v17, 6  ;;  %v2158_v59 = vadd.f32 %v2153_v26, %v1870_v47  ;;  %v2127_v62 = vadd.f32 %v2126_v54, %v2112_v52  ;;  %v7974_v54 = vld [vmem:[%s15523_s5 + $0x768] sm:$0xf0] }
 0x330   :  { %2727 = vmatpush.bf16.msrb.mxu3 %v7833_v22  ;;  %v8028_v22 = vld [vmem:[%s15523_s5 + $0x7d0] sm:$0xf] }
 0x331   :  { %2188 = vst [vmem:[#allocation2 + $0x30] sm:$0xfc] %v2180_v58  ;;  %v2169_v12 = vadd.f32 %v2165_v44, %v2158_v59  ;;  %v2159_v27 = vadd.f32 %v2127_v62, %v1871_v51  ;;  %v10273_v51 = vld [vmem:[%s15523_s5 + $0x764] sm:$0xf] }
 0x332   :  { %2190 = vst [vmem:[#allocation2 + $0x8] sm:$0x3] %v2180_v58  ;;  %v10292_v58 = vld [vmem:[%s15523_s5 + $0x7f4] sm:$0xf0]  ;;  %v7977_v3 = vor.u32 %v10273_v51, %v7974_v54  ;;  %v7942_v51 = vld [vmem:[%s15523_s5 + $0x728] sm:$0xf0] }
 0x333   :  { %v2173_v5 = vmax.f32 %v2169_v12, 0.0  ;;  %v2170_v7 = vadd.f32 %v2164_v43, %v2159_v27  ;;  %v1872_v43 = vadd.f32 %v1867_v10, %v1584_v4  ;;  %v7964_v10 = vld [vmem:[%s15523_s5 + $0x750] sm:$0xf]  ;;  %v10272_v12 = vld [vmem:[%s15523_s5 + $0x754] sm:$0xf0]  ;;  %v7945_v1 = vor.u32 %v10265_v32, %v7942_v51 }
 0x334   :  { %v2154_v11 = vpop.f32.mrf.mxu3  ;;  %v10271_v27 = vld [vmem:[%s15523_s5 + $0x754] sm:$0xf]  ;;  %v7965_v35 = vor.u32 %v10272_v12, %v7964_v10  ;;  %v8004_v10 = vld [vmem:[%s15523_s5 + $0x7a0] sm:$0xf]  ;;  %v7990_v51 = vld [vmem:[%s15523_s5 + $0x788] sm:$0xf0] }
 0x335   :  { %v2181_v14 = vrot.slane %v2173_v5, 6  ;;  %v2174_v48 = vmax.f32 %v2170_v7, 0.0  ;;  %v2155_v55 = vadd.f32 %v2154_v11, %v2140_v30  ;;  %v8045_v7 = vor.u32 %v10292_v58, %v8044_v56  ;;  %v10290_v30 = vld [vmem:[%s15523_s5 + $0x7e4] sm:$0xf0]  ;;  %v10289_v11 = vld [vmem:[%s15523_s5 + $0x7e4] sm:$0xf] }
 0x336   :  { %v8012_v56 = vld [vmem:[%s15523_s5 + $0x7b0] sm:$0xf]  ;;  %v10284_v58 = vld [vmem:[%s15523_s5 + $0x7b4] sm:$0xf0] }
 0x337   :  { %2189 = vst [vmem:[#allocation2] sm:$0xfc] %v2181_v14  ;;  %v2182_v21 = vrot.slane %v2174_v48, 6  ;;  %v2160_v50 = vadd.f32 %v2155_v55, %v1872_v43  ;;  %v7969_v43 = vor.u32 %v10271_v27, %v7966_v28  ;;  %v10270_v48 = vld [vmem:[%s15523_s5 + $0x744] sm:$0xf0]  ;;  %v8013_v12 = vor.u32 %v10284_v58, %v8012_v56 }
 0x338   :  { %2191 = vst [vmem:[#allocation2 + $0x10] sm:$0x3] %v2181_v14  ;;  %v2235_v25 = vld [vmem:[#allocation2 + $0x30] sm:$0xfe]  ;;  %v7956_v14 = vld [vmem:[%s15523_s5 + $0x740] sm:$0xf] }
 0x339   :  { %2192 = vst [vmem:[#allocation2 + $0x28] sm:$0xfc] %v2182_v21  ;;  %v2171_v0 = vadd.f32 %v2165_v44, %v2160_v50  ;;  %v2237_v36 = vld [vmem:[#allocation2 + $0x8] sm:$0x1]  ;;  %v2251_v33 = vrot.slane %v2235_v25, 1  ;;  %v8041_v50 = vor.u32 %v10289_v11, %v8038_v13  ;;  %v7957_v25 = vor.u32 %v10270_v48, %v7956_v14 }
 0x33a   :  { %2194 = vst [vmem:[#allocation2 + $0x18] sm:$0x3] %v2182_v21  ;;  %v2252_v34 = vrot.slane %v2237_v36, 1  ;;  %v10269_v55 = vld [vmem:[%s15523_s5 + $0x744] sm:$0xf]  ;;  %v8037_v21 = vor.u32 %v10290_v30, %v8036_v37 }
 0x33b   :  { %v2175_v6 = vmax.f32 %v2171_v0, 0.0  ;;  %v10288_v0 = vld [vmem:[%s15523_s5 + $0x7d4] sm:$0xf0]  ;;  %v7961_v36 = vor.u32 %v10269_v55, %v7958_v20  ;;  %v10282_v28 = vld [vmem:[%s15523_s5 + $0x7a4] sm:$0xf0] }
 0x33c   :  { %v2253_v26 = vsel %vm813_vm12, %v2251_v33, %v2252_v34  ;;  %v8029_v33 = vor.u32 %v10288_v0, %v8028_v22  ;;  %v10262_v37 = vld [vmem:[%s15523_s5 + $0x704] sm:$0xf0]  ;;  %v7926_v30 = vld [vmem:[%s15523_s5 + $0x708] sm:$0xf0]  ;;  %v8140_v14 = vld [vmem:[%s15523_s5 + $0x870] sm:$0xf]  ;;  %v8005_v0 = vor.u32 %v10282_v28, %v8004_v10 }
 0x33d   :  { %v2183_v23 = vrot.slane %v2175_v6, 6  ;;  %v10287_v6 = vld [vmem:[%s15523_s5 + $0x7d4] sm:$0xf]  ;;  %v10308_v48 = vld [vmem:[%s15523_s5 + $0x874] sm:$0xf0] }
 0x33e   :  { %v2236_v47 = vld [vmem:[#allocation2] sm:$0xfe]  ;;  %v2734_v55 = vld [vmem:[#allocation2 + $0x30] sm:$0xfc]  ;;  %v2736_v20 = vld [vmem:[#allocation2 + $0x8] sm:$0x3] }
 0x33f   :  { %2193 = vst [vmem:[#allocation2 + $0x20] sm:$0xfc] %v2183_v23  ;;  %v2238_v17 = vld [vmem:[#allocation2 + $0x10] sm:$0x1]  ;;  %v2254_v62 = vrot.slane %v2236_v47, 1 }
 0x340   :  { %2195 = vst [vmem:[#allocation2 + $0x38] sm:$0x3] %v2183_v23  ;;  %v2239_v49 = vld [vmem:[#allocation2 + $0x28] sm:$0xfe]  ;;  %v2255_v61 = vrot.slane %v2238_v17, 1  ;;  %v2196_v17 = vld [vmem:[#allocation2 + $0x30] sm:$0xff] }
 0x341   :  { %v2241_v39 = vld [vmem:[#allocation2 + $0x18] sm:$0x1]  ;;  %v2257_v40 = vrot.slane %v2239_v49, 1  ;;  %v8030_v23 = vld [vmem:[%s15523_s5 + $0x7d8] sm:$0xf0] }
 0x342   :  { %v2258_v29 = vrot.slane %v2241_v39, 1  ;;  %v2256_v4 = vsel %vm813_vm12, %v2254_v62, %v2255_v61  ;;  %v7950_v49 = vld [vmem:[%s15523_s5 + $0x738] sm:$0xf0]  ;;  %v8033_v34 = vor.u32 %v10287_v6, %v8030_v23  ;;  %v2198_v39 = vld [vmem:[#allocation2 + $0x28] sm:$0xff]  ;;  %v2740_v13 = vld [vmem:[#allocation2 + $0x18] sm:$0x3] }
 0x343   :  { %v8022_v47 = vld [vmem:[%s15523_s5 + $0x7c8] sm:$0xf0]  ;;  %v8014_v62 = vld [vmem:[%s15523_s5 + $0x7b8] sm:$0xf0]  ;;  %v7996_v22 = vld [vmem:[%s15523_s5 + $0x790] sm:$0xf] }
 0x344   :  { %v2259_v44 = vsel %vm813_vm12, %v2257_v40, %v2258_v29  ;;  %v8020_v40 = vld [vmem:[%s15523_s5 + $0x7c0] sm:$0xf]  ;;  %v10285_v29 = vld [vmem:[%s15523_s5 + $0x7c4] sm:$0xf]  ;;  %v2738_v11 = vld [vmem:[#allocation2 + $0x28] sm:$0xfc] }
 0x345   :  { %v2267_v52 = vpack.c.bf16 %v2259_v44, %v2253_v26  ;;  %v7949_v26 = vor.u32 %v10268_v8, %v7948_v38  ;;  %v7953_v44 = vor.u32 %v10267_v24, %v7950_v49  ;;  %v8025_v54 = vor.u32 %v10285_v29, %v8022_v47  ;;  %v10280_v23 = vld [vmem:[%s15523_s5 + $0x794] sm:$0xf0]  ;;  %v7998_v8 = vld [vmem:[%s15523_s5 + $0x798] sm:$0xf0]  ;;  %v8134_v29 = vld [vmem:[%s15523_s5 + $0x868] sm:$0xf0] }
 0x346   :  { %v2240_v59 = vld [vmem:[#allocation2 + $0x20] sm:$0xfe]  ;;  %v2757_v38 = vrot.slane %v2740_v13, 2  ;;  %v2750_v24 = vrot.slane %v2734_v55, 2  ;;  %v2751_v49 = vrot.slane %v2736_v20, 2  ;;  %v8141_v47 = vor.u32 %v10308_v48, %v8140_v14 }
 0x347   :  { %2470 = vmatmul.bf16.vlgmr.msra.gmra.mxu0 %v2267_v52  ;;  %2498 = vmatmul.bf16.vlgmr.msra.gmra.mxu2 %v2267_v52  ;;  %v2242_v18 = vld [vmem:[#allocation2 + $0x38] sm:$0x1]  ;;  %v2260_v15 = vrot.slane %v2240_v59, 1  ;;  %v8021_v52 = vor.u32 %v10286_v42, %v8020_v40  ;;  %v10283_v59 = vld [vmem:[%s15523_s5 + $0x7b4] sm:$0xf] }
 0x348   :  { %2961 = vmatpush.bf16.msra.mxu0 %v7981_v45  ;;  %2989 = vmatpush.bf16.msra.mxu2 %v7985_v46  ;;  %v2261_v63 = vrot.slane %v2242_v18, 1  ;;  %v7940_v45 = vld [vmem:[%s15523_s5 + $0x720] sm:$0xf]  ;;  %v2200_v46 = vpack.c.bf16 %v2198_v39, %v2196_v17  ;;  %v8017_v27 = vor.u32 %v10283_v59, %v8014_v62  ;;  %v10306_v40 = vld [vmem:[%s15523_s5 + $0x864] sm:$0xf0]  ;;  %v2752_v62 = vsel %vm1313_vm13, %v2750_v24, %v2751_v49 }
 0x349   :  { %v7941_v61 = vor.u32 %v10266_v31, %v7940_v45  ;;  %v2197_v18 = vld [vmem:[#allocation2] sm:$0xff]  ;;  %v8204_v56 = vld [vmem:[%s15523_s5 + $0x8f0] sm:$0xf]  ;;  %v10324_v58 = vld [vmem:[%s15523_s5 + $0x8f4] sm:$0xf0] }
 0x34a   :  { %v2262_v5 = vsel %vm813_vm12, %v2260_v15, %v2261_v63  ;;  %v2199_v15 = vld [vmem:[#allocation2 + $0x20] sm:$0xff]  ;;  %v7934_v63 = vld [vmem:[%s15523_s5 + $0x718] sm:$0xf0]  ;;  %v10323_v59 = vld [vmem:[%s15523_s5 + $0x8f4] sm:$0xf] }
 0x34b   :  { %v2268_v19 = vpack.c.bf16 %v2262_v5, %v2256_v4  ;;  %v10281_v4 = vld [vmem:[%s15523_s5 + $0x7a4] sm:$0xf]  ;;  %v8006_v5 = vld [vmem:[%s15523_s5 + $0x7a8] sm:$0xf0]  ;;  %v10304_v28 = vld [vmem:[%s15523_s5 + $0x854] sm:$0xf0] }
 0x34c   :  { %2962 = vmatpush.bf16.msra.mxu0 %v7973_v60  ;;  %2990 = vmatpush.bf16.msra.mxu2 %v7977_v3  ;;  %v10264_v60 = vld [vmem:[%s15523_s5 + $0x714] sm:$0xf0]  ;;  %v10263_v3 = vld [vmem:[%s15523_s5 + $0x714] sm:$0xf]  ;;  %v8009_v6 = vor.u32 %v10281_v4, %v8006_v5  ;;  %v10305_v42 = vld [vmem:[%s15523_s5 + $0x864] sm:$0xf] }
 0x34d   :  { %2484 = vmatmul.bf16.vlgmr.msra.gmra.mxu1 %v2268_v19  ;;  %2512 = vmatmul.bf16.vlgmr.msra.gmra.mxu3 %v2268_v19  ;;  %v10261_v19 = vld [vmem:[%s15523_s5 + $0x704] sm:$0xf]  ;;  %v10303_v4 = vld [vmem:[%s15523_s5 + $0x854] sm:$0xf]  ;;  %v8126_v5 = vld [vmem:[%s15523_s5 + $0x858] sm:$0xf0] }
 0x34e   :  { %2975 = vmatpush.bf16.msra.mxu1 %v8045_v7  ;;  %3003 = vmatpush.bf16.msra.mxu3 %v8049_v9  ;;  %v2201_v7 = vpack.c.bf16 %v2199_v15, %v2197_v18  ;;  %v7924_v9 = vld [vmem:[%s15523_s5 + $0x700] sm:$0xf]  ;;  %v7929_v39 = vor.u32 %v10261_v19, %v7926_v30  ;;  %v10277_v45 = vld [vmem:[%s15523_s5 + $0x784] sm:$0xf]  ;;  %v2737_v15 = vld [vmem:[#allocation2 + $0x10] sm:$0x3]  ;;  %v8129_v14 = vor.u32 %v10303_v4, %v8126_v5 }
 0x34f   :  { %v2735_v18 = vld [vmem:[#allocation2] sm:$0xfc]  ;;  %v2754_v19 = vrot.slane %v2737_v15, 2  ;;  %v10302_v20 = vld [vmem:[%s15523_s5 + $0x844] sm:$0xf0] }
 0x350   :  { %2963 = vmatpush.bf16.msra.mxu0 %v7965_v35  ;;  %2991 = vmatpush.bf16.msra.mxu2 %v7969_v43  ;;  %v7933_v35 = vor.u32 %v10264_v60, %v7932_v16  ;;  %v7937_v43 = vor.u32 %v10263_v3, %v7934_v63  ;;  %v8137_v60 = vor.u32 %v10305_v42, %v8134_v29  ;;  %v8124_v3 = vld [vmem:[%s15523_s5 + $0x850] sm:$0xf]  ;;  %v8196_v30 = vld [vmem:[%s15523_s5 + $0x8e0] sm:$0xf]  ;;  %v10321_v13 = vld [vmem:[%s15523_s5 + $0x8e4] sm:$0xf] }
 0x351   :  { %v8116_v55 = vld [vmem:[%s15523_s5 + $0x840] sm:$0xf]  ;;  %v8092_v15 = vld [vmem:[%s15523_s5 + $0x810] sm:$0xf]  ;;  %v8166_v4 = vld [vmem:[%s15523_s5 + $0x8a8] sm:$0xf0] }
 0x352   :  { %2976 = vmatpush.bf16.msra.mxu1 %v8037_v21  ;;  %3004 = vmatpush.bf16.msra.mxu3 %v8041_v50  ;;  %v10307_v21 = vld [vmem:[%s15523_s5 + $0x874] sm:$0xf]  ;;  %v8142_v50 = vld [vmem:[%s15523_s5 + $0x878] sm:$0xf0]  ;;  %v8117_v24 = vor.u32 %v10302_v20, %v8116_v55  ;;  %v8084_v5 = vld [vmem:[%s15523_s5 + $0x800] sm:$0xf] }
 0x353   :  { %v8145_v17 = vor.u32 %v10307_v21, %v8142_v50  ;;  %v10301_v21 = vld [vmem:[%s15523_s5 + $0x844] sm:$0xf]  ;;  %v8118_v50 = vld [vmem:[%s15523_s5 + $0x848] sm:$0xf0]  ;;  %v10339_v55 = vld [vmem:[%s15523_s5 + $0x974] sm:$0xf] }
 0x354   :  { %2964 = vmatpush.bf16.msra.mxu0 %v7957_v25  ;;  %2992 = vmatpush.bf16.msra.mxu2 %v7961_v36  ;;  %v10279_v25 = vld [vmem:[%s15523_s5 + $0x794] sm:$0xf]  ;;  %v2756_v36 = vrot.slane %v2738_v11, 2  ;;  %v10322_v11 = vld [vmem:[%s15523_s5 + $0x8e4] sm:$0xf0]  ;;  %v8121_v49 = vor.u32 %v10301_v21, %v8118_v50 }
 0x355   :  { %v8001_v31 = vor.u32 %v10279_v25, %v7998_v8  ;;  %v8190_v8 = vld [vmem:[%s15523_s5 + $0x8d8] sm:$0xf0] }
 0x356   :  { %2977 = vmatpush.bf16.msra.mxu1 %v8029_v33  ;;  %3005 = vmatpush.bf16.msra.mxu3 %v8033_v34  ;;  %v8132_v33 = vld [vmem:[%s15523_s5 + $0x860] sm:$0xf]  ;;  %v7925_v34 = vor.u32 %v10262_v37, %v7924_v9  ;;  %v2758_v32 = vsel %vm1313_vm13, %v2756_v36, %v2757_v38  ;;  %v2753_v37 = vrot.slane %v2735_v18, 2  ;;  %v10320_v36 = vld [vmem:[%s15523_s5 + $0x8d4] sm:$0xf0] }
 0x357   :  { %2686 = vmatmul.bf16.vlgmr.msrb.gmra.mxu0 %v2200_v46  ;;  %2714 = vmatmul.bf16.vlgmr.msrb.gmra.mxu2 %v2200_v46  ;;  %v7997_v46 = vor.u32 %v10280_v23, %v7996_v22  ;;  %v2766_v16 = vpack.c.bf16 %v2758_v32, %v2752_v62  ;;  %v8188_v23 = vld [vmem:[%s15523_s5 + $0x8d0] sm:$0xf]  ;;  %v10319_v38 = vld [vmem:[%s15523_s5 + $0x8d4] sm:$0xf]  ;;  %v10298_v32 = vld [vmem:[%s15523_s5 + $0x824] sm:$0xf0] }
 0x358   :  { %2965 = vmatpush.bf16.msra.mxu0 %v7949_v26  ;;  %2993 = vmatpush.bf16.msra.mxu2 %v7953_v44  ;;  %v7988_v26 = vld [vmem:[%s15523_s5 + $0x780] sm:$0xf]  ;;  %v10278_v44 = vld [vmem:[%s15523_s5 + $0x784] sm:$0xf0]  ;;  %v2755_v22 = vsel %vm1313_vm13, %v2753_v37, %v2754_v19  ;;  %v8189_v42 = vor.u32 %v10320_v36, %v8188_v23  ;;  %v8193_v29 = vor.u32 %v10319_v38, %v8190_v8  ;;  %v10315_v62 = vld [vmem:[%s15523_s5 + $0x8b4] sm:$0xf] }
 0x359   :  { %v8086_v37 = vld [vmem:[%s15523_s5 + $0x808] sm:$0xf0]  ;;  %v8302_v20 = vld [vmem:[%s15523_s5 + $0x978] sm:$0xf0] }
 0x35a   :  { %2978 = vmatpush.bf16.msra.mxu1 %v8021_v52  ;;  %3006 = vmatpush.bf16.msra.mxu3 %v8025_v54  ;;  %v2739_v52 = vld [vmem:[#allocation2 + $0x20] sm:$0xfc]  ;;  %v2741_v54 = vld [vmem:[#allocation2 + $0x38] sm:$0x3]  ;;  %v3025_v19 = vld [vmem:[#allocation2 + $0x28] sm:$0xf8] }
 0x35b   :  { %v2759_v63 = vrot.slane %v2739_v52, 2  ;;  %v2760_v10 = vrot.slane %v2741_v54, 2  ;;  %v8102_v52 = vld [vmem:[%s15523_s5 + $0x828] sm:$0xf0]  ;;  %v8158_v36 = vld [vmem:[%s15523_s5 + $0x898] sm:$0xf0] }
 0x35c   :  { %2966 = vmatpush.bf16.msra.mxu0 %v7941_v61  ;;  %2994 = vmatpush.bf16.msra.mxu2 %v7945_v1  ;;  %v8133_v61 = vor.u32 %v10306_v40, %v8132_v33  ;;  %v8206_v1 = vld [vmem:[%s15523_s5 + $0x8f8] sm:$0xf0]  ;;  %v8108_v33 = vld [vmem:[%s15523_s5 + $0x830] sm:$0xf] }
 0x35d   :  { %2700 = vmatmul.bf16.vlgmr.msrb.gmra.mxu1 %v2201_v7  ;;  %2728 = vmatmul.bf16.vlgmr.msrb.gmra.mxu3 %v2201_v7  ;;  %v8205_v7 = vor.u32 %v10324_v58, %v8204_v56  ;;  %v8209_v9 = vor.u32 %v10323_v59, %v8206_v1  ;;  %v2761_v48 = vsel %vm1313_vm13, %v2759_v63, %v2760_v10  ;;  %v8110_v40 = vld [vmem:[%s15523_s5 + $0x838] sm:$0xf0]  ;;  %v8172_v58 = vld [vmem:[%s15523_s5 + $0x8b0] sm:$0xf]  ;;  %v10316_v59 = vld [vmem:[%s15523_s5 + $0x8b4] sm:$0xf0] }
 0x35e   :  { %2979 = vmatpush.bf16.msra.mxu1 %v8013_v12  ;;  %3007 = vmatpush.bf16.msra.mxu3 %v8017_v27  ;;  %v7989_v12 = vor.u32 %v10278_v44, %v7988_v26  ;;  %v7993_v27 = vor.u32 %v10277_v45, %v7990_v51  ;;  %v2767_v25 = vpack.c.bf16 %v2761_v48, %v2755_v22  ;;  %v10317_v26 = vld [vmem:[%s15523_s5 + $0x8c4] sm:$0xf]  ;;  %v8182_v44 = vld [vmem:[%s15523_s5 + $0x8c8] sm:$0xf0]  ;;  %v8164_v63 = vld [vmem:[%s15523_s5 + $0x8a0] sm:$0xf] }
 0x35f   :  { %v10297_v51 = vld [vmem:[%s15523_s5 + $0x824] sm:$0xf]  ;;  %v8185_v56 = vor.u32 %v10317_v26, %v8182_v44  ;;  %v8173_v10 = vor.u32 %v10316_v59, %v8172_v58  ;;  %v10340_v48 = vld [vmem:[%s15523_s5 + $0x974] sm:$0xf0]  ;;  %v8156_v22 = vld [vmem:[%s15523_s5 + $0x890] sm:$0xf] }
 0x360   :  { %2967 = vmatpush.bf16.msra.mxu0 %v7933_v35  ;;  %2995 = vmatpush.bf16.msra.mxu2 %v7937_v43  ;;  %v8198_v35 = vld [vmem:[%s15523_s5 + $0x8e8] sm:$0xf0]  ;;  %v8125_v43 = vor.u32 %v10304_v28, %v8124_v3  ;;  %v8105_v18 = vor.u32 %v10297_v51, %v8102_v52  ;;  %v8094_v3 = vld [vmem:[%s15523_s5 + $0x818] sm:$0xf0]  ;;  %v10313_v28 = vld [vmem:[%s15523_s5 + $0x8a4] sm:$0xf] }
 0x361   :  { %v8169_v50 = vor.u32 %v10313_v28, %v8166_v4  ;;  %v3026_v26 = vld [vmem:[#allocation2 + $0x20] sm:$0xf8]  ;;  %v3028_v44 = vld [vmem:[#allocation2 + $0x38] sm:$0x7]  ;;  %v8150_v51 = vld [vmem:[%s15523_s5 + $0x888] sm:$0xf0] }
 0x362   :  { %2980 = vmatpush.bf16.msra.mxu1 %v8005_v0  ;;  %3008 = vmatpush.bf16.msra.mxu3 %v8009_v6  ;;  %v8197_v0 = vor.u32 %v10322_v11, %v8196_v30  ;;  %v8201_v6 = vor.u32 %v10321_v13, %v8198_v35  ;;  %v3027_v30 = vld [vmem:[#allocation2 + $0x18] sm:$0x7]  ;;  %v8300_v35 = vld [vmem:[%s15523_s5 + $0x970] sm:$0xf] }
 0x363   :  { %v3044_v23 = vrot.slane %v3027_v30, 3  ;;  %v8364_v52 = vld [vmem:[%s15523_s5 + $0x9f0] sm:$0xf]  ;;  %v10336_v28 = vld [vmem:[%s15523_s5 + $0x954] sm:$0xf0] }
 0x364   :  { %2968 = vmatpush.bf16.msra.mxu0 %v7925_v34  ;;  %2996 = vmatpush.bf16.msra.mxu2 %v7929_v39  ;;  %v10300_v34 = vld [vmem:[%s15523_s5 + $0x834] sm:$0xf0]  ;;  %v10299_v39 = vld [vmem:[%s15523_s5 + $0x834] sm:$0xf]  ;;  %v3024_v58 = vld [vmem:[#allocation2 + $0x10] sm:$0x7] }
 0x365   :  { %v8109_v45 = vor.u32 %v10300_v34, %v8108_v33  ;;  %v8292_v33 = vld [vmem:[%s15523_s5 + $0x960] sm:$0xf]  ;;  %v10338_v34 = vld [vmem:[%s15523_s5 + $0x964] sm:$0xf0] }
 0x366   :  { %2981 = vmatpush.bf16.msra.mxu1 %v7997_v46  ;;  %3009 = vmatpush.bf16.msra.mxu3 %v8001_v31  ;;  %v8113_v46 = vor.u32 %v10299_v39, %v8110_v40  ;;  %v8100_v31 = vld [vmem:[%s15523_s5 + $0x820] sm:$0xf]  ;;  %v10337_v39 = vld [vmem:[%s15523_s5 + $0x964] sm:$0xf]  ;;  %v8294_v40 = vld [vmem:[%s15523_s5 + $0x968] sm:$0xf0] }
 0x367   :  { %2969 = vmatmul.bf16.vlgmr.msra.gmra.mxu0 %v2766_v16  ;;  %2997 = vmatmul.bf16.vlgmr.msra.gmra.mxu2 %v2766_v16  ;;  %v8101_v1 = vor.u32 %v10298_v32, %v8100_v31  ;;  %v10296_v16 = vld [vmem:[%s15523_s5 + $0x814] sm:$0xf0]  ;;  %v10309_v32 = vld [vmem:[%s15523_s5 + $0x884] sm:$0xf]  ;;  %v10354_v30 = vld [vmem:[%s15523_s5 + $0x9e4] sm:$0xf0] }
 0x368   :  { %3248 = vmatpush.bf16.msrb.mxu0 %v8141_v47  ;;  %3276 = vmatpush.bf16.msrb.mxu2 %v8145_v17  ;;  %v8180_v47 = vld [vmem:[%s15523_s5 + $0x8c0] sm:$0xf]  ;;  %v10318_v17 = vld [vmem:[%s15523_s5 + $0x8c4] sm:$0xf0]  ;;  %v8093_v11 = vor.u32 %v10296_v16, %v8092_v15  ;;  %v8293_v16 = vor.u32 %v10338_v34, %v8292_v33 }
 0x369   :  { %v8181_v54 = vor.u32 %v10318_v17, %v8180_v47  ;;  %v8148_v47 = vld [vmem:[%s15523_s5 + $0x880] sm:$0xf]  ;;  %v10310_v17 = vld [vmem:[%s15523_s5 + $0x884] sm:$0xf0] }
 0x36a   :  { %2982 = vmatpush.bf16.msra.mxu1 %v7989_v12  ;;  %3010 = vmatpush.bf16.msra.mxu3 %v7993_v27  ;;  %v10314_v27 = vld [vmem:[%s15523_s5 + $0x8a4] sm:$0xf0] }
 0x36b   :  { %v8165_v21 = vor.u32 %v10314_v27, %v8164_v63  ;;  %v8153_v63 = vor.u32 %v10309_v32, %v8150_v51  ;;  %v8284_v27 = vld [vmem:[%s15523_s5 + $0x950] sm:$0xf]  ;;  %v10329_v51 = vld [vmem:[%s15523_s5 + $0x924] sm:$0xf] }
 0x36c   :  { %3249 = vmatpush.bf16.msrb.mxu0 %v8133_v61  ;;  %3277 = vmatpush.bf16.msrb.mxu2 %v8137_v60  ;;  %v8174_v61 = vld [vmem:[%s15523_s5 + $0x8b8] sm:$0xf0]  ;;  %v10295_v60 = vld [vmem:[%s15523_s5 + $0x814] sm:$0xf] }
 0x36d   :  { %2983 = vmatmul.bf16.vlgmr.msra.gmra.mxu1 %v2767_v25  ;;  %3011 = vmatmul.bf16.vlgmr.msra.gmra.mxu3 %v2767_v25  ;;  %v8177_v12 = vor.u32 %v10315_v62, %v8174_v61  ;;  %v8097_v13 = vor.u32 %v10295_v60, %v8094_v3  ;;  %v10311_v25 = vld [vmem:[%s15523_s5 + $0x894] sm:$0xf]  ;;  %v8366_v61 = vld [vmem:[%s15523_s5 + $0x9f8] sm:$0xf0]  ;;  %v8297_v60 = vor.u32 %v10337_v39, %v8294_v40 }
 0x36e   :  { %3262 = vmatpush.bf16.msrb.mxu1 %v8205_v7  ;;  %3290 = vmatpush.bf16.msrb.mxu3 %v8209_v9  ;;  %v10294_v7 = vld [vmem:[%s15523_s5 + $0x804] sm:$0xf0]  ;;  %v10293_v9 = vld [vmem:[%s15523_s5 + $0x804] sm:$0xf]  ;;  %v10355_v62 = vld [vmem:[%s15523_s5 + $0x9f4] sm:$0xf]  ;;  %v8149_v3 = vor.u32 %v10310_v17, %v8148_v47 }
 0x36f   :  { %v10331_v39 = vld [vmem:[%s15523_s5 + $0x934] sm:$0xf]  ;;  %v8270_v40 = vld [vmem:[%s15523_s5 + $0x938] sm:$0xf0]  ;;  %v10349_v47 = vld [vmem:[%s15523_s5 + $0x9c4] sm:$0xf] }
 0x370   :  { %3250 = vmatpush.bf16.msrb.mxu0 %v8125_v43  ;;  %3278 = vmatpush.bf16.msrb.mxu2 %v8129_v14  ;;  %v3021_v43 = vld [vmem:[#allocation2 + $0x30] sm:$0xf8]  ;;  %v3023_v14 = vld [vmem:[#allocation2 + $0x8] sm:$0x7]  ;;  %v8342_v17 = vld [vmem:[%s15523_s5 + $0x9c8] sm:$0xf0] }
 0x371   :  { %v3037_v38 = vrot.slane %v3021_v43, 3  ;;  %v3038_v8 = vrot.slane %v3023_v14, 3  ;;  %v8285_v43 = vor.u32 %v10336_v28, %v8284_v27  ;;  %v8345_v32 = vor.u32 %v10349_v47, %v8342_v17  ;;  %v8326_v27 = vld [vmem:[%s15523_s5 + $0x9a8] sm:$0xf0]  ;;  %v8244_v28 = vld [vmem:[%s15523_s5 + $0x900] sm:$0xf] }
 0x372   :  { %3263 = vmatpush.bf16.msrb.mxu1 %v8197_v0  ;;  %3291 = vmatpush.bf16.msrb.mxu3 %v8201_v6  ;;  %v10312_v0 = vld [vmem:[%s15523_s5 + $0x894] sm:$0xf0]  ;;  %v3043_v6 = vrot.slane %v3025_v19, 3 }
 0x373   :  { %v3039_v59 = vsel %vm1601_vm14, %v3037_v38, %v3038_v8 }
 0x374   :  { %3251 = vmatpush.bf16.msrb.mxu0 %v8117_v24  ;;  %3279 = vmatpush.bf16.msrb.mxu2 %v8121_v49  ;;  %v8085_v24 = vor.u32 %v10294_v7, %v8084_v5  ;;  %v8089_v49 = vor.u32 %v10293_v9, %v8086_v37  ;;  %v3045_v31 = vsel %vm1601_vm14, %v3043_v6, %v3044_v23  ;;  %v10335_v7 = vld [vmem:[%s15523_s5 + $0x954] sm:$0xf]  ;;  %v8286_v9 = vld [vmem:[%s15523_s5 + $0x958] sm:$0xf0]  ;;  %v8356_v37 = vld [vmem:[%s15523_s5 + $0x9e0] sm:$0xf] }
 0x375   :  { %v3053_v15 = vpack.c.bf16 %v3045_v31, %v3039_v59  ;;  %v8369_v5 = vor.u32 %v10355_v62, %v8366_v61  ;;  %v8289_v14 = vor.u32 %v10335_v7, %v8286_v9  ;;  %v8348_v6 = vld [vmem:[%s15523_s5 + $0x9d0] sm:$0xf]  ;;  %v10352_v23 = vld [vmem:[%s15523_s5 + $0x9d4] sm:$0xf0]  ;;  %v8334_v59 = vld [vmem:[%s15523_s5 + $0x9b8] sm:$0xf0] }
 0x376   :  { %3264 = vmatpush.bf16.msrb.mxu1 %v8189_v42  ;;  %3292 = vmatpush.bf16.msrb.mxu3 %v8193_v29  ;;  %v8301_v42 = vor.u32 %v10340_v48, %v8300_v35  ;;  %v8305_v29 = vor.u32 %v10339_v55, %v8302_v20  ;;  %v8276_v48 = vld [vmem:[%s15523_s5 + $0x940] sm:$0xf]  ;;  %v10334_v55 = vld [vmem:[%s15523_s5 + $0x944] sm:$0xf0]  ;;  %v8349_v33 = vor.u32 %v10352_v23, %v8348_v6  ;;  %v3314_v7 = vld [vmem:[#allocation2 + $0x18] sm:$0xf] }
 0x377   :  { %v8277_v38 = vor.u32 %v10334_v55, %v8276_v48  ;;  %v10344_v48 = vld [vmem:[%s15523_s5 + $0x994] sm:$0xf0]  ;;  %v10343_v55 = vld [vmem:[%s15523_s5 + $0x994] sm:$0xf] }
 0x378   :  { %3252 = vmatpush.bf16.msrb.mxu0 %v8109_v45  ;;  %3280 = vmatpush.bf16.msrb.mxu2 %v8113_v46  ;;  %v8157_v45 = vor.u32 %v10312_v0, %v8156_v22  ;;  %v8161_v46 = vor.u32 %v10311_v25, %v8158_v36  ;;  %v10333_v22 = vld [vmem:[%s15523_s5 + $0x944] sm:$0xf]  ;;  %v8278_v0 = vld [vmem:[%s15523_s5 + $0x948] sm:$0xf0]  ;;  %v10351_v25 = vld [vmem:[%s15523_s5 + $0x9d4] sm:$0xf] }
 0x379   :  { %v8350_v36 = vld [vmem:[%s15523_s5 + $0x9d8] sm:$0xf0]  ;;  %v8281_v8 = vor.u32 %v10333_v22, %v8278_v0 }
 0x37a   :  { %3265 = vmatpush.bf16.msrb.mxu1 %v8181_v54  ;;  %3293 = vmatpush.bf16.msrb.mxu3 %v8185_v56  ;;  %v10356_v54 = vld [vmem:[%s15523_s5 + $0x9f4] sm:$0xf0]  ;;  %v3022_v56 = vld [vmem:[#allocation2] sm:$0xf8]  ;;  %v8353_v34 = vor.u32 %v10351_v25, %v8350_v36 }
 0x37b   :  { %v8365_v4 = vor.u32 %v10356_v54, %v8364_v52  ;;  %v8262_v52 = vld [vmem:[%s15523_s5 + $0x928] sm:$0xf0]  ;;  %v8332_v54 = vld [vmem:[%s15523_s5 + $0x9b0] sm:$0xf]  ;;  %v3313_v25 = vld [vmem:[#allocation2 + $0x20] sm:$0xf0] }
 0x37c   :  { %3253 = vmatpush.bf16.msrb.mxu0 %v8101_v1  ;;  %3281 = vmatpush.bf16.msrb.mxu2 %v8105_v18  ;;  %v3046_v1 = vrot.slane %v3026_v26, 3  ;;  %v3047_v18 = vrot.slane %v3028_v44, 3  ;;  %v8273_v44 = vor.u32 %v10331_v39, %v8270_v40  ;;  %v8265_v61 = vor.u32 %v10329_v51, %v8262_v52  ;;  %v3315_v36 = vld [vmem:[#allocation2 + $0x38] sm:$0xf]  ;;  %v10341_v39 = vld [vmem:[%s15523_s5 + $0x984] sm:$0xf] }
 0x37d   :  { %v8310_v40 = vld [vmem:[%s15523_s5 + $0x988] sm:$0xf0]  ;;  %v3334_v47 = vrot.slane %v3315_v36, 4  ;;  %v10417_v36 = vld [vmem:[%s15523_s5 + $0xbe4] sm:$0xf] }
 0x37e   :  { %3266 = vmatpush.bf16.msrb.mxu1 %v8173_v10  ;;  %3294 = vmatpush.bf16.msrb.mxu3 %v8177_v12  ;;  %v3040_v10 = vrot.slane %v3022_v56, 3  ;;  %v3041_v12 = vrot.slane %v3024_v58, 3  ;;  %v3048_v19 = vsel %vm1601_vm14, %v3046_v1, %v3047_v18  ;;  %v10348_v56 = vld [vmem:[%s15523_s5 + $0x9b4] sm:$0xf0]  ;;  %v10347_v58 = vld [vmem:[%s15523_s5 + $0x9b4] sm:$0xf] }
 0x37f   :  { %v8252_v1 = vld [vmem:[%s15523_s5 + $0x910] sm:$0xf]  ;;  %v10328_v18 = vld [vmem:[%s15523_s5 + $0x914] sm:$0xf0] }
 0x380   :  { %3254 = vmatpush.bf16.msrb.mxu0 %v8093_v11  ;;  %3282 = vmatpush.bf16.msrb.mxu2 %v8097_v13  ;;  %v10353_v11 = vld [vmem:[%s15523_s5 + $0x9e4] sm:$0xf]  ;;  %v8358_v13 = vld [vmem:[%s15523_s5 + $0x9e8] sm:$0xf0]  ;;  %v3042_v35 = vsel %vm1601_vm14, %v3040_v10, %v3041_v12  ;;  %v10346_v10 = vld [vmem:[%s15523_s5 + $0x9a4] sm:$0xf0]  ;;  %v8253_v9 = vor.u32 %v10328_v18, %v8252_v1 }
 0x381   :  { %v3054_v20 = vpack.c.bf16 %v3048_v19, %v3042_v35  ;;  %v10345_v12 = vld [vmem:[%s15523_s5 + $0x9a4] sm:$0xf] }
 0x382   :  { %3267 = vmatpush.bf16.msrb.mxu1 %v8165_v21  ;;  %3295 = vmatpush.bf16.msrb.mxu3 %v8169_v50  ;;  %v8357_v21 = vor.u32 %v10354_v30, %v8356_v37  ;;  %v8361_v50 = vor.u32 %v10353_v11, %v8358_v13  ;;  %v10325_v19 = vld [vmem:[%s15523_s5 + $0x904] sm:$0xf]  ;;  %v3308_v30 = vld [vmem:[#allocation2 + $0x30] sm:$0xf0]  ;;  %v3310_v11 = vld [vmem:[#allocation2 + $0x8] sm:$0xf]  ;;  %v8329_v35 = vor.u32 %v10345_v12, %v8326_v27 }
 0x383   :  { %v3324_v6 = vrot.slane %v3308_v30, 4  ;;  %v3325_v23 = vrot.slane %v3310_v11, 4  ;;  %v8557_v11 = vld [vmem:[%s15523_s5 + $0xbf0] sm:$0xf] }
 0x384   :  { %3255 = vmatpush.bf16.msrb.mxu0 %v8085_v24  ;;  %3283 = vmatpush.bf16.msrb.mxu2 %v8089_v49  ;;  %v8268_v24 = vld [vmem:[%s15523_s5 + $0x930] sm:$0xf]  ;;  %v10332_v49 = vld [vmem:[%s15523_s5 + $0x934] sm:$0xf0] }
 0x385   :  { %v8269_v26 = vor.u32 %v10332_v49, %v8268_v24  ;;  %v8308_v24 = vld [vmem:[%s15523_s5 + $0x980] sm:$0xf]  ;;  %v10342_v49 = vld [vmem:[%s15523_s5 + $0x984] sm:$0xf0]  ;;  %v3326_v17 = vsel %vm1889_vm15, %v3324_v6, %v3325_v23 }
 0x386   :  { %3268 = vmatpush.bf16.msrb.mxu1 %v8157_v45  ;;  %3296 = vmatpush.bf16.msrb.mxu3 %v8161_v46  ;;  %v8260_v45 = vld [vmem:[%s15523_s5 + $0x920] sm:$0xf]  ;;  %v10330_v46 = vld [vmem:[%s15523_s5 + $0x924] sm:$0xf0] }
 0x387   :  { %3256 = vmatmul.bf16.vlgmr.msrb.gmra.mxu0 %v3053_v15  ;;  %3284 = vmatmul.bf16.vlgmr.msrb.gmra.mxu2 %v3053_v15  ;;  %v8261_v62 = vor.u32 %v10330_v46, %v8260_v45  ;;  %v8333_v15 = vor.u32 %v10348_v56, %v8332_v54  ;;  %v8313_v45 = vor.u32 %v10341_v39, %v8310_v40  ;;  %v8549_v6 = vld [vmem:[%s15523_s5 + $0xbe0] sm:$0xf]  ;;  %v10397_v39 = vld [vmem:[%s15523_s5 + $0xb44] sm:$0xf] }
 0x388   :  { %3535 = vmatpush.bf16.msra.mxu0 %v8301_v42  ;;  %3563 = vmatpush.bf16.msra.mxu2 %v8305_v29  ;;  %v8340_v42 = vld [vmem:[%s15523_s5 + $0x9c0] sm:$0xf]  ;;  %v10350_v29 = vld [vmem:[%s15523_s5 + $0x9c4] sm:$0xf0] }
 0x389   :  { %v8341_v31 = vor.u32 %v10350_v29, %v8340_v42  ;;  %v3311_v42 = vld [vmem:[#allocation2 + $0x10] sm:$0xf]  ;;  %v3333_v29 = vrot.slane %v3313_v25, 4  ;;  %v10418_v25 = vld [vmem:[%s15523_s5 + $0xbe4] sm:$0xf0] }
 0x38a   :  { %3269 = vmatpush.bf16.msrb.mxu1 %v8149_v3  ;;  %3297 = vmatpush.bf16.msrb.mxu3 %v8153_v63  ;;  %v8254_v3 = vld [vmem:[%s15523_s5 + $0x918] sm:$0xf0]  ;;  %v8324_v63 = vld [vmem:[%s15523_s5 + $0x9a0] sm:$0xf] }
 0x38b   :  { %v8325_v13 = vor.u32 %v10346_v10, %v8324_v63  ;;  %v8495_v10 = vld [vmem:[%s15523_s5 + $0xb78] sm:$0xf0] }
 0x38c   :  { %3536 = vmatpush.bf16.msra.mxu0 %v8293_v16  ;;  %3564 = vmatpush.bf16.msra.mxu2 %v8297_v60  ;;  %v8337_v16 = vor.u32 %v10347_v58, %v8334_v59  ;;  %v10327_v60 = vld [vmem:[%s15523_s5 + $0x914] sm:$0xf] }
 0x38d   :  { %3270 = vmatmul.bf16.vlgmr.msrb.gmra.mxu1 %v3054_v20  ;;  %3298 = vmatmul.bf16.vlgmr.msrb.gmra.mxu3 %v3054_v20  ;;  %v8257_v37 = vor.u32 %v10327_v60, %v8254_v3  ;;  %v8318_v20 = vld [vmem:[%s15523_s5 + $0x998] sm:$0xf0]  ;;  %v10404_v60 = vld [vmem:[%s15523_s5 + $0xb74] sm:$0xf0]  ;;  %v10403_v3 = vld [vmem:[%s15523_s5 + $0xb74] sm:$0xf] }
 0x38e   :  { %3549 = vmatpush.bf16.msra.mxu1 %v8365_v4  ;;  %3577 = vmatpush.bf16.msra.mxu3 %v8369_v5  ;;  %v10326_v4 = vld [vmem:[%s15523_s5 + $0x904] sm:$0xf0]  ;;  %v3312_v5 = vld [vmem:[#allocation2 + $0x28] sm:$0xf0]  ;;  %v8498_v27 = vor.u32 %v10403_v3, %v8495_v10  ;;  %v8533_v10 = vld [vmem:[%s15523_s5 + $0xbc0] sm:$0xf] }
 0x38f   :  { %v8245_v22 = vor.u32 %v10326_v4, %v8244_v28  ;;  %v8485_v4 = vld [vmem:[%s15523_s5 + $0xb60] sm:$0xf] }
 0x390   :  { %3537 = vmatpush.bf16.msra.mxu0 %v8285_v43  ;;  %3565 = vmatpush.bf16.msra.mxu2 %v8289_v14  ;;  %v8246_v43 = vld [vmem:[%s15523_s5 + $0x908] sm:$0xf0]  ;;  %v8316_v14 = vld [vmem:[%s15523_s5 + $0x990] sm:$0xf] }
 0x391   :  { %v8249_v0 = vor.u32 %v10325_v19, %v8246_v43 }
 0x392   :  { %3550 = vmatpush.bf16.msra.mxu1 %v8357_v21  ;;  %3578 = vmatpush.bf16.msra.mxu3 %v8361_v50  ;;  %v3330_v21 = vrot.slane %v3312_v5, 4  ;;  %v3331_v50 = vrot.slane %v3314_v7, 4  ;;  %v10402_v5 = vld [vmem:[%s15523_s5 + $0xb64] sm:$0xf0]  ;;  %v10401_v7 = vld [vmem:[%s15523_s5 + $0xb64] sm:$0xf] }
 0x394   :  { %3538 = vmatpush.bf16.msra.mxu0 %v8277_v38  ;;  %3566 = vmatpush.bf16.msra.mxu2 %v8281_v8  ;;  %v8317_v38 = vor.u32 %v10344_v48, %v8316_v14  ;;  %v8321_v8 = vor.u32 %v10343_v55, %v8318_v20  ;;  %v8559_v14 = vld [vmem:[%s15523_s5 + $0xbf8] sm:$0xf0]  ;;  %v8477_v48 = vld [vmem:[%s15523_s5 + $0xb50] sm:$0xf]  ;;  %v10400_v55 = vld [vmem:[%s15523_s5 + $0xb54] sm:$0xf0] }
 0x396   :  { %3551 = vmatpush.bf16.msra.mxu1 %v8349_v33  ;;  %3579 = vmatpush.bf16.msra.mxu3 %v8353_v34  ;;  %v3309_v33 = vld [vmem:[#allocation2] sm:$0xf0]  ;;  %v3332_v34 = vsel %vm1889_vm15, %v3330_v21, %v3331_v50  ;;  %v8478_v50 = vor.u32 %v10400_v55, %v8477_v48  ;;  %v8525_v48 = vld [vmem:[%s15523_s5 + $0xbb0] sm:$0xf]  ;;  %v10412_v55 = vld [vmem:[%s15523_s5 + $0xbb4] sm:$0xf0] }
 0x397   :  { %v3327_v46 = vrot.slane %v3309_v33, 4  ;;  %v8469_v33 = vld [vmem:[%s15523_s5 + $0xb40] sm:$0xf] }
 0x398   :  { %3539 = vmatpush.bf16.msra.mxu0 %v8269_v26  ;;  %3567 = vmatpush.bf16.msra.mxu2 %v8273_v44  ;;  %v8309_v26 = vor.u32 %v10342_v49, %v8308_v24  ;;  %v3340_v44 = vpack.c.bf16 %v3332_v34, %v3326_v17  ;;  %v8550_v24 = vor.u32 %v10418_v25, %v8549_v6  ;;  %v10398_v34 = vld [vmem:[%s15523_s5 + $0xb44] sm:$0xf0]  ;;  %v8445_v6 = vld [vmem:[%s15523_s5 + $0xb10] sm:$0xf]  ;;  %v10392_v25 = vld [vmem:[%s15523_s5 + $0xb14] sm:$0xf0] }
 0x399   :  { %v8470_v40 = vor.u32 %v10398_v34, %v8469_v33 }
 0x39a   :  { %3552 = vmatpush.bf16.msra.mxu1 %v8341_v31  ;;  %3580 = vmatpush.bf16.msra.mxu3 %v8345_v32  ;;  %v3328_v31 = vrot.slane %v3311_v42, 4  ;;  %v3335_v32 = vsel %vm1889_vm15, %v3333_v29, %v3334_v47  ;;  %v8471_v42 = vld [vmem:[%s15523_s5 + $0xb48] sm:$0xf0]  ;;  %v8541_v29 = vld [vmem:[%s15523_s5 + $0xbd0] sm:$0xf] }
 0x39b   :  { %v10416_v47 = vld [vmem:[%s15523_s5 + $0xbd4] sm:$0xf0] }
 0x39c   :  { %3540 = vmatpush.bf16.msra.mxu0 %v8261_v62  ;;  %3568 = vmatpush.bf16.msra.mxu2 %v8265_v61  ;;  %v3329_v51 = vsel %vm1889_vm15, %v3327_v46, %v3328_v31  ;;  %v8543_v46 = vld [vmem:[%s15523_s5 + $0xbd8] sm:$0xf0]  ;;  %v8461_v31 = vld [vmem:[%s15523_s5 + $0xb30] sm:$0xf] }
 0x39d   :  { %v3341_v52 = vpack.c.bf16 %v3335_v32, %v3329_v51  ;;  %v10396_v51 = vld [vmem:[%s15523_s5 + $0xb34] sm:$0xf0] }
 0x39e   :  { %3553 = vmatpush.bf16.msra.mxu1 %v8333_v15  ;;  %3581 = vmatpush.bf16.msra.mxu3 %v8337_v16  ;;  %v8493_v16 = vld [vmem:[%s15523_s5 + $0xb70] sm:$0xf]  ;;  %v8462_v3 = vor.u32 %v10396_v51, %v8461_v31  ;;  %v8519_v31 = vld [vmem:[%s15523_s5 + $0xba8] sm:$0xf0]  ;;  %v10390_v51 = vld [vmem:[%s15523_s5 + $0xb04] sm:$0xf0] }
 0x39f   :  { %v8494_v63 = vor.u32 %v10404_v60, %v8493_v16  ;;  %v8463_v16 = vld [vmem:[%s15523_s5 + $0xb38] sm:$0xf0] }
 0x3a0   :  { %3541 = vmatpush.bf16.msra.mxu0 %v8253_v9  ;;  %3569 = vmatpush.bf16.msra.mxu2 %v8257_v37  ;;  %v8486_v9 = vor.u32 %v10402_v5, %v8485_v4  ;;  %v8487_v37 = vld [vmem:[%s15523_s5 + $0xb68] sm:$0xf0]  ;;  %v10413_v4 = vld [vmem:[%s15523_s5 + $0xbc4] sm:$0xf] }
 0x3a1   :  { %v8490_v30 = vor.u32 %v10401_v7, %v8487_v37  ;;  %v8535_v7 = vld [vmem:[%s15523_s5 + $0xbc8] sm:$0xf0] }
 0x3a2   :  { %3554 = vmatpush.bf16.msra.mxu1 %v8325_v13  ;;  %3582 = vmatpush.bf16.msra.mxu3 %v8329_v35  ;;  %v10420_v13 = vld [vmem:[%s15523_s5 + $0xbf4] sm:$0xf0]  ;;  %v10419_v35 = vld [vmem:[%s15523_s5 + $0xbf4] sm:$0xf]  ;;  %v8538_v37 = vor.u32 %v10413_v4, %v8535_v7 }
 0x3a3   :  { %v8558_v43 = vor.u32 %v10420_v13, %v8557_v11  ;;  %v8562_v21 = vor.u32 %v10419_v35, %v8559_v14  ;;  %v10394_v11 = vld [vmem:[%s15523_s5 + $0xb24] sm:$0xf0]  ;;  %v10393_v13 = vld [vmem:[%s15523_s5 + $0xb24] sm:$0xf]  ;;  %v8455_v14 = vld [vmem:[%s15523_s5 + $0xb28] sm:$0xf0] }
 0x3a4   :  { %3542 = vmatpush.bf16.msra.mxu0 %v8245_v22  ;;  %3570 = vmatpush.bf16.msra.mxu2 %v8249_v0  ;;  %v10399_v22 = vld [vmem:[%s15523_s5 + $0xb54] sm:$0xf]  ;;  %v8479_v0 = vld [vmem:[%s15523_s5 + $0xb58] sm:$0xf0] }
 0x3a5   :  { %v8482_v23 = vor.u32 %v10399_v22, %v8479_v0  ;;  %v10411_v22 = vld [vmem:[%s15523_s5 + $0xbb4] sm:$0xf]  ;;  %v8527_v0 = vld [vmem:[%s15523_s5 + $0xbb8] sm:$0xf0] }
 0x3a6   :  { %3555 = vmatpush.bf16.msra.mxu1 %v8317_v38  ;;  %3583 = vmatpush.bf16.msra.mxu3 %v8321_v8  ;;  %v8551_v38 = vld [vmem:[%s15523_s5 + $0xbe8] sm:$0xf0]  ;;  %v10371_v7 = vld [vmem:[%s15523_s5 + $0xa74] sm:$0xf] }
 0x3a7   :  { %3543 = vmatmul.bf16.vlgmr.msra.gmra.mxu0 %v3340_v44  ;;  %3571 = vmatmul.bf16.vlgmr.msra.gmra.mxu2 %v3340_v44  ;;  %v8554_v49 = vor.u32 %v10417_v36, %v8551_v38  ;;  %v8542_v44 = vor.u32 %v10416_v47, %v8541_v29  ;;  %v10391_v36 = vld [vmem:[%s15523_s5 + $0xb14] sm:$0xf]  ;;  %v8447_v38 = vld [vmem:[%s15523_s5 + $0xb18] sm:$0xf0] }
 0x3a8   :  { %3896 = vmatpush.bf16.msrb.mxu0 %v8494_v63  ;;  %3924 = vmatpush.bf16.msrb.mxu2 %v8498_v27  ;;  %v10414_v27 = vld [vmem:[%s15523_s5 + $0xbc4] sm:$0xf0]  ;;  %v8450_v33 = vor.u32 %v10391_v36, %v8447_v38 }
 0x3a9   :  { %v8534_v5 = vor.u32 %v10414_v27, %v8533_v10  ;;  %v8439_v10 = vld [vmem:[%s15523_s5 + $0xb08] sm:$0xf0]  ;;  %v8621_v27 = vld [vmem:[%s15523_s5 + $0xa70] sm:$0xf] }
 0x3aa   :  { %3556 = vmatpush.bf16.msra.mxu1 %v8309_v26  ;;  %3584 = vmatpush.bf16.msra.mxu3 %v8313_v45  ;;  %v8474_v26 = vor.u32 %v10397_v39, %v8471_v42  ;;  %v10415_v45 = vld [vmem:[%s15523_s5 + $0xbd4] sm:$0xf] }
 0x3ab   :  { %v8546_v32 = vor.u32 %v10415_v45, %v8543_v46  ;;  %v10409_v45 = vld [vmem:[%s15523_s5 + $0xba4] sm:$0xf] }
 0x3ac   :  { %3897 = vmatpush.bf16.msrb.mxu0 %v8486_v9  ;;  %3925 = vmatpush.bf16.msrb.mxu2 %v8490_v30  ;;  %v8453_v30 = vld [vmem:[%s15523_s5 + $0xb20] sm:$0xf] }
 0x3ad   :  { %3557 = vmatmul.bf16.vlgmr.msra.gmra.mxu1 %v3341_v52  ;;  %3585 = vmatmul.bf16.vlgmr.msra.gmra.mxu3 %v3341_v52  ;;  %v10395_v52 = vld [vmem:[%s15523_s5 + $0xb34] sm:$0xf] }
 0x3ae   :  { %3910 = vmatpush.bf16.msrb.mxu1 %v8558_v43  ;;  %3938 = vmatpush.bf16.msrb.mxu3 %v8562_v21  ;;  %v8466_v63 = vor.u32 %v10395_v52, %v8463_v16  ;;  %v8454_v43 = vor.u32 %v10394_v11, %v8453_v30  ;;  %v8458_v21 = vor.u32 %v10393_v13, %v8455_v14  ;;  %v8509_v13 = vld [vmem:[%s15523_s5 + $0xb90] sm:$0xf]  ;;  %v10407_v14 = vld [vmem:[%s15523_s5 + $0xb94] sm:$0xf] }
 0x3af   :  { %v8522_v16 = vor.u32 %v10409_v45, %v8519_v31  ;;  %v8503_v45 = vld [vmem:[%s15523_s5 + $0xb88] sm:$0xf0]  ;;  %v10388_v31 = vld [vmem:[%s15523_s5 + $0xaf4] sm:$0xf0] }
 0x3b0   :  { %3898 = vmatpush.bf16.msrb.mxu0 %v8478_v50  ;;  %3926 = vmatpush.bf16.msrb.mxu2 %v8482_v23  ;;  %v8526_v50 = vor.u32 %v10412_v55, %v8525_v48  ;;  %v8530_v23 = vor.u32 %v10411_v22, %v8527_v0  ;;  %v8511_v55 = vld [vmem:[%s15523_s5 + $0xb98] sm:$0xf0]  ;;  %v8613_v22 = vld [vmem:[%s15523_s5 + $0xa60] sm:$0xf]  ;;  %v10370_v0 = vld [vmem:[%s15523_s5 + $0xa64] sm:$0xf0] }
 0x3b2   :  { %3911 = vmatpush.bf16.msrb.mxu1 %v8550_v24  ;;  %3939 = vmatpush.bf16.msrb.mxu3 %v8554_v49  ;;  %v8446_v24 = vor.u32 %v10392_v25, %v8445_v6  ;;  %v10369_v6 = vld [vmem:[%s15523_s5 + $0xa64] sm:$0xf]  ;;  %v8615_v25 = vld [vmem:[%s15523_s5 + $0xa68] sm:$0xf0] }
 0x3b3   :  { %v8618_v38 = vor.u32 %v10369_v6, %v8615_v25  ;;  %v10366_v6 = vld [vmem:[%s15523_s5 + $0xa44] sm:$0xf0] }
 0x3b4   :  { %3899 = vmatpush.bf16.msrb.mxu0 %v8470_v40  ;;  %3927 = vmatpush.bf16.msrb.mxu2 %v8474_v26  ;;  %v8517_v26 = vld [vmem:[%s15523_s5 + $0xba0] sm:$0xf] }
 0x3b6   :  { %3912 = vmatpush.bf16.msrb.mxu1 %v8542_v44  ;;  %3940 = vmatpush.bf16.msrb.mxu3 %v8546_v32  ;;  %v10410_v44 = vld [vmem:[%s15523_s5 + $0xba4] sm:$0xf0]  ;;  %v8437_v32 = vld [vmem:[%s15523_s5 + $0xb00] sm:$0xf] }
 0x3b7   :  { %v8518_v46 = vor.u32 %v10410_v44, %v8517_v26  ;;  %v10405_v26 = vld [vmem:[%s15523_s5 + $0xb84] sm:$0xf] }
 0x3b8   :  { %3900 = vmatpush.bf16.msrb.mxu0 %v8462_v3  ;;  %3928 = vmatpush.bf16.msrb.mxu2 %v8466_v63  ;;  %v8438_v3 = vor.u32 %v10390_v51, %v8437_v32  ;;  %v10389_v63 = vld [vmem:[%s15523_s5 + $0xb04] sm:$0xf]  ;;  %v8506_v51 = vor.u32 %v10405_v26, %v8503_v45  ;;  %v8671_v45 = vld [vmem:[%s15523_s5 + $0xad8] sm:$0xf0] }
 0x3b9   :  { %v8442_v4 = vor.u32 %v10389_v63, %v8439_v10  ;;  %v8687_v63 = vld [vmem:[%s15523_s5 + $0xaf8] sm:$0xf0]  ;;  %v8605_v10 = vld [vmem:[%s15523_s5 + $0xa50] sm:$0xf] }
 0x3ba   :  { %3913 = vmatpush.bf16.msrb.mxu1 %v8534_v5  ;;  %3941 = vmatpush.bf16.msrb.mxu3 %v8538_v37  ;;  %v10372_v5 = vld [vmem:[%s15523_s5 + $0xa74] sm:$0xf0]  ;;  %v8623_v37 = vld [vmem:[%s15523_s5 + $0xa78] sm:$0xf0] }
 0x3bb   :  { %v8622_v30 = vor.u32 %v10372_v5, %v8621_v27  ;;  %v8626_v11 = vor.u32 %v10371_v7, %v8623_v37  ;;  %v10367_v5 = vld [vmem:[%s15523_s5 + $0xa54] sm:$0xf]  ;;  %v8607_v7 = vld [vmem:[%s15523_s5 + $0xa58] sm:$0xf0] }
 0x3bc   :  { %3901 = vmatpush.bf16.msrb.mxu0 %v8454_v43  ;;  %3929 = vmatpush.bf16.msrb.mxu2 %v8458_v21  ;;  %v10408_v43 = vld [vmem:[%s15523_s5 + $0xb94] sm:$0xf0] }
 0x3bd   :  { %v8510_v48 = vor.u32 %v10408_v43, %v8509_v13  ;;  %v8677_v13 = vld [vmem:[%s15523_s5 + $0xae0] sm:$0xf]  ;;  %v10386_v43 = vld [vmem:[%s15523_s5 + $0xae4] sm:$0xf0] }
 0x3be   :  { %3914 = vmatpush.bf16.msrb.mxu1 %v8526_v50  ;;  %3942 = vmatpush.bf16.msrb.mxu3 %v8530_v23  ;;  %v8514_v50 = vor.u32 %v10407_v14, %v8511_v55  ;;  %v8614_v23 = vor.u32 %v10370_v0, %v8613_v22  ;;  %v10385_v14 = vld [vmem:[%s15523_s5 + $0xae4] sm:$0xf]  ;;  %v8678_v55 = vor.u32 %v10386_v43, %v8677_v13  ;;  %v8597_v0 = vld [vmem:[%s15523_s5 + $0xa40] sm:$0xf] }
 0x3bf   :  { %v8598_v25 = vor.u32 %v10366_v6, %v8597_v0 }
 0x3c0   :  { %3902 = vmatpush.bf16.msrb.mxu0 %v8446_v24  ;;  %3930 = vmatpush.bf16.msrb.mxu2 %v8450_v33  ;;  %v8501_v24 = vld [vmem:[%s15523_s5 + $0xb80] sm:$0xf]  ;;  %v10406_v33 = vld [vmem:[%s15523_s5 + $0xb84] sm:$0xf0] }
 0x3c1   :  { %v8502_v44 = vor.u32 %v10406_v33, %v8501_v24  ;;  %v8669_v24 = vld [vmem:[%s15523_s5 + $0xad0] sm:$0xf]  ;;  %v10384_v33 = vld [vmem:[%s15523_s5 + $0xad4] sm:$0xf0] }
 0x3c2   :  { %3915 = vmatpush.bf16.msrb.mxu1 %v8518_v46  ;;  %3943 = vmatpush.bf16.msrb.mxu3 %v8522_v16  ;;  %v8685_v46 = vld [vmem:[%s15523_s5 + $0xaf0] sm:$0xf] }
 0x3c3   :  { %v8686_v16 = vor.u32 %v10388_v31, %v8685_v46  ;;  %v8589_v46 = vld [vmem:[%s15523_s5 + $0xa30] sm:$0xf] }
 0x3c4   :  { %v13330_v54 = vpop.f32.mrf.mxu0  ;;  %3903 = vmatpush.bf16.msrb.mxu0 %v8438_v3  ;;  %3931 = vmatpush.bf16.msrb.mxu2 %v8442_v4  ;;  %v10387_v3 = vld [vmem:[%s15523_s5 + $0xaf4] sm:$0xf]  ;;  %v10368_v4 = vld [vmem:[%s15523_s5 + $0xa54] sm:$0xf0] }
 0x3c5   :  { %v8690_v27 = vor.u32 %v10387_v3, %v8687_v63  ;;  %v10364_v63 = vld [vmem:[%s15523_s5 + $0xa34] sm:$0xf0] }
 0x3c6   :  { %3916 = vmatpush.bf16.msrb.mxu1 %v8510_v48  ;;  %3944 = vmatpush.bf16.msrb.mxu3 %v8514_v50  ;;  %v8679_v50 = vld [vmem:[%s15523_s5 + $0xae8] sm:$0xf0] }
 0x3c7   :  { %v8682_v22 = vor.u32 %v10385_v14, %v8679_v50  ;;  %v10361_v50 = vld [vmem:[%s15523_s5 + $0xa24] sm:$0xf] }
 0x3c8   :  { %4112 = vmatpush.bf16.msra.mxu0 %v8622_v30  ;;  %4140 = vmatpush.bf16.msra.mxu2 %v8626_v11  ;;  %v8606_v30 = vor.u32 %v10368_v4, %v8605_v10  ;;  %v8610_v11 = vor.u32 %v10367_v5, %v8607_v7  ;;  %v10363_v10 = vld [vmem:[%s15523_s5 + $0xa34] sm:$0xf]  ;;  %v8661_v4 = vld [vmem:[%s15523_s5 + $0xac0] sm:$0xf]  ;;  %v10382_v5 = vld [vmem:[%s15523_s5 + $0xac4] sm:$0xf0] }
 0x3c9   :  { %v10381_v7 = vld [vmem:[%s15523_s5 + $0xac4] sm:$0xf] }
 0x3ca   :  { %v13332_v56 = vpop.f32.mrf.mxu1  ;;  %v13334_v58 = vpop.f32.mrf.mxu2  ;;  %3917 = vmatpush.bf16.msrb.mxu1 %v8502_v44  ;;  %3945 = vmatpush.bf16.msrb.mxu3 %v8506_v51  ;;  %v10383_v44 = vld [vmem:[%s15523_s5 + $0xad4] sm:$0xf] }
 0x3cb   :  { %v2486_v48 = vadd.f32 %v13332_v56, %v13330_v54  ;;  %v10365_v54 = vld [vmem:[%s15523_s5 + $0xa44] sm:$0xf]  ;;  %v8674_v3 = vor.u32 %v10383_v44, %v8671_v45  ;;  %v8575_v44 = vld [vmem:[%s15523_s5 + $0xa18] sm:$0xf0] }
 0x3cc   :  { %v13338_v62 = vpop.f32.mrf.mxu0  ;;  %4113 = vmatpush.bf16.msra.mxu0 %v8614_v23  ;;  %4141 = vmatpush.bf16.msra.mxu2 %v8618_v38  ;;  %v8599_v38 = vld [vmem:[%s15523_s5 + $0xa48] sm:$0xf0] }
 0x3ce   :  { %4126 = vmatpush.bf16.msra.mxu1 %v8686_v16  ;;  %4154 = vmatpush.bf16.msra.mxu3 %v8690_v27  ;;  %v8591_v27 = vld [vmem:[%s15523_s5 + $0xa38] sm:$0xf0] }
 0x3d0   :  { %v13336_v59 = vpop.f32.mrf.mxu3  ;;  %4114 = vmatpush.bf16.msra.mxu0 %v8606_v30  ;;  %4142 = vmatpush.bf16.msra.mxu2 %v8610_v11  ;;  %v8581_v30 = vld [vmem:[%s15523_s5 + $0xa20] sm:$0xf]  ;;  %v10362_v11 = vld [vmem:[%s15523_s5 + $0xa24] sm:$0xf0] }
 0x3d1   :  { %v2514_v31 = vadd.f32 %v13336_v59, %v13334_v58 }
 0x3d2   :  { %v13340_v61 = vpop.f32.mrf.mxu1  ;;  %v13342_v1 = vpop.f32.mrf.mxu2  ;;  %4127 = vmatpush.bf16.msra.mxu1 %v8678_v55  ;;  %4155 = vmatpush.bf16.msra.mxu3 %v8682_v22  ;;  %v8662_v55 = vor.u32 %v10382_v5, %v8661_v4  ;;  %v8583_v22 = vld [vmem:[%s15523_s5 + $0xa28] sm:$0xf0]  ;;  %v10357_v5 = vld [vmem:[%s15523_s5 + $0xa04] sm:$0xf] }
 0x3d3   :  { %v2488_v58 = vadd.f32 %v13340_v61, %v13338_v62  ;;  %v8663_v61 = vld [vmem:[%s15523_s5 + $0xac8] sm:$0xf0] }
 0x3d4   :  { %v13346_v15 = vpop.f32.mrf.mxu0  ;;  %4115 = vmatpush.bf16.msra.mxu0 %v8598_v25  ;;  %v10379_v25 = vld [vmem:[%s15523_s5 + $0xab4] sm:$0xf] }
 0x3d5   :  { %v2688_v56 = vadd.f32 %v13346_v15, %v2486_v48  ;;  %v13670_v15 = vld [vmem:[%s15524_s6 + $0x6] ss:$8 sm:$0x3] }
 0x3d6   :  { %4156 = vmatpush.bf16.msra.mxu3 %v8674_v3  ;;  %v8645_v3 = vld [vmem:[%s15523_s5 + $0xaa0] sm:$0xf]  ;;  %v3599_v4 = vperm.slane %v13670_v15, 1 }
 0x3d8   :  { %v13344_v18 = vpop.f32.mrf.mxu3 }
 0x3da   :  { %v13360_v12 = vpop.f32.mrf.mxu1  ;;  %v13362_v28 = vpop.f32.mrf.mxu2 }
 0x3db   :  { %v2702_v51 = vadd.f32 %v13360_v12, %v2688_v56  ;;  %v2716_v13 = vadd.f32 %v13362_v28, %v2514_v31  ;;  %v3598_v28 = vperm.slane %v13670_v15, 0  ;;  %v8582_v56 = vor.u32 %v10362_v11, %v8581_v30  ;;  %v8631_v15 = vld [vmem:[%s15523_s5 + $0xa88] sm:$0xf0] }
 0x3dc   :  { %v13396_v20 = vpop.f32.mrf.mxu0 }
 0x3dd   :  { %v2690_v43 = vadd.f32 %v13396_v20, %v2488_v58  ;;  %v8666_v20 = vor.u32 %v10381_v7, %v8663_v61  ;;  %v10358_v58 = vld [vmem:[%s15523_s5 + $0xa04] sm:$0xf0]  ;;  %v8567_v7 = vld [vmem:[%s15523_s5 + $0xa08] sm:$0xf0] }
 0x3df   :  { %4157 = vmatpush.bf16.msra.mxu3 %v8666_v20 }
 0x3e0   :  { %v13376_v19 = vpop.f32.mrf.mxu3 }
 0x3e2   :  { %v13416_v8 = vpop.f32.mrf.mxu1  ;;  %v13436_v17 = vpop.f32.mrf.mxu2 }
 0x3e3   :  { %v2704_v45 = vadd.f32 %v13416_v8, %v2690_v43  ;;  %v10378_v8 = vld [vmem:[%s15523_s5 + $0xaa4] sm:$0xf0] }
 0x3e4   :  { %v13470_v9 = vpop.f32.mrf.mxu0  ;;  %v8646_v43 = vor.u32 %v10378_v8, %v8645_v3  ;;  %v8781_v3 = vld [vmem:[%s15523_s5 + $0xc70] sm:$0xf]  ;;  %v10436_v8 = vld [vmem:[%s15523_s5 + $0xc74] sm:$0xf0] }
 0x3e8   :  { %v13456_v60 = vpop.f32.mrf.mxu3 }
 0x3ea   :  { %v13481_v35 = vpop.f32.mrf.mxu1  ;;  %v13510_v49 = vpop.f32.mrf.mxu2 }
 0x3eb   :  { %v2985_v23 = vadd.f32 %v13481_v35, %v13470_v9  ;;  %v8602_v9 = vor.u32 %v10365_v54, %v8599_v38  ;;  %v8670_v35 = vor.u32 %v10384_v33, %v8669_v24  ;;  %v8655_v38 = vld [vmem:[%s15523_s5 + $0xab8] sm:$0xf0]  ;;  %v8573_v24 = vld [vmem:[%s15523_s5 + $0xa10] sm:$0xf]  ;;  %v2730_v33 = vadd.f32 %v13376_v19, %v2716_v13 }
 0x3ec   :  { %v13514_v39 = vpop.f32.mrf.mxu0 }
 0x3ed   :  { %4143 = vmatpush.bf16.msra.mxu2 %v8602_v9  ;;  %v3017_v62 = vadd.f32 %v2985_v23, %v2702_v51  ;;  %4128 = vmatpush.bf16.msra.mxu1 %v8670_v35  ;;  %v8586_v23 = vor.u32 %v10361_v50, %v8583_v22  ;;  %v10360_v9 = vld [vmem:[%s15523_s5 + $0xa14] sm:$0xf0]  ;;  %v10359_v35 = vld [vmem:[%s15523_s5 + $0xa14] sm:$0xf]  ;;  %v8637_v22 = vld [vmem:[%s15523_s5 + $0xa90] sm:$0xf] }
 0x3f0   :  { %v13512_v34 = vpop.f32.mrf.mxu3 }
 0x3f1   :  { %v3013_v14 = vadd.f32 %v13512_v34, %v13510_v49  ;;  %v8653_v49 = vld [vmem:[%s15523_s5 + $0xab0] sm:$0xf]  ;;  %v10380_v34 = vld [vmem:[%s15523_s5 + $0xab4] sm:$0xf0]  ;;  %4129 = vmatpush.bf16.msra.mxu1 %v8662_v55 }
 0x3f2   :  { %v13516_v40 = vpop.f32.mrf.mxu1  ;;  %v13518_v42 = vpop.f32.mrf.mxu2 }
 0x3f3   :  { %v2987_v54 = vadd.f32 %v13516_v40, %v13514_v39  ;;  %v3018_v31 = vadd.f32 %v3013_v14, %v2730_v33 }
 0x3f8   :  { %v13520_v29 = vpop.f32.mrf.mxu3 }
 0x3f9   :  { %v3015_v61 = vadd.f32 %v13520_v29, %v13518_v42  ;;  %v8570_v29 = vor.u32 %v10357_v5, %v8567_v7  ;;  %v8782_v5 = vor.u32 %v10436_v8, %v8781_v3  ;;  %v8749_v3 = vld [vmem:[%s15523_s5 + $0xc30] sm:$0xf]  ;;  %v10428_v8 = vld [vmem:[%s15523_s5 + $0xc34] sm:$0xf0] }
 0x404   :  { %v13522_v47 = vpop.f32.mrf.mxu0 }
 0x40a   :  { %v13542_v52 = vpop.f32.mrf.mxu1  ;;  %v13574_v21 = vpop.f32.mrf.mxu2 }
 0x40b   :  { %v3272_v16 = vadd.f32 %v13542_v52, %v13522_v47  ;;  %v8590_v47 = vor.u32 %v10364_v63, %v8589_v46  ;;  %v8594_v52 = vor.u32 %v10363_v10, %v8591_v27  ;;  %v8578_v63 = vor.u32 %v10359_v35, %v8575_v44  ;;  %v8647_v10 = vld [vmem:[%s15523_s5 + $0xaa8] sm:$0xf0]  ;;  %v8565_v27 = vld [vmem:[%s15523_s5 + $0xa00] sm:$0xf] }
 0x40c   :  { %v13608_v32 = vpop.f32.mrf.mxu0  ;;  %v8566_v42 = vor.u32 %v10358_v58, %v8565_v27  ;;  %v8783_v27 = vld [vmem:[%s15523_s5 + $0xc78] sm:$0xf0] }
 0x40d   :  { %v3304_v0 = vadd.f32 %v3272_v16, %v3017_v62  ;;  %4116 = vmatpush.bf16.msra.mxu0 %v8590_v47  ;;  %4144 = vmatpush.bf16.msra.mxu2 %v8594_v52  ;;  %v8658_v16 = vor.u32 %v10379_v25, %v8655_v38 }
 0x40f   :  { %4158 = vmatpush.bf16.msra.mxu3 %v8658_v16 }
 0x410   :  { %v13588_v36 = vpop.f32.mrf.mxu3 }
 0x411   :  { %v3300_v39 = vadd.f32 %v13588_v36, %v13574_v21  ;;  %v8654_v21 = vor.u32 %v10380_v34, %v8653_v49  ;;  %v2516_v36 = vadd.f32 %v13344_v18, %v13342_v1  ;;  %4117 = vmatpush.bf16.msra.mxu0 %v8582_v56  ;;  %4145 = vmatpush.bf16.msra.mxu2 %v8586_v23 }
 0x412   :  { %v13628_v37 = vpop.f32.mrf.mxu1  ;;  %v13665_v26 = vpop.f32.mrf.mxu2  ;;  %v8574_v18 = vor.u32 %v10360_v9, %v8573_v24 }
 0x413   :  { %v3274_v19 = vadd.f32 %v13628_v37, %v13608_v32  ;;  %v10377_v32 = vld [vmem:[%s15523_s5 + $0xaa4] sm:$0xf]  ;;  %v3019_v37 = vadd.f32 %v2987_v54, %v2704_v45  ;;  %v2718_v62 = vadd.f32 %v13436_v17, %v2516_v36  ;;  %4130 = vmatpush.bf16.msra.mxu1 %v8654_v21  ;;  %v10376_v17 = vld [vmem:[%s15523_s5 + $0xa94] sm:$0xf0] }
 0x414   :  { %v8650_v50 = vor.u32 %v10377_v32, %v8647_v10  ;;  %v8638_v56 = vor.u32 %v10376_v17, %v8637_v22  ;;  %v10435_v32 = vld [vmem:[%s15523_s5 + $0xc74] sm:$0xf] }
 0x415   :  { %v3306_v30 = vadd.f32 %v3274_v19, %v3019_v37  ;;  %4118 = vmatpush.bf16.msra.mxu0 %v8574_v18  ;;  %4146 = vmatpush.bf16.msra.mxu2 %v8578_v63  ;;  %v2732_v20 = vadd.f32 %v13456_v60, %v2718_v62  ;;  %v8629_v60 = vld [vmem:[%s15523_s5 + $0xa80] sm:$0xf]  ;;  %v8786_v7 = vor.u32 %v10435_v32, %v8783_v27  ;;  %v10451_v22 = vld [vmem:[%s15523_s5 + $0xcf4] sm:$0xf]  ;;  %v10446_v27 = vld [vmem:[%s15523_s5 + $0xcc4] sm:$0xf0] }
 0x416   :  { %4159 = vmatpush.bf16.msra.mxu3 %v8650_v50  ;;  %v8773_v62 = vld [vmem:[%s15523_s5 + $0xc60] sm:$0xf]  ;;  %v10427_v32 = vld [vmem:[%s15523_s5 + $0xc34] sm:$0xf] }
 0x417   :  { %4131 = vmatpush.bf16.msra.mxu1 %v8646_v43  ;;  %v3020_v23 = vadd.f32 %v3015_v61, %v2732_v20  ;;  %v10434_v61 = vld [vmem:[%s15523_s5 + $0xc64] sm:$0xf0]  ;;  %v8845_v43 = vld [vmem:[%s15523_s5 + $0xcf0] sm:$0xf] }
 0x418   :  { %v13697_v59 = vpop.f32.mrf.mxu3 }
 0x419   :  { %v3302_v49 = vadd.f32 %v13697_v59, %v13665_v26  ;;  %v10374_v26 = vld [vmem:[%s15523_s5 + $0xa84] sm:$0xf0]  ;;  %4119 = vmatpush.bf16.msra.mxu0 %v8566_v42  ;;  %4147 = vmatpush.bf16.msra.mxu2 %v8570_v29  ;;  %v8847_v29 = vld [vmem:[%s15523_s5 + $0xcf8] sm:$0xf0] }
 0x41a   :  { %v8630_v44 = vor.u32 %v10374_v26, %v8629_v60  ;;  %v8837_v60 = vld [vmem:[%s15523_s5 + $0xce0] sm:$0xf] }
 0x41b   :  { %4132 = vmatpush.bf16.msra.mxu1 %v8638_v56  ;;  %v8767_v56 = vld [vmem:[%s15523_s5 + $0xc58] sm:$0xf0] }
 0x41f   :  { %4133 = vmatpush.bf16.msra.mxu1 %v8630_v44  ;;  %v8759_v44 = vld [vmem:[%s15523_s5 + $0xc48] sm:$0xf0] }
 0x424   :  { %v3544_v12 = vpop.f32.mrf.mxu0 }
 0x42a   :  { %v3558_v48 = vpop.f32.mrf.mxu1  ;;  %v3572_v46 = vpop.f32.mrf.mxu2 }
 0x42b   :  { %v3559_v6 = vadd.f32 %v3558_v48, %v3544_v12  ;;  %v3305_v12 = vadd.f32 %v3300_v39, %v3018_v31  ;;  %v10373_v39 = vld [vmem:[%s15523_s5 + $0xa84] sm:$0xf] }
 0x42c   :  { %v3546_v11 = vpop.f32.mrf.mxu0 }
 0x42d   :  { %v3591_v40 = vadd.f32 %v3559_v6, %v3304_v0  ;;  %v10375_v0 = vld [vmem:[%s15523_s5 + $0xa94] sm:$0xf]  ;;  %v8639_v6 = vld [vmem:[%s15523_s5 + $0xa98] sm:$0xf0] }
 0x42e   :  { %v8642_v24 = vor.u32 %v10375_v0, %v8639_v6  ;;  %v8774_v0 = vor.u32 %v10434_v61, %v8773_v62  ;;  %v10426_v62 = vld [vmem:[%s15523_s5 + $0xc24] sm:$0xf0]  ;;  %v10425_v61 = vld [vmem:[%s15523_s5 + $0xc24] sm:$0xf] }
 0x42f   :  { %v3602_v51 = vadd.f32 %v3598_v28, %v3591_v40 }
 0x430   :  { %v3586_v1 = vpop.f32.mrf.mxu3  ;;  %4160 = vmatpush.bf16.msra.mxu3 %v8642_v24  ;;  %v8850_v24 = vor.u32 %v10451_v22, %v8847_v29  ;;  %v8733_v29 = vld [vmem:[%s15523_s5 + $0xc10] sm:$0xf] }
 0x431   :  { %v3606_v47 = vmax.f32 %v3602_v51, 0.0  ;;  %v3587_v52 = vadd.f32 %v3586_v1, %v3572_v46  ;;  %v8634_v46 = vor.u32 %v10373_v39, %v8631_v15  ;;  %v8839_v39 = vld [vmem:[%s15523_s5 + $0xce8] sm:$0xf0] }
 0x432   :  { %v3560_v13 = vpop.f32.mrf.mxu1  ;;  %v3574_v59 = vpop.f32.mrf.mxu2 }
 0x433   :  { %v3614_v14 = vrot.slane %v3606_v47, 6  ;;  %v3592_v48 = vadd.f32 %v3587_v52, %v3305_v12  ;;  %v3561_v55 = vadd.f32 %v3560_v13, %v3546_v11  ;;  %v8775_v13 = vld [vmem:[%s15523_s5 + $0xc68] sm:$0xf0] }
 0x434   :  { %4161 = vmatpush.bf16.msra.mxu3 %v8634_v46  ;;  %v8829_v46 = vld [vmem:[%s15523_s5 + $0xcd0] sm:$0xf] }
 0x435   :  { %3622 = vst [vmem:[#allocation2 + $0x30] sm:$0xfc] %v3614_v14  ;;  %v3603_v34 = vadd.f32 %v3599_v4, %v3592_v48  ;;  %v3593_v54 = vadd.f32 %v3561_v55, %v3306_v30  ;;  %v10433_v30 = vld [vmem:[%s15523_s5 + $0xc64] sm:$0xf] }
 0x436   :  { %3624 = vst [vmem:[#allocation2 + $0x8] sm:$0x3] %v3614_v14  ;;  %v10452_v14 = vld [vmem:[%s15523_s5 + $0xcf4] sm:$0xf0]  ;;  %v8778_v6 = vor.u32 %v10433_v30, %v8775_v13  ;;  %v8743_v30 = vld [vmem:[%s15523_s5 + $0xc28] sm:$0xf0] }
 0x437   :  { %v3607_v25 = vmax.f32 %v3603_v34, 0.0  ;;  %v3604_v38 = vadd.f32 %v3598_v28, %v3593_v54  ;;  %v3307_v28 = vadd.f32 %v3302_v49, %v3020_v23  ;;  %v8765_v49 = vld [vmem:[%s15523_s5 + $0xc50] sm:$0xf]  ;;  %v10432_v34 = vld [vmem:[%s15523_s5 + $0xc54] sm:$0xf0]  ;;  %v8746_v22 = vor.u32 %v10425_v61, %v8743_v30 }
 0x438   :  { %v3588_v33 = vpop.f32.mrf.mxu3  ;;  %v10431_v54 = vld [vmem:[%s15523_s5 + $0xc54] sm:$0xf]  ;;  %v8766_v15 = vor.u32 %v10432_v34, %v8765_v49  ;;  %v8805_v49 = vld [vmem:[%s15523_s5 + $0xca0] sm:$0xf]  ;;  %v8791_v30 = vld [vmem:[%s15523_s5 + $0xc88] sm:$0xf0] }
 0x439   :  { %v3615_v40 = vrot.slane %v3607_v25, 6  ;;  %v3608_v9 = vmax.f32 %v3604_v38, 0.0  ;;  %v3589_v35 = vadd.f32 %v3588_v33, %v3574_v59  ;;  %v8846_v38 = vor.u32 %v10452_v14, %v8845_v43  ;;  %v10450_v59 = vld [vmem:[%s15523_s5 + $0xce4] sm:$0xf0]  ;;  %v10449_v33 = vld [vmem:[%s15523_s5 + $0xce4] sm:$0xf] }
 0x43a   :  { %v8813_v43 = vld [vmem:[%s15523_s5 + $0xcb0] sm:$0xf]  ;;  %v10444_v14 = vld [vmem:[%s15523_s5 + $0xcb4] sm:$0xf0] }
 0x43b   :  { %3623 = vst [vmem:[#allocation2] sm:$0xfc] %v3615_v40  ;;  %v3616_v45 = vrot.slane %v3608_v9, 6  ;;  %v3594_v19 = vadd.f32 %v3589_v35, %v3307_v28  ;;  %v8770_v28 = vor.u32 %v10431_v54, %v8767_v56  ;;  %v10430_v9 = vld [vmem:[%s15523_s5 + $0xc44] sm:$0xf0]  ;;  %v8814_v34 = vor.u32 %v10444_v14, %v8813_v43 }
 0x43c   :  { %3625 = vst [vmem:[#allocation2 + $0x10] sm:$0x3] %v3615_v40  ;;  %v3669_v51 = vld [vmem:[#allocation2 + $0x30] sm:$0xfe]  ;;  %v8757_v40 = vld [vmem:[%s15523_s5 + $0xc40] sm:$0xf] }
 0x43d   :  { %3626 = vst [vmem:[#allocation2 + $0x28] sm:$0xfc] %v3616_v45  ;;  %v3605_v21 = vadd.f32 %v3599_v4, %v3594_v19  ;;  %v3671_v16 = vld [vmem:[#allocation2 + $0x8] sm:$0x1]  ;;  %v3685_v1 = vrot.slane %v3669_v51, 1  ;;  %v8842_v19 = vor.u32 %v10449_v33, %v8839_v39  ;;  %v8758_v51 = vor.u32 %v10430_v9, %v8757_v40 }
 0x43e   :  { %3628 = vst [vmem:[#allocation2 + $0x18] sm:$0x3] %v3616_v45  ;;  %v3686_v18 = vrot.slane %v3671_v16, 1  ;;  %v10429_v35 = vld [vmem:[%s15523_s5 + $0xc44] sm:$0xf]  ;;  %v8838_v45 = vor.u32 %v10450_v59, %v8837_v60 }
 0x43f   :  { %v3609_v36 = vmax.f32 %v3605_v21, 0.0  ;;  %v10448_v21 = vld [vmem:[%s15523_s5 + $0xcd4] sm:$0xf0]  ;;  %v8762_v16 = vor.u32 %v10429_v35, %v8759_v44  ;;  %v10442_v56 = vld [vmem:[%s15523_s5 + $0xca4] sm:$0xf0] }
 0x440   :  { %v3687_v52 = vsel %vm813_vm12, %v3685_v1, %v3686_v18  ;;  %v8830_v1 = vor.u32 %v10448_v21, %v8829_v46  ;;  %v10422_v60 = vld [vmem:[%s15523_s5 + $0xc04] sm:$0xf0]  ;;  %v8727_v59 = vld [vmem:[%s15523_s5 + $0xc08] sm:$0xf0]  ;;  %v8941_v40 = vld [vmem:[%s15523_s5 + $0xd70] sm:$0xf]  ;;  %v8806_v21 = vor.u32 %v10442_v56, %v8805_v49 }
 0x441   :  { %v3617_v31 = vrot.slane %v3609_v36, 6  ;;  %v10447_v36 = vld [vmem:[%s15523_s5 + $0xcd4] sm:$0xf]  ;;  %v10468_v9 = vld [vmem:[%s15523_s5 + $0xd74] sm:$0xf0] }
 0x442   :  { %v3670_v12 = vld [vmem:[#allocation2] sm:$0xfe]  ;;  %v4168_v35 = vld [vmem:[#allocation2 + $0x30] sm:$0xfc]  ;;  %v4170_v44 = vld [vmem:[#allocation2 + $0x8] sm:$0x3] }
 0x443   :  { %3627 = vst [vmem:[#allocation2 + $0x20] sm:$0xfc] %v3617_v31  ;;  %v3672_v47 = vld [vmem:[#allocation2 + $0x10] sm:$0x1]  ;;  %v3688_v55 = vrot.slane %v3670_v12, 1 }
 0x444   :  { %3629 = vst [vmem:[#allocation2 + $0x38] sm:$0x3] %v3617_v31  ;;  %v3673_v37 = vld [vmem:[#allocation2 + $0x28] sm:$0xfe]  ;;  %v3689_v50 = vrot.slane %v3672_v47, 1  ;;  %v3630_v47 = vld [vmem:[#allocation2 + $0x30] sm:$0xff] }
 0x445   :  { %v3675_v63 = vld [vmem:[#allocation2 + $0x18] sm:$0x1]  ;;  %v3691_v10 = vrot.slane %v3673_v37, 1  ;;  %v8831_v31 = vld [vmem:[%s15523_s5 + $0xcd8] sm:$0xf0] }
 0x446   :  { %v3692_v58 = vrot.slane %v3675_v63, 1  ;;  %v3690_v23 = vsel %vm813_vm12, %v3688_v55, %v3689_v50  ;;  %v8751_v37 = vld [vmem:[%s15523_s5 + $0xc38] sm:$0xf0]  ;;  %v8834_v18 = vor.u32 %v10447_v36, %v8831_v31  ;;  %v3632_v63 = vld [vmem:[#allocation2 + $0x28] sm:$0xff]  ;;  %v4174_v39 = vld [vmem:[#allocation2 + $0x18] sm:$0x3] }
 0x447   :  { %v8823_v12 = vld [vmem:[%s15523_s5 + $0xcc8] sm:$0xf0]  ;;  %v8815_v55 = vld [vmem:[%s15523_s5 + $0xcb8] sm:$0xf0]  ;;  %v8797_v46 = vld [vmem:[%s15523_s5 + $0xc90] sm:$0xf] }
 0x448   :  { %v3693_v4 = vsel %vm813_vm12, %v3691_v10, %v3692_v58  ;;  %v8821_v10 = vld [vmem:[%s15523_s5 + $0xcc0] sm:$0xf]  ;;  %v10445_v58 = vld [vmem:[%s15523_s5 + $0xcc4] sm:$0xf]  ;;  %v4172_v33 = vld [vmem:[#allocation2 + $0x28] sm:$0xfc] }
 0x449   :  { %v3701_v11 = vpack.c.bf16 %v3693_v4, %v3687_v52  ;;  %v8750_v52 = vor.u32 %v10428_v8, %v8749_v3  ;;  %v8754_v4 = vor.u32 %v10427_v32, %v8751_v37  ;;  %v8826_v13 = vor.u32 %v10445_v58, %v8823_v12  ;;  %v10440_v31 = vld [vmem:[%s15523_s5 + $0xc94] sm:$0xf0]  ;;  %v8799_v8 = vld [vmem:[%s15523_s5 + $0xc98] sm:$0xf0]  ;;  %v8935_v58 = vld [vmem:[%s15523_s5 + $0xd68] sm:$0xf0] }
 0x44a   :  { %v3674_v48 = vld [vmem:[#allocation2 + $0x20] sm:$0xfe]  ;;  %v4191_v3 = vrot.slane %v4174_v39, 2  ;;  %v4184_v32 = vrot.slane %v4168_v35, 2  ;;  %v4185_v37 = vrot.slane %v4170_v44, 2  ;;  %v8942_v12 = vor.u32 %v10468_v9, %v8941_v40 }
 0x44b   :  { %3904 = vmatmul.bf16.vlgmr.msrb.gmra.mxu0 %v3701_v11  ;;  %3932 = vmatmul.bf16.vlgmr.msrb.gmra.mxu2 %v3701_v11  ;;  %v3676_v17 = vld [vmem:[#allocation2 + $0x38] sm:$0x1]  ;;  %v3694_v42 = vrot.slane %v3674_v48, 1  ;;  %v8822_v11 = vor.u32 %v10446_v27, %v8821_v10  ;;  %v10443_v48 = vld [vmem:[%s15523_s5 + $0xcb4] sm:$0xf] }
 0x44c   :  { %4395 = vmatpush.bf16.msrb.mxu0 %v8782_v5  ;;  %4423 = vmatpush.bf16.msrb.mxu2 %v8786_v7  ;;  %v3695_v20 = vrot.slane %v3676_v17, 1  ;;  %v8741_v5 = vld [vmem:[%s15523_s5 + $0xc20] sm:$0xf]  ;;  %v3634_v7 = vpack.c.bf16 %v3632_v63, %v3630_v47  ;;  %v8818_v54 = vor.u32 %v10443_v48, %v8815_v55  ;;  %v10466_v10 = vld [vmem:[%s15523_s5 + $0xd64] sm:$0xf0]  ;;  %v4186_v55 = vsel %vm1313_vm13, %v4184_v32, %v4185_v37 }
 0x44d   :  { %v8742_v50 = vor.u32 %v10426_v62, %v8741_v5  ;;  %v3631_v17 = vld [vmem:[#allocation2] sm:$0xff]  ;;  %v9005_v43 = vld [vmem:[%s15523_s5 + $0xdf0] sm:$0xf]  ;;  %v10484_v14 = vld [vmem:[%s15523_s5 + $0xdf4] sm:$0xf0] }
 0x44e   :  { %v3696_v25 = vsel %vm813_vm12, %v3694_v42, %v3695_v20  ;;  %v3633_v42 = vld [vmem:[#allocation2 + $0x20] sm:$0xff]  ;;  %v8735_v20 = vld [vmem:[%s15523_s5 + $0xc18] sm:$0xf0]  ;;  %v10483_v48 = vld [vmem:[%s15523_s5 + $0xdf4] sm:$0xf] }
 0x44f   :  { %v3702_v26 = vpack.c.bf16 %v3696_v25, %v3690_v23  ;;  %v10441_v23 = vld [vmem:[%s15523_s5 + $0xca4] sm:$0xf]  ;;  %v8807_v25 = vld [vmem:[%s15523_s5 + $0xca8] sm:$0xf0]  ;;  %v10464_v56 = vld [vmem:[%s15523_s5 + $0xd54] sm:$0xf0] }
 0x450   :  { %4396 = vmatpush.bf16.msrb.mxu0 %v8774_v0  ;;  %4424 = vmatpush.bf16.msrb.mxu2 %v8778_v6  ;;  %v10424_v0 = vld [vmem:[%s15523_s5 + $0xc14] sm:$0xf0]  ;;  %v10423_v6 = vld [vmem:[%s15523_s5 + $0xc14] sm:$0xf]  ;;  %v8810_v36 = vor.u32 %v10441_v23, %v8807_v25  ;;  %v10465_v27 = vld [vmem:[%s15523_s5 + $0xd64] sm:$0xf] }
 0x451   :  { %3918 = vmatmul.bf16.vlgmr.msrb.gmra.mxu1 %v3702_v26  ;;  %3946 = vmatmul.bf16.vlgmr.msrb.gmra.mxu3 %v3702_v26  ;;  %v10421_v26 = vld [vmem:[%s15523_s5 + $0xc04] sm:$0xf]  ;;  %v10463_v23 = vld [vmem:[%s15523_s5 + $0xd54] sm:$0xf]  ;;  %v8927_v25 = vld [vmem:[%s15523_s5 + $0xd58] sm:$0xf0] }
 0x452   :  { %4409 = vmatpush.bf16.msrb.mxu1 %v8846_v38  ;;  %4437 = vmatpush.bf16.msrb.mxu3 %v8850_v24  ;;  %v3635_v38 = vpack.c.bf16 %v3633_v42, %v3631_v17  ;;  %v8725_v24 = vld [vmem:[%s15523_s5 + $0xc00] sm:$0xf]  ;;  %v8730_v63 = vor.u32 %v10421_v26, %v8727_v59  ;;  %v10437_v5 = vld [vmem:[%s15523_s5 + $0xc84] sm:$0xf]  ;;  %v4171_v42 = vld [vmem:[#allocation2 + $0x10] sm:$0x3]  ;;  %v8930_v40 = vor.u32 %v10463_v23, %v8927_v25 }
 0x453   :  { %v4169_v17 = vld [vmem:[#allocation2] sm:$0xfc]  ;;  %v4188_v26 = vrot.slane %v4171_v42, 2  ;;  %v10462_v44 = vld [vmem:[%s15523_s5 + $0xd44] sm:$0xf0] }
 0x454   :  { %4397 = vmatpush.bf16.msrb.mxu0 %v8766_v15  ;;  %4425 = vmatpush.bf16.msrb.mxu2 %v8770_v28  ;;  %v8734_v15 = vor.u32 %v10424_v0, %v8733_v29  ;;  %v8738_v28 = vor.u32 %v10423_v6, %v8735_v20  ;;  %v8938_v0 = vor.u32 %v10465_v27, %v8935_v58  ;;  %v8925_v6 = vld [vmem:[%s15523_s5 + $0xd50] sm:$0xf]  ;;  %v8997_v59 = vld [vmem:[%s15523_s5 + $0xde0] sm:$0xf]  ;;  %v10481_v39 = vld [vmem:[%s15523_s5 + $0xde4] sm:$0xf] }
 0x455   :  { %v8917_v35 = vld [vmem:[%s15523_s5 + $0xd40] sm:$0xf]  ;;  %v8893_v42 = vld [vmem:[%s15523_s5 + $0xd10] sm:$0xf]  ;;  %v8967_v23 = vld [vmem:[%s15523_s5 + $0xda8] sm:$0xf0] }
 0x456   :  { %4410 = vmatpush.bf16.msrb.mxu1 %v8838_v45  ;;  %4438 = vmatpush.bf16.msrb.mxu3 %v8842_v19  ;;  %v10467_v45 = vld [vmem:[%s15523_s5 + $0xd74] sm:$0xf]  ;;  %v8943_v19 = vld [vmem:[%s15523_s5 + $0xd78] sm:$0xf0]  ;;  %v8918_v32 = vor.u32 %v10462_v44, %v8917_v35  ;;  %v8885_v25 = vld [vmem:[%s15523_s5 + $0xd00] sm:$0xf] }
 0x457   :  { %v8946_v47 = vor.u32 %v10467_v45, %v8943_v19  ;;  %v10461_v45 = vld [vmem:[%s15523_s5 + $0xd44] sm:$0xf]  ;;  %v8919_v19 = vld [vmem:[%s15523_s5 + $0xd48] sm:$0xf0]  ;;  %v10499_v35 = vld [vmem:[%s15523_s5 + $0xe74] sm:$0xf] }
 0x458   :  { %4398 = vmatpush.bf16.msrb.mxu0 %v8758_v51  ;;  %4426 = vmatpush.bf16.msrb.mxu2 %v8762_v16  ;;  %v10439_v51 = vld [vmem:[%s15523_s5 + $0xc94] sm:$0xf]  ;;  %v4190_v16 = vrot.slane %v4172_v33, 2  ;;  %v10482_v33 = vld [vmem:[%s15523_s5 + $0xde4] sm:$0xf0]  ;;  %v8922_v37 = vor.u32 %v10461_v45, %v8919_v19 }
 0x459   :  { %v8802_v62 = vor.u32 %v10439_v51, %v8799_v8  ;;  %v8991_v8 = vld [vmem:[%s15523_s5 + $0xdd8] sm:$0xf0] }
 0x45a   :  { %4411 = vmatpush.bf16.msrb.mxu1 %v8830_v1  ;;  %4439 = vmatpush.bf16.msrb.mxu3 %v8834_v18  ;;  %v8933_v1 = vld [vmem:[%s15523_s5 + $0xd60] sm:$0xf]  ;;  %v8726_v18 = vor.u32 %v10422_v60, %v8725_v24  ;;  %v4192_v61 = vsel %vm1313_vm13, %v4190_v16, %v4191_v3  ;;  %v4187_v60 = vrot.slane %v4169_v17, 2  ;;  %v10480_v16 = vld [vmem:[%s15523_s5 + $0xdd4] sm:$0xf0] }
 0x45b   :  { %4120 = vmatmul.bf16.vlgmr.msra.gmra.mxu0 %v3634_v7  ;;  %4148 = vmatmul.bf16.vlgmr.msra.gmra.mxu2 %v3634_v7  ;;  %v8798_v7 = vor.u32 %v10440_v31, %v8797_v46  ;;  %v4200_v29 = vpack.c.bf16 %v4192_v61, %v4186_v55  ;;  %v8989_v31 = vld [vmem:[%s15523_s5 + $0xdd0] sm:$0xf]  ;;  %v10479_v3 = vld [vmem:[%s15523_s5 + $0xdd4] sm:$0xf]  ;;  %v10458_v61 = vld [vmem:[%s15523_s5 + $0xd24] sm:$0xf0] }
 0x45c   :  { %4399 = vmatpush.bf16.msrb.mxu0 %v8750_v52  ;;  %4427 = vmatpush.bf16.msrb.mxu2 %v8754_v4  ;;  %v8789_v52 = vld [vmem:[%s15523_s5 + $0xc80] sm:$0xf]  ;;  %v10438_v4 = vld [vmem:[%s15523_s5 + $0xc84] sm:$0xf0]  ;;  %v4189_v46 = vsel %vm1313_vm13, %v4187_v60, %v4188_v26  ;;  %v8990_v27 = vor.u32 %v10480_v16, %v8989_v31  ;;  %v8994_v58 = vor.u32 %v10479_v3, %v8991_v8  ;;  %v10475_v55 = vld [vmem:[%s15523_s5 + $0xdb4] sm:$0xf] }
 0x45d   :  { %v8887_v60 = vld [vmem:[%s15523_s5 + $0xd08] sm:$0xf0]  ;;  %v9103_v44 = vld [vmem:[%s15523_s5 + $0xe78] sm:$0xf0] }
 0x45e   :  { %4412 = vmatpush.bf16.msrb.mxu1 %v8822_v11  ;;  %4440 = vmatpush.bf16.msrb.mxu3 %v8826_v13  ;;  %v4173_v11 = vld [vmem:[#allocation2 + $0x20] sm:$0xfc]  ;;  %v4175_v13 = vld [vmem:[#allocation2 + $0x38] sm:$0x3]  ;;  %v4459_v26 = vld [vmem:[#allocation2 + $0x28] sm:$0xf8] }
 0x45f   :  { %v4193_v20 = vrot.slane %v4173_v11, 2  ;;  %v4194_v49 = vrot.slane %v4175_v13, 2  ;;  %v8903_v11 = vld [vmem:[%s15523_s5 + $0xd28] sm:$0xf0]  ;;  %v8959_v16 = vld [vmem:[%s15523_s5 + $0xd98] sm:$0xf0] }
 0x460   :  { %4400 = vmatpush.bf16.msrb.mxu0 %v8742_v50  ;;  %4428 = vmatpush.bf16.msrb.mxu2 %v8746_v22  ;;  %v8934_v50 = vor.u32 %v10466_v10, %v8933_v1  ;;  %v9007_v22 = vld [vmem:[%s15523_s5 + $0xdf8] sm:$0xf0]  ;;  %v8909_v1 = vld [vmem:[%s15523_s5 + $0xd30] sm:$0xf] }
 0x461   :  { %4134 = vmatmul.bf16.vlgmr.msra.gmra.mxu1 %v3635_v38  ;;  %4162 = vmatmul.bf16.vlgmr.msra.gmra.mxu3 %v3635_v38  ;;  %v9006_v38 = vor.u32 %v10484_v14, %v9005_v43  ;;  %v9010_v24 = vor.u32 %v10483_v48, %v9007_v22  ;;  %v4195_v9 = vsel %vm1313_vm13, %v4193_v20, %v4194_v49  ;;  %v8911_v10 = vld [vmem:[%s15523_s5 + $0xd38] sm:$0xf0]  ;;  %v8973_v14 = vld [vmem:[%s15523_s5 + $0xdb0] sm:$0xf]  ;;  %v10476_v48 = vld [vmem:[%s15523_s5 + $0xdb4] sm:$0xf0] }
 0x462   :  { %4413 = vmatpush.bf16.msrb.mxu1 %v8814_v34  ;;  %4441 = vmatpush.bf16.msrb.mxu3 %v8818_v54  ;;  %v8790_v34 = vor.u32 %v10438_v4, %v8789_v52  ;;  %v8794_v54 = vor.u32 %v10437_v5, %v8791_v30  ;;  %v4201_v51 = vpack.c.bf16 %v4195_v9, %v4189_v46  ;;  %v10477_v52 = vld [vmem:[%s15523_s5 + $0xdc4] sm:$0xf]  ;;  %v8983_v4 = vld [vmem:[%s15523_s5 + $0xdc8] sm:$0xf0]  ;;  %v8965_v20 = vld [vmem:[%s15523_s5 + $0xda0] sm:$0xf] }
 0x463   :  { %v10457_v30 = vld [vmem:[%s15523_s5 + $0xd24] sm:$0xf]  ;;  %v8986_v43 = vor.u32 %v10477_v52, %v8983_v4  ;;  %v8974_v49 = vor.u32 %v10476_v48, %v8973_v14  ;;  %v10500_v9 = vld [vmem:[%s15523_s5 + $0xe74] sm:$0xf0]  ;;  %v8957_v46 = vld [vmem:[%s15523_s5 + $0xd90] sm:$0xf] }
 0x464   :  { %4401 = vmatpush.bf16.msrb.mxu0 %v8734_v15  ;;  %4429 = vmatpush.bf16.msrb.mxu2 %v8738_v28  ;;  %v8999_v15 = vld [vmem:[%s15523_s5 + $0xde8] sm:$0xf0]  ;;  %v8926_v28 = vor.u32 %v10464_v56, %v8925_v6  ;;  %v8906_v17 = vor.u32 %v10457_v30, %v8903_v11  ;;  %v8895_v6 = vld [vmem:[%s15523_s5 + $0xd18] sm:$0xf0]  ;;  %v10473_v56 = vld [vmem:[%s15523_s5 + $0xda4] sm:$0xf] }
 0x465   :  { %v8970_v19 = vor.u32 %v10473_v56, %v8967_v23  ;;  %v4460_v52 = vld [vmem:[#allocation2 + $0x20] sm:$0xf8]  ;;  %v4462_v4 = vld [vmem:[#allocation2 + $0x38] sm:$0x7]  ;;  %v8951_v30 = vld [vmem:[%s15523_s5 + $0xd88] sm:$0xf0] }
 0x466   :  { %4414 = vmatpush.bf16.msrb.mxu1 %v8806_v21  ;;  %4442 = vmatpush.bf16.msrb.mxu3 %v8810_v36  ;;  %v8998_v21 = vor.u32 %v10482_v33, %v8997_v59  ;;  %v9002_v36 = vor.u32 %v10481_v39, %v8999_v15  ;;  %v4461_v59 = vld [vmem:[#allocation2 + $0x18] sm:$0x7]  ;;  %v9101_v15 = vld [vmem:[%s15523_s5 + $0xe70] sm:$0xf] }
 0x467   :  { %v4478_v31 = vrot.slane %v4461_v59, 3  ;;  %v9165_v11 = vld [vmem:[%s15523_s5 + $0xef0] sm:$0xf]  ;;  %v10496_v56 = vld [vmem:[%s15523_s5 + $0xe54] sm:$0xf0] }
 0x468   :  { %4402 = vmatpush.bf16.msrb.mxu0 %v8726_v18  ;;  %4430 = vmatpush.bf16.msrb.mxu2 %v8730_v63  ;;  %v10460_v18 = vld [vmem:[%s15523_s5 + $0xd34] sm:$0xf0]  ;;  %v10459_v63 = vld [vmem:[%s15523_s5 + $0xd34] sm:$0xf]  ;;  %v4458_v14 = vld [vmem:[#allocation2 + $0x10] sm:$0x7] }
 0x469   :  { %v8910_v5 = vor.u32 %v10460_v18, %v8909_v1  ;;  %v9093_v1 = vld [vmem:[%s15523_s5 + $0xe60] sm:$0xf]  ;;  %v10498_v18 = vld [vmem:[%s15523_s5 + $0xe64] sm:$0xf0] }
 0x46a   :  { %4415 = vmatpush.bf16.msrb.mxu1 %v8798_v7  ;;  %4443 = vmatpush.bf16.msrb.mxu3 %v8802_v62  ;;  %v8914_v7 = vor.u32 %v10459_v63, %v8911_v10  ;;  %v8901_v62 = vld [vmem:[%s15523_s5 + $0xd20] sm:$0xf]  ;;  %v10497_v63 = vld [vmem:[%s15523_s5 + $0xe64] sm:$0xf]  ;;  %v9095_v10 = vld [vmem:[%s15523_s5 + $0xe68] sm:$0xf0] }
 0x46b   :  { %4403 = vmatmul.bf16.vlgmr.msrb.gmra.mxu0 %v4200_v29  ;;  %4431 = vmatmul.bf16.vlgmr.msrb.gmra.mxu2 %v4200_v29  ;;  %v8902_v22 = vor.u32 %v10458_v61, %v8901_v62  ;;  %v10456_v29 = vld [vmem:[%s15523_s5 + $0xd14] sm:$0xf0]  ;;  %v10469_v61 = vld [vmem:[%s15523_s5 + $0xd84] sm:$0xf]  ;;  %v10514_v59 = vld [vmem:[%s15523_s5 + $0xee4] sm:$0xf0] }
 0x46c   :  { %4682 = vmatpush.bf16.msra.mxu0 %v8942_v12  ;;  %4710 = vmatpush.bf16.msra.mxu2 %v8946_v47  ;;  %v8981_v12 = vld [vmem:[%s15523_s5 + $0xdc0] sm:$0xf]  ;;  %v10478_v47 = vld [vmem:[%s15523_s5 + $0xdc4] sm:$0xf0]  ;;  %v8894_v33 = vor.u32 %v10456_v29, %v8893_v42  ;;  %v9094_v29 = vor.u32 %v10498_v18, %v9093_v1 }
 0x46d   :  { %v8982_v13 = vor.u32 %v10478_v47, %v8981_v12  ;;  %v8949_v12 = vld [vmem:[%s15523_s5 + $0xd80] sm:$0xf]  ;;  %v10470_v47 = vld [vmem:[%s15523_s5 + $0xd84] sm:$0xf0] }
 0x46e   :  { %4416 = vmatpush.bf16.msrb.mxu1 %v8790_v34  ;;  %4444 = vmatpush.bf16.msrb.mxu3 %v8794_v54  ;;  %v10474_v54 = vld [vmem:[%s15523_s5 + $0xda4] sm:$0xf0] }
 0x46f   :  { %v8966_v45 = vor.u32 %v10474_v54, %v8965_v20  ;;  %v8954_v20 = vor.u32 %v10469_v61, %v8951_v30  ;;  %v9085_v54 = vld [vmem:[%s15523_s5 + $0xe50] sm:$0xf]  ;;  %v10489_v30 = vld [vmem:[%s15523_s5 + $0xe24] sm:$0xf] }
 0x470   :  { %4683 = vmatpush.bf16.msra.mxu0 %v8934_v50  ;;  %4711 = vmatpush.bf16.msra.mxu2 %v8938_v0  ;;  %v8975_v50 = vld [vmem:[%s15523_s5 + $0xdb8] sm:$0xf0]  ;;  %v10455_v0 = vld [vmem:[%s15523_s5 + $0xd14] sm:$0xf] }
 0x471   :  { %4417 = vmatmul.bf16.vlgmr.msrb.gmra.mxu1 %v4201_v51  ;;  %4445 = vmatmul.bf16.vlgmr.msrb.gmra.mxu3 %v4201_v51  ;;  %v8978_v34 = vor.u32 %v10475_v55, %v8975_v50  ;;  %v8898_v39 = vor.u32 %v10455_v0, %v8895_v6  ;;  %v10471_v51 = vld [vmem:[%s15523_s5 + $0xd94] sm:$0xf]  ;;  %v9167_v50 = vld [vmem:[%s15523_s5 + $0xef8] sm:$0xf0]  ;;  %v9098_v0 = vor.u32 %v10497_v63, %v9095_v10 }
 0x472   :  { %4696 = vmatpush.bf16.msra.mxu1 %v9006_v38  ;;  %4724 = vmatpush.bf16.msra.mxu3 %v9010_v24  ;;  %v10454_v38 = vld [vmem:[%s15523_s5 + $0xd04] sm:$0xf0]  ;;  %v10453_v24 = vld [vmem:[%s15523_s5 + $0xd04] sm:$0xf]  ;;  %v10515_v55 = vld [vmem:[%s15523_s5 + $0xef4] sm:$0xf]  ;;  %v8950_v6 = vor.u32 %v10470_v47, %v8949_v12 }
 0x473   :  { %v10491_v63 = vld [vmem:[%s15523_s5 + $0xe34] sm:$0xf]  ;;  %v9071_v10 = vld [vmem:[%s15523_s5 + $0xe38] sm:$0xf0]  ;;  %v10509_v12 = vld [vmem:[%s15523_s5 + $0xec4] sm:$0xf] }
 0x474   :  { %4684 = vmatpush.bf16.msra.mxu0 %v8926_v28  ;;  %4712 = vmatpush.bf16.msra.mxu2 %v8930_v40  ;;  %v4455_v28 = vld [vmem:[#allocation2 + $0x30] sm:$0xf8]  ;;  %v4457_v40 = vld [vmem:[#allocation2 + $0x8] sm:$0x7]  ;;  %v9143_v47 = vld [vmem:[%s15523_s5 + $0xec8] sm:$0xf0] }
 0x475   :  { %v4471_v3 = vrot.slane %v4455_v28, 3  ;;  %v4472_v8 = vrot.slane %v4457_v40, 3  ;;  %v9086_v28 = vor.u32 %v10496_v56, %v9085_v54  ;;  %v9146_v61 = vor.u32 %v10509_v12, %v9143_v47  ;;  %v9127_v54 = vld [vmem:[%s15523_s5 + $0xea8] sm:$0xf0]  ;;  %v9045_v56 = vld [vmem:[%s15523_s5 + $0xe00] sm:$0xf] }
 0x476   :  { %4697 = vmatpush.bf16.msra.mxu1 %v8998_v21  ;;  %4725 = vmatpush.bf16.msra.mxu3 %v9002_v36  ;;  %v10472_v21 = vld [vmem:[%s15523_s5 + $0xd94] sm:$0xf0]  ;;  %v4477_v36 = vrot.slane %v4459_v26, 3 }
 0x477   :  { %v4473_v48 = vsel %vm1601_vm14, %v4471_v3, %v4472_v8 }
 0x478   :  { %4685 = vmatpush.bf16.msra.mxu0 %v8918_v32  ;;  %4713 = vmatpush.bf16.msra.mxu2 %v8922_v37  ;;  %v8886_v32 = vor.u32 %v10454_v38, %v8885_v25  ;;  %v8890_v37 = vor.u32 %v10453_v24, %v8887_v60  ;;  %v4479_v62 = vsel %vm1601_vm14, %v4477_v36, %v4478_v31  ;;  %v10495_v38 = vld [vmem:[%s15523_s5 + $0xe54] sm:$0xf]  ;;  %v9087_v24 = vld [vmem:[%s15523_s5 + $0xe58] sm:$0xf0]  ;;  %v9157_v60 = vld [vmem:[%s15523_s5 + $0xee0] sm:$0xf] }
 0x479   :  { %v4487_v42 = vpack.c.bf16 %v4479_v62, %v4473_v48  ;;  %v9170_v25 = vor.u32 %v10515_v55, %v9167_v50  ;;  %v9090_v40 = vor.u32 %v10495_v38, %v9087_v24  ;;  %v9149_v36 = vld [vmem:[%s15523_s5 + $0xed0] sm:$0xf]  ;;  %v10512_v31 = vld [vmem:[%s15523_s5 + $0xed4] sm:$0xf0]  ;;  %v9135_v48 = vld [vmem:[%s15523_s5 + $0xeb8] sm:$0xf0] }
 0x47a   :  { %4698 = vmatpush.bf16.msra.mxu1 %v8990_v27  ;;  %4726 = vmatpush.bf16.msra.mxu3 %v8994_v58  ;;  %v9102_v27 = vor.u32 %v10500_v9, %v9101_v15  ;;  %v9106_v58 = vor.u32 %v10499_v35, %v9103_v44  ;;  %v9077_v9 = vld [vmem:[%s15523_s5 + $0xe40] sm:$0xf]  ;;  %v10494_v35 = vld [vmem:[%s15523_s5 + $0xe44] sm:$0xf0]  ;;  %v9150_v1 = vor.u32 %v10512_v31, %v9149_v36  ;;  %v4748_v38 = vld [vmem:[#allocation2 + $0x18] sm:$0xf] }
 0x47b   :  { %v9078_v3 = vor.u32 %v10494_v35, %v9077_v9  ;;  %v10504_v9 = vld [vmem:[%s15523_s5 + $0xe94] sm:$0xf0]  ;;  %v10503_v35 = vld [vmem:[%s15523_s5 + $0xe94] sm:$0xf] }
 0x47c   :  { %4686 = vmatpush.bf16.msra.mxu0 %v8910_v5  ;;  %4714 = vmatpush.bf16.msra.mxu2 %v8914_v7  ;;  %v8958_v5 = vor.u32 %v10472_v21, %v8957_v46  ;;  %v8962_v7 = vor.u32 %v10471_v51, %v8959_v16  ;;  %v10493_v46 = vld [vmem:[%s15523_s5 + $0xe44] sm:$0xf]  ;;  %v9079_v21 = vld [vmem:[%s15523_s5 + $0xe48] sm:$0xf0]  ;;  %v10511_v51 = vld [vmem:[%s15523_s5 + $0xed4] sm:$0xf] }
 0x47d   :  { %v9151_v16 = vld [vmem:[%s15523_s5 + $0xed8] sm:$0xf0]  ;;  %v9082_v8 = vor.u32 %v10493_v46, %v9079_v21 }
 0x47e   :  { %4699 = vmatpush.bf16.msra.mxu1 %v8982_v13  ;;  %4727 = vmatpush.bf16.msra.mxu3 %v8986_v43  ;;  %v10516_v13 = vld [vmem:[%s15523_s5 + $0xef4] sm:$0xf0]  ;;  %v4456_v43 = vld [vmem:[#allocation2] sm:$0xf8]  ;;  %v9154_v18 = vor.u32 %v10511_v51, %v9151_v16 }
 0x47f   :  { %v9166_v23 = vor.u32 %v10516_v13, %v9165_v11  ;;  %v9063_v11 = vld [vmem:[%s15523_s5 + $0xe28] sm:$0xf0]  ;;  %v9133_v13 = vld [vmem:[%s15523_s5 + $0xeb0] sm:$0xf]  ;;  %v4747_v51 = vld [vmem:[#allocation2 + $0x20] sm:$0xf0] }
 0x480   :  { %4687 = vmatpush.bf16.msra.mxu0 %v8902_v22  ;;  %4715 = vmatpush.bf16.msra.mxu2 %v8906_v17  ;;  %v4480_v22 = vrot.slane %v4460_v52, 3  ;;  %v4481_v17 = vrot.slane %v4462_v4, 3  ;;  %v9074_v4 = vor.u32 %v10491_v63, %v9071_v10  ;;  %v9066_v50 = vor.u32 %v10489_v30, %v9063_v11  ;;  %v4749_v16 = vld [vmem:[#allocation2 + $0x38] sm:$0xf]  ;;  %v10501_v63 = vld [vmem:[%s15523_s5 + $0xe84] sm:$0xf] }
 0x481   :  { %v9111_v10 = vld [vmem:[%s15523_s5 + $0xe88] sm:$0xf0]  ;;  %v4768_v12 = vrot.slane %v4749_v16, 4  ;;  %v10577_v16 = vld [vmem:[%s15523_s5 + $0x10e4] sm:$0xf] }
 0x482   :  { %4700 = vmatpush.bf16.msra.mxu1 %v8974_v49  ;;  %4728 = vmatpush.bf16.msra.mxu3 %v8978_v34  ;;  %v4474_v49 = vrot.slane %v4456_v43, 3  ;;  %v4475_v34 = vrot.slane %v4458_v14, 3  ;;  %v4482_v26 = vsel %vm1601_vm14, %v4480_v22, %v4481_v17  ;;  %v10508_v43 = vld [vmem:[%s15523_s5 + $0xeb4] sm:$0xf0]  ;;  %v10507_v14 = vld [vmem:[%s15523_s5 + $0xeb4] sm:$0xf] }
 0x483   :  { %v9053_v22 = vld [vmem:[%s15523_s5 + $0xe10] sm:$0xf]  ;;  %v10488_v17 = vld [vmem:[%s15523_s5 + $0xe14] sm:$0xf0] }
 0x484   :  { %4688 = vmatpush.bf16.msra.mxu0 %v8894_v33  ;;  %4716 = vmatpush.bf16.msra.mxu2 %v8898_v39  ;;  %v10513_v33 = vld [vmem:[%s15523_s5 + $0xee4] sm:$0xf]  ;;  %v9159_v39 = vld [vmem:[%s15523_s5 + $0xee8] sm:$0xf0]  ;;  %v4476_v15 = vsel %vm1601_vm14, %v4474_v49, %v4475_v34  ;;  %v10506_v49 = vld [vmem:[%s15523_s5 + $0xea4] sm:$0xf0]  ;;  %v9054_v24 = vor.u32 %v10488_v17, %v9053_v22 }
 0x485   :  { %v4488_v44 = vpack.c.bf16 %v4482_v26, %v4476_v15  ;;  %v10505_v34 = vld [vmem:[%s15523_s5 + $0xea4] sm:$0xf] }
 0x486   :  { %4701 = vmatpush.bf16.msra.mxu1 %v8966_v45  ;;  %4729 = vmatpush.bf16.msra.mxu3 %v8970_v19  ;;  %v9158_v45 = vor.u32 %v10514_v59, %v9157_v60  ;;  %v9162_v19 = vor.u32 %v10513_v33, %v9159_v39  ;;  %v10485_v26 = vld [vmem:[%s15523_s5 + $0xe04] sm:$0xf]  ;;  %v4742_v59 = vld [vmem:[#allocation2 + $0x30] sm:$0xf0]  ;;  %v4744_v33 = vld [vmem:[#allocation2 + $0x8] sm:$0xf]  ;;  %v9130_v15 = vor.u32 %v10505_v34, %v9127_v54 }
 0x487   :  { %v4758_v36 = vrot.slane %v4742_v59, 4  ;;  %v4759_v31 = vrot.slane %v4744_v33, 4  ;;  %v9358_v33 = vld [vmem:[%s15523_s5 + $0x10f0] sm:$0xf] }
 0x488   :  { %4689 = vmatpush.bf16.msra.mxu0 %v8886_v32  ;;  %4717 = vmatpush.bf16.msra.mxu2 %v8890_v37  ;;  %v9069_v32 = vld [vmem:[%s15523_s5 + $0xe30] sm:$0xf]  ;;  %v10492_v37 = vld [vmem:[%s15523_s5 + $0xe34] sm:$0xf0] }
 0x489   :  { %v9070_v52 = vor.u32 %v10492_v37, %v9069_v32  ;;  %v9109_v32 = vld [vmem:[%s15523_s5 + $0xe80] sm:$0xf]  ;;  %v10502_v37 = vld [vmem:[%s15523_s5 + $0xe84] sm:$0xf0]  ;;  %v4760_v47 = vsel %vm1889_vm15, %v4758_v36, %v4759_v31 }
 0x48a   :  { %4702 = vmatpush.bf16.msra.mxu1 %v8958_v5  ;;  %4730 = vmatpush.bf16.msra.mxu3 %v8962_v7  ;;  %v9061_v5 = vld [vmem:[%s15523_s5 + $0xe20] sm:$0xf]  ;;  %v10490_v7 = vld [vmem:[%s15523_s5 + $0xe24] sm:$0xf0] }
 0x48b   :  { %4690 = vmatmul.bf16.vlgmr.msra.gmra.mxu0 %v4487_v42  ;;  %4718 = vmatmul.bf16.vlgmr.msra.gmra.mxu2 %v4487_v42  ;;  %v9062_v55 = vor.u32 %v10490_v7, %v9061_v5  ;;  %v9134_v42 = vor.u32 %v10508_v43, %v9133_v13  ;;  %v9114_v5 = vor.u32 %v10501_v63, %v9111_v10  ;;  %v9350_v36 = vld [vmem:[%s15523_s5 + $0x10e0] sm:$0xf]  ;;  %v10557_v63 = vld [vmem:[%s15523_s5 + $0x1044] sm:$0xf] }
 0x48c   :  { %4969 = vmatpush.bf16.msrb.mxu0 %v9102_v27  ;;  %4997 = vmatpush.bf16.msrb.mxu2 %v9106_v58  ;;  %v9141_v27 = vld [vmem:[%s15523_s5 + $0xec0] sm:$0xf]  ;;  %v10510_v58 = vld [vmem:[%s15523_s5 + $0xec4] sm:$0xf0] }
 0x48d   :  { %v9142_v62 = vor.u32 %v10510_v58, %v9141_v27  ;;  %v4745_v27 = vld [vmem:[#allocation2 + $0x10] sm:$0xf]  ;;  %v4767_v58 = vrot.slane %v4747_v51, 4  ;;  %v10578_v51 = vld [vmem:[%s15523_s5 + $0x10e4] sm:$0xf0] }
 0x48e   :  { %4703 = vmatpush.bf16.msra.mxu1 %v8950_v6  ;;  %4731 = vmatpush.bf16.msra.mxu3 %v8954_v20  ;;  %v9055_v6 = vld [vmem:[%s15523_s5 + $0xe18] sm:$0xf0]  ;;  %v9125_v20 = vld [vmem:[%s15523_s5 + $0xea0] sm:$0xf] }
 0x48f   :  { %v9126_v39 = vor.u32 %v10506_v49, %v9125_v20  ;;  %v9296_v49 = vld [vmem:[%s15523_s5 + $0x1078] sm:$0xf0] }
 0x490   :  { %4970 = vmatpush.bf16.msrb.mxu0 %v9094_v29  ;;  %4998 = vmatpush.bf16.msrb.mxu2 %v9098_v0  ;;  %v9138_v29 = vor.u32 %v10507_v14, %v9135_v48  ;;  %v10487_v0 = vld [vmem:[%s15523_s5 + $0xe14] sm:$0xf] }
 0x491   :  { %4704 = vmatmul.bf16.vlgmr.msra.gmra.mxu1 %v4488_v44  ;;  %4732 = vmatmul.bf16.vlgmr.msra.gmra.mxu3 %v4488_v44  ;;  %v9058_v60 = vor.u32 %v10487_v0, %v9055_v6  ;;  %v9119_v44 = vld [vmem:[%s15523_s5 + $0xe98] sm:$0xf0]  ;;  %v10564_v0 = vld [vmem:[%s15523_s5 + $0x1074] sm:$0xf0]  ;;  %v10563_v6 = vld [vmem:[%s15523_s5 + $0x1074] sm:$0xf] }
 0x492   :  { %4983 = vmatpush.bf16.msrb.mxu1 %v9166_v23  ;;  %5011 = vmatpush.bf16.msrb.mxu3 %v9170_v25  ;;  %v10486_v23 = vld [vmem:[%s15523_s5 + $0xe04] sm:$0xf0]  ;;  %v4746_v25 = vld [vmem:[#allocation2 + $0x28] sm:$0xf0]  ;;  %v9299_v54 = vor.u32 %v10563_v6, %v9296_v49  ;;  %v9334_v49 = vld [vmem:[%s15523_s5 + $0x10c0] sm:$0xf] }
 0x493   :  { %v9046_v46 = vor.u32 %v10486_v23, %v9045_v56  ;;  %v9286_v23 = vld [vmem:[%s15523_s5 + $0x1060] sm:$0xf] }
 0x494   :  { %4971 = vmatpush.bf16.msrb.mxu0 %v9086_v28  ;;  %4999 = vmatpush.bf16.msrb.mxu2 %v9090_v40  ;;  %v9047_v28 = vld [vmem:[%s15523_s5 + $0xe08] sm:$0xf0]  ;;  %v9117_v40 = vld [vmem:[%s15523_s5 + $0xe90] sm:$0xf] }
 0x495   :  { %v9050_v21 = vor.u32 %v10485_v26, %v9047_v28 }
 0x496   :  { %4984 = vmatpush.bf16.msrb.mxu1 %v9158_v45  ;;  %5012 = vmatpush.bf16.msrb.mxu3 %v9162_v19  ;;  %v4764_v45 = vrot.slane %v4746_v25, 4  ;;  %v4765_v19 = vrot.slane %v4748_v38, 4  ;;  %v10562_v25 = vld [vmem:[%s15523_s5 + $0x1064] sm:$0xf0]  ;;  %v10561_v38 = vld [vmem:[%s15523_s5 + $0x1064] sm:$0xf] }
 0x498   :  { %4972 = vmatpush.bf16.msrb.mxu0 %v9078_v3  ;;  %5000 = vmatpush.bf16.msrb.mxu2 %v9082_v8  ;;  %v9118_v3 = vor.u32 %v10504_v9, %v9117_v40  ;;  %v9122_v8 = vor.u32 %v10503_v35, %v9119_v44  ;;  %v9360_v40 = vld [vmem:[%s15523_s5 + $0x10f8] sm:$0xf0]  ;;  %v9278_v9 = vld [vmem:[%s15523_s5 + $0x1050] sm:$0xf]  ;;  %v10560_v35 = vld [vmem:[%s15523_s5 + $0x1054] sm:$0xf0] }
 0x49a   :  { %4985 = vmatpush.bf16.msrb.mxu1 %v9150_v1  ;;  %5013 = vmatpush.bf16.msrb.mxu3 %v9154_v18  ;;  %v4743_v1 = vld [vmem:[#allocation2] sm:$0xf0]  ;;  %v4766_v18 = vsel %vm1889_vm15, %v4764_v45, %v4765_v19  ;;  %v9279_v19 = vor.u32 %v10560_v35, %v9278_v9  ;;  %v9326_v9 = vld [vmem:[%s15523_s5 + $0x10b0] sm:$0xf]  ;;  %v10572_v35 = vld [vmem:[%s15523_s5 + $0x10b4] sm:$0xf0] }
 0x49b   :  { %v4761_v7 = vrot.slane %v4743_v1, 4  ;;  %v9270_v1 = vld [vmem:[%s15523_s5 + $0x1040] sm:$0xf] }
 0x49c   :  { %4973 = vmatpush.bf16.msrb.mxu0 %v9070_v52  ;;  %5001 = vmatpush.bf16.msrb.mxu2 %v9074_v4  ;;  %v9110_v52 = vor.u32 %v10502_v37, %v9109_v32  ;;  %v4774_v4 = vpack.c.bf16 %v4766_v18, %v4760_v47  ;;  %v9351_v32 = vor.u32 %v10578_v51, %v9350_v36  ;;  %v10558_v18 = vld [vmem:[%s15523_s5 + $0x1044] sm:$0xf0]  ;;  %v9246_v36 = vld [vmem:[%s15523_s5 + $0x1010] sm:$0xf]  ;;  %v10552_v51 = vld [vmem:[%s15523_s5 + $0x1014] sm:$0xf0] }
 0x49d   :  { %v9271_v10 = vor.u32 %v10558_v18, %v9270_v1 }
 0x49e   :  { %4986 = vmatpush.bf16.msrb.mxu1 %v9142_v62  ;;  %5014 = vmatpush.bf16.msrb.mxu3 %v9146_v61  ;;  %v4762_v62 = vrot.slane %v4745_v27, 4  ;;  %v4769_v61 = vsel %vm1889_vm15, %v4767_v58, %v4768_v12  ;;  %v9272_v27 = vld [vmem:[%s15523_s5 + $0x1048] sm:$0xf0]  ;;  %v9342_v58 = vld [vmem:[%s15523_s5 + $0x10d0] sm:$0xf] }
 0x49f   :  { %v10576_v12 = vld [vmem:[%s15523_s5 + $0x10d4] sm:$0xf0] }
 0x4a0   :  { %4974 = vmatpush.bf16.msrb.mxu0 %v9062_v55  ;;  %5002 = vmatpush.bf16.msrb.mxu2 %v9066_v50  ;;  %v4763_v30 = vsel %vm1889_vm15, %v4761_v7, %v4762_v62  ;;  %v9344_v7 = vld [vmem:[%s15523_s5 + $0x10d8] sm:$0xf0]  ;;  %v9262_v62 = vld [vmem:[%s15523_s5 + $0x1030] sm:$0xf] }
 0x4a1   :  { %v4775_v11 = vpack.c.bf16 %v4769_v61, %v4763_v30  ;;  %v10556_v30 = vld [vmem:[%s15523_s5 + $0x1034] sm:$0xf0] }
 0x4a2   :  { %4987 = vmatpush.bf16.msrb.mxu1 %v9134_v42  ;;  %5015 = vmatpush.bf16.msrb.mxu3 %v9138_v29  ;;  %v9294_v29 = vld [vmem:[%s15523_s5 + $0x1070] sm:$0xf]  ;;  %v9263_v6 = vor.u32 %v10556_v30, %v9262_v62  ;;  %v9320_v62 = vld [vmem:[%s15523_s5 + $0x10a8] sm:$0xf0]  ;;  %v10550_v30 = vld [vmem:[%s15523_s5 + $0x1004] sm:$0xf0] }
 0x4a3   :  { %v9295_v20 = vor.u32 %v10564_v0, %v9294_v29  ;;  %v9264_v29 = vld [vmem:[%s15523_s5 + $0x1038] sm:$0xf0] }
 0x4a4   :  { %4975 = vmatpush.bf16.msrb.mxu0 %v9054_v24  ;;  %5003 = vmatpush.bf16.msrb.mxu2 %v9058_v60  ;;  %v9287_v24 = vor.u32 %v10562_v25, %v9286_v23  ;;  %v9288_v60 = vld [vmem:[%s15523_s5 + $0x1068] sm:$0xf0]  ;;  %v10573_v23 = vld [vmem:[%s15523_s5 + $0x10c4] sm:$0xf] }
 0x4a5   :  { %v9291_v59 = vor.u32 %v10561_v38, %v9288_v60  ;;  %v9336_v38 = vld [vmem:[%s15523_s5 + $0x10c8] sm:$0xf0] }
 0x4a6   :  { %4988 = vmatpush.bf16.msrb.mxu1 %v9126_v39  ;;  %5016 = vmatpush.bf16.msrb.mxu3 %v9130_v15  ;;  %v10580_v39 = vld [vmem:[%s15523_s5 + $0x10f4] sm:$0xf0]  ;;  %v10579_v15 = vld [vmem:[%s15523_s5 + $0x10f4] sm:$0xf]  ;;  %v9339_v60 = vor.u32 %v10573_v23, %v9336_v38 }
 0x4a7   :  { %v9359_v28 = vor.u32 %v10580_v39, %v9358_v33  ;;  %v9363_v45 = vor.u32 %v10579_v15, %v9360_v40  ;;  %v10554_v33 = vld [vmem:[%s15523_s5 + $0x1024] sm:$0xf0]  ;;  %v10553_v39 = vld [vmem:[%s15523_s5 + $0x1024] sm:$0xf]  ;;  %v9256_v40 = vld [vmem:[%s15523_s5 + $0x1028] sm:$0xf0] }
 0x4a8   :  { %4976 = vmatpush.bf16.msrb.mxu0 %v9046_v46  ;;  %5004 = vmatpush.bf16.msrb.mxu2 %v9050_v21  ;;  %v10559_v46 = vld [vmem:[%s15523_s5 + $0x1054] sm:$0xf]  ;;  %v9280_v21 = vld [vmem:[%s15523_s5 + $0x1058] sm:$0xf0] }
 0x4a9   :  { %v9283_v31 = vor.u32 %v10559_v46, %v9280_v21  ;;  %v10571_v46 = vld [vmem:[%s15523_s5 + $0x10b4] sm:$0xf]  ;;  %v9328_v21 = vld [vmem:[%s15523_s5 + $0x10b8] sm:$0xf0] }
 0x4aa   :  { %4989 = vmatpush.bf16.msrb.mxu1 %v9118_v3  ;;  %5017 = vmatpush.bf16.msrb.mxu3 %v9122_v8  ;;  %v9352_v3 = vld [vmem:[%s15523_s5 + $0x10e8] sm:$0xf0]  ;;  %v10531_v38 = vld [vmem:[%s15523_s5 + $0xf74] sm:$0xf] }
 0x4ab   :  { %4977 = vmatmul.bf16.vlgmr.msrb.gmra.mxu0 %v4774_v4  ;;  %5005 = vmatmul.bf16.vlgmr.msrb.gmra.mxu2 %v4774_v4  ;;  %v9355_v37 = vor.u32 %v10577_v16, %v9352_v3  ;;  %v9343_v4 = vor.u32 %v10576_v12, %v9342_v58  ;;  %v10551_v16 = vld [vmem:[%s15523_s5 + $0x1014] sm:$0xf]  ;;  %v9248_v3 = vld [vmem:[%s15523_s5 + $0x1018] sm:$0xf0] }
 0x4ac   :  { %5330 = vmatpush.bf16.msra.mxu0 %v9295_v20  ;;  %5358 = vmatpush.bf16.msra.mxu2 %v9299_v54  ;;  %v10574_v54 = vld [vmem:[%s15523_s5 + $0x10c4] sm:$0xf0]  ;;  %v9251_v1 = vor.u32 %v10551_v16, %v9248_v3 }
 0x4ad   :  { %v9335_v25 = vor.u32 %v10574_v54, %v9334_v49  ;;  %v9240_v49 = vld [vmem:[%s15523_s5 + $0x1008] sm:$0xf0]  ;;  %v9422_v54 = vld [vmem:[%s15523_s5 + $0xf70] sm:$0xf] }
 0x4ae   :  { %4990 = vmatpush.bf16.msrb.mxu1 %v9110_v52  ;;  %5018 = vmatpush.bf16.msrb.mxu3 %v9114_v5  ;;  %v9275_v52 = vor.u32 %v10557_v63, %v9272_v27  ;;  %v10575_v5 = vld [vmem:[%s15523_s5 + $0x10d4] sm:$0xf] }
 0x4af   :  { %v9347_v61 = vor.u32 %v10575_v5, %v9344_v7  ;;  %v10569_v5 = vld [vmem:[%s15523_s5 + $0x10a4] sm:$0xf] }
 0x4b0   :  { %5331 = vmatpush.bf16.msra.mxu0 %v9287_v24  ;;  %5359 = vmatpush.bf16.msra.mxu2 %v9291_v59  ;;  %v9254_v59 = vld [vmem:[%s15523_s5 + $0x1020] sm:$0xf] }
 0x4b1   :  { %4991 = vmatmul.bf16.vlgmr.msrb.gmra.mxu1 %v4775_v11  ;;  %5019 = vmatmul.bf16.vlgmr.msrb.gmra.mxu3 %v4775_v11  ;;  %v10555_v11 = vld [vmem:[%s15523_s5 + $0x1034] sm:$0xf] }
 0x4b2   :  { %5344 = vmatpush.bf16.msra.mxu1 %v9359_v28  ;;  %5372 = vmatpush.bf16.msra.mxu3 %v9363_v45  ;;  %v9267_v20 = vor.u32 %v10555_v11, %v9264_v29  ;;  %v9255_v28 = vor.u32 %v10554_v33, %v9254_v59  ;;  %v9259_v45 = vor.u32 %v10553_v39, %v9256_v40  ;;  %v9310_v39 = vld [vmem:[%s15523_s5 + $0x1090] sm:$0xf]  ;;  %v10567_v40 = vld [vmem:[%s15523_s5 + $0x1094] sm:$0xf] }
 0x4b3   :  { %v9323_v29 = vor.u32 %v10569_v5, %v9320_v62  ;;  %v9304_v5 = vld [vmem:[%s15523_s5 + $0x1088] sm:$0xf0]  ;;  %v10548_v62 = vld [vmem:[%s15523_s5 + $0xff4] sm:$0xf0] }
 0x4b4   :  { %5332 = vmatpush.bf16.msra.mxu0 %v9279_v19  ;;  %5360 = vmatpush.bf16.msra.mxu2 %v9283_v31  ;;  %v9327_v19 = vor.u32 %v10572_v35, %v9326_v9  ;;  %v9331_v31 = vor.u32 %v10571_v46, %v9328_v21  ;;  %v9312_v35 = vld [vmem:[%s15523_s5 + $0x1098] sm:$0xf0]  ;;  %v9414_v46 = vld [vmem:[%s15523_s5 + $0xf60] sm:$0xf]  ;;  %v10530_v21 = vld [vmem:[%s15523_s5 + $0xf64] sm:$0xf0] }
 0x4b6   :  { %5345 = vmatpush.bf16.msra.mxu1 %v9351_v32  ;;  %5373 = vmatpush.bf16.msra.mxu3 %v9355_v37  ;;  %v9247_v32 = vor.u32 %v10552_v51, %v9246_v36  ;;  %v10529_v36 = vld [vmem:[%s15523_s5 + $0xf64] sm:$0xf]  ;;  %v9416_v51 = vld [vmem:[%s15523_s5 + $0xf68] sm:$0xf0] }
 0x4b7   :  { %v9419_v3 = vor.u32 %v10529_v36, %v9416_v51  ;;  %v10526_v36 = vld [vmem:[%s15523_s5 + $0xf44] sm:$0xf0] }
 0x4b8   :  { %5333 = vmatpush.bf16.msra.mxu0 %v9271_v10  ;;  %5361 = vmatpush.bf16.msra.mxu2 %v9275_v52  ;;  %v9318_v52 = vld [vmem:[%s15523_s5 + $0x10a0] sm:$0xf] }
 0x4ba   :  { %5346 = vmatpush.bf16.msra.mxu1 %v9343_v4  ;;  %5374 = vmatpush.bf16.msra.mxu3 %v9347_v61  ;;  %v10570_v4 = vld [vmem:[%s15523_s5 + $0x10a4] sm:$0xf0]  ;;  %v9238_v61 = vld [vmem:[%s15523_s5 + $0x1000] sm:$0xf] }
 0x4bb   :  { %v9319_v7 = vor.u32 %v10570_v4, %v9318_v52  ;;  %v10565_v52 = vld [vmem:[%s15523_s5 + $0x1084] sm:$0xf] }
 0x4bc   :  { %5334 = vmatpush.bf16.msra.mxu0 %v9263_v6  ;;  %5362 = vmatpush.bf16.msra.mxu2 %v9267_v20  ;;  %v9239_v6 = vor.u32 %v10550_v30, %v9238_v61  ;;  %v10549_v20 = vld [vmem:[%s15523_s5 + $0x1004] sm:$0xf]  ;;  %v9307_v30 = vor.u32 %v10565_v52, %v9304_v5  ;;  %v9472_v5 = vld [vmem:[%s15523_s5 + $0xfd8] sm:$0xf0] }
 0x4bd   :  { %v9243_v23 = vor.u32 %v10549_v20, %v9240_v49  ;;  %v9488_v20 = vld [vmem:[%s15523_s5 + $0xff8] sm:$0xf0]  ;;  %v9406_v49 = vld [vmem:[%s15523_s5 + $0xf50] sm:$0xf] }
 0x4be   :  { %5347 = vmatpush.bf16.msra.mxu1 %v9335_v25  ;;  %5375 = vmatpush.bf16.msra.mxu3 %v9339_v60  ;;  %v10532_v25 = vld [vmem:[%s15523_s5 + $0xf74] sm:$0xf0]  ;;  %v9424_v60 = vld [vmem:[%s15523_s5 + $0xf78] sm:$0xf0] }
 0x4bf   :  { %v9423_v59 = vor.u32 %v10532_v25, %v9422_v54  ;;  %v9427_v33 = vor.u32 %v10531_v38, %v9424_v60  ;;  %v10527_v25 = vld [vmem:[%s15523_s5 + $0xf54] sm:$0xf]  ;;  %v9408_v38 = vld [vmem:[%s15523_s5 + $0xf58] sm:$0xf0] }
 0x4c0   :  { %5335 = vmatpush.bf16.msra.mxu0 %v9255_v28  ;;  %5363 = vmatpush.bf16.msra.mxu2 %v9259_v45  ;;  %v10568_v28 = vld [vmem:[%s15523_s5 + $0x1094] sm:$0xf0] }
 0x4c1   :  { %v9311_v9 = vor.u32 %v10568_v28, %v9310_v39  ;;  %v9478_v39 = vld [vmem:[%s15523_s5 + $0xfe0] sm:$0xf]  ;;  %v10546_v28 = vld [vmem:[%s15523_s5 + $0xfe4] sm:$0xf0] }
 0x4c2   :  { %5348 = vmatpush.bf16.msra.mxu1 %v9327_v19  ;;  %5376 = vmatpush.bf16.msra.mxu3 %v9331_v31  ;;  %v9315_v19 = vor.u32 %v10567_v40, %v9312_v35  ;;  %v9415_v31 = vor.u32 %v10530_v21, %v9414_v46  ;;  %v10545_v40 = vld [vmem:[%s15523_s5 + $0xfe4] sm:$0xf]  ;;  %v9479_v35 = vor.u32 %v10546_v28, %v9478_v39  ;;  %v9398_v21 = vld [vmem:[%s15523_s5 + $0xf40] sm:$0xf] }
 0x4c3   :  { %v9399_v51 = vor.u32 %v10526_v36, %v9398_v21 }
 0x4c4   :  { %5336 = vmatpush.bf16.msra.mxu0 %v9247_v32  ;;  %5364 = vmatpush.bf16.msra.mxu2 %v9251_v1  ;;  %v9302_v32 = vld [vmem:[%s15523_s5 + $0x1080] sm:$0xf]  ;;  %v10566_v1 = vld [vmem:[%s15523_s5 + $0x1084] sm:$0xf0] }
 0x4c5   :  { %v9303_v4 = vor.u32 %v10566_v1, %v9302_v32  ;;  %v9470_v32 = vld [vmem:[%s15523_s5 + $0xfd0] sm:$0xf]  ;;  %v10544_v1 = vld [vmem:[%s15523_s5 + $0xfd4] sm:$0xf0] }
 0x4c6   :  { %5349 = vmatpush.bf16.msra.mxu1 %v9319_v7  ;;  %5377 = vmatpush.bf16.msra.mxu3 %v9323_v29  ;;  %v9486_v7 = vld [vmem:[%s15523_s5 + $0xff0] sm:$0xf] }
 0x4c7   :  { %v9487_v29 = vor.u32 %v10548_v62, %v9486_v7  ;;  %v9390_v7 = vld [vmem:[%s15523_s5 + $0xf30] sm:$0xf] }
 0x4c8   :  { %v14413_v13 = vpop.f32.mrf.mxu0  ;;  %5337 = vmatpush.bf16.msra.mxu0 %v9239_v6  ;;  %5365 = vmatpush.bf16.msra.mxu2 %v9243_v23  ;;  %v10547_v6 = vld [vmem:[%s15523_s5 + $0xff4] sm:$0xf]  ;;  %v10528_v23 = vld [vmem:[%s15523_s5 + $0xf54] sm:$0xf0] }
 0x4c9   :  { %v9491_v54 = vor.u32 %v10547_v6, %v9488_v20  ;;  %v10524_v20 = vld [vmem:[%s15523_s5 + $0xf34] sm:$0xf0] }
 0x4ca   :  { %5350 = vmatpush.bf16.msra.mxu1 %v9311_v9  ;;  %5378 = vmatpush.bf16.msra.mxu3 %v9315_v19  ;;  %v9480_v19 = vld [vmem:[%s15523_s5 + $0xfe8] sm:$0xf0] }
 0x4cb   :  { %v9483_v46 = vor.u32 %v10545_v40, %v9480_v19  ;;  %v10521_v19 = vld [vmem:[%s15523_s5 + $0xf24] sm:$0xf] }
 0x4cc   :  { %5546 = vmatpush.bf16.msrb.mxu0 %v9423_v59  ;;  %5574 = vmatpush.bf16.msrb.mxu2 %v9427_v33  ;;  %v9407_v59 = vor.u32 %v10528_v23, %v9406_v49  ;;  %v9411_v33 = vor.u32 %v10527_v25, %v9408_v38  ;;  %v10523_v49 = vld [vmem:[%s15523_s5 + $0xf34] sm:$0xf]  ;;  %v9462_v23 = vld [vmem:[%s15523_s5 + $0xfc0] sm:$0xf]  ;;  %v10542_v25 = vld [vmem:[%s15523_s5 + $0xfc4] sm:$0xf0] }
 0x4cd   :  { %v10541_v38 = vld [vmem:[%s15523_s5 + $0xfc4] sm:$0xf] }
 0x4ce   :  { %v14415_v43 = vpop.f32.mrf.mxu1  ;;  %v14417_v14 = vpop.f32.mrf.mxu2  ;;  %5351 = vmatpush.bf16.msra.mxu1 %v9303_v4  ;;  %5379 = vmatpush.bf16.msra.mxu3 %v9307_v30  ;;  %v10543_v4 = vld [vmem:[%s15523_s5 + $0xfd4] sm:$0xf] }
 0x4cf   :  { %v3920_v9 = vadd.f32 %v14415_v43, %v14413_v13  ;;  %v10525_v13 = vld [vmem:[%s15523_s5 + $0xf44] sm:$0xf]  ;;  %v9475_v6 = vor.u32 %v10543_v4, %v9472_v5  ;;  %v9376_v4 = vld [vmem:[%s15523_s5 + $0xf18] sm:$0xf0] }
 0x4d0   :  { %v14421_v55 = vpop.f32.mrf.mxu0  ;;  %5547 = vmatpush.bf16.msrb.mxu0 %v9415_v31  ;;  %5575 = vmatpush.bf16.msrb.mxu2 %v9419_v3  ;;  %v9400_v3 = vld [vmem:[%s15523_s5 + $0xf48] sm:$0xf0] }
 0x4d2   :  { %5560 = vmatpush.bf16.msrb.mxu1 %v9487_v29  ;;  %5588 = vmatpush.bf16.msrb.mxu3 %v9491_v54  ;;  %v9392_v54 = vld [vmem:[%s15523_s5 + $0xf38] sm:$0xf0] }
 0x4d4   :  { %v14419_v48 = vpop.f32.mrf.mxu3  ;;  %5548 = vmatpush.bf16.msrb.mxu0 %v9407_v59  ;;  %5576 = vmatpush.bf16.msrb.mxu2 %v9411_v33  ;;  %v9382_v59 = vld [vmem:[%s15523_s5 + $0xf20] sm:$0xf]  ;;  %v10522_v33 = vld [vmem:[%s15523_s5 + $0xf24] sm:$0xf0] }
 0x4d5   :  { %v3948_v62 = vadd.f32 %v14419_v48, %v14417_v14 }
 0x4d6   :  { %v14423_v50 = vpop.f32.mrf.mxu1  ;;  %v14425_v22 = vpop.f32.mrf.mxu2  ;;  %5561 = vmatpush.bf16.msrb.mxu1 %v9479_v35  ;;  %5589 = vmatpush.bf16.msrb.mxu3 %v9483_v46  ;;  %v9463_v35 = vor.u32 %v10542_v25, %v9462_v23  ;;  %v9384_v46 = vld [vmem:[%s15523_s5 + $0xf28] sm:$0xf0]  ;;  %v10517_v25 = vld [vmem:[%s15523_s5 + $0xf04] sm:$0xf] }
 0x4d7   :  { %v3922_v14 = vadd.f32 %v14423_v50, %v14421_v55  ;;  %v9464_v50 = vld [vmem:[%s15523_s5 + $0xfc8] sm:$0xf0] }
 0x4d8   :  { %v14429_v42 = vpop.f32.mrf.mxu0  ;;  %5549 = vmatpush.bf16.msrb.mxu0 %v9399_v51  ;;  %v10539_v51 = vld [vmem:[%s15523_s5 + $0xfb4] sm:$0xf] }
 0x4d9   :  { %v4122_v43 = vadd.f32 %v14429_v42, %v3920_v9  ;;  %v14753_v42 = vld [vmem:[%s15524_s6 + $0x7] ss:$8 sm:$0x3] }
 0x4da   :  { %5590 = vmatpush.bf16.msrb.mxu3 %v9475_v6  ;;  %v9446_v6 = vld [vmem:[%s15523_s5 + $0xfa0] sm:$0xf]  ;;  %v5033_v23 = vperm.slane %v14753_v42, 1 }
 0x4dc   :  { %v14427_v17 = vpop.f32.mrf.mxu3 }
 0x4de   :  { %v14443_v34 = vpop.f32.mrf.mxu1  ;;  %v14445_v56 = vpop.f32.mrf.mxu2 }
 0x4df   :  { %v4136_v30 = vadd.f32 %v14443_v34, %v4122_v43  ;;  %v4150_v39 = vadd.f32 %v14445_v56, %v3948_v62  ;;  %v5032_v56 = vperm.slane %v14753_v42, 0  ;;  %v9383_v43 = vor.u32 %v10522_v33, %v9382_v59  ;;  %v9432_v42 = vld [vmem:[%s15523_s5 + $0xf88] sm:$0xf0] }
 0x4e0   :  { %v14479_v44 = vpop.f32.mrf.mxu0 }
 0x4e1   :  { %v4124_v28 = vadd.f32 %v14479_v44, %v3922_v14  ;;  %v9467_v44 = vor.u32 %v10541_v38, %v9464_v50  ;;  %v10518_v14 = vld [vmem:[%s15523_s5 + $0xf04] sm:$0xf0]  ;;  %v9368_v38 = vld [vmem:[%s15523_s5 + $0xf08] sm:$0xf0] }
 0x4e3   :  { %5591 = vmatpush.bf16.msrb.mxu3 %v9467_v44 }
 0x4e4   :  { %v14459_v26 = vpop.f32.mrf.mxu3 }
 0x4e6   :  { %v14499_v8 = vpop.f32.mrf.mxu1  ;;  %v14519_v47 = vpop.f32.mrf.mxu2 }
 0x4e7   :  { %v4138_v5 = vadd.f32 %v14499_v8, %v4124_v28  ;;  %v10538_v8 = vld [vmem:[%s15523_s5 + $0xfa4] sm:$0xf0] }
 0x4e8   :  { %v14553_v24 = vpop.f32.mrf.mxu0  ;;  %v9447_v28 = vor.u32 %v10538_v8, %v9446_v6  ;;  %v9582_v6 = vld [vmem:[%s15523_s5 + $0x1170] sm:$0xf]  ;;  %v10596_v8 = vld [vmem:[%s15523_s5 + $0x1174] sm:$0xf0] }
 0x4ec   :  { %v14539_v0 = vpop.f32.mrf.mxu3 }
 0x4ee   :  { %v14564_v15 = vpop.f32.mrf.mxu1  ;;  %v14593_v37 = vpop.f32.mrf.mxu2 }
 0x4ef   :  { %v4419_v31 = vadd.f32 %v14564_v15, %v14553_v24  ;;  %v9403_v24 = vor.u32 %v10525_v13, %v9400_v3  ;;  %v9471_v15 = vor.u32 %v10544_v1, %v9470_v32  ;;  %v9456_v3 = vld [vmem:[%s15523_s5 + $0xfb8] sm:$0xf0]  ;;  %v9374_v32 = vld [vmem:[%s15523_s5 + $0xf10] sm:$0xf]  ;;  %v4164_v1 = vadd.f32 %v14459_v26, %v4150_v39 }
 0x4f0   :  { %v14597_v63 = vpop.f32.mrf.mxu0 }
 0x4f1   :  { %5577 = vmatpush.bf16.msrb.mxu2 %v9403_v24  ;;  %v4451_v55 = vadd.f32 %v4419_v31, %v4136_v30  ;;  %5562 = vmatpush.bf16.msrb.mxu1 %v9471_v15  ;;  %v9387_v31 = vor.u32 %v10521_v19, %v9384_v46  ;;  %v10520_v24 = vld [vmem:[%s15523_s5 + $0xf14] sm:$0xf0]  ;;  %v10519_v15 = vld [vmem:[%s15523_s5 + $0xf14] sm:$0xf]  ;;  %v9438_v46 = vld [vmem:[%s15523_s5 + $0xf90] sm:$0xf] }
 0x4f4   :  { %v14595_v18 = vpop.f32.mrf.mxu3 }
 0x4f5   :  { %v4447_v40 = vadd.f32 %v14595_v18, %v14593_v37  ;;  %v9454_v37 = vld [vmem:[%s15523_s5 + $0xfb0] sm:$0xf]  ;;  %v10540_v18 = vld [vmem:[%s15523_s5 + $0xfb4] sm:$0xf0]  ;;  %5563 = vmatpush.bf16.msrb.mxu1 %v9463_v35 }
 0x4f6   :  { %v14599_v10 = vpop.f32.mrf.mxu1  ;;  %v14601_v27 = vpop.f32.mrf.mxu2 }
 0x4f7   :  { %v4421_v13 = vadd.f32 %v14599_v10, %v14597_v63  ;;  %v4452_v62 = vadd.f32 %v4447_v40, %v4164_v1 }
 0x4fc   :  { %v14603_v58 = vpop.f32.mrf.mxu3 }
 0x4fd   :  { %v4449_v50 = vadd.f32 %v14603_v58, %v14601_v27  ;;  %v9371_v58 = vor.u32 %v10517_v25, %v9368_v38  ;;  %v9583_v25 = vor.u32 %v10596_v8, %v9582_v6  ;;  %v9550_v6 = vld [vmem:[%s15523_s5 + $0x1130] sm:$0xf]  ;;  %v10588_v8 = vld [vmem:[%s15523_s5 + $0x1134] sm:$0xf0] }
 0x508   :  { %v14605_v12 = vpop.f32.mrf.mxu0 }
 0x50e   :  { %v14625_v11 = vpop.f32.mrf.mxu1  ;;  %v14657_v45 = vpop.f32.mrf.mxu2 }
 0x50f   :  { %v4706_v29 = vadd.f32 %v14625_v11, %v14605_v12  ;;  %v9391_v12 = vor.u32 %v10524_v20, %v9390_v7  ;;  %v9395_v11 = vor.u32 %v10523_v49, %v9392_v54  ;;  %v9379_v20 = vor.u32 %v10519_v15, %v9376_v4  ;;  %v9448_v49 = vld [vmem:[%s15523_s5 + $0xfa8] sm:$0xf0]  ;;  %v9366_v54 = vld [vmem:[%s15523_s5 + $0xf00] sm:$0xf] }
 0x510   :  { %v14691_v61 = vpop.f32.mrf.mxu0  ;;  %v9367_v27 = vor.u32 %v10518_v14, %v9366_v54  ;;  %v9584_v54 = vld [vmem:[%s15523_s5 + $0x1178] sm:$0xf0] }
 0x511   :  { %v4738_v21 = vadd.f32 %v4706_v29, %v4451_v55  ;;  %5550 = vmatpush.bf16.msrb.mxu0 %v9391_v12  ;;  %5578 = vmatpush.bf16.msrb.mxu2 %v9395_v11  ;;  %v9459_v29 = vor.u32 %v10539_v51, %v9456_v3 }
 0x513   :  { %5592 = vmatpush.bf16.msrb.mxu3 %v9459_v29 }
 0x514   :  { %v14671_v16 = vpop.f32.mrf.mxu3 }
 0x515   :  { %v4734_v63 = vadd.f32 %v14671_v16, %v14657_v45  ;;  %v9455_v45 = vor.u32 %v10540_v18, %v9454_v37  ;;  %v3950_v16 = vadd.f32 %v14427_v17, %v14425_v22  ;;  %5551 = vmatpush.bf16.msrb.mxu0 %v9383_v43  ;;  %5579 = vmatpush.bf16.msrb.mxu2 %v9387_v31 }
 0x516   :  { %v14711_v60 = vpop.f32.mrf.mxu1  ;;  %v14748_v52 = vpop.f32.mrf.mxu2  ;;  %v9375_v17 = vor.u32 %v10520_v24, %v9374_v32 }
 0x517   :  { %v4708_v26 = vadd.f32 %v14711_v60, %v14691_v61  ;;  %v10537_v61 = vld [vmem:[%s15523_s5 + $0xfa4] sm:$0xf]  ;;  %v4453_v60 = vadd.f32 %v4421_v13, %v4138_v5  ;;  %v4152_v55 = vadd.f32 %v14519_v47, %v3950_v16  ;;  %5564 = vmatpush.bf16.msrb.mxu1 %v9455_v45  ;;  %v10536_v47 = vld [vmem:[%s15523_s5 + $0xf94] sm:$0xf0] }
 0x518   :  { %v9451_v19 = vor.u32 %v10537_v61, %v9448_v49  ;;  %v9439_v43 = vor.u32 %v10536_v47, %v9438_v46  ;;  %v10595_v61 = vld [vmem:[%s15523_s5 + $0x1174] sm:$0xf] }
 0x519   :  { %v4740_v59 = vadd.f32 %v4708_v26, %v4453_v60  ;;  %5552 = vmatpush.bf16.msrb.mxu0 %v9375_v17  ;;  %5580 = vmatpush.bf16.msrb.mxu2 %v9379_v20  ;;  %v4166_v44 = vadd.f32 %v14539_v0, %v4152_v55  ;;  %v9430_v0 = vld [vmem:[%s15523_s5 + $0xf80] sm:$0xf]  ;;  %v9587_v38 = vor.u32 %v10595_v61, %v9584_v54  ;;  %v10611_v46 = vld [vmem:[%s15523_s5 + $0x11f4] sm:$0xf]  ;;  %v10606_v54 = vld [vmem:[%s15523_s5 + $0x11c4] sm:$0xf0] }
 0x51a   :  { %5593 = vmatpush.bf16.msrb.mxu3 %v9451_v19  ;;  %v9574_v55 = vld [vmem:[%s15523_s5 + $0x1160] sm:$0xf]  ;;  %v10587_v61 = vld [vmem:[%s15523_s5 + $0x1134] sm:$0xf] }
 0x51b   :  { %5565 = vmatpush.bf16.msrb.mxu1 %v9447_v28  ;;  %v4454_v31 = vadd.f32 %v4449_v50, %v4166_v44  ;;  %v10594_v50 = vld [vmem:[%s15523_s5 + $0x1164] sm:$0xf0]  ;;  %v9646_v28 = vld [vmem:[%s15523_s5 + $0x11f0] sm:$0xf] }
 0x51c   :  { %v14780_v48 = vpop.f32.mrf.mxu3 }
 0x51d   :  { %v4736_v37 = vadd.f32 %v14780_v48, %v14748_v52  ;;  %v10534_v52 = vld [vmem:[%s15523_s5 + $0xf84] sm:$0xf0]  ;;  %5553 = vmatpush.bf16.msrb.mxu0 %v9367_v27  ;;  %5581 = vmatpush.bf16.msrb.mxu2 %v9371_v58  ;;  %v9648_v58 = vld [vmem:[%s15523_s5 + $0x11f8] sm:$0xf0] }
 0x51e   :  { %v9431_v4 = vor.u32 %v10534_v52, %v9430_v0  ;;  %v9638_v0 = vld [vmem:[%s15523_s5 + $0x11e0] sm:$0xf] }
 0x51f   :  { %5566 = vmatpush.bf16.msrb.mxu1 %v9439_v43  ;;  %v9568_v43 = vld [vmem:[%s15523_s5 + $0x1158] sm:$0xf0] }
 0x523   :  { %5567 = vmatpush.bf16.msrb.mxu1 %v9431_v4  ;;  %v9560_v4 = vld [vmem:[%s15523_s5 + $0x1148] sm:$0xf0] }
 0x528   :  { %v4978_v34 = vpop.f32.mrf.mxu0 }
 0x52e   :  { %v4992_v9 = vpop.f32.mrf.mxu1  ;;  %v5006_v7 = vpop.f32.mrf.mxu2 }
 0x52f   :  { %v4993_v36 = vadd.f32 %v4992_v9, %v4978_v34  ;;  %v4739_v34 = vadd.f32 %v4734_v63, %v4452_v62  ;;  %v10533_v63 = vld [vmem:[%s15523_s5 + $0xf84] sm:$0xf] }
 0x530   :  { %v4980_v33 = vpop.f32.mrf.mxu0 }
 0x531   :  { %v5025_v10 = vadd.f32 %v4993_v36, %v4738_v21  ;;  %v10535_v21 = vld [vmem:[%s15523_s5 + $0xf94] sm:$0xf]  ;;  %v9440_v36 = vld [vmem:[%s15523_s5 + $0xf98] sm:$0xf0] }
 0x532   :  { %v9443_v32 = vor.u32 %v10535_v21, %v9440_v36  ;;  %v9575_v21 = vor.u32 %v10594_v50, %v9574_v55  ;;  %v10586_v55 = vld [vmem:[%s15523_s5 + $0x1124] sm:$0xf0]  ;;  %v10585_v50 = vld [vmem:[%s15523_s5 + $0x1124] sm:$0xf] }
 0x533   :  { %v5036_v30 = vadd.f32 %v5032_v56, %v5025_v10 }
 0x534   :  { %v5020_v22 = vpop.f32.mrf.mxu3  ;;  %5594 = vmatpush.bf16.msrb.mxu3 %v9443_v32  ;;  %v9651_v32 = vor.u32 %v10611_v46, %v9648_v58  ;;  %v9534_v58 = vld [vmem:[%s15523_s5 + $0x1110] sm:$0xf] }
 0x535   :  { %v5040_v12 = vmax.f32 %v5036_v30, 0.0  ;;  %v5021_v11 = vadd.f32 %v5020_v22, %v5006_v7  ;;  %v9435_v7 = vor.u32 %v10533_v63, %v9432_v42  ;;  %v9640_v63 = vld [vmem:[%s15523_s5 + $0x11e8] sm:$0xf0] }
 0x536   :  { %v4994_v39 = vpop.f32.mrf.mxu1  ;;  %v5008_v48 = vpop.f32.mrf.mxu2 }
 0x537   :  { %v5048_v40 = vrot.slane %v5040_v12, 6  ;;  %v5026_v9 = vadd.f32 %v5021_v11, %v4739_v34  ;;  %v4995_v35 = vadd.f32 %v4994_v39, %v4980_v33  ;;  %v9576_v39 = vld [vmem:[%s15523_s5 + $0x1168] sm:$0xf0] }
 0x538   :  { %5595 = vmatpush.bf16.msrb.mxu3 %v9435_v7  ;;  %v9630_v7 = vld [vmem:[%s15523_s5 + $0x11d0] sm:$0xf] }
 0x539   :  { %5056 = vst [vmem:[#allocation2 + $0x30] sm:$0xfc] %v5048_v40  ;;  %v5037_v18 = vadd.f32 %v5033_v23, %v5026_v9  ;;  %v5027_v13 = vadd.f32 %v4995_v35, %v4740_v59  ;;  %v10593_v59 = vld [vmem:[%s15523_s5 + $0x1164] sm:$0xf] }
 0x53a   :  { %5058 = vst [vmem:[#allocation2 + $0x8] sm:$0x3] %v5048_v40  ;;  %v10612_v40 = vld [vmem:[%s15523_s5 + $0x11f4] sm:$0xf0]  ;;  %v9579_v36 = vor.u32 %v10593_v59, %v9576_v39  ;;  %v9544_v59 = vld [vmem:[%s15523_s5 + $0x1128] sm:$0xf0] }
 0x53b   :  { %v5041_v51 = vmax.f32 %v5037_v18, 0.0  ;;  %v5038_v3 = vadd.f32 %v5032_v56, %v5027_v13  ;;  %v4741_v56 = vadd.f32 %v4736_v37, %v4454_v31  ;;  %v9566_v37 = vld [vmem:[%s15523_s5 + $0x1150] sm:$0xf]  ;;  %v10592_v18 = vld [vmem:[%s15523_s5 + $0x1154] sm:$0xf0]  ;;  %v9547_v46 = vor.u32 %v10585_v50, %v9544_v59 }
 0x53c   :  { %v5022_v1 = vpop.f32.mrf.mxu3  ;;  %v10591_v13 = vld [vmem:[%s15523_s5 + $0x1154] sm:$0xf]  ;;  %v9567_v42 = vor.u32 %v10592_v18, %v9566_v37  ;;  %v9606_v37 = vld [vmem:[%s15523_s5 + $0x11a0] sm:$0xf]  ;;  %v9592_v59 = vld [vmem:[%s15523_s5 + $0x1188] sm:$0xf0] }
 0x53d   :  { %v5049_v10 = vrot.slane %v5041_v51, 6  ;;  %v5042_v24 = vmax.f32 %v5038_v3, 0.0  ;;  %v5023_v15 = vadd.f32 %v5022_v1, %v5008_v48  ;;  %v9647_v3 = vor.u32 %v10612_v40, %v9646_v28  ;;  %v10610_v48 = vld [vmem:[%s15523_s5 + $0x11e4] sm:$0xf0]  ;;  %v10609_v1 = vld [vmem:[%s15523_s5 + $0x11e4] sm:$0xf] }
 0x53e   :  { %v9614_v28 = vld [vmem:[%s15523_s5 + $0x11b0] sm:$0xf]  ;;  %v10604_v40 = vld [vmem:[%s15523_s5 + $0x11b4] sm:$0xf0] }
 0x53f   :  { %5057 = vst [vmem:[#allocation2] sm:$0xfc] %v5049_v10  ;;  %v5050_v5 = vrot.slane %v5042_v24, 6  ;;  %v5028_v26 = vadd.f32 %v5023_v15, %v4741_v56  ;;  %v9571_v56 = vor.u32 %v10591_v13, %v9568_v43  ;;  %v10590_v24 = vld [vmem:[%s15523_s5 + $0x1144] sm:$0xf0]  ;;  %v9615_v18 = vor.u32 %v10604_v40, %v9614_v28 }
 0x540   :  { %5059 = vst [vmem:[#allocation2 + $0x10] sm:$0x3] %v5049_v10  ;;  %v5103_v30 = vld [vmem:[#allocation2 + $0x30] sm:$0xfe]  ;;  %v9558_v10 = vld [vmem:[%s15523_s5 + $0x1140] sm:$0xf] }
 0x541   :  { %5060 = vst [vmem:[#allocation2 + $0x28] sm:$0xfc] %v5050_v5  ;;  %v5039_v45 = vadd.f32 %v5033_v23, %v5028_v26  ;;  %v5105_v29 = vld [vmem:[#allocation2 + $0x8] sm:$0x1]  ;;  %v5119_v22 = vrot.slane %v5103_v30, 1  ;;  %v9643_v26 = vor.u32 %v10609_v1, %v9640_v63  ;;  %v9559_v30 = vor.u32 %v10590_v24, %v9558_v10 }
 0x542   :  { %5062 = vst [vmem:[#allocation2 + $0x18] sm:$0x3] %v5050_v5  ;;  %v5120_v17 = vrot.slane %v5105_v29, 1  ;;  %v10589_v15 = vld [vmem:[%s15523_s5 + $0x1144] sm:$0xf]  ;;  %v9639_v5 = vor.u32 %v10610_v48, %v9638_v0 }
 0x543   :  { %v5043_v16 = vmax.f32 %v5039_v45, 0.0  ;;  %v10608_v45 = vld [vmem:[%s15523_s5 + $0x11d4] sm:$0xf0]  ;;  %v9563_v29 = vor.u32 %v10589_v15, %v9560_v4  ;;  %v10602_v43 = vld [vmem:[%s15523_s5 + $0x11a4] sm:$0xf0] }
 0x544   :  { %v5121_v11 = vsel %vm813_vm12, %v5119_v22, %v5120_v17  ;;  %v9631_v22 = vor.u32 %v10608_v45, %v9630_v7  ;;  %v10582_v0 = vld [vmem:[%s15523_s5 + $0x1104] sm:$0xf0]  ;;  %v9528_v48 = vld [vmem:[%s15523_s5 + $0x1108] sm:$0xf0]  ;;  %v9742_v10 = vld [vmem:[%s15523_s5 + $0x1270] sm:$0xf]  ;;  %v9607_v45 = vor.u32 %v10602_v43, %v9606_v37 }
 0x545   :  { %v5051_v62 = vrot.slane %v5043_v16, 6  ;;  %v10607_v16 = vld [vmem:[%s15523_s5 + $0x11d4] sm:$0xf]  ;;  %v10628_v24 = vld [vmem:[%s15523_s5 + $0x1274] sm:$0xf0] }
 0x546   :  { %v5104_v34 = vld [vmem:[#allocation2] sm:$0xfe]  ;;  %v5602_v15 = vld [vmem:[#allocation2 + $0x30] sm:$0xfc]  ;;  %v5604_v4 = vld [vmem:[#allocation2 + $0x8] sm:$0x3] }
 0x547   :  { %5061 = vst [vmem:[#allocation2 + $0x20] sm:$0xfc] %v5051_v62  ;;  %v5106_v12 = vld [vmem:[#allocation2 + $0x10] sm:$0x1]  ;;  %v5122_v35 = vrot.slane %v5104_v34, 1 }
 0x548   :  { %5063 = vst [vmem:[#allocation2 + $0x38] sm:$0x3] %v5051_v62  ;;  %v5107_v60 = vld [vmem:[#allocation2 + $0x28] sm:$0xfe]  ;;  %v5123_v19 = vrot.slane %v5106_v12, 1  ;;  %v5064_v12 = vld [vmem:[#allocation2 + $0x30] sm:$0xff] }
 0x549   :  { %v5109_v20 = vld [vmem:[#allocation2 + $0x18] sm:$0x1]  ;;  %v5125_v49 = vrot.slane %v5107_v60, 1  ;;  %v9632_v62 = vld [vmem:[%s15523_s5 + $0x11d8] sm:$0xf0] }
 0x54a   :  { %v5126_v14 = vrot.slane %v5109_v20, 1  ;;  %v5124_v31 = vsel %vm813_vm12, %v5122_v35, %v5123_v19  ;;  %v9552_v60 = vld [vmem:[%s15523_s5 + $0x1138] sm:$0xf0]  ;;  %v9635_v17 = vor.u32 %v10607_v16, %v9632_v62  ;;  %v5066_v20 = vld [vmem:[#allocation2 + $0x28] sm:$0xff]  ;;  %v5608_v63 = vld [vmem:[#allocation2 + $0x18] sm:$0x3] }
 0x54b   :  { %v9624_v34 = vld [vmem:[%s15523_s5 + $0x11c8] sm:$0xf0]  ;;  %v9616_v35 = vld [vmem:[%s15523_s5 + $0x11b8] sm:$0xf0]  ;;  %v9598_v7 = vld [vmem:[%s15523_s5 + $0x1190] sm:$0xf] }
 0x54c   :  { %v5127_v23 = vsel %vm813_vm12, %v5125_v49, %v5126_v14  ;;  %v9622_v49 = vld [vmem:[%s15523_s5 + $0x11c0] sm:$0xf]  ;;  %v10605_v14 = vld [vmem:[%s15523_s5 + $0x11c4] sm:$0xf]  ;;  %v5606_v1 = vld [vmem:[#allocation2 + $0x28] sm:$0xfc] }
 0x54d   :  { %v5135_v33 = vpack.c.bf16 %v5127_v23, %v5121_v11  ;;  %v9551_v11 = vor.u32 %v10588_v8, %v9550_v6  ;;  %v9555_v23 = vor.u32 %v10587_v61, %v9552_v60  ;;  %v9627_v39 = vor.u32 %v10605_v14, %v9624_v34  ;;  %v10600_v62 = vld [vmem:[%s15523_s5 + $0x1194] sm:$0xf0]  ;;  %v9600_v8 = vld [vmem:[%s15523_s5 + $0x1198] sm:$0xf0]  ;;  %v9736_v14 = vld [vmem:[%s15523_s5 + $0x1268] sm:$0xf0] }
 0x54e   :  { %v5108_v9 = vld [vmem:[#allocation2 + $0x20] sm:$0xfe]  ;;  %v5625_v6 = vrot.slane %v5608_v63, 2  ;;  %v5618_v61 = vrot.slane %v5602_v15, 2  ;;  %v5619_v60 = vrot.slane %v5604_v4, 2  ;;  %v9743_v34 = vor.u32 %v10628_v24, %v9742_v10 }
 0x54f   :  { %5338 = vmatmul.bf16.vlgmr.msra.gmra.mxu0 %v5135_v33  ;;  %5366 = vmatmul.bf16.vlgmr.msra.gmra.mxu2 %v5135_v33  ;;  %v5110_v47 = vld [vmem:[#allocation2 + $0x38] sm:$0x1]  ;;  %v5128_v27 = vrot.slane %v5108_v9, 1  ;;  %v9623_v33 = vor.u32 %v10606_v54, %v9622_v49  ;;  %v10603_v9 = vld [vmem:[%s15523_s5 + $0x11b4] sm:$0xf] }
 0x550   :  { %5829 = vmatpush.bf16.msra.mxu0 %v9583_v25  ;;  %5857 = vmatpush.bf16.msra.mxu2 %v9587_v38  ;;  %v5129_v44 = vrot.slane %v5110_v47, 1  ;;  %v9542_v25 = vld [vmem:[%s15523_s5 + $0x1120] sm:$0xf]  ;;  %v5068_v38 = vpack.c.bf16 %v5066_v20, %v5064_v12  ;;  %v9619_v13 = vor.u32 %v10603_v9, %v9616_v35  ;;  %v10626_v49 = vld [vmem:[%s15523_s5 + $0x1264] sm:$0xf0]  ;;  %v5620_v35 = vsel %vm1313_vm13, %v5618_v61, %v5619_v60 }
 0x551   :  { %v9543_v19 = vor.u32 %v10586_v55, %v9542_v25  ;;  %v5065_v47 = vld [vmem:[#allocation2] sm:$0xff]  ;;  %v9806_v28 = vld [vmem:[%s15523_s5 + $0x12f0] sm:$0xf]  ;;  %v10644_v40 = vld [vmem:[%s15523_s5 + $0x12f4] sm:$0xf0] }
 0x552   :  { %v5130_v51 = vsel %vm813_vm12, %v5128_v27, %v5129_v44  ;;  %v5067_v27 = vld [vmem:[#allocation2 + $0x20] sm:$0xff]  ;;  %v9536_v44 = vld [vmem:[%s15523_s5 + $0x1118] sm:$0xf0]  ;;  %v10643_v9 = vld [vmem:[%s15523_s5 + $0x12f4] sm:$0xf] }
 0x553   :  { %v5136_v52 = vpack.c.bf16 %v5130_v51, %v5124_v31  ;;  %v10601_v31 = vld [vmem:[%s15523_s5 + $0x11a4] sm:$0xf]  ;;  %v9608_v51 = vld [vmem:[%s15523_s5 + $0x11a8] sm:$0xf0]  ;;  %v10624_v43 = vld [vmem:[%s15523_s5 + $0x1254] sm:$0xf0] }
 0x554   :  { %5830 = vmatpush.bf16.msra.mxu0 %v9575_v21  ;;  %5858 = vmatpush.bf16.msra.mxu2 %v9579_v36  ;;  %v10584_v21 = vld [vmem:[%s15523_s5 + $0x1114] sm:$0xf0]  ;;  %v10583_v36 = vld [vmem:[%s15523_s5 + $0x1114] sm:$0xf]  ;;  %v9611_v16 = vor.u32 %v10601_v31, %v9608_v51  ;;  %v10625_v54 = vld [vmem:[%s15523_s5 + $0x1264] sm:$0xf] }
 0x555   :  { %5352 = vmatmul.bf16.vlgmr.msra.gmra.mxu1 %v5136_v52  ;;  %5380 = vmatmul.bf16.vlgmr.msra.gmra.mxu3 %v5136_v52  ;;  %v10581_v52 = vld [vmem:[%s15523_s5 + $0x1104] sm:$0xf]  ;;  %v10623_v31 = vld [vmem:[%s15523_s5 + $0x1254] sm:$0xf]  ;;  %v9728_v51 = vld [vmem:[%s15523_s5 + $0x1258] sm:$0xf0] }
 0x556   :  { %5843 = vmatpush.bf16.msra.mxu1 %v9647_v3  ;;  %5871 = vmatpush.bf16.msra.mxu3 %v9651_v32  ;;  %v5069_v3 = vpack.c.bf16 %v5067_v27, %v5065_v47  ;;  %v9526_v32 = vld [vmem:[%s15523_s5 + $0x1100] sm:$0xf]  ;;  %v9531_v20 = vor.u32 %v10581_v52, %v9528_v48  ;;  %v10597_v25 = vld [vmem:[%s15523_s5 + $0x1184] sm:$0xf]  ;;  %v5605_v27 = vld [vmem:[#allocation2 + $0x10] sm:$0x3]  ;;  %v9731_v10 = vor.u32 %v10623_v31, %v9728_v51 }
 0x557   :  { %v5603_v47 = vld [vmem:[#allocation2] sm:$0xfc]  ;;  %v5622_v52 = vrot.slane %v5605_v27, 2  ;;  %v10622_v4 = vld [vmem:[%s15523_s5 + $0x1244] sm:$0xf0] }
 0x558   :  { %5831 = vmatpush.bf16.msra.mxu0 %v9567_v42  ;;  %5859 = vmatpush.bf16.msra.mxu2 %v9571_v56  ;;  %v9535_v42 = vor.u32 %v10584_v21, %v9534_v58  ;;  %v9539_v56 = vor.u32 %v10583_v36, %v9536_v44  ;;  %v9739_v21 = vor.u32 %v10625_v54, %v9736_v14  ;;  %v9726_v36 = vld [vmem:[%s15523_s5 + $0x1250] sm:$0xf]  ;;  %v9798_v48 = vld [vmem:[%s15523_s5 + $0x12e0] sm:$0xf]  ;;  %v10641_v63 = vld [vmem:[%s15523_s5 + $0x12e4] sm:$0xf] }
 0x559   :  { %v9718_v15 = vld [vmem:[%s15523_s5 + $0x1240] sm:$0xf]  ;;  %v9694_v27 = vld [vmem:[%s15523_s5 + $0x1210] sm:$0xf]  ;;  %v9768_v31 = vld [vmem:[%s15523_s5 + $0x12a8] sm:$0xf0] }
 0x55a   :  { %5844 = vmatpush.bf16.msra.mxu1 %v9639_v5  ;;  %5872 = vmatpush.bf16.msra.mxu3 %v9643_v26  ;;  %v10627_v5 = vld [vmem:[%s15523_s5 + $0x1274] sm:$0xf]  ;;  %v9744_v26 = vld [vmem:[%s15523_s5 + $0x1278] sm:$0xf0]  ;;  %v9719_v61 = vor.u32 %v10622_v4, %v9718_v15  ;;  %v9686_v51 = vld [vmem:[%s15523_s5 + $0x1200] sm:$0xf] }
 0x55b   :  { %v9747_v12 = vor.u32 %v10627_v5, %v9744_v26  ;;  %v10621_v5 = vld [vmem:[%s15523_s5 + $0x1244] sm:$0xf]  ;;  %v9720_v26 = vld [vmem:[%s15523_s5 + $0x1248] sm:$0xf0]  ;;  %v10659_v15 = vld [vmem:[%s15523_s5 + $0x1374] sm:$0xf] }
 0x55c   :  { %5832 = vmatpush.bf16.msra.mxu0 %v9559_v30  ;;  %5860 = vmatpush.bf16.msra.mxu2 %v9563_v29  ;;  %v10599_v30 = vld [vmem:[%s15523_s5 + $0x1194] sm:$0xf]  ;;  %v5624_v29 = vrot.slane %v5606_v1, 2  ;;  %v10642_v1 = vld [vmem:[%s15523_s5 + $0x12e4] sm:$0xf0]  ;;  %v9723_v60 = vor.u32 %v10621_v5, %v9720_v26 }
 0x55d   :  { %v9603_v55 = vor.u32 %v10599_v30, %v9600_v8  ;;  %v9792_v8 = vld [vmem:[%s15523_s5 + $0x12d8] sm:$0xf0] }
 0x55e   :  { %5845 = vmatpush.bf16.msra.mxu1 %v9631_v22  ;;  %5873 = vmatpush.bf16.msra.mxu3 %v9635_v17  ;;  %v9734_v22 = vld [vmem:[%s15523_s5 + $0x1260] sm:$0xf]  ;;  %v9527_v17 = vor.u32 %v10582_v0, %v9526_v32  ;;  %v5626_v50 = vsel %vm1313_vm13, %v5624_v29, %v5625_v6  ;;  %v5621_v0 = vrot.slane %v5603_v47, 2  ;;  %v10640_v29 = vld [vmem:[%s15523_s5 + $0x12d4] sm:$0xf0] }
 0x55f   :  { %5554 = vmatmul.bf16.vlgmr.msrb.gmra.mxu0 %v5068_v38  ;;  %5582 = vmatmul.bf16.vlgmr.msrb.gmra.mxu2 %v5068_v38  ;;  %v9599_v38 = vor.u32 %v10600_v62, %v9598_v7  ;;  %v5634_v58 = vpack.c.bf16 %v5626_v50, %v5620_v35  ;;  %v9790_v62 = vld [vmem:[%s15523_s5 + $0x12d0] sm:$0xf]  ;;  %v10639_v6 = vld [vmem:[%s15523_s5 + $0x12d4] sm:$0xf]  ;;  %v10618_v50 = vld [vmem:[%s15523_s5 + $0x1224] sm:$0xf0] }
 0x560   :  { %5833 = vmatpush.bf16.msra.mxu0 %v9551_v11  ;;  %5861 = vmatpush.bf16.msra.mxu2 %v9555_v23  ;;  %v9590_v11 = vld [vmem:[%s15523_s5 + $0x1180] sm:$0xf]  ;;  %v10598_v23 = vld [vmem:[%s15523_s5 + $0x1184] sm:$0xf0]  ;;  %v5623_v7 = vsel %vm1313_vm13, %v5621_v0, %v5622_v52  ;;  %v9791_v54 = vor.u32 %v10640_v29, %v9790_v62  ;;  %v9795_v14 = vor.u32 %v10639_v6, %v9792_v8  ;;  %v10635_v35 = vld [vmem:[%s15523_s5 + $0x12b4] sm:$0xf] }
 0x561   :  { %v9688_v0 = vld [vmem:[%s15523_s5 + $0x1208] sm:$0xf0]  ;;  %v9904_v4 = vld [vmem:[%s15523_s5 + $0x1378] sm:$0xf0] }
 0x562   :  { %5846 = vmatpush.bf16.msra.mxu1 %v9623_v33  ;;  %5874 = vmatpush.bf16.msra.mxu3 %v9627_v39  ;;  %v5607_v33 = vld [vmem:[#allocation2 + $0x20] sm:$0xfc]  ;;  %v5609_v39 = vld [vmem:[#allocation2 + $0x38] sm:$0x3]  ;;  %v5893_v52 = vld [vmem:[#allocation2 + $0x28] sm:$0xf8] }
 0x563   :  { %v5627_v44 = vrot.slane %v5607_v33, 2  ;;  %v5628_v37 = vrot.slane %v5609_v39, 2  ;;  %v9704_v33 = vld [vmem:[%s15523_s5 + $0x1228] sm:$0xf0]  ;;  %v9760_v29 = vld [vmem:[%s15523_s5 + $0x1298] sm:$0xf0] }
 0x564   :  { %5834 = vmatpush.bf16.msra.mxu0 %v9543_v19  ;;  %5862 = vmatpush.bf16.msra.mxu2 %v9547_v46  ;;  %v9735_v19 = vor.u32 %v10626_v49, %v9734_v22  ;;  %v9808_v46 = vld [vmem:[%s15523_s5 + $0x12f8] sm:$0xf0]  ;;  %v9710_v22 = vld [vmem:[%s15523_s5 + $0x1230] sm:$0xf] }
 0x565   :  { %5568 = vmatmul.bf16.vlgmr.msrb.gmra.mxu1 %v5069_v3  ;;  %5596 = vmatmul.bf16.vlgmr.msrb.gmra.mxu3 %v5069_v3  ;;  %v9807_v3 = vor.u32 %v10644_v40, %v9806_v28  ;;  %v9811_v32 = vor.u32 %v10643_v9, %v9808_v46  ;;  %v5629_v24 = vsel %vm1313_vm13, %v5627_v44, %v5628_v37  ;;  %v9712_v49 = vld [vmem:[%s15523_s5 + $0x1238] sm:$0xf0]  ;;  %v9774_v40 = vld [vmem:[%s15523_s5 + $0x12b0] sm:$0xf]  ;;  %v10636_v9 = vld [vmem:[%s15523_s5 + $0x12b4] sm:$0xf0] }
 0x566   :  { %5847 = vmatpush.bf16.msra.mxu1 %v9615_v18  ;;  %5875 = vmatpush.bf16.msra.mxu3 %v9619_v13  ;;  %v9591_v18 = vor.u32 %v10598_v23, %v9590_v11  ;;  %v9595_v13 = vor.u32 %v10597_v25, %v9592_v59  ;;  %v5635_v30 = vpack.c.bf16 %v5629_v24, %v5623_v7  ;;  %v10637_v11 = vld [vmem:[%s15523_s5 + $0x12c4] sm:$0xf]  ;;  %v9784_v23 = vld [vmem:[%s15523_s5 + $0x12c8] sm:$0xf0]  ;;  %v9766_v44 = vld [vmem:[%s15523_s5 + $0x12a0] sm:$0xf] }
 0x567   :  { %v10617_v59 = vld [vmem:[%s15523_s5 + $0x1224] sm:$0xf]  ;;  %v9787_v28 = vor.u32 %v10637_v11, %v9784_v23  ;;  %v9775_v37 = vor.u32 %v10636_v9, %v9774_v40  ;;  %v10660_v24 = vld [vmem:[%s15523_s5 + $0x1374] sm:$0xf0]  ;;  %v9758_v7 = vld [vmem:[%s15523_s5 + $0x1290] sm:$0xf] }
 0x568   :  { %5835 = vmatpush.bf16.msra.mxu0 %v9535_v42  ;;  %5863 = vmatpush.bf16.msra.mxu2 %v9539_v56  ;;  %v9800_v42 = vld [vmem:[%s15523_s5 + $0x12e8] sm:$0xf0]  ;;  %v9727_v56 = vor.u32 %v10624_v43, %v9726_v36  ;;  %v9707_v47 = vor.u32 %v10617_v59, %v9704_v33  ;;  %v9696_v36 = vld [vmem:[%s15523_s5 + $0x1218] sm:$0xf0]  ;;  %v10633_v43 = vld [vmem:[%s15523_s5 + $0x12a4] sm:$0xf] }
 0x569   :  { %v9771_v26 = vor.u32 %v10633_v43, %v9768_v31  ;;  %v5894_v11 = vld [vmem:[#allocation2 + $0x20] sm:$0xf8]  ;;  %v5896_v23 = vld [vmem:[#allocation2 + $0x38] sm:$0x7]  ;;  %v9752_v59 = vld [vmem:[%s15523_s5 + $0x1288] sm:$0xf0] }
 0x56a   :  { %5848 = vmatpush.bf16.msra.mxu1 %v9607_v45  ;;  %5876 = vmatpush.bf16.msra.mxu3 %v9611_v16  ;;  %v9799_v45 = vor.u32 %v10642_v1, %v9798_v48  ;;  %v9803_v16 = vor.u32 %v10641_v63, %v9800_v42  ;;  %v5895_v48 = vld [vmem:[#allocation2 + $0x18] sm:$0x7]  ;;  %v9902_v42 = vld [vmem:[%s15523_s5 + $0x1370] sm:$0xf] }
 0x56b   :  { %v5912_v62 = vrot.slane %v5895_v48, 3  ;;  %v9966_v33 = vld [vmem:[%s15523_s5 + $0x13f0] sm:$0xf]  ;;  %v10656_v43 = vld [vmem:[%s15523_s5 + $0x1354] sm:$0xf0] }
 0x56c   :  { %5836 = vmatpush.bf16.msra.mxu0 %v9527_v17  ;;  %5864 = vmatpush.bf16.msra.mxu2 %v9531_v20  ;;  %v10620_v17 = vld [vmem:[%s15523_s5 + $0x1234] sm:$0xf0]  ;;  %v10619_v20 = vld [vmem:[%s15523_s5 + $0x1234] sm:$0xf]  ;;  %v5892_v40 = vld [vmem:[#allocation2 + $0x10] sm:$0x7] }
 0x56d   :  { %v9711_v25 = vor.u32 %v10620_v17, %v9710_v22  ;;  %v9894_v22 = vld [vmem:[%s15523_s5 + $0x1360] sm:$0xf]  ;;  %v10658_v17 = vld [vmem:[%s15523_s5 + $0x1364] sm:$0xf0] }
 0x56e   :  { %5849 = vmatpush.bf16.msra.mxu1 %v9599_v38  ;;  %5877 = vmatpush.bf16.msra.mxu3 %v9603_v55  ;;  %v9715_v38 = vor.u32 %v10619_v20, %v9712_v49  ;;  %v9702_v55 = vld [vmem:[%s15523_s5 + $0x1220] sm:$0xf]  ;;  %v10657_v20 = vld [vmem:[%s15523_s5 + $0x1364] sm:$0xf]  ;;  %v9896_v49 = vld [vmem:[%s15523_s5 + $0x1368] sm:$0xf0] }
 0x56f   :  { %5837 = vmatmul.bf16.vlgmr.msra.gmra.mxu0 %v5634_v58  ;;  %5865 = vmatmul.bf16.vlgmr.msra.gmra.mxu2 %v5634_v58  ;;  %v9703_v46 = vor.u32 %v10618_v50, %v9702_v55  ;;  %v10616_v58 = vld [vmem:[%s15523_s5 + $0x1214] sm:$0xf0]  ;;  %v10629_v50 = vld [vmem:[%s15523_s5 + $0x1284] sm:$0xf]  ;;  %v10674_v48 = vld [vmem:[%s15523_s5 + $0x13e4] sm:$0xf0] }
 0x570   :  { %6116 = vmatpush.bf16.msrb.mxu0 %v9743_v34  ;;  %6144 = vmatpush.bf16.msrb.mxu2 %v9747_v12  ;;  %v9782_v34 = vld [vmem:[%s15523_s5 + $0x12c0] sm:$0xf]  ;;  %v10638_v12 = vld [vmem:[%s15523_s5 + $0x12c4] sm:$0xf0]  ;;  %v9695_v1 = vor.u32 %v10616_v58, %v9694_v27  ;;  %v9895_v58 = vor.u32 %v10658_v17, %v9894_v22 }
 0x571   :  { %v9783_v39 = vor.u32 %v10638_v12, %v9782_v34  ;;  %v9750_v34 = vld [vmem:[%s15523_s5 + $0x1280] sm:$0xf]  ;;  %v10630_v12 = vld [vmem:[%s15523_s5 + $0x1284] sm:$0xf0] }
 0x572   :  { %5850 = vmatpush.bf16.msra.mxu1 %v9591_v18  ;;  %5878 = vmatpush.bf16.msra.mxu3 %v9595_v13  ;;  %v10634_v13 = vld [vmem:[%s15523_s5 + $0x12a4] sm:$0xf0] }
 0x573   :  { %v9767_v5 = vor.u32 %v10634_v13, %v9766_v44  ;;  %v9755_v44 = vor.u32 %v10629_v50, %v9752_v59  ;;  %v9886_v13 = vld [vmem:[%s15523_s5 + $0x1350] sm:$0xf]  ;;  %v10649_v59 = vld [vmem:[%s15523_s5 + $0x1324] sm:$0xf] }
 0x574   :  { %6117 = vmatpush.bf16.msrb.mxu0 %v9735_v19  ;;  %6145 = vmatpush.bf16.msrb.mxu2 %v9739_v21  ;;  %v9776_v19 = vld [vmem:[%s15523_s5 + $0x12b8] sm:$0xf0]  ;;  %v10615_v21 = vld [vmem:[%s15523_s5 + $0x1214] sm:$0xf] }
 0x575   :  { %5851 = vmatmul.bf16.vlgmr.msra.gmra.mxu1 %v5635_v30  ;;  %5879 = vmatmul.bf16.vlgmr.msra.gmra.mxu3 %v5635_v30  ;;  %v9779_v18 = vor.u32 %v10635_v35, %v9776_v19  ;;  %v9699_v63 = vor.u32 %v10615_v21, %v9696_v36  ;;  %v10631_v30 = vld [vmem:[%s15523_s5 + $0x1294] sm:$0xf]  ;;  %v9968_v19 = vld [vmem:[%s15523_s5 + $0x13f8] sm:$0xf0]  ;;  %v9899_v21 = vor.u32 %v10657_v20, %v9896_v49 }
 0x576   :  { %6130 = vmatpush.bf16.msrb.mxu1 %v9807_v3  ;;  %6158 = vmatpush.bf16.msrb.mxu3 %v9811_v32  ;;  %v10614_v3 = vld [vmem:[%s15523_s5 + $0x1204] sm:$0xf0]  ;;  %v10613_v32 = vld [vmem:[%s15523_s5 + $0x1204] sm:$0xf]  ;;  %v10675_v35 = vld [vmem:[%s15523_s5 + $0x13f4] sm:$0xf]  ;;  %v9751_v36 = vor.u32 %v10630_v12, %v9750_v34 }
 0x577   :  { %v10651_v20 = vld [vmem:[%s15523_s5 + $0x1334] sm:$0xf]  ;;  %v9872_v49 = vld [vmem:[%s15523_s5 + $0x1338] sm:$0xf0]  ;;  %v10669_v34 = vld [vmem:[%s15523_s5 + $0x13c4] sm:$0xf] }
 0x578   :  { %6118 = vmatpush.bf16.msrb.mxu0 %v9727_v56  ;;  %6146 = vmatpush.bf16.msrb.mxu2 %v9731_v10  ;;  %v5889_v56 = vld [vmem:[#allocation2 + $0x30] sm:$0xf8]  ;;  %v5891_v10 = vld [vmem:[#allocation2 + $0x8] sm:$0x7]  ;;  %v9944_v12 = vld [vmem:[%s15523_s5 + $0x13c8] sm:$0xf0] }
 0x579   :  { %v5905_v6 = vrot.slane %v5889_v56, 3  ;;  %v5906_v8 = vrot.slane %v5891_v10, 3  ;;  %v9887_v56 = vor.u32 %v10656_v43, %v9886_v13  ;;  %v9947_v50 = vor.u32 %v10669_v34, %v9944_v12  ;;  %v9928_v13 = vld [vmem:[%s15523_s5 + $0x13a8] sm:$0xf0]  ;;  %v9846_v43 = vld [vmem:[%s15523_s5 + $0x1300] sm:$0xf] }
 0x57a   :  { %6131 = vmatpush.bf16.msrb.mxu1 %v9799_v45  ;;  %6159 = vmatpush.bf16.msrb.mxu3 %v9803_v16  ;;  %v10632_v45 = vld [vmem:[%s15523_s5 + $0x1294] sm:$0xf0]  ;;  %v5911_v16 = vrot.slane %v5893_v52, 3 }
 0x57b   :  { %v5907_v9 = vsel %vm1601_vm14, %v5905_v6, %v5906_v8 }
 0x57c   :  { %6119 = vmatpush.bf16.msrb.mxu0 %v9719_v61  ;;  %6147 = vmatpush.bf16.msrb.mxu2 %v9723_v60  ;;  %v9687_v61 = vor.u32 %v10614_v3, %v9686_v51  ;;  %v9691_v60 = vor.u32 %v10613_v32, %v9688_v0  ;;  %v5913_v55 = vsel %vm1601_vm14, %v5911_v16, %v5912_v62  ;;  %v10655_v3 = vld [vmem:[%s15523_s5 + $0x1354] sm:$0xf]  ;;  %v9888_v32 = vld [vmem:[%s15523_s5 + $0x1358] sm:$0xf0]  ;;  %v9958_v0 = vld [vmem:[%s15523_s5 + $0x13e0] sm:$0xf] }
 0x57d   :  { %v5921_v27 = vpack.c.bf16 %v5913_v55, %v5907_v9  ;;  %v9971_v51 = vor.u32 %v10675_v35, %v9968_v19  ;;  %v9891_v10 = vor.u32 %v10655_v3, %v9888_v32  ;;  %v9950_v16 = vld [vmem:[%s15523_s5 + $0x13d0] sm:$0xf]  ;;  %v10672_v62 = vld [vmem:[%s15523_s5 + $0x13d4] sm:$0xf0]  ;;  %v9936_v9 = vld [vmem:[%s15523_s5 + $0x13b8] sm:$0xf0] }
 0x57e   :  { %6132 = vmatpush.bf16.msrb.mxu1 %v9791_v54  ;;  %6160 = vmatpush.bf16.msrb.mxu3 %v9795_v14  ;;  %v9903_v54 = vor.u32 %v10660_v24, %v9902_v42  ;;  %v9907_v14 = vor.u32 %v10659_v15, %v9904_v4  ;;  %v9878_v24 = vld [vmem:[%s15523_s5 + $0x1340] sm:$0xf]  ;;  %v10654_v15 = vld [vmem:[%s15523_s5 + $0x1344] sm:$0xf0]  ;;  %v9951_v22 = vor.u32 %v10672_v62, %v9950_v16  ;;  %v6182_v3 = vld [vmem:[#allocation2 + $0x18] sm:$0xf] }
 0x57f   :  { %v9879_v6 = vor.u32 %v10654_v15, %v9878_v24  ;;  %v10664_v24 = vld [vmem:[%s15523_s5 + $0x1394] sm:$0xf0]  ;;  %v10663_v15 = vld [vmem:[%s15523_s5 + $0x1394] sm:$0xf] }
 0x580   :  { %6120 = vmatpush.bf16.msrb.mxu0 %v9711_v25  ;;  %6148 = vmatpush.bf16.msrb.mxu2 %v9715_v38  ;;  %v9759_v25 = vor.u32 %v10632_v45, %v9758_v7  ;;  %v9763_v38 = vor.u32 %v10631_v30, %v9760_v29  ;;  %v10653_v7 = vld [vmem:[%s15523_s5 + $0x1344] sm:$0xf]  ;;  %v9880_v45 = vld [vmem:[%s15523_s5 + $0x1348] sm:$0xf0]  ;;  %v10671_v30 = vld [vmem:[%s15523_s5 + $0x13d4] sm:$0xf] }
 0x581   :  { %v9952_v29 = vld [vmem:[%s15523_s5 + $0x13d8] sm:$0xf0]  ;;  %v9883_v8 = vor.u32 %v10653_v7, %v9880_v45 }
 0x582   :  { %6133 = vmatpush.bf16.msrb.mxu1 %v9783_v39  ;;  %6161 = vmatpush.bf16.msrb.mxu3 %v9787_v28  ;;  %v10676_v39 = vld [vmem:[%s15523_s5 + $0x13f4] sm:$0xf0]  ;;  %v5890_v28 = vld [vmem:[#allocation2] sm:$0xf8]  ;;  %v9955_v17 = vor.u32 %v10671_v30, %v9952_v29 }
 0x583   :  { %v9967_v31 = vor.u32 %v10676_v39, %v9966_v33  ;;  %v9864_v33 = vld [vmem:[%s15523_s5 + $0x1328] sm:$0xf0]  ;;  %v9934_v39 = vld [vmem:[%s15523_s5 + $0x13b0] sm:$0xf]  ;;  %v6181_v30 = vld [vmem:[#allocation2 + $0x20] sm:$0xf0] }
 0x584   :  { %6121 = vmatpush.bf16.msrb.mxu0 %v9703_v46  ;;  %6149 = vmatpush.bf16.msrb.mxu2 %v9707_v47  ;;  %v5914_v46 = vrot.slane %v5894_v11, 3  ;;  %v5915_v47 = vrot.slane %v5896_v23, 3  ;;  %v9875_v23 = vor.u32 %v10651_v20, %v9872_v49  ;;  %v9867_v19 = vor.u32 %v10649_v59, %v9864_v33  ;;  %v6183_v29 = vld [vmem:[#allocation2 + $0x38] sm:$0xf]  ;;  %v10661_v20 = vld [vmem:[%s15523_s5 + $0x1384] sm:$0xf] }
 0x585   :  { %v9912_v49 = vld [vmem:[%s15523_s5 + $0x1388] sm:$0xf0]  ;;  %v6202_v34 = vrot.slane %v6183_v29, 4  ;;  %v9972_v29 = vld [vmem:[%s15524_s6 + $0x10] ss:$8 sm:$0x3] }
 0x586   :  { %6134 = vmatpush.bf16.msrb.mxu1 %v9775_v37  ;;  %6162 = vmatpush.bf16.msrb.mxu3 %v9779_v18  ;;  %v5908_v37 = vrot.slane %v5890_v28, 3  ;;  %v5909_v18 = vrot.slane %v5892_v40, 3  ;;  %v5916_v52 = vsel %vm1601_vm14, %v5914_v46, %v5915_v47  ;;  %v10668_v28 = vld [vmem:[%s15523_s5 + $0x13b4] sm:$0xf0]  ;;  %v10667_v40 = vld [vmem:[%s15523_s5 + $0x13b4] sm:$0xf] }
 0x587   :  { %v9854_v46 = vld [vmem:[%s15523_s5 + $0x1310] sm:$0xf]  ;;  %v10648_v47 = vld [vmem:[%s15523_s5 + $0x1314] sm:$0xf0] }
 0x588   :  { %6122 = vmatpush.bf16.msrb.mxu0 %v9695_v1  ;;  %6150 = vmatpush.bf16.msrb.mxu2 %v9699_v63  ;;  %v10673_v1 = vld [vmem:[%s15523_s5 + $0x13e4] sm:$0xf]  ;;  %v9960_v63 = vld [vmem:[%s15523_s5 + $0x13e8] sm:$0xf0]  ;;  %v5910_v42 = vsel %vm1601_vm14, %v5908_v37, %v5909_v18  ;;  %v10666_v37 = vld [vmem:[%s15523_s5 + $0x13a4] sm:$0xf0]  ;;  %v9855_v32 = vor.u32 %v10648_v47, %v9854_v46 }
 0x589   :  { %v5922_v4 = vpack.c.bf16 %v5916_v52, %v5910_v42  ;;  %v10665_v18 = vld [vmem:[%s15523_s5 + $0x13a4] sm:$0xf] }
 0x58a   :  { %6135 = vmatpush.bf16.msrb.mxu1 %v9767_v5  ;;  %6163 = vmatpush.bf16.msrb.mxu3 %v9771_v26  ;;  %v9959_v5 = vor.u32 %v10674_v48, %v9958_v0  ;;  %v9963_v26 = vor.u32 %v10673_v1, %v9960_v63  ;;  %v10645_v52 = vld [vmem:[%s15523_s5 + $0x1304] sm:$0xf]  ;;  %v6176_v48 = vld [vmem:[#allocation2 + $0x30] sm:$0xf0]  ;;  %v6178_v1 = vld [vmem:[#allocation2 + $0x8] sm:$0xf]  ;;  %v9931_v42 = vor.u32 %v10665_v18, %v9928_v13 }
 0x58b   :  { %v6192_v16 = vrot.slane %v6176_v48, 4  ;;  %v6193_v62 = vrot.slane %v6178_v1, 4 }
 0x58c   :  { %6123 = vmatpush.bf16.msrb.mxu0 %v9687_v61  ;;  %6151 = vmatpush.bf16.msrb.mxu2 %v9691_v60  ;;  %v9870_v61 = vld [vmem:[%s15523_s5 + $0x1330] sm:$0xf]  ;;  %v10652_v60 = vld [vmem:[%s15523_s5 + $0x1334] sm:$0xf0] }
 0x58d   :  { %v9871_v11 = vor.u32 %v10652_v60, %v9870_v61  ;;  %v9910_v61 = vld [vmem:[%s15523_s5 + $0x1380] sm:$0xf]  ;;  %v10662_v60 = vld [vmem:[%s15523_s5 + $0x1384] sm:$0xf0]  ;;  %v6194_v12 = vsel %vm1889_vm15, %v6192_v16, %v6193_v62 }
 0x58e   :  { %6136 = vmatpush.bf16.msrb.mxu1 %v9759_v25  ;;  %6164 = vmatpush.bf16.msrb.mxu3 %v9763_v38  ;;  %v9862_v25 = vld [vmem:[%s15523_s5 + $0x1320] sm:$0xf]  ;;  %v10650_v38 = vld [vmem:[%s15523_s5 + $0x1324] sm:$0xf0] }
 0x58f   :  { %6124 = vmatmul.bf16.vlgmr.msrb.gmra.mxu0 %v5921_v27  ;;  %6152 = vmatmul.bf16.vlgmr.msrb.gmra.mxu2 %v5921_v27  ;;  %v9863_v35 = vor.u32 %v10650_v38, %v9862_v25  ;;  %v9935_v27 = vor.u32 %v10668_v28, %v9934_v39  ;;  %v9915_v25 = vor.u32 %v10661_v20, %v9912_v49  ;;  %v6466_v49 = vperm.slane %v9972_v29, 0 }
 0x590   :  { %6403 = vmatpush.bf16.msra.mxu0 %v9903_v54  ;;  %6431 = vmatpush.bf16.msra.mxu2 %v9907_v14  ;;  %v9942_v54 = vld [vmem:[%s15523_s5 + $0x13c0] sm:$0xf]  ;;  %v10670_v14 = vld [vmem:[%s15523_s5 + $0x13c4] sm:$0xf0] }
 0x591   :  { %v9943_v55 = vor.u32 %v10670_v14, %v9942_v54  ;;  %v6179_v54 = vld [vmem:[#allocation2 + $0x10] sm:$0xf]  ;;  %v6201_v14 = vrot.slane %v6181_v30, 4 }
 0x592   :  { %6137 = vmatpush.bf16.msrb.mxu1 %v9751_v36  ;;  %6165 = vmatpush.bf16.msrb.mxu3 %v9755_v44  ;;  %v9856_v36 = vld [vmem:[%s15523_s5 + $0x1318] sm:$0xf0]  ;;  %v9926_v44 = vld [vmem:[%s15523_s5 + $0x13a0] sm:$0xf] }
 0x593   :  { %v9927_v63 = vor.u32 %v10666_v37, %v9926_v44 }
 0x594   :  { %6404 = vmatpush.bf16.msra.mxu0 %v9895_v58  ;;  %6432 = vmatpush.bf16.msra.mxu2 %v9899_v21  ;;  %v9939_v58 = vor.u32 %v10667_v40, %v9936_v9  ;;  %v10647_v21 = vld [vmem:[%s15523_s5 + $0x1314] sm:$0xf] }
 0x595   :  { %6138 = vmatmul.bf16.vlgmr.msrb.gmra.mxu1 %v5922_v4  ;;  %6166 = vmatmul.bf16.vlgmr.msrb.gmra.mxu3 %v5922_v4  ;;  %v9859_v0 = vor.u32 %v10647_v21, %v9856_v36  ;;  %v9920_v4 = vld [vmem:[%s15523_s5 + $0x1398] sm:$0xf0] }
 0x596   :  { %6417 = vmatpush.bf16.msra.mxu1 %v9967_v31  ;;  %6445 = vmatpush.bf16.msra.mxu3 %v9971_v51  ;;  %v10646_v31 = vld [vmem:[%s15523_s5 + $0x1304] sm:$0xf0]  ;;  %v6180_v51 = vld [vmem:[#allocation2 + $0x28] sm:$0xf0] }
 0x597   :  { %v9847_v7 = vor.u32 %v10646_v31, %v9846_v43 }
 0x598   :  { %6405 = vmatpush.bf16.msra.mxu0 %v9887_v56  ;;  %6433 = vmatpush.bf16.msra.mxu2 %v9891_v10  ;;  %v9848_v56 = vld [vmem:[%s15523_s5 + $0x1308] sm:$0xf0]  ;;  %v9918_v10 = vld [vmem:[%s15523_s5 + $0x1390] sm:$0xf] }
 0x599   :  { %v9851_v45 = vor.u32 %v10645_v52, %v9848_v56 }
 0x59a   :  { %6418 = vmatpush.bf16.msra.mxu1 %v9959_v5  ;;  %6446 = vmatpush.bf16.msra.mxu3 %v9963_v26  ;;  %v6198_v5 = vrot.slane %v6180_v51, 4  ;;  %v6199_v26 = vrot.slane %v6182_v3, 4 }
 0x59c   :  { %6406 = vmatpush.bf16.msra.mxu0 %v9879_v6  ;;  %6434 = vmatpush.bf16.msra.mxu2 %v9883_v8  ;;  %v9919_v6 = vor.u32 %v10664_v24, %v9918_v10  ;;  %v9923_v8 = vor.u32 %v10663_v15, %v9920_v4 }
 0x59e   :  { %6419 = vmatpush.bf16.msra.mxu1 %v9951_v22  ;;  %6447 = vmatpush.bf16.msra.mxu3 %v9955_v17  ;;  %v6177_v22 = vld [vmem:[#allocation2] sm:$0xf0]  ;;  %v6200_v17 = vsel %vm1889_vm15, %v6198_v5, %v6199_v26 }
 0x59f   :  { %v6195_v38 = vrot.slane %v6177_v22, 4 }
 0x5a0   :  { %6407 = vmatpush.bf16.msra.mxu0 %v9871_v11  ;;  %6435 = vmatpush.bf16.msra.mxu2 %v9875_v23  ;;  %v9911_v11 = vor.u32 %v10662_v60, %v9910_v61  ;;  %v6208_v23 = vpack.c.bf16 %v6200_v17, %v6194_v12 }
 0x5a2   :  { %6420 = vmatpush.bf16.msra.mxu1 %v9943_v55  ;;  %6448 = vmatpush.bf16.msra.mxu3 %v9947_v50  ;;  %v6196_v55 = vrot.slane %v6179_v54, 4  ;;  %v6203_v50 = vsel %vm1889_vm15, %v6201_v14, %v6202_v34 }
 0x5a4   :  { %6408 = vmatpush.bf16.msra.mxu0 %v9863_v35  ;;  %6436 = vmatpush.bf16.msra.mxu2 %v9867_v19  ;;  %v6197_v59 = vsel %vm1889_vm15, %v6195_v38, %v6196_v55 }
 0x5a5   :  { %v6209_v33 = vpack.c.bf16 %v6203_v50, %v6197_v59 }
 0x5a6   :  { %6421 = vmatpush.bf16.msra.mxu1 %v9935_v27  ;;  %6449 = vmatpush.bf16.msra.mxu3 %v9939_v58 }
 0x5a8   :  { %6409 = vmatpush.bf16.msra.mxu0 %v9855_v32  ;;  %6437 = vmatpush.bf16.msra.mxu2 %v9859_v0 }
 0x5aa   :  { %6422 = vmatpush.bf16.msra.mxu1 %v9927_v63  ;;  %6450 = vmatpush.bf16.msra.mxu3 %v9931_v42 }
 0x5ac   :  { %6410 = vmatpush.bf16.msra.mxu0 %v9847_v7  ;;  %6438 = vmatpush.bf16.msra.mxu2 %v9851_v45 }
 0x5ae   :  { %6423 = vmatpush.bf16.msra.mxu1 %v9919_v6  ;;  %6451 = vmatpush.bf16.msra.mxu3 %v9923_v8 }
 0x5af   :  { %6411 = vmatmul.bf16.vlgmr.msra.gmra.mxu0 %v6208_v23  ;;  %6439 = vmatmul.bf16.vlgmr.msra.gmra.mxu2 %v6208_v23 }
 0x5b2   :  { %6424 = vmatpush.bf16.msra.mxu1 %v9911_v11  ;;  %6452 = vmatpush.bf16.msra.mxu3 %v9915_v25 }
 0x5b5   :  { %6425 = vmatmul.bf16.vlgmr.msra.gmra.mxu1 %v6209_v33  ;;  %6453 = vmatmul.bf16.vlgmr.msra.gmra.mxu3 %v6209_v33 }
 0x5cc   :  { %v5339_v39 = vpop.f32.mrf.mxu0 }
 0x5d2   :  { %v5353_v28 = vpop.f32.mrf.mxu1  ;;  %v5367_v40 = vpop.f32.mrf.mxu2 }
 0x5d3   :  { %v5354_v15 = vadd.f32 %v5353_v28, %v5339_v39 }
 0x5d4   :  { %v5341_v35 = vpop.f32.mrf.mxu0 }
 0x5d8   :  { %v5381_v9 = vpop.f32.mrf.mxu3 }
 0x5d9   :  { %v5382_v16 = vadd.f32 %v5381_v9, %v5367_v40 }
 0x5da   :  { %v5355_v19 = vpop.f32.mrf.mxu1  ;;  %v5369_v46 = vpop.f32.mrf.mxu2 }
 0x5db   :  { %v5356_v8 = vadd.f32 %v5355_v19, %v5341_v35  ;;  %v6467_v35 = vperm.slane %v9972_v29, 1 }
 0x5dc   :  { %v5555_v27 = vpop.f32.mrf.mxu0 }
 0x5dd   :  { %v5556_v4 = vadd.f32 %v5555_v27, %v5354_v15 }
 0x5e0   :  { %v5383_v47 = vpop.f32.mrf.mxu3 }
 0x5e1   :  { %v5384_v59 = vadd.f32 %v5383_v47, %v5369_v46 }
 0x5e2   :  { %v5569_v58 = vpop.f32.mrf.mxu1  ;;  %v5583_v21 = vpop.f32.mrf.mxu2 }
 0x5e3   :  { %v5570_v7 = vadd.f32 %v5569_v58, %v5556_v4  ;;  %v5584_v61 = vadd.f32 %v5583_v21, %v5382_v16 }
 0x5e4   :  { %v5557_v44 = vpop.f32.mrf.mxu0 }
 0x5e5   :  { %v5558_v54 = vadd.f32 %v5557_v44, %v5356_v8 }
 0x5e8   :  { %v5597_v36 = vpop.f32.mrf.mxu3 }
 0x5e9   :  { %v5598_v34 = vadd.f32 %v5597_v36, %v5584_v61 }
 0x5ea   :  { %v5571_v37 = vpop.f32.mrf.mxu1  ;;  %v5585_v18 = vpop.f32.mrf.mxu2 }
 0x5eb   :  { %v5572_v23 = vadd.f32 %v5571_v37, %v5558_v54  ;;  %v5586_v19 = vadd.f32 %v5585_v18, %v5384_v59 }
 0x5ec   :  { %v5838_v43 = vpop.f32.mrf.mxu0 }
 0x5f0   :  { %v5599_v13 = vpop.f32.mrf.mxu3 }
 0x5f2   :  { %v5852_v31 = vpop.f32.mrf.mxu1  ;;  %v5866_v51 = vpop.f32.mrf.mxu2 }
 0x5f3   :  { %v5853_v5 = vadd.f32 %v5852_v31, %v5838_v43  ;;  %v5600_v43 = vadd.f32 %v5599_v13, %v5586_v19 }
 0x5f4   :  { %v5840_v32 = vpop.f32.mrf.mxu0 }
 0x5f5   :  { %v5885_v6 = vadd.f32 %v5853_v5, %v5570_v7 }
 0x5f8   :  { %v5880_v3 = vpop.f32.mrf.mxu3 }
 0x5f9   :  { %v5881_v22 = vadd.f32 %v5880_v3, %v5866_v51 }
 0x5fa   :  { %v5854_v0 = vpop.f32.mrf.mxu1  ;;  %v5868_v52 = vpop.f32.mrf.mxu2 }
 0x5fb   :  { %v5855_v14 = vadd.f32 %v5854_v0, %v5840_v32  ;;  %v5886_v38 = vadd.f32 %v5881_v22, %v5598_v34 }
 0x5fd   :  { %v5887_v33 = vadd.f32 %v5855_v14, %v5572_v23 }
 0x600   :  { %v5882_v48 = vpop.f32.mrf.mxu3 }
 0x601   :  { %v5883_v21 = vadd.f32 %v5882_v48, %v5868_v52 }
 0x603   :  { %v5888_v51 = vadd.f32 %v5883_v21, %v5600_v43 }
 0x60c   :  { %v6125_v1 = vpop.f32.mrf.mxu0 }
 0x612   :  { %v6139_v63 = vpop.f32.mrf.mxu1  ;;  %v6153_v42 = vpop.f32.mrf.mxu2 }
 0x613   :  { %v6140_v45 = vadd.f32 %v6139_v63, %v6125_v1 }
 0x614   :  { %v6127_v10 = vpop.f32.mrf.mxu0 }
 0x615   :  { %v6172_v17 = vadd.f32 %v6140_v45, %v5885_v6 }
 0x618   :  { %v6167_v56 = vpop.f32.mrf.mxu3 }
 0x619   :  { %v6168_v12 = vadd.f32 %v6167_v56, %v6153_v42 }
 0x61a   :  { %v6141_v24 = vpop.f32.mrf.mxu1  ;;  %v6155_v26 = vpop.f32.mrf.mxu2 }
 0x61b   :  { %v6142_v55 = vadd.f32 %v6141_v24, %v6127_v10  ;;  %v6173_v28 = vadd.f32 %v6168_v12, %v5886_v38 }
 0x61d   :  { %v6174_v36 = vadd.f32 %v6142_v55, %v5887_v33 }
 0x620   :  { %v6169_v62 = vpop.f32.mrf.mxu3 }
 0x621   :  { %v6170_v46 = vadd.f32 %v6169_v62, %v6155_v26 }
 0x623   :  { %v6175_v0 = vadd.f32 %v6170_v46, %v5888_v51 }
 0x62c   :  { %v6412_v30 = vpop.f32.mrf.mxu0 }
 0x632   :  { %v6426_v60 = vpop.f32.mrf.mxu1  ;;  %v6440_v25 = vpop.f32.mrf.mxu2 }
 0x633   :  { %v6427_v20 = vadd.f32 %v6426_v60, %v6412_v30 }
 0x634   :  { %v6414_v27 = vpop.f32.mrf.mxu0 }
 0x635   :  { %v6459_v11 = vadd.f32 %v6427_v20, %v6172_v17 }
 0x637   :  { %v6470_v50 = vadd.f32 %v6466_v49, %v6459_v11 }
 0x638   :  { %v6454_v39 = vpop.f32.mrf.mxu3 }
 0x639   :  { %v6474_v40 = vadd.f32 %v6470_v50, %v11637_v41  ;;  %v6455_v9 = vadd.f32 %v6454_v39, %v6440_v25 }
 0x63a   :  { %v6428_v58 = vpop.f32.mrf.mxu1  ;;  %v6442_v32 = vpop.f32.mrf.mxu2 }
 0x63b   :  { %6478 = vst [vmem:[%s15525_s7] sm:$0xff] %v6474_v40  ;;  %v6460_v44 = vadd.f32 %v6455_v9, %v6173_v28  ;;  %v6429_v37 = vadd.f32 %v6428_v58, %v6414_v27 }
 0x63d   :  { %v6471_v47 = vadd.f32 %v6467_v35, %v6460_v44  ;;  %v6461_v31 = vadd.f32 %v6429_v37, %v6174_v36 }
 0x63f   :  { %v6475_v41 = vadd.f32 %v6471_v47, %v11645_v53  ;;  %v6472_v3 = vadd.f32 %v6466_v49, %v6461_v31 }
 0x640   :  { %v6456_v18 = vpop.f32.mrf.mxu3 }
 0x641   :  { %6479 = vst [vmem:[%s15525_s7 + $0x8] sm:$0xff] %v6475_v41  ;;  %v6476_v52 = vadd.f32 %v6472_v3, %v11649_v57  ;;  %v6457_v48 = vadd.f32 %v6456_v18, %v6442_v32 }
 0x643   :  { %6480 = vst [vmem:[%s15525_s7 + $0x10] sm:$0xff] %v6476_v52  ;;  %v6462_v13 = vadd.f32 %v6457_v48, %v6175_v0 }
 0x645   :  { %v6473_v1 = vadd.f32 %v6467_v35, %v6462_v13 }
 0x647   :  { %v6477_v63 = vadd.f32 %v6473_v1, %v11652_v2 }
 0x649   :  { %6481 = vst [vmem:[%s15525_s7 + $0x18] sm:$0xff] %v6477_v63 }
 0x64a   :  { %10711 = dma.done.wait [#allocation4], 32  }
 0x64b   :  { %10712 = vsyncadd [#allocation4], 4294967264 }
 0x64c   :  { %6501 = vsyncpa [#allocation4], 1 }

</bundles_post_ra>
